<compile_context>
chip_gen: v5e
topology: v5e:2x2
jax: 0.10.0
libtpu: 0.0.40
codegen_flags: <defaults>
</compile_context>

<pallas_src>
import functools

import jax
import jax.numpy as jnp
from jax.experimental import pallas as pl
from jax.experimental.pallas import tpu as pltpu


def _convlstm_kernel(hx_ref, c_ref, w_ref, b_ref, wci_ref, wcf_ref, wco_ref,
                     ch_ref, cc_ref, pad_ref, lhs_ref, *, k, pad):
    # hx_ref : (1, H, W, C)        fused [h|x] tile, bf16 (cast in wrapper)
    # c_ref  : (1, Ch, H*W)        previous cell state, channel-major, f32
    # w_ref  : (K*K*C, 4*Ch)       fused conv weights, bf16, rows (dy,dx,[h|x]),
    #                              gate columns ordered [i|f|c|o]
    # b_ref  : (1, 4*Ch)           bias [bi|bf|bc|bo] (x-conv bias only), f32
    # wci/wcf/wco : (1, Ch, H*W)   peephole weights, channel-major, f32
    # ch_ref, cc_ref : (1, Ch, H*W) outputs (lane-dense stores)
    # pad_ref: (Hp, Wp, C)         bf16 zero-halo [h|x] frame (VMEM scratch)
    # lhs_ref: (H*W, K*K*C)        bf16 im2col LHS (VMEM scratch)
    H, W, C = hx_ref.shape[1], hx_ref.shape[2], hx_ref.shape[3]
    Ch = c_ref.shape[1]
    HW = H * W

    # ---- Zero ONLY the halo ring; the interior is fully overwritten below. ----
    if pad > 0:
        zero_row = jnp.zeros((pad, W + 2 * pad, C), dtype=pad_ref.dtype)
        zero_col = jnp.zeros((H + 2 * pad, pad, C), dtype=pad_ref.dtype)
        pad_ref[0:pad, :, :] = zero_row
        pad_ref[H + pad:H + 2 * pad, :, :] = zero_row
        pad_ref[:, 0:pad, :] = zero_col
        pad_ref[:, W + pad:W + 2 * pad, :] = zero_col

    # ---- Single interior store of the pre-fused bf16 [h|x] tile. ----
    pad_ref[pad:pad + H, pad:pad + W, :] = hx_ref[0]

    # ---- im2col into a VMEM scratch: per-tap stores, bounded live range. ----
    t = 0
    for dy in range(k):
        for dx in range(k):
            lhs_ref[:, t * C:(t + 1) * C] = (
                pad_ref[dy:dy + H, dx:dx + W, :].reshape(HW, C))
            t += 1

    # ---- ONE deep MXU matmul: (HW, K*K*C) x (K*K*C, 4*Ch), f32 accumulate. ----
    gates = jnp.dot(lhs_ref[...], w_ref[...],
                    preferred_element_type=jnp.float32)        # (HW, 4Ch) f32
    gates = gates + b_ref[...]                                 # dense 128-lane add

    # ---- One transpose -> channel-major; all math below is 256-lane dense. ----
    g = jnp.transpose(gates)                                   # (4Ch, HW) f32
    gi = g[0 * Ch:1 * Ch, :]
    gf = g[1 * Ch:2 * Ch, :]
    gc = g[2 * Ch:3 * Ch, :]
    go = g[3 * Ch:4 * Ch, :]

    c_prev = c_ref[0]                                          # (Ch, HW) f32
    ci = jax.nn.sigmoid(gi + c_prev * wci_ref[0])
    cf = jax.nn.sigmoid(gf + c_prev * wcf_ref[0])
    cc = cf * c_prev + ci * jnp.tanh(gc)
    co = jax.nn.sigmoid(go + cc * wco_ref[0])
    ch = co * jnp.tanh(cc)

    ch_ref[0, :, :] = ch.astype(ch_ref.dtype)                  # lane-dense stores
    cc_ref[0, :, :] = cc.astype(cc_ref.dtype)


def conv_lstm_cell(x, h, c, params):
    """Pallas ConvLSTMCell forward.  Returns (ch, cc), both (B, H, W, Ch)."""
    B, H, W, Cin = x.shape
    Ch = h.shape[-1]
    K = params["wx"].shape[0]
    pad = (K - 1) // 2
    C = Ch + Cin
    Hp, Wp = H + 2 * pad, W + 2 * pad
    HW = H * W

    # ---- One-time parameter / layout prep (wrapper-side plumbing). ----
    w_fused = jnp.concatenate([params["wh"], params["wx"]], axis=2)   # (K,K,C,4Ch)
    w_fused = w_fused.reshape(K * K * C, 4 * Ch).astype(jnp.bfloat16)
    bias = params["b"].astype(jnp.float32)                            # (1, 4*Ch)

    # Fused bf16 [h|x]: halves HBM DMA and enables one interior store in-kernel.
    hx = jnp.concatenate([h, x], axis=-1).astype(jnp.bfloat16)        # (B,H,W,C)

    def to_cm(a):   # NHWC -> channel-major (N, Ch, H*W), f32 (lane-dense slabs)
        return (jnp.transpose(a, (0, 3, 1, 2))
                .reshape(a.shape[0], Ch, HW).astype(jnp.float32))

    c_cm = to_cm(c)
    wci_cm = to_cm(params["wci"])
    wcf_cm = to_cm(params["wcf"])
    wco_cm = to_cm(params["wco"])

    kern = functools.partial(_convlstm_kernel, k=K, pad=pad)

    in_specs = [
        pl.BlockSpec((1, H, W, C), lambda b: (b, 0, 0, 0)),       # hx (bf16)
        pl.BlockSpec((1, Ch, HW), lambda b: (b, 0, 0)),           # c  (f32, ch-major)
        pl.BlockSpec((K * K * C, 4 * Ch), lambda b: (0, 0)),      # fused weights
        pl.BlockSpec((1, 4 * Ch), lambda b: (0, 0)),              # bias
        pl.BlockSpec((1, Ch, HW), lambda b: (0, 0, 0)),           # Wci
        pl.BlockSpec((1, Ch, HW), lambda b: (0, 0, 0)),           # Wcf
        pl.BlockSpec((1, Ch, HW), lambda b: (0, 0, 0)),           # Wco
    ]
    out_specs = (
        pl.BlockSpec((1, Ch, HW), lambda b: (b, 0, 0)),
        pl.BlockSpec((1, Ch, HW), lambda b: (b, 0, 0)),
    )
    out_shape = (
        jax.ShapeDtypeStruct((B, Ch, HW), jnp.float32),
        jax.ShapeDtypeStruct((B, Ch, HW), jnp.float32),
    )
    fn = pl.pallas_call(
        kern,
        out_shape=out_shape,
        grid=(B,),
        in_specs=in_specs,
        out_specs=out_specs,
        scratch_shapes=[
            pltpu.VMEM((Hp, Wp, C), jnp.bfloat16),       # zero-halo [h|x] frame
            pltpu.VMEM((HW, K * K * C), jnp.bfloat16),   # im2col LHS
        ],
        compiler_params=pltpu.CompilerParams(
            dimension_semantics=("parallel",),
            vmem_limit_bytes=32 * 1024 * 1024),
    )
    ch_cm, cc_cm = fn(hx, c_cm, w_fused, bias, wci_cm, wcf_cm, wco_cm)

    # Channel-major (B, Ch, H*W) -> NHWC (wrapper-side layout plumbing).
    ch = ch_cm.reshape(B, Ch, H, W).transpose(0, 2, 3, 1)
    cc = cc_cm.reshape(B, Ch, H, W).transpose(0, 2, 3, 1)
    return ch, cc


def _conv_same(x, w, b=None):
    out = jax.lax.conv_general_dilated(
        x, w, window_strides=(1, 1), padding="SAME",
        dimension_numbers=("NHWC", "HWIO", "NHWC"))
    if b is not None:
        out = out + b
    return out


def conv_lstm_cell_ref(x, h, c, p):
    """Pure-JAX f32 reference mirroring the PyTorch forward exactly."""
    Ch = h.shape[-1]
    wx, wh, b = p["wx"], p["wh"], p["b"][0]
    wxi, wxf, wxc, wxo = (wx[..., i * Ch:(i + 1) * Ch] for i in range(4))
    whi, whf, whc, who = (wh[..., i * Ch:(i + 1) * Ch] for i in range(4))
    bxi, bxf, bxc, bxo = (b[i * Ch:(i + 1) * Ch] for i in range(4))
    ci = jax.nn.sigmoid(_conv_same(x, wxi, bxi) + _conv_same(h, whi) + c * p["wci"])
    cf = jax.nn.sigmoid(_conv_same(x, wxf, bxf) + _conv_same(h, whf) + c * p["wcf"])
    cc = cf * c + ci * jnp.tanh(_conv_same(x, wxc, bxc) + _conv_same(h, whc))
    co = jax.nn.sigmoid(_conv_same(x, wxo, bxo) + _conv_same(h, who) + cc * p["wco"])
    ch = co * jnp.tanh(cc)
    return ch, cc


def init_params(key, Cin, Ch, K, H, W):
    ks = jax.random.split(key, 12)
    sx = 1.0 / jnp.sqrt(Cin * K * K)
    sh = 1.0 / jnp.sqrt(Ch * K * K)
    # Gate order: i, f, c, o (fused along the output-channel axis).
    wx = jnp.concatenate(
        [jax.random.uniform(ks[i], (K, K, Cin, Ch), jnp.float32, -sx, sx)
         for i in range(4)], axis=-1)
    wh = jnp.concatenate(
        [jax.random.uniform(ks[4 + i], (K, K, Ch, Ch), jnp.float32, -sh, sh)
         for i in range(4)], axis=-1)
    b = jnp.concatenate(
        [jax.random.uniform(ks[8 + i], (Ch,), jnp.float32, -sx, sx)
         for i in range(4)], axis=-1).reshape(1, 4 * Ch)
    # Peephole weights Wci/Wcf/Wco: (1, H, W, Ch).  torch init_hidden makes them
    # zeros; small deterministic values here so the peephole path is exercised.
    kp = jax.random.split(ks[11], 3)
    wci = 0.1 * jax.random.normal(kp[0], (1, H, W, Ch), jnp.float32)
    wcf = 0.1 * jax.random.normal(kp[1], (1, H, W, Ch), jnp.float32)
    wco = 0.1 * jax.random.normal(kp[2], (1, H, W, Ch), jnp.float32)
    return {"wx": wx, "wh": wh, "b": b, "wci": wci, "wcf": wcf, "wco": wco}


if __name__ == "__main__":
    B, Cin, Ch, H, W, K = 2, 4, 32, 16, 16, 3
    key = jax.random.PRNGKey(0)
    kx, kh, kc, kp = jax.random.split(key, 4)
    x = jax.random.normal(kx, (B, H, W, Cin), jnp.float32)
    h = jax.random.normal(kh, (B, H, W, Ch), jnp.float32)
    c = jax.random.normal(kc, (B, H, W, Ch), jnp.float32)
    params = init_params(kp, Cin, Ch, K, H, W)

    ch, cc = conv_lstm_cell(x, h, c, params)
    jax.block_until_ready((ch, cc))

    ch_ref, cc_ref = conv_lstm_cell_ref(x, h, c, params)
    # bf16 MXU operands (f32 accumulation) => loosened tolerance vs f32 convs.
    assert jnp.allclose(ch, ch_ref, rtol=2e-2, atol=2e-2), "ch mismatch"
    assert jnp.allclose(cc, cc_ref, rtol=2e-2, atol=2e-2), "cc mismatch"

    print("KERNEL_OK")
</pallas_src>

<mosaic_0001>
module attributes {stable_mosaic.version = 11 : i64} {
  func.func @_convlstm_kernel(%arg0: i32, %arg1: memref<1x16x16x36xbf16, #tpu.memory_space<vmem>>, %arg2: memref<1x32x256xf32, #tpu.memory_space<vmem>>, %arg3: memref<324x128xbf16, #tpu.memory_space<vmem>>, %arg4: memref<1x128xf32, #tpu.memory_space<vmem>>, %arg5: memref<1x32x256xf32, #tpu.memory_space<vmem>>, %arg6: memref<1x32x256xf32, #tpu.memory_space<vmem>>, %arg7: memref<1x32x256xf32, #tpu.memory_space<vmem>>, %arg8: memref<1x32x256xf32, #tpu.memory_space<vmem>>, %arg9: memref<1x32x256xf32, #tpu.memory_space<vmem>>, %arg10: memref<18x18x36xbf16, #tpu.memory_space<vmem>>, %arg11: memref<256x324xbf16, #tpu.memory_space<vmem>>) attributes {dimension_semantics = [#tpu.dimension_semantics<parallel>], iteration_bounds = array<i64: 2>, scalar_prefetch = 0 : i64, scratch_operands = 2 : i64, tpu.core_type = #tpu.core_type<tc>, window_params = [{transform_indices = @transform_0, window_bounds = array<i64: 1, 16, 16, 36>}, {transform_indices = @transform_1, window_bounds = array<i64: 1, 32, 256>}, {pipeline_mode = #tpu.pipeline_mode<synchronous>, transform_indices = @transform_2, window_bounds = array<i64: 324, 128>}, {pipeline_mode = #tpu.pipeline_mode<synchronous>, transform_indices = @transform_3, window_bounds = array<i64: 1, 128>}, {pipeline_mode = #tpu.pipeline_mode<synchronous>, transform_indices = @transform_4, window_bounds = array<i64: 1, 32, 256>}, {pipeline_mode = #tpu.pipeline_mode<synchronous>, transform_indices = @transform_5, window_bounds = array<i64: 1, 32, 256>}, {pipeline_mode = #tpu.pipeline_mode<synchronous>, transform_indices = @transform_6, window_bounds = array<i64: 1, 32, 256>}, {transform_indices = @transform_7, window_bounds = array<i64: 1, 32, 256>}, {transform_indices = @transform_8, window_bounds = array<i64: 1, 32, 256>}]} {
    %cst = arith.constant 0.000000e+00 : bf16
    %0 = vector.broadcast %cst : bf16 to vector<1x18x36xbf16>
    %cst_0 = arith.constant 0.000000e+00 : bf16
    %1 = vector.broadcast %cst_0 : bf16 to vector<18x1x36xbf16>
    %c0 = arith.constant 0 : index
    %c0_1 = arith.constant 0 : index
    %c0_2 = arith.constant 0 : index
    %2 = vector.load %arg10[%c0, %c0_1, %c0_2] : memref<18x18x36xbf16, #tpu.memory_space<vmem>>, vector<1x18x36xbf16>
    tpu.vector_store %arg10[%c0, %c0_1, %c0_2], %0 {strides = array<i32>} : memref<18x18x36xbf16, #tpu.memory_space<vmem>>, vector<1x18x36xbf16>,
    %c17 = arith.constant 17 : index
    %c0_3 = arith.constant 0 : index
    %c0_4 = arith.constant 0 : index
    %3 = vector.load %arg10[%c17, %c0_3, %c0_4] : memref<18x18x36xbf16, #tpu.memory_space<vmem>>, vector<1x18x36xbf16>
    tpu.vector_store %arg10[%c17, %c0_3, %c0_4], %0 {strides = array<i32>} : memref<18x18x36xbf16, #tpu.memory_space<vmem>>, vector<1x18x36xbf16>,
    %c0_5 = arith.constant 0 : index
    %c0_6 = arith.constant 0 : index
    %c0_7 = arith.constant 0 : index
    %4 = vector.load %arg10[%c0_5, %c0_6, %c0_7] : memref<18x18x36xbf16, #tpu.memory_space<vmem>>, vector<18x1x36xbf16>
    tpu.vector_store %arg10[%c0_5, %c0_6, %c0_7], %1 {strides = array<i32>} : memref<18x18x36xbf16, #tpu.memory_space<vmem>>, vector<18x1x36xbf16>,
    %c0_8 = arith.constant 0 : index
    %c17_9 = arith.constant 17 : index
    %c0_10 = arith.constant 0 : index
    %5 = vector.load %arg10[%c0_8, %c17_9, %c0_10] : memref<18x18x36xbf16, #tpu.memory_space<vmem>>, vector<18x1x36xbf16>
    tpu.vector_store %arg10[%c0_8, %c17_9, %c0_10], %1 {strides = array<i32>} : memref<18x18x36xbf16, #tpu.memory_space<vmem>>, vector<18x1x36xbf16>,
    %c0_11 = arith.constant 0 : index
    %c0_12 = arith.constant 0 : index
    %c0_13 = arith.constant 0 : index
    %c0_14 = arith.constant 0 : index
    %6 = vector.load %arg1[%c0_11, %c0_12, %c0_13, %c0_14] : memref<1x16x16x36xbf16, #tpu.memory_space<vmem>>, vector<1x16x16x36xbf16>
    %7 = vector.shape_cast %6 : vector<1x16x16x36xbf16> to vector<16x16x36xbf16>
    %c1 = arith.constant 1 : index
    %c1_15 = arith.constant 1 : index
    %c0_16 = arith.constant 0 : index
    %8 = vector.load %arg10[%c1, %c1_15, %c0_16] : memref<18x18x36xbf16, #tpu.memory_space<vmem>>, vector<16x16x36xbf16>
    tpu.vector_store %arg10[%c1, %c1_15, %c0_16], %7 {strides = array<i32>} : memref<18x18x36xbf16, #tpu.memory_space<vmem>>, vector<16x16x36xbf16>,
    %c0_17 = arith.constant 0 : index
    %c0_18 = arith.constant 0 : index
    %c0_19 = arith.constant 0 : index
    %9 = vector.load %arg10[%c0_17, %c0_18, %c0_19] : memref<18x18x36xbf16, #tpu.memory_space<vmem>>, vector<16x16x36xbf16>
    %10 = vector.shape_cast %9 : vector<16x16x36xbf16> to vector<256x36xbf16>
    %c0_20 = arith.constant 0 : index
    %c0_21 = arith.constant 0 : index
    %11 = vector.load %arg11[%c0_20, %c0_21] : memref<256x324xbf16, #tpu.memory_space<vmem>>, vector<256x36xbf16>
    tpu.vector_store %arg11[%c0_20, %c0_21], %10 {strides = array<i32>} : memref<256x324xbf16, #tpu.memory_space<vmem>>, vector<256x36xbf16>,
    %c0_22 = arith.constant 0 : index
    %c1_23 = arith.constant 1 : index
    %c0_24 = arith.constant 0 : index
    %12 = vector.load %arg10[%c0_22, %c1_23, %c0_24] : memref<18x18x36xbf16, #tpu.memory_space<vmem>>, vector<16x16x36xbf16>
    %13 = vector.shape_cast %12 : vector<16x16x36xbf16> to vector<256x36xbf16>
    %c0_25 = arith.constant 0 : index
    %c36 = arith.constant 36 : index
    %14 = vector.load %arg11[%c0_25, %c36] : memref<256x324xbf16, #tpu.memory_space<vmem>>, vector<256x36xbf16>
    tpu.vector_store %arg11[%c0_25, %c36], %13 {strides = array<i32>} : memref<256x324xbf16, #tpu.memory_space<vmem>>, vector<256x36xbf16>,
    %c0_26 = arith.constant 0 : index
    %c2 = arith.constant 2 : index
    %c0_27 = arith.constant 0 : index
    %15 = vector.load %arg10[%c0_26, %c2, %c0_27] : memref<18x18x36xbf16, #tpu.memory_space<vmem>>, vector<16x16x36xbf16>
    %16 = vector.shape_cast %15 : vector<16x16x36xbf16> to vector<256x36xbf16>
    %c0_28 = arith.constant 0 : index
    %c72 = arith.constant 72 : index
    %17 = vector.load %arg11[%c0_28, %c72] : memref<256x324xbf16, #tpu.memory_space<vmem>>, vector<256x36xbf16>
    tpu.vector_store %arg11[%c0_28, %c72], %16 {strides = array<i32>} : memref<256x324xbf16, #tpu.memory_space<vmem>>, vector<256x36xbf16>,
    %c1_29 = arith.constant 1 : index
    %c0_30 = arith.constant 0 : index
    %c0_31 = arith.constant 0 : index
    %18 = vector.load %arg10[%c1_29, %c0_30, %c0_31] : memref<18x18x36xbf16, #tpu.memory_space<vmem>>, vector<16x16x36xbf16>
    %19 = vector.shape_cast %18 : vector<16x16x36xbf16> to vector<256x36xbf16>
    %c0_32 = arith.constant 0 : index
    %c108 = arith.constant 108 : index
    %20 = vector.load %arg11[%c0_32, %c108] : memref<256x324xbf16, #tpu.memory_space<vmem>>, vector<256x36xbf16>
    tpu.vector_store %arg11[%c0_32, %c108], %19 {strides = array<i32>} : memref<256x324xbf16, #tpu.memory_space<vmem>>, vector<256x36xbf16>,
    %c1_33 = arith.constant 1 : index
    %c1_34 = arith.constant 1 : index
    %c0_35 = arith.constant 0 : index
    %21 = vector.load %arg10[%c1_33, %c1_34, %c0_35] : memref<18x18x36xbf16, #tpu.memory_space<vmem>>, vector<16x16x36xbf16>
    %22 = vector.shape_cast %21 : vector<16x16x36xbf16> to vector<256x36xbf16>
    %c0_36 = arith.constant 0 : index
    %c144 = arith.constant 144 : index
    %23 = vector.load %arg11[%c0_36, %c144] : memref<256x324xbf16, #tpu.memory_space<vmem>>, vector<256x36xbf16>
    tpu.vector_store %arg11[%c0_36, %c144], %22 {strides = array<i32>} : memref<256x324xbf16, #tpu.memory_space<vmem>>, vector<256x36xbf16>,
    %c1_37 = arith.constant 1 : index
    %c2_38 = arith.constant 2 : index
    %c0_39 = arith.constant 0 : index
    %24 = vector.load %arg10[%c1_37, %c2_38, %c0_39] : memref<18x18x36xbf16, #tpu.memory_space<vmem>>, vector<16x16x36xbf16>
    %25 = vector.shape_cast %24 : vector<16x16x36xbf16> to vector<256x36xbf16>
    %c0_40 = arith.constant 0 : index
    %c180 = arith.constant 180 : index
    %26 = vector.load %arg11[%c0_40, %c180] : memref<256x324xbf16, #tpu.memory_space<vmem>>, vector<256x36xbf16>
    tpu.vector_store %arg11[%c0_40, %c180], %25 {strides = array<i32>} : memref<256x324xbf16, #tpu.memory_space<vmem>>, vector<256x36xbf16>,
    %c2_41 = arith.constant 2 : index
    %c0_42 = arith.constant 0 : index
    %c0_43 = arith.constant 0 : index
    %27 = vector.load %arg10[%c2_41, %c0_42, %c0_43] : memref<18x18x36xbf16, #tpu.memory_space<vmem>>, vector<16x16x36xbf16>
    %28 = vector.shape_cast %27 : vector<16x16x36xbf16> to vector<256x36xbf16>
    %c0_44 = arith.constant 0 : index
    %c216 = arith.constant 216 : index
    %29 = vector.load %arg11[%c0_44, %c216] : memref<256x324xbf16, #tpu.memory_space<vmem>>, vector<256x36xbf16>
    tpu.vector_store %arg11[%c0_44, %c216], %28 {strides = array<i32>} : memref<256x324xbf16, #tpu.memory_space<vmem>>, vector<256x36xbf16>,
    %c2_45 = arith.constant 2 : index
    %c1_46 = arith.constant 1 : index
    %c0_47 = arith.constant 0 : index
    %30 = vector.load %arg10[%c2_45, %c1_46, %c0_47] : memref<18x18x36xbf16, #tpu.memory_space<vmem>>, vector<16x16x36xbf16>
    %31 = vector.shape_cast %30 : vector<16x16x36xbf16> to vector<256x36xbf16>
    %c0_48 = arith.constant 0 : index
    %c252 = arith.constant 252 : index
    %32 = vector.load %arg11[%c0_48, %c252] : memref<256x324xbf16, #tpu.memory_space<vmem>>, vector<256x36xbf16>
    tpu.vector_store %arg11[%c0_48, %c252], %31 {strides = array<i32>} : memref<256x324xbf16, #tpu.memory_space<vmem>>, vector<256x36xbf16>,
    %c2_49 = arith.constant 2 : index
    %c2_50 = arith.constant 2 : index
    %c0_51 = arith.constant 0 : index
    %33 = vector.load %arg10[%c2_49, %c2_50, %c0_51] : memref<18x18x36xbf16, #tpu.memory_space<vmem>>, vector<16x16x36xbf16>
    %34 = vector.shape_cast %33 : vector<16x16x36xbf16> to vector<256x36xbf16>
    %c0_52 = arith.constant 0 : index
    %c288 = arith.constant 288 : index
    %35 = vector.load %arg11[%c0_52, %c288] : memref<256x324xbf16, #tpu.memory_space<vmem>>, vector<256x36xbf16>
    tpu.vector_store %arg11[%c0_52, %c288], %34 {strides = array<i32>} : memref<256x324xbf16, #tpu.memory_space<vmem>>, vector<256x36xbf16>,
    %c0_53 = arith.constant 0 : index
    %c0_54 = arith.constant 0 : index
    %36 = vector.load %arg11[%c0_53, %c0_54] : memref<256x324xbf16, #tpu.memory_space<vmem>>, vector<256x324xbf16>
    %c0_55 = arith.constant 0 : index
    %c0_56 = arith.constant 0 : index
    %37 = vector.load %arg3[%c0_55, %c0_56] : memref<324x128xbf16, #tpu.memory_space<vmem>>, vector<324x128xbf16>
    %cst_57 = arith.constant dense<0.000000e+00> : vector<256x128xf32>
    %38 = tpu.matmul %36, %37, %cst_57 {dimension_numbers = #tpu.dot_dimension_numbers<[1], [0], [0], [1], [0, 0, 1, 1], [], []>} : vector<256x324xbf16>, vector<324x128xbf16>, vector<256x128xf32> -> vector<256x128xf32>
    %c0_58 = arith.constant 0 : index
    %c0_59 = arith.constant 0 : index
    %39 = vector.load %arg4[%c0_58, %c0_59] : memref<1x128xf32, #tpu.memory_space<vmem>>, vector<1x128xf32>
    %40 = vector.broadcast %39 : vector<1x128xf32> to vector<256x128xf32>
    %41 = arith.addf %38, %40 : vector<256x128xf32>
    %42 = tpu.transpose %41, [1, 0] : vector<256x128xf32> -> vector<128x256xf32>
    %43 = vector.extract_strided_slice %42 {offsets = [0, 0], sizes = [32, 256], strides = [1, 1]} : vector<128x256xf32> to vector<32x256xf32>
    %44 = vector.extract_strided_slice %42 {offsets = [32, 0], sizes = [32, 256], strides = [1, 1]} : vector<128x256xf32> to vector<32x256xf32>
    %45 = vector.extract_strided_slice %42 {offsets = [64, 0], sizes = [32, 256], strides = [1, 1]} : vector<128x256xf32> to vector<32x256xf32>
    %46 = vector.extract_strided_slice %42 {offsets = [96, 0], sizes = [32, 256], strides = [1, 1]} : vector<128x256xf32> to vector<32x256xf32>
    %c0_60 = arith.constant 0 : index
    %c0_61 = arith.constant 0 : index
    %c0_62 = arith.constant 0 : index
    %47 = vector.load %arg2[%c0_60, %c0_61, %c0_62] : memref<1x32x256xf32, #tpu.memory_space<vmem>>, vector<1x32x256xf32>
    %48 = vector.shape_cast %47 : vector<1x32x256xf32> to vector<32x256xf32>
    %c0_63 = arith.constant 0 : index
    %c0_64 = arith.constant 0 : index
    %c0_65 = arith.constant 0 : index
    %49 = vector.load %arg5[%c0_63, %c0_64, %c0_65] : memref<1x32x256xf32, #tpu.memory_space<vmem>>, vector<1x32x256xf32>
    %50 = vector.shape_cast %49 : vector<1x32x256xf32> to vector<32x256xf32>
    %51 = arith.mulf %48, %50 : vector<32x256xf32>
    %52 = arith.addf %43, %51 : vector<32x256xf32>
    %53 = arith.negf %52 : vector<32x256xf32>
    %54 = math.exp %53 : vector<32x256xf32>
    %cst_66 = arith.constant 1.000000e+00 : f32
    %55 = vector.broadcast %cst_66 : f32 to vector<32x256xf32>
    %56 = arith.addf %55, %54 : vector<32x256xf32>
    %57 = arith.divf %55, %56 : vector<32x256xf32>
    %c0_67 = arith.constant 0 : index
    %c0_68 = arith.constant 0 : index
    %c0_69 = arith.constant 0 : index
    %58 = vector.load %arg6[%c0_67, %c0_68, %c0_69] : memref<1x32x256xf32, #tpu.memory_space<vmem>>, vector<1x32x256xf32>
    %59 = vector.shape_cast %58 : vector<1x32x256xf32> to vector<32x256xf32>
    %60 = arith.mulf %48, %59 : vector<32x256xf32>
    %61 = arith.addf %44, %60 : vector<32x256xf32>
    %62 = arith.negf %61 : vector<32x256xf32>
    %63 = math.exp %62 : vector<32x256xf32>
    %cst_70 = arith.constant 1.000000e+00 : f32
    %64 = vector.broadcast %cst_70 : f32 to vector<32x256xf32>
    %65 = arith.addf %64, %63 : vector<32x256xf32>
    %66 = arith.divf %64, %65 : vector<32x256xf32>
    %67 = arith.mulf %66, %48 : vector<32x256xf32>
    %68 = math.tanh %45 : vector<32x256xf32>
    %69 = arith.mulf %57, %68 : vector<32x256xf32>
    %70 = arith.addf %67, %69 : vector<32x256xf32>
    %c0_71 = arith.constant 0 : index
    %c0_72 = arith.constant 0 : index
    %c0_73 = arith.constant 0 : index
    %71 = vector.load %arg7[%c0_71, %c0_72, %c0_73] : memref<1x32x256xf32, #tpu.memory_space<vmem>>, vector<1x32x256xf32>
    %72 = vector.shape_cast %71 : vector<1x32x256xf32> to vector<32x256xf32>
    %73 = arith.mulf %70, %72 : vector<32x256xf32>
    %74 = arith.addf %46, %73 : vector<32x256xf32>
    %75 = arith.negf %74 : vector<32x256xf32>
    %76 = math.exp %75 : vector<32x256xf32>
    %cst_74 = arith.constant 1.000000e+00 : f32
    %77 = vector.broadcast %cst_74 : f32 to vector<32x256xf32>
    %78 = arith.addf %77, %76 : vector<32x256xf32>
    %79 = arith.divf %77, %78 : vector<32x256xf32>
    %80 = math.tanh %70 : vector<32x256xf32>
    %81 = arith.mulf %79, %80 : vector<32x256xf32>
    %c0_75 = arith.constant 0 : index
    %c0_76 = arith.constant 0 : index
    %c0_77 = arith.constant 0 : index
    %82 = vector.load %arg8[%c0_75, %c0_76, %c0_77] : memref<1x32x256xf32, #tpu.memory_space<vmem>>, vector<1x32x256xf32>
    %83 = vector.shape_cast %82 : vector<1x32x256xf32> to vector<32x256xf32>
    %84 = vector.shape_cast %81 : vector<32x256xf32> to vector<1x32x256xf32>
    tpu.vector_store %arg8[%c0_75, %c0_76, %c0_77], %84 {strides = array<i32>} : memref<1x32x256xf32, #tpu.memory_space<vmem>>, vector<1x32x256xf32>,
    %c0_78 = arith.constant 0 : index
    %c0_79 = arith.constant 0 : index
    %c0_80 = arith.constant 0 : index
    %85 = vector.load %arg9[%c0_78, %c0_79, %c0_80] : memref<1x32x256xf32, #tpu.memory_space<vmem>>, vector<1x32x256xf32>
    %86 = vector.shape_cast %85 : vector<1x32x256xf32> to vector<32x256xf32>
    %87 = vector.shape_cast %70 : vector<32x256xf32> to vector<1x32x256xf32>
    tpu.vector_store %arg9[%c0_78, %c0_79, %c0_80], %87 {strides = array<i32>} : memref<1x32x256xf32, #tpu.memory_space<vmem>>, vector<1x32x256xf32>,
    return
  }
  func.func @transform_0(%arg0: i32) -> (i32, i32, i32, i32) {
    %c0_i32 = arith.constant 0 : i32
    %c0_i32_0 = arith.constant 0 : i32
    %c0_i32_1 = arith.constant 0 : i32
    %c0_i32_2 = arith.constant 0 : i32
    return %arg0, %c0_i32, %c0_i32_0, %c0_i32_1 : i32, i32, i32, i32
  }
  func.func @transform_1(%arg0: i32) -> (i32, i32, i32) {
    %c0_i32 = arith.constant 0 : i32
    %c0_i32_0 = arith.constant 0 : i32
    %c0_i32_1 = arith.constant 0 : i32
    return %arg0, %c0_i32, %c0_i32_0 : i32, i32, i32
  }
  func.func @transform_2(%arg0: i32) -> (i32, i32) {
    %c0_i32 = arith.constant 0 : i32
    %c0_i32_0 = arith.constant 0 : i32
    %c0_i32_1 = arith.constant 0 : i32
    return %c0_i32, %c0_i32_0 : i32, i32
  }
  func.func @transform_3(%arg0: i32) -> (i32, i32) {
    %c0_i32 = arith.constant 0 : i32
    %c0_i32_0 = arith.constant 0 : i32
    %c0_i32_1 = arith.constant 0 : i32
    return %c0_i32, %c0_i32_0 : i32, i32
  }
  func.func @transform_4(%arg0: i32) -> (i32, i32, i32) {
    %c0_i32 = arith.constant 0 : i32
    %c0_i32_0 = arith.constant 0 : i32
    %c0_i32_1 = arith.constant 0 : i32
    %c0_i32_2 = arith.constant 0 : i32
    return %c0_i32, %c0_i32_0, %c0_i32_1 : i32, i32, i32
  }
  func.func @transform_5(%arg0: i32) -> (i32, i32, i32) {
    %c0_i32 = arith.constant 0 : i32
    %c0_i32_0 = arith.constant 0 : i32
    %c0_i32_1 = arith.constant 0 : i32
    %c0_i32_2 = arith.constant 0 : i32
    return %c0_i32, %c0_i32_0, %c0_i32_1 : i32, i32, i32
  }
  func.func @transform_6(%arg0: i32) -> (i32, i32, i32) {
    %c0_i32 = arith.constant 0 : i32
    %c0_i32_0 = arith.constant 0 : i32
    %c0_i32_1 = arith.constant 0 : i32
    %c0_i32_2 = arith.constant 0 : i32
    return %c0_i32, %c0_i32_0, %c0_i32_1 : i32, i32, i32
  }
  func.func @transform_7(%arg0: i32) -> (i32, i32, i32) {
    %c0_i32 = arith.constant 0 : i32
    %c0_i32_0 = arith.constant 0 : i32
    %c0_i32_1 = arith.constant 0 : i32
    return %arg0, %c0_i32, %c0_i32_0 : i32, i32, i32
  }
  func.func @transform_8(%arg0: i32) -> (i32, i32, i32) {
    %c0_i32 = arith.constant 0 : i32
    %c0_i32_0 = arith.constant 0 : i32
    %c0_i32_1 = arith.constant 0 : i32
    return %arg0, %c0_i32, %c0_i32_0 : i32, i32, i32
  }
}

</mosaic_0001>

<bundles_post_ra>
// kernel: tpu_custom_call.1
= control target key start
LH: loop header
LB: loop body
LE: loop exit
PB: predicated region body
PF: predicated region fallthrough
CT: control target
= control target key end

     0   :  { %s9903_s0 = inlined_call_operand.hbm [shape: bf16[2,16,16,36], index: 0, kind: input, shape index: {}]   ;;  %s9904_s1 = inlined_call_operand.hbm [shape: f32[2,32,256], index: 1, kind: input, shape index: {}]   ;;  %s9905_s2 = inlined_call_operand.hbm [shape: bf16[324,128], index: 2, kind: input, shape index: {}]   ;;  %s9906_s3 = inlined_call_operand.vmem [shape: f32[1,128], index: 3, kind: input, shape index: {}]   ;;  %s9907_s4 = inlined_call_operand.hbm [shape: f32[1,32,256], index: 4, kind: input, shape index: {}]   ;;  %s9908_s5 = inlined_call_operand.hbm [shape: f32[1,32,256], index: 5, kind: input, shape index: {}]   ;;  %s9909_s6 = inlined_call_operand.hbm [shape: f32[1,32,256], index: 6, kind: input, shape index: {}]   ;;  %s9910_s7 = inlined_call_operand.hbm [shape: f32[2,32,256], index: 7, kind: output, shape index: {0}]   ;;  %s9911_s8 = inlined_call_operand.hbm [shape: f32[2,32,256], index: 8, kind: output, shape index: {1}]  }
   0x1   :  { %9919 = sst [smem:[#allocation28_spill]] %s9905_s2 }
   0x2   :  { %9920 = sst [smem:[#allocation29_spill]] %s9907_s4 }
   0x3   :  { %9921 = sst [smem:[#allocation30_spill]] %s9908_s5 }
   0x4   :  { %9922 = sst [smem:[#allocation31_spill]] %s9909_s6 }
   0x5   :  { %14 = vsyncpa [#allocation5], 0 }
   0x6   :  { %16 = vsyncpa [#allocation5 + $0x1], 0 }
   0x7   :  { %17 = vsyncpa [#allocation8], 0 }
   0x8   :  { %19 = vsyncpa [#allocation8 + $0x1], 0 }
   0x9   :  { %20 = vsyncpa [#allocation11], 0 }
   0xa   :  { %21 = vsyncpa [#allocation14], 0 }
   0xb   :  { %22 = vsyncpa [#allocation6], 0 }
   0xc   :  { %24 = vsyncpa [#allocation6 + $0x1], 0 }
   0xd   :  { %25 = vsyncpa [#allocation17], 0 }
   0xe   :  { %27 = vsyncpa [#allocation17 + $0x1], 0  ;;  %s7065_s27 = smov 0   ;;  %s7067_s28 = smov 0  }
   0xf   :  { %s7069_s29 = smov 0   ;;  %s7071_s30 = smov 0  }
  0x10 LB: > { %9923 = sst [smem:[#allocation25_spill]] %s6996_s29  ;;  %s7086_s9 = sadd.s32 4294967295, %s7000_s30   ;;  %s7000_s30 = sphi %s7071_s30, %s9973_s30   ;;  %s6996_s29 = sphi %s7069_s29, %s9975_s29   ;;  %s6992_s28 = sphi %s7067_s28, %s9977_s28   ;;  %s6988_s27 = sphi %s7065_s27, %s9976_s27  }
  0x11   : > { %s5983_s10 = sadd.s32 4294967294, %s7000_s30   ;;  %p53_p0 = scmp.ne.s32.totalorder %s6992_s28, %s6988_s27 }
  0x12   : > { %p54_p1 = scmp.eq.s32.totalorder %s7086_s9, 0  ;;  %p208_p2 = scmp.eq.s32.totalorder %s7086_s9, 1 }
  0x13   : > { %p214_p3 = scmp.eq.s32.totalorder %s5983_s10, 1  ;;  %p5984_p5 = scmp.ge.s32.totalorder %s7000_s30, 1 }
  0x14   : > { %p7095_p4 = por %p54_p1, %p53_p0  ;;  %p247_p7 = scmp.lt.s32.totalorder %s7000_s30, 3 }
  0x15   : > { %p7100_p6 = por %p214_p3, %p53_p0  ;;  %s9926_s2 = sld [smem:[#allocation28_spill]] }
  0x16   : > { %p7108_p8 = pnand %p5984_p5, %p247_p7  ;;  %s7002_s17 = smov [#allocation9]  }
  0x17   : > { %s260_s18 = sshll.u32 %s7002_s17, 4  ;;  %s9929_s4 = sld [smem:[#allocation29_spill]]  ;;  %s261_s18 = int_to_ptr.vmem [resolvable:$true] %s260_s18 }
  0x18   : > { %p6490_p9 = pneg %p7108_p8  ;;  %s9912_s23 = smov 64  }
  0x19   : > { %s9915_s24 = smov 4   ;;  %s7005_s25 = smov [#allocation10]  }
  0x1a   : > { %p7116_p10 = pnand %p6490_p9, %p54_p1  ;;  %s277_s26 = sshll.u32 %s7005_s25, 4  ;;  %s278_s26 = int_to_ptr.vmem [resolvable:$true] %s277_s26 }
  0x1b   : > { %s258_s15 = sshll.u32 %s9926_s2, 4  ;;  %s9913_s10 = smov 256   ;;  %s259_s15 = int_to_ptr.hbm [resolvable:$true] %s258_s15 }
  0x1c   : > { %6493 = dma.hbm_to_vmem [thread:$0]  (!%p7116_p10), %s259_s15, 2624, %s261_s18, [#allocation8], %s9912_s23, %s9912_s23, %s9915_s24  }
  0x1d   : > { %s275_s22 = sshll.u32 %s9929_s4, 4  ;;  %s9914_s13 = smov 16   ;;  %s276_s22 = int_to_ptr.hbm [resolvable:$true] %s275_s22 }
  0x1e   : > { %6496 = dma.hbm_to_vmem [thread:$0]  (!%p7116_p10), %s276_s22, 1024, %s278_s26, [#allocation11], %s9913_s10, %s9913_s10, %s9914_s13  }
  0x1f   : > { %s9930_s5 = sld [smem:[#allocation30_spill]]  ;;  %s7008_s18 = smov [#allocation12]  }
  0x20   : > { %s291_s20 = sshll.u32 %s7008_s18, 4  ;;  %s9931_s6 = sld [smem:[#allocation31_spill]]  ;;  %s292_s20 = int_to_ptr.vmem [resolvable:$true] %s291_s20 }
  0x21   : > { %s7009_s22 = smov [#allocation13]   ;;  %s7151_s14 = sadd.s32 1, %s7000_s30  }
  0x22   : > { %s305_s26 = sshll.u32 %s7009_s22, 4  ;;  %9932 = sst [smem:[#allocation26_spill]] %s7151_s14  ;;  %s306_s26 = int_to_ptr.vmem [resolvable:$true] %s305_s26 }
  0x23   : > { %s40_s17 = sadd.s32 1, %s6996_s29  ;;  %s37_s18 = ssub.s32 %s7000_s30, %s7151_s14 }
  0x24   : > { %p47_p12 = scmp.ne.s32.totalorder %s6996_s29, %s6992_s28  ;;  %p38_p13 = scmp.eq.s32.totalorder %s37_s18, 0 }
  0x25   : > { %s289_s15 = sshll.u32 %s9930_s5, 4  ;;  %p48_p0 = scmp.eq.s32.totalorder %s7000_s30, 0  ;;  %s290_s15 = int_to_ptr.hbm [resolvable:$true] %s289_s15 }
  0x26   : > { %s303_s23 = sshll.u32 %s9931_s6, 4  ;;  %p7161_p3 = por %p208_p2, %p47_p12  ;;  %s304_s23 = int_to_ptr.hbm [resolvable:$true] %s303_s23 }
  0x27   : > { %6499 = dma.hbm_to_vmem [thread:$0]  (!%p7116_p10), %s290_s15, 1024, %s292_s20, [#allocation11], %s9913_s10, %s9913_s10, %s9914_s13  }
  0x28   : > { %6502 = dma.hbm_to_vmem [thread:$0]  (!%p7116_p10), %s304_s23, 1024, %s306_s26, [#allocation14], %s9913_s10, %s9913_s10, %s9914_s13  }
  0x29   : > { %p6521_p5 = scmp.lt.s32.totalorder %s7000_s30, 2  ;;  %p49_p7 = por %p48_p0, %p47_p12 }
  0x2a   : > { %s7167_s19 = scalar_select %p38_p13, %s6996_s29, %s40_s17  }
  0x2b   : > { %s7170_s20 = sand.u32 1, %s6996_s29   ;;  %s6373_s21 = sshll.u32 %s7000_s30, 7 }
  0x2c   : > { %9934 = sst [smem:[#allocation27_spill]] %s7167_s19  ;;  %s5990_s23 = sshll.u32 %s7170_s20, 7 }
  0x2d   : > { %s328_s26 = scalar_lea.hbm %s9903_s0, %s6373_s21  ;;  %s323_s18 = scalar_lea.vmem [#allocation4], %s5990_s23 }
  0x2e   : > { %s331_s10 = sshll.u32 %s323_s18, 4  ;;  %s329_s13 = sshll.u32 %s328_s26, 4  ;;  %s332_s10 = int_to_ptr.vmem [resolvable:$true] %s331_s10  ;;  %s330_s13 = int_to_ptr.hbm [resolvable:$true] %s329_s13 }
  0x2f   : > { %p7177_p2 = pnand %p6521_p5, %p49_p7  ;;  %s341_s24 = sand.u32 1, %s7000_s30  }
  0x30   : > { %s5993_s2 = sshll.u32 %s7170_s20, 6  ;;  %s320_s4 = scalar_lea.sflag [#allocation5], %s7170_s20 }
  0x31   : > { %s6826_s5 = sshra.s32 %s330_s13, 4  ;;  %p6830_p10 = pneg %p7177_p2  ;;  %s6827_s5 = int_to_ptr.hbm [resolvable:$true] %s6826_s5 }
  0x32   : > { %s6828_s6 = scalar_lea.hbm %s6827_s5, 128  ;;  %s6833_s25 = scalar_lea.hbm %s9903_s0, 256 }
  0x33   : > { %p6829_p9 = scmp.ne.s32.totalorder %s6827_s5, %s6828_s6  ;;  %p6834_p0 = scmp.lt.s32.totalorder %s6827_s5, %s9903_s0 }
  0x34   : > { %p6835_p5 = scmp.lt.s32.totalorder %s6833_s25, %s6828_s6 }
  0x35   : > { %p6831_p12 = pnand %p6830_p10, %p6829_p9 }
  0x36   : > { %p6836_p7 = por %p6835_p5, %p6834_p0 }
  0x37   : > { %p6832_p13 = pneg %p6831_p12 }
  0x39   : > { %p6837_p11 = pnand %p6836_p7, %p6832_p13 }
  0x3b   : > { %6840 = shalt.err (!%p6837_p11)
}
  0x3c   : > { %s9936_s20 = smov 4   ;;  %s9937_s18 = smov 64  }
  0x3d   : > { %6506 = dma.hbm_to_vmem [thread:$0]  (!%p7177_p2), %s330_s13, 2048, %s332_s10, %s320_s4, %s9937_s18, %s9937_s18, %s9936_s20  }
  0x3e   : > { %s6374_s19 = sshll.u32 %s7000_s30, 6  ;;  %s345_s14 = scalar_lea.vmem [#allocation7], %s5993_s2 }
  0x3f   : > { %s350_s21 = scalar_lea.hbm %s9904_s1, %s6374_s19  ;;  %s353_s22 = sshll.u32 %s345_s14, 4  ;;  %s354_s22 = int_to_ptr.vmem [resolvable:$true] %s353_s22 }
  0x40   : > { %s351_s5 = sshll.u32 %s350_s21, 4  ;;  %s342_s6 = scalar_lea.sflag [#allocation8], %s341_s24  ;;  %s352_s5 = int_to_ptr.hbm [resolvable:$true] %s351_s5 }
  0x41   : > { %s6856_s25 = sshra.s32 %s352_s5, 4  ;;  %s6863_s13 = scalar_lea.hbm %s9904_s1, 128  ;;  %s6857_s25 = int_to_ptr.hbm [resolvable:$true] %s6856_s25 }
  0x42   : > { %s6858_s26 = scalar_lea.hbm %s6857_s25, 64  ;;  %p6864_p13 = scmp.lt.s32.totalorder %s6857_s25, %s9904_s1 }
  0x43   : > { %p6859_p11 = scmp.ne.s32.totalorder %s6857_s25, %s6858_s26  ;;  %p6865_p0 = scmp.lt.s32.totalorder %s6863_s13, %s6858_s26 }
  0x45   : > { %p6861_p9 = pnand %p6859_p11, %p6830_p10  ;;  %p6866_p5 = por %p6865_p0, %p6864_p13 }
  0x47   : > { %p6862_p12 = pneg %p6861_p9 }
  0x49   : > { %p6867_p7 = pnand %p6866_p5, %p6862_p12 }
  0x4b   : > { %6870 = shalt.err (!%p6867_p7)
}
  0x4c   : > { %s9938_s2 = smov 16   ;;  %s9939_s24 = smov 256  }
  0x4d   : > { %6509 = dma.hbm_to_vmem [thread:$0]  (!%p7177_p2), %s352_s5, 1024, %s354_s22, %s342_s6, %s9939_s24, %s9939_s24, %s9938_s2  }
  0x4e   : > { %365 = sbr.rel (%p7108_p8) target bundleno = 1342 (0x53e), region = 48  ;;  %s7221_s14 = sand.u32 (!%p7108_p8), 1, %s6992_s28  }
  0x4f   : > { %s5997_s20 = sshll.u32 (!%p7108_p8), %s7221_s14, 7  ;;  %s368_s18 = scalar_lea.sflag (!%p7108_p8), [#allocation5], %s7221_s14 }
  0x50   : > { %s7225_s23 = scalar_lea.vmem (!%p7108_p8), [#allocation4], %s5997_s20 }
  0x53   : > { %6959 = dma.done.wait (%p7095_p4), %s368_s18, 2048  }
  0x54   : > { %6961 = vsyncadd (%p7095_p4), %s368_s18, 4294965248  ;;  %s377_s16 = sand.u32 1, %s7086_s9   ;;  %s7233_s17 = sshll.u32 %s7221_s14, 6 }
  0x55   : > { %s378_s21 = scalar_lea.sflag [#allocation8], %s377_s16  ;;  %s7236_s22 = scalar_lea.vmem [#allocation7], %s7233_s17 }
  0x56   : > { %6963 = dma.done.wait (%p7095_p4), %s378_s21, 1024  }
  0x57   : > { %6965 = vsyncadd (%p7095_p4), %s378_s21, 4294966272 }
  0x58   : > { %6967 = dma.done.wait (%p54_p1), [#allocation8], 2624  }
  0x59   : > { %6969 = vsyncadd (%p54_p1), [#allocation8], 4294964672 }
  0x5a   : > { %6971 = dma.done.wait (%p54_p1), [#allocation11], 2048  }
  0x5b   : > { %6973 = vsyncadd (%p54_p1), [#allocation11], 4294965248 }
  0x5c   : > { %6975 = dma.done.wait (%p54_p1), [#allocation14], 1024  }
  0x5d   : > { %6977 = vsyncadd (%p54_p1), [#allocation14], 4294966272  ;;  %vm446_vm0 = vcmask 289792   ;;  %vm449_vm1 = vcmask 286720   ;;  %v7010_v0 = vmov 0   ;;  %s7011_s11 = smov 36  }
  0x5e   : > { %448 = vst.msk [vmem:[#allocation2 + $0x4] sm:$0xf] %vm446_vm0, %v7010_v0  ;;  %vm512_vm2 = vsmask.f32 7938  ;;  %vm456_vm3 = vsmask.f32 256 }
  0x5f   : > { %450 = vst.msk [vmem:[#allocation2 + $0x8] sm:$0x1] %vm449_vm1, %v7010_v0  ;;  %vm7260_vm4 = vmand %vm449_vm1, %vm512_vm2  ;;  %vm600_vm5 = vsmask.f32 4368  ;;  %v517_v2 = vld [vmem:[#allocation2 + $0x14] sm:$0x1] }
  0x60   : > { %447 = vst.msk [vmem:[#allocation2] sm:$0xf] %vm446_vm0, %v7010_v0  ;;  %v7267_v3 = vld [vmem:[%s7225_s23] sm:$0xf]  ;;  %v569_v4 = vld [vmem:[%s7225_s23 + $0x4] sm:$0xf]  ;;  %vm7272_vm6 = vmand %vm449_vm1, %vm456_vm3 }
  0x61   : > { %452 = vst.msk [vmem:[#allocation2 + $0xcc] sm:$0xf] %vm446_vm0, %v7010_v0  ;;  %v518_v7 = vsel %vm7260_vm4, 0, %v517_v2  ;;  %v603_v8 = vshrl.u32 %v7267_v3, 16  ;;  %v611_v9 = vshrl.u32 %v569_v4, 16  ;;  %v614_v17 = vshll.u32 %v569_v4, 16  ;;  %vm7289_vm8 = vmor %vm456_vm3, %vm600_vm5 }
  0x62   : > { %453 = vst.msk [vmem:[#allocation2 + $0xd0] sm:$0xf] %vm446_vm0, %v7010_v0  ;;  %vm1149_vm7 = vsmask.f32 3328  ;;  %v526_v24 = vld [vmem:[#allocation2 + $0x38] sm:$0x1]  ;;  %vm7352_vm11 = vmand %vm446_vm0, %vm512_vm2 }
  0x63   : > { %454 = vst.msk [vmem:[#allocation2 + $0xd4] sm:$0x1] %vm449_vm1, %v7010_v0  ;;  %v7281_v15 = vrot.slane %v603_v8, 7  ;;  %v613_v16 = vrot.slane %v611_v9, 7  ;;  %v527_v27 = vsel %vm7260_vm4, 0, %v526_v24  ;;  %vm1761_vm12 = vcmask 1042432  }
  0x64   : > { %519 = vst [vmem:[#allocation2 + $0x14] sm:$0x1] %v518_v7  ;;  %v7298_v28 = vld [vmem:[%s7225_s23 + $0x18] sm:$0xf]  ;;  %v575_v29 = vld [vmem:[%s7225_s23 + $0x1c] sm:$0xf] }
  0x65   : > { %v1102_v6 = vld [vmem:[#allocation2 + $0x4] sm:$0xf]  ;;  %v609_v22 = vrot.slane %v7281_v15, 4  ;;  %v616_v23 = vor.u32 %v614_v17, %v613_v16  ;;  %v618_v26 = vrot.slane %v613_v16, 4  ;;  %vm1150_vm9 = vsmask.f32 7440 }
  0x66   : > { %v514_v10 = vld [vmem:[#allocation2 + $0x8] sm:$0x1]  ;;  %v1162_v11 = vshll.u32 %v1102_v6, 16  ;;  %v1166_v12 = vshrl.u32 %v1102_v6, 16  ;;  %528 = vst [vmem:[#allocation2 + $0x38] sm:$0x1] %v527_v27  ;;  %vm7316_vm10 = vmor %vm1149_vm7, %vm1150_vm9 }
  0x67   : > { %v515_v13 = vsel %vm7260_vm4, 0, %v514_v10  ;;  %v458_v14 = vld [vmem:[#allocation2] sm:$0x1]  ;;  %v617_v30 = vsel %vm7289_vm8, %v609_v22, %v616_v23  ;;  %v654_v31 = vshrl.u32 %v7298_v28, 16  ;;  %v662_v32 = vshrl.u32 %v575_v29, 16  ;;  %s7012_s5 = smov 72  }
  0x68   : > { %516 = vst [vmem:[#allocation2 + $0x8] sm:$0x1] %v515_v13  ;;  %v7283_v18 = vrot.slane %v1162_v11, 5  ;;  %v1168_v19 = vrot.slane %v1166_v12, 4  ;;  %v459_v20 = vsel %vm7272_vm6, 0, %v458_v14  ;;  %v665_v33 = vshll.u32 %v575_v29, 16 }
  0x69   : > { %460 = vst [vmem:[#allocation2] sm:$0x1] %v459_v20  ;;  %v523_v34 = vld [vmem:[#allocation2 + $0x2c] sm:$0x1]  ;;  %v7305_v37 = vrot.slane %v654_v31, 7  ;;  %v664_v38 = vrot.slane %v662_v32, 7 }
  0x6a   : > { %v1169_v25 = vor.u32 %v1168_v19, %v7283_v18  ;;  %928 = vst.msk [vmem:[#allocation2 + $0x10] sm:$0xf] %vm446_vm0, %v617_v30  ;;  %v524_v39 = vsel %vm7260_vm4, 0, %v523_v34  ;;  %v572_v41 = vld [vmem:[%s7225_s23 + $0x10] sm:$0xf]  ;;  %vm1762_vm13 = vcmask 1046532  }
  0x6b   : > { %v929_v36 = vld [vmem:[#allocation2 + $0x14] sm:$0x1]  ;;  %525 = vst [vmem:[#allocation2 + $0x2c] sm:$0x1] %v524_v39  ;;  %v573_v42 = vld [vmem:[%s7225_s23 + $0x14] sm:$0xf]  ;;  %v667_v45 = vor.u32 %v665_v33, %v664_v38  ;;  %vm7730_vm14 = vmor %vm1761_vm12, %vm1762_vm13 }
  0x6c   : > { %v1170_v35 = vrot.slane %v1169_v25, 4  ;;  %v930_v40 = vsel %vm7272_vm6, %v618_v26, %v929_v36  ;;  %v660_v44 = vrot.slane %v7305_v37, 4  ;;  %v669_v46 = vrot.slane %v664_v38, 4  ;;  %v467_v57 = vld [vmem:[#allocation2 + $0x24] sm:$0x1]  ;;  %s7013_s6 = smov 108  }
  0x6d   : > { %931 = vst [vmem:[#allocation2 + $0x14] sm:$0x1] %v930_v40  ;;  %v637_v49 = vshrl.u32 %v572_v41, 16  ;;  %v640_v50 = vshll.u32 %v572_v41, 16  ;;  %v645_v51 = vshrl.u32 %v573_v42, 16  ;;  %v648_v56 = vshll.u32 %v573_v42, 16 }
  0x6e   : > { %v668_v55 = vsel %vm7289_vm8, %v660_v44, %v667_v45  ;;  %v950_v59 = vld [vmem:[#allocation2 + $0x38] sm:$0x1]  ;;  %v468_v13 = vsel %vm7272_vm6, 0, %v467_v57  ;;  %v532_v14 = vld [vmem:[#allocation2 + $0x50] sm:$0x1]  ;;  %vm1632_vm15 = vcmask 584992  }
  0x6f   : > { %v1103_v43 = vld [vmem:[#allocation2 + $0x8] sm:$0x1]  ;;  %949 = vst.msk [vmem:[#allocation2 + $0x34] sm:$0xf] %vm446_vm0, %v668_v55  ;;  %v639_v60 = vrot.slane %v637_v49, 7  ;;  %v951_v0 = vsel %vm7272_vm6, %v669_v46, %v950_v59  ;;  %v647_v2 = vrot.slane %v645_v51, 7 }
  0x70   : > { %v1172_v47 = vshll.u32 %v1103_v43, 16  ;;  %v1101_v48 = vld [vmem:[#allocation2] sm:$0xf]  ;;  %952 = vst [vmem:[#allocation2 + $0x38] sm:$0x1] %v951_v0  ;;  %v533_v29 = vsel %vm7260_vm4, 0, %v532_v14 }
  0x71   : > { %v1153_v53 = vshrl.u32 %v1101_v48, 16  ;;  %v1156_v54 = vshll.u32 %v1101_v48, 16  ;;  %v1105_v63 = vld [vmem:[#allocation2 + $0x10] sm:$0xf]  ;;  %v643_v8 = vrot.slane %v639_v60, 4  ;;  %v650_v10 = vor.u32 %v648_v56, %v647_v2  ;;  %s7014_s25 = smov 16  }
  0x72   : > { %v1174_v58 = vrot.slane %v1172_v47, 5  ;;  %v1186_v6 = vshll.u32 %v1105_v63, 16  ;;  %v1190_v7 = vshrl.u32 %v1105_v63, 16  ;;  %v652_v11 = vrot.slane %v647_v2, 4  ;;  %v943_v12 = vld [vmem:[#allocation2 + $0x2c] sm:$0x1] }
  0x73   : > { %v1155_v61 = vrot.slane %v1153_v53, 4  ;;  %v1158_v62 = vrot.slane %v1156_v54, 5  ;;  %469 = vst [vmem:[#allocation2 + $0x24] sm:$0x1] %v468_v13  ;;  %v651_v23 = vsel %vm7289_vm8, %v643_v8, %v650_v10  ;;  %v7337_v25 = vld [vmem:[%s7225_s23 + $0x28] sm:$0xf]  ;;  %v642_v34 = vor.u32 %v640_v50, %v639_v60 }
  0x74   : > { %v1175_v4 = vsel %vm7316_vm10, %v1170_v35, %v1174_v58  ;;  %v1106_v16 = vld [vmem:[#allocation2 + $0x14] sm:$0x1]  ;;  %v7330_v17 = vrot.slane %v1186_v6, 5  ;;  %v1192_v19 = vrot.slane %v1190_v7, 4  ;;  %v944_v24 = vsel %vm7272_vm6, %v652_v11, %v943_v12  ;;  %v579_v26 = vld [vmem:[%s7225_s23 + $0x2c] sm:$0xf] }
  0x75   : > { %1538 = vrot.lane.b32.xlu0 %v1175_v4, %s7011_s11  ;;  %v1159_v9 = vor.u32 %v1158_v62, %v1155_v61  ;;  %v1196_v22 = vshll.u32 %v1106_v16, 16  ;;  %942 = vst.msk [vmem:[#allocation2 + $0x28] sm:$0xf] %vm446_vm0, %v651_v23  ;;  %v688_v30 = vshrl.u32 %v7337_v25, 16  ;;  %v696_v35 = vshrl.u32 %v579_v26, 16  ;;  %s7015_s26 = smov 52  }
  0x76   : > { %v1193_v27 = vor.u32 %v1192_v19, %v7330_v17  ;;  %v1114_v33 = vld [vmem:[#allocation2 + $0x34] sm:$0xf]  ;;  %945 = vst [vmem:[#allocation2 + $0x2c] sm:$0x1] %v944_v24  ;;  %v699_v43 = vshll.u32 %v579_v26, 16  ;;  %vm1972_vm1 = vcmask 880192  }
  0x77   : > { %v1160_v20 = vrot.slane %v1159_v9, 4  ;;  %v1198_v32 = vrot.slane %v1196_v22, 5  ;;  %v1258_v38 = vshll.u32 %v1114_v33, 16  ;;  %v1262_v39 = vshrl.u32 %v1114_v33, 16  ;;  %534 = vst [vmem:[#allocation2 + $0x50] sm:$0x1] %v533_v29 }
  0x78   : > { %v1194_v36 = vrot.slane %v1193_v27, 4  ;;  %v7348_v40 = vrot.slane %v688_v30, 7  ;;  %v1115_v42 = vld [vmem:[#allocation2 + $0x38] sm:$0x1]  ;;  %v520_v44 = vld [vmem:[#allocation2 + $0x20] sm:$0x1] }
  0x79   : > { %v1165_v31 = vsel %vm7316_vm10, %v1160_v20, %v7283_v18  ;;  %v698_v18 = vrot.slane %v696_v35, 7  ;;  %v7358_v46 = vrot.slane %v1258_v38, 5  ;;  %v1264_v47 = vrot.slane %v1262_v39, 4  ;;  %v7361_v49 = vld [vmem:[%s7225_s23 + $0x8] sm:$0xf]  ;;  %s7016_s4 = smov 124  }
  0x7a   : > { %v1199_v45 = vsel %vm7316_vm10, %v1194_v36, %v1198_v32  ;;  %v1268_v48 = vshll.u32 %v1115_v42, 16  ;;  %v939_v50 = vld [vmem:[#allocation2 + $0x24] sm:$0xf]  ;;  %v694_v51 = vrot.slane %v7348_v40, 4  ;;  %v521_v55 = vsel %vm7260_vm4, 0, %v520_v44  ;;  %s7017_s10 = smov 88  }
  0x7b   : > { %1542 = vrot.lane.b32.xlu1 %v1199_v45, %s7011_s11  ;;  %v701_v53 = vor.u32 %v699_v43, %v698_v18  ;;  %v703_v54 = vrot.slane %v698_v18, 4  ;;  %v1265_v56 = vor.u32 %v1264_v47, %v7358_v46  ;;  %v940_v58 = vsel %vm7352_vm11, %v642_v34, %v939_v50  ;;  %522 = vst [vmem:[#allocation2 + $0x20] sm:$0x1] %v521_v55  ;;  %v571_v59 = vld [vmem:[%s7225_s23 + $0xc] sm:$0xf]  ;;  %s7018_s13 = smov 32  }
  0x7c   : > { %v1270_v57 = vrot.slane %v1268_v48, 5  ;;  %v620_v60 = vshrl.u32 %v7361_v49, 16  ;;  %v1111_v61 = vld [vmem:[#allocation2 + $0x28] sm:$0xf]  ;;  %941 = vst [vmem:[#allocation2 + $0x24] sm:$0xf] %v940_v58 }
  0x7d   : > { %1536 = vrot.lane.b32.xlu0 %v1165_v31, %s7011_s11  ;;  %v702_v62 = vsel %vm7289_vm8, %v694_v51, %v701_v53  ;;  %v628_v63 = vshrl.u32 %v571_v59, 16  ;;  %v1266_v0 = vrot.slane %v1265_v56, 4  ;;  %v1112_v2 = vld [vmem:[#allocation2 + $0x2c] sm:$0x1]  ;;  %v1234_v4 = vshll.u32 %v1111_v61, 16  ;;  %s9529_s2 = scalar_lea.vmem [#allocation16], %s7233_s17 }
  0x7e   : > { %v1238_v6 = vshrl.u32 %v1111_v61, 16  ;;  %v7375_v7 = vrot.slane %v620_v60, 7  ;;  %v1244_v8 = vshll.u32 %v1112_v2, 16  ;;  %963 = vst.msk [vmem:[#allocation2 + $0x4c] sm:$0xf] %vm446_vm0, %v702_v62  ;;  %v691_v22 = vshll.u32 %v7337_v25, 16 }
  0x7f   : > { %v964_v9 = vld [vmem:[#allocation2 + $0x50] sm:$0x1]  ;;  %v630_v10 = vrot.slane %v628_v63, 7  ;;  %v1271_v11 = vsel %vm7316_vm10, %v1266_v0, %v1270_v57  ;;  %v7380_v12 = vrot.slane %v1234_v4, 5  ;;  %v476_v16 = vld [vmem:[#allocation2 + $0x48] sm:$0x1] }
  0x80   : > { %v1240_v13 = vrot.slane %v1238_v6, 4  ;;  %v965_v14 = vsel %vm7272_vm6, %v703_v54, %v964_v9  ;;  %v461_v19 = vld [vmem:[#allocation2 + $0xc] sm:$0x1]  ;;  %v1246_v20 = vrot.slane %v1244_v8, 5  ;;  %v626_v23 = vrot.slane %v7375_v7, 4  ;;  %s9650_s24 = scalar_lea.vmem [#allocation15], %s7233_s17 }
  0x81   : > { %966 = vst [vmem:[#allocation2 + $0x50] sm:$0x1] %v965_v14  ;;  %v631_v24 = vshll.u32 %v571_v59, 16  ;;  %v635_v27 = vrot.slane %v630_v10, 4  ;;  %v477_v29 = vsel %vm7272_vm6, 0, %v476_v16  ;;  %v462_v30 = vsel %vm7272_vm6, 0, %v461_v19 }
  0x82   : > { %v1241_v26 = vor.u32 %v1240_v13, %v7380_v12  ;;  %v529_v31 = vld [vmem:[#allocation2 + $0x44] sm:$0x1]  ;;  %v606_v32 = vshll.u32 %v7267_v3, 16  ;;  %v936_v33 = vld [vmem:[#allocation2 + $0x20] sm:$0x1]  ;;  %v693_v45 = vor.u32 %v691_v22, %v7348_v40  ;;  %vm2230_vm2 = vcmask 1044320  }
  0x83   : > { %v633_v25 = vor.u32 %v631_v24, %v630_v10  ;;  %478 = vst [vmem:[#allocation2 + $0x48] sm:$0x1] %v477_v29  ;;  %v1110_v35 = vld [vmem:[#allocation2 + $0x24] sm:$0xf]  ;;  %v937_v36 = vsel %vm7272_vm6, %v635_v27, %v936_v33  ;;  %v530_v38 = vsel %vm7260_vm4, 0, %v529_v31  ;;  %vm2231_vm3 = vcmask 130052  }
  0x84   : > { %v1242_v34 = vrot.slane %v1241_v26, 4  ;;  %463 = vst [vmem:[#allocation2 + $0xc] sm:$0x1] %v462_v30  ;;  %v1225_v39 = vshrl.u32 %v1110_v35, 16  ;;  %v1228_v42 = vshll.u32 %v1110_v35, 16  ;;  %v608_v54 = vor.u32 %v606_v32, %v7281_v15  ;;  %vm8135_vm5 = vmor %vm2231_vm3, %vm2230_vm2  ;;  %s6443_s20 = sshll.u32 %s7086_s9, 6 }
  0x85   : > { %1554 = vrot.lane.b32.xlu0 %v1271_v11, %s7011_s11  ;;  %v634_v3 = vsel %vm7289_vm8, %v626_v23, %v633_v25  ;;  %938 = vst [vmem:[#allocation2 + $0x20] sm:$0x1] %v937_v36  ;;  %v7400_v18 = vld [vmem:[%s7225_s23 + $0x20] sm:$0xf]  ;;  %v1120_v44 = vld [vmem:[#allocation2 + $0x4c] sm:$0xf]  ;;  %s5812_s16 = scalar_lea.hbm %s9911_s8, %s6443_s20 }
  0x86   : > { %v1247_v43 = vsel %vm7316_vm10, %v1242_v34, %v1246_v20  ;;  %935 = vst.msk [vmem:[#allocation2 + $0x1c] sm:$0xf] %vm446_vm0, %v634_v3  ;;  %v577_v47 = vld [vmem:[%s7225_s23 + $0x24] sm:$0xf]  ;;  %v1227_v48 = vrot.slane %v1225_v39, 4  ;;  %v1230_v50 = vrot.slane %v1228_v42, 5 }
  0x87   : > { %1550 = vrot.lane.b32.xlu1 %v1247_v43, %s7011_s11  ;;  %v1306_v51 = vshll.u32 %v1120_v44, 16  ;;  %v1310_v53 = vshrl.u32 %v1120_v44, 16  ;;  %531 = vst [vmem:[#allocation2 + $0x44] sm:$0x1] %v530_v38  ;;  %v671_v56 = vshrl.u32 %v7400_v18, 16  ;;  %v679_v57 = vshrl.u32 %v577_v47, 16 }
  0x88   : > { %v1121_v55 = vld [vmem:[#allocation2 + $0x50] sm:$0x1]  ;;  %v682_v58 = vshll.u32 %v577_v47, 16  ;;  %v1231_v59 = vor.u32 %v1230_v50, %v1227_v48  ;;  %v535_v62 = vld [vmem:[#allocation2 + $0x5c] sm:$0x1]  ;;  %v674_v25 = vshll.u32 %v7400_v18, 16 }
  0x89   : > { %v7410_v60 = vrot.slane %v1306_v51, 5  ;;  %v1312_v61 = vrot.slane %v1310_v53, 4  ;;  %v1316_v40 = vshll.u32 %v1121_v55, 16  ;;  %v673_v0 = vrot.slane %v671_v56, 7  ;;  %v7426_v31 = vld [vmem:[%s7225_s23 + $0x30] sm:$0xf] }
  0x8a   : > { %v960_v63 = vld [vmem:[#allocation2 + $0x48] sm:$0xf]  ;;  %v681_v2 = vrot.slane %v679_v57, 7  ;;  %v536_v4 = vsel %vm7260_vm4, 0, %v535_v62  ;;  %v1232_v6 = vrot.slane %v1231_v59, 4  ;;  %v705_v34 = vshrl.u32 %v7426_v31, 16 }
  0x8b   : > { %v1313_v15 = vor.u32 %v1312_v61, %v7410_v60  ;;  %v1318_v8 = vrot.slane %v1316_v40, 5  ;;  %v961_v9 = vsel %vm7352_vm11, %v693_v45, %v960_v63  ;;  %v925_v10 = vld [vmem:[#allocation2 + $0xc] sm:$0xf]  ;;  %537 = vst [vmem:[#allocation2 + $0x5c] sm:$0x1] %v536_v4  ;;  %v677_v14 = vrot.slane %v673_v0, 4 }
  0x8c   : > { %v1109_v11 = vld [vmem:[#allocation2 + $0x20] sm:$0x1]  ;;  %962 = vst [vmem:[#allocation2 + $0x48] sm:$0xf] %v961_v9  ;;  %v926_v13 = vsel %vm7352_vm11, %v608_v54, %v925_v10  ;;  %v684_v16 = vor.u32 %v682_v58, %v681_v2  ;;  %v686_v19 = vrot.slane %v681_v2, 4  ;;  %v1237_v20 = vsel %vm7316_vm10, %v1232_v6, %v7380_v12  ;;  %s5813_s17 = sshll.u32 %s9529_s2, 4  ;;  %s5814_s17 = int_to_ptr.vmem [resolvable:$true] %s5813_s17 }
  0x8d   : > { %v1314_v22 = vrot.slane %v1313_v15, 4  ;;  %v1108_v23 = vld [vmem:[#allocation2 + $0x1c] sm:$0xf]  ;;  %v1220_v24 = vshll.u32 %v1109_v11, 16  ;;  %927 = vst [vmem:[#allocation2 + $0xc] sm:$0xf] %v926_v13  ;;  %1548 = vrot.lane.b32.xlu0 %v1237_v20, %s7011_s11  ;;  %v676_v63 = vor.u32 %v674_v25, %v673_v0 }
  0x8e   : > { %v1210_v26 = vshll.u32 %v1108_v23, 16  ;;  %v1214_v27 = vshrl.u32 %v1108_v23, 16  ;;  %v685_v29 = vsel %vm7289_vm8, %v677_v14, %v684_v16  ;;  %v957_v30 = vld [vmem:[#allocation2 + $0x44] sm:$0x1]  ;;  %v581_v33 = vld [vmem:[%s7225_s23 + $0x34] sm:$0xf] }
  0x8f   : > { %v1319_v32 = vsel %vm7316_vm10, %v1314_v22, %v1318_v8  ;;  %956 = vst.msk [vmem:[#allocation2 + $0x40] sm:$0xf] %vm446_vm0, %v685_v29  ;;  %v958_v12 = vsel %vm7272_vm6, %v686_v19, %v957_v30  ;;  %v1222_v38 = vrot.slane %v1220_v24, 5  ;;  %v713_v39 = vshrl.u32 %v581_v33, 16  ;;  %v473_v18 = vld [vmem:[#allocation2 + $0x3c] sm:$0x1] }
  0x90   : > { %1562 = vrot.lane.b32.xlu1 %v1319_v32, %s7011_s11  ;;  %v7437_v35 = vrot.slane %v1210_v26, 5  ;;  %v1216_v36 = vrot.slane %v1214_v27, 4  ;;  %959 = vst [vmem:[#allocation2 + $0x44] sm:$0x1] %v958_v12  ;;  %v7439_v42 = vrot.slane %v705_v34, 7  ;;  %v716_v3 = vshll.u32 %v581_v33, 16 }
  0x91   : > { %v464_v43 = vld [vmem:[#allocation2 + $0x18] sm:$0x1]  ;;  %v715_v45 = vrot.slane %v713_v39, 7  ;;  %v474_v47 = vsel %vm7272_vm6, 0, %v473_v18  ;;  %v623_v50 = vshll.u32 %v7361_v49, 16  ;;  %vm2793_vm7 = vcmask 420992  }
  0x92   : > { %v1217_v44 = vor.u32 %v1216_v36, %v7437_v35  ;;  %v465_v48 = vsel %vm7272_vm6, 0, %v464_v43  ;;  %v711_v53 = vrot.slane %v7439_v42, 4  ;;  %v971_v54 = vld [vmem:[#allocation2 + $0x5c] sm:$0x1]  ;;  %475 = vst [vmem:[#allocation2 + $0x3c] sm:$0x1] %v474_v47 }
  0x93   : > { %v1119_v51 = vld [vmem:[#allocation2 + $0x48] sm:$0xf]  ;;  %v718_v59 = vor.u32 %v716_v3, %v715_v45  ;;  %v720_v62 = vrot.slane %v715_v45, 4  ;;  %466 = vst [vmem:[#allocation2 + $0x18] sm:$0x1] %v465_v48  ;;  %v625_v23 = vor.u32 %v623_v50, %v7375_v7  ;;  %vm3130_vm9 = vcmask 716192  }
  0x94   : > { %v1218_v55 = vrot.slane %v1217_v44, 4  ;;  %v1297_v56 = vshrl.u32 %v1119_v51, 16  ;;  %v1300_v57 = vshll.u32 %v1119_v51, 16  ;;  %v1104_v58 = vld [vmem:[#allocation2 + $0xc] sm:$0xf]  ;;  %vm3950_vm12 = vcmask 1044448  }
  0x95   : > { %v1177_v61 = vshrl.u32 %v1104_v58, 16  ;;  %v1180_v40 = vshll.u32 %v1104_v58, 16  ;;  %v719_v15 = vsel %vm7289_vm8, %v711_v53, %v718_v59  ;;  %v485_v8 = vld [vmem:[#allocation2 + $0x6c] sm:$0x1]  ;;  %v972_v19 = vsel %vm7272_vm6, %v720_v62, %v971_v54  ;;  %v584_v22 = vld [vmem:[%s7225_s23 + $0x40] sm:$0xf] }
  0x96   : > { %v1223_v2 = vsel %vm7316_vm10, %v1218_v55, %v1222_v38  ;;  %v1299_v4 = vrot.slane %v1297_v56, 4  ;;  %v1302_v49 = vrot.slane %v1300_v57, 5  ;;  %v1117_v6 = vld [vmem:[#allocation2 + $0x40] sm:$0xf]  ;;  %970 = vst.msk [vmem:[#allocation2 + $0x58] sm:$0xf] %vm446_vm0, %v719_v15 }
  0x97   : > { %1546 = vrot.lane.b32.xlu2 %v1223_v2, %s7011_s11  ;;  %v1179_v9 = vrot.slane %v1177_v61, 4  ;;  %v1182_v10 = vrot.slane %v1180_v40, 5  ;;  %v1118_v11 = vld [vmem:[#allocation2 + $0x44] sm:$0x1]  ;;  %v1282_v13 = vshll.u32 %v1117_v6, 16  ;;  %v1286_v0 = vshrl.u32 %v1117_v6, 16 }
  0x98   : > { %v1303_v14 = vor.u32 %v1302_v49, %v1299_v4  ;;  %v1292_v16 = vshll.u32 %v1118_v11, 16  ;;  %v486_v20 = vsel %vm7272_vm6, 0, %v485_v8  ;;  %973 = vst [vmem:[#allocation2 + $0x5c] sm:$0x1] %v972_v19  ;;  %v585_v29 = vld [vmem:[%s7225_s23 + $0x44] sm:$0xf] }
  0x99   : > { %v1183_v24 = vor.u32 %v1182_v10, %v1179_v9  ;;  %v7460_v26 = vrot.slane %v1282_v13, 5  ;;  %v1288_v27 = vrot.slane %v1286_v0, 4  ;;  %v953_v25 = vld [vmem:[#allocation2 + $0x3c] sm:$0xf]  ;;  %487 = vst [vmem:[#allocation2 + $0x6c] sm:$0x1] %v486_v20 }
  0x9a   : > { %v1304_v30 = vrot.slane %v1303_v14, 4  ;;  %v1294_v32 = vrot.slane %v1292_v16, 5  ;;  %v954_v34 = vsel %vm7352_vm11, %v676_v63, %v953_v25  ;;  %v739_v36 = vshrl.u32 %v584_v22, 16  ;;  %v482_v38 = vld [vmem:[#allocation2 + $0x60] sm:$0x1]  ;;  %s5815_s21 = sshll.u32 %s5812_s16, 4  ;;  %s5816_s21 = int_to_ptr.hbm [resolvable:$true] %s5815_s21 }
  0x9b   : > { %v1184_v12 = vrot.slane %v1183_v24, 4  ;;  %v1289_v33 = vor.u32 %v1288_v27, %v7460_v26  ;;  %v582_v7 = vld [vmem:[%s7225_s23 + $0x38] sm:$0xf]  ;;  %955 = vst [vmem:[#allocation2 + $0x3c] sm:$0xf] %v954_v34  ;;  %v742_v18 = vshll.u32 %v584_v22, 16 }
  0x9c   : > { %v1309_v39 = vsel %vm7316_vm10, %v1304_v30, %v7410_v60  ;;  %v932_v3 = vld [vmem:[#allocation2 + $0x18] sm:$0xf]  ;;  %v747_v43 = vshrl.u32 %v585_v29, 16  ;;  %v741_v48 = vrot.slane %v739_v36, 7  ;;  %v583_v50 = vld [vmem:[%s7225_s23 + $0x3c] sm:$0xf] }
  0x9d   : > { %1560 = vrot.lane.b32.xlu0 %v1309_v39, %s7011_s11  ;;  %v1189_v44 = vsel %vm7316_vm10, %v1184_v12, %v7330_v17  ;;  %v1290_v45 = vrot.slane %v1289_v33, 4  ;;  %v933_v47 = vsel %vm7352_vm11, %v625_v23, %v932_v3  ;;  %v470_v51 = vld [vmem:[#allocation2 + $0x30] sm:$0x1]  ;;  %v750_v53 = vshll.u32 %v585_v29, 16  ;;  %v1123_v56 = vld [vmem:[#allocation2 + $0x58] sm:$0xf] }
  0x9e   : > { %1540 = vrot.lane.b32.xlu1 %v1189_v44, %s7011_s11  ;;  %934 = vst [vmem:[#allocation2 + $0x18] sm:$0xf] %v933_v47  ;;  %v7478_v60 = vrot.slane %v747_v43, 7  ;;  %v483_v54 = vsel %vm7272_vm6, 0, %v482_v38  ;;  %v722_v55 = vshrl.u32 %v582_v7, 16  ;;  %v744_v57 = vor.u32 %v742_v18, %v741_v48 }
  0x9f   : > { %v1295_v17 = vsel %vm7316_vm10, %v1290_v45, %v1294_v32  ;;  %v745_v58 = vrot.slane %v741_v48, 4  ;;  %484 = vst [vmem:[#allocation2 + $0x60] sm:$0x1] %v483_v54  ;;  %v725_v59 = vshll.u32 %v582_v7, 16  ;;  %v1124_v61 = vld [vmem:[#allocation2 + $0x5c] sm:$0x1] }
  0xa0   : > { %1558 = vrot.lane.b32.xlu2 %v1295_v17, %s7011_s11  ;;  %v1330_v40 = vshll.u32 %v1123_v56, 16  ;;  %v1334_v62 = vshrl.u32 %v1123_v56, 16  ;;  %v752_v63 = vor.u32 %v750_v53, %v7478_v60  ;;  %v724_v2 = vrot.slane %v722_v55, 7  ;;  %v981_v6 = vld [vmem:[#allocation2 + $0x6c] sm:$0xf] }
  0xa1   : > { %v657_v4 = vshll.u32 %v7298_v28, 16  ;;  %v1340_v49 = vshll.u32 %v1124_v61, 16  ;;  %v730_v15 = vshrl.u32 %v583_v50, 16  ;;  %v471_v8 = vsel %vm7272_vm6, 0, %v470_v51  ;;  %v544_v0 = vld [vmem:[#allocation2 + $0x80] sm:$0x1] }
  0xa2   : > { %v7489_v9 = vrot.slane %v1330_v40, 5  ;;  %v1336_v10 = vrot.slane %v1334_v62, 4  ;;  %v753_v11 = vsel %vm7289_vm8, %v745_v58, %v752_v63  ;;  %v982_v13 = vsel %vm7352_vm11, %v744_v57, %v981_v6  ;;  %472 = vst [vmem:[#allocation2 + $0x30] sm:$0x1] %v471_v8  ;;  %v1116_v28 = vld [vmem:[#allocation2 + $0x3c] sm:$0xf] }
  0xa3   : > { %v1342_v14 = vrot.slane %v1340_v49, 5  ;;  %983 = vst [vmem:[#allocation2 + $0x6c] sm:$0xf] %v982_v13  ;;  %v727_v16 = vor.u32 %v725_v59, %v724_v2  ;;  %v733_v19 = vshll.u32 %v583_v50, 16  ;;  %v1273_v22 = vshrl.u32 %v1116_v28, 16 }
  0xa4   : > { %v1337_v20 = vor.u32 %v1336_v10, %v7489_v9  ;;  %v1276_v23 = vshll.u32 %v1116_v28, 16  ;;  %984 = vst.msk [vmem:[#allocation2 + $0x70] sm:$0xf] %vm446_vm0, %v753_v11  ;;  %v7497_v24 = vrot.slane %v730_v15, 7  ;;  %v728_v29 = vrot.slane %v724_v2, 4 }
  0xa5   : > { %v1107_v27 = vld [vmem:[#allocation2 + $0x18] sm:$0xf]  ;;  %v659_v30 = vor.u32 %v657_v4, %v7305_v37  ;;  %v545_v32 = vsel %vm7260_vm4, 0, %v544_v0  ;;  %v7503_v25 = vld [vmem:[%s7225_s23 + $0x48] sm:$0xf]  ;;  %v1275_v33 = vrot.slane %v1273_v22, 4 }
  0xa6   : > { %v1338_v12 = vrot.slane %v1337_v20, 4  ;;  %v1278_v34 = vrot.slane %v1276_v23, 5  ;;  %v1201_v36 = vshrl.u32 %v1107_v27, 16  ;;  %v974_v38 = vld [vmem:[#allocation2 + $0x60] sm:$0xf]  ;;  %v1204_v7 = vshll.u32 %v1107_v27, 16 }
  0xa7   : > { %v735_v39 = vor.u32 %v733_v19, %v7497_v24  ;;  %v975_v3 = vsel %vm7352_vm11, %v727_v16, %v974_v38  ;;  %546 = vst [vmem:[#allocation2 + $0x80] sm:$0x1] %v545_v32  ;;  %v587_v18 = vld [vmem:[%s7225_s23 + $0x4c] sm:$0xf]  ;;  %v756_v37 = vshrl.u32 %v7503_v25, 16  ;;  %v708_v27 = vshll.u32 %v7426_v31, 16 }
  0xa8   : > { %v1343_v43 = vsel %vm7316_vm10, %v1338_v12, %v1342_v14  ;;  %v1279_v44 = vor.u32 %v1278_v34, %v1275_v33  ;;  %v1203_v45 = vrot.slane %v1201_v36, 4  ;;  %976 = vst [vmem:[#allocation2 + $0x60] sm:$0xf] %v975_v3  ;;  %v1206_v47 = vrot.slane %v1204_v7, 5  ;;  %v541_v54 = vld [vmem:[#allocation2 + $0x74] sm:$0x1] }
  0xa9   : > { %1566 = vrot.lane.b32.xlu0 %v1343_v43, %s7011_s11  ;;  %v736_v48 = vsel %vm7289_vm8, %v728_v29, %v735_v39  ;;  %v946_v50 = vld [vmem:[#allocation2 + $0x30] sm:$0xf]  ;;  %v7515_v51 = vrot.slane %v756_v37, 7  ;;  %v764_v53 = vshrl.u32 %v587_v18, 16  ;;  %v767_v57 = vshll.u32 %v587_v18, 16 }
  0xaa   : > { %v1280_v55 = vrot.slane %v1279_v44, 4  ;;  %v1128_v17 = vld [vmem:[#allocation2 + $0x6c] sm:$0xf]  ;;  %977 = vst.msk [vmem:[#allocation2 + $0x64] sm:$0xf] %vm446_vm0, %v736_v48  ;;  %v947_v56 = vsel %vm7352_vm11, %v659_v30, %v946_v50  ;;  %v1207_v58 = vor.u32 %v1206_v47, %v1203_v45  ;;  %v542_v14 = vsel %vm7260_vm4, 0, %v541_v54 }
  0xab   : > { %v1129_v59 = vld [vmem:[#allocation2 + $0x70] sm:$0xf]  ;;  %v1369_v61 = vshrl.u32 %v1128_v17, 16  ;;  %v1372_v40 = vshll.u32 %v1128_v17, 16  ;;  %948 = vst [vmem:[#allocation2 + $0x30] sm:$0xf] %v947_v56  ;;  %v710_v47 = vor.u32 %v708_v27, %v7439_v42 }
  0xac   : > { %v1285_v62 = vsel %vm7316_vm10, %v1280_v55, %v7460_v26  ;;  %v1378_v63 = vshll.u32 %v1129_v59, 16  ;;  %v1382_v2 = vshrl.u32 %v1129_v59, 16  ;;  %v762_v4 = vrot.slane %v7515_v51, 4  ;;  %v479_v49 = vld [vmem:[#allocation2 + $0x54] sm:$0x1] }
  0xad   : > { %1556 = vrot.lane.b32.xlu1 %v1285_v62, %s7011_s11  ;;  %v1208_v6 = vrot.slane %v1207_v58, 4  ;;  %v1371_v15 = vrot.slane %v1369_v61, 4  ;;  %v1374_v8 = vrot.slane %v1372_v40, 5  ;;  %v766_v10 = vrot.slane %v764_v53, 7  ;;  %v494_v11 = vld [vmem:[#allocation2 + $0x90] sm:$0x1] }
  0xae   : > { %v1380_v13 = vrot.slane %v1378_v63, 5  ;;  %v992_v0 = vld [vmem:[#allocation2 + $0x80] sm:$0x1]  ;;  %v1384_v28 = vrot.slane %v1382_v2, 4  ;;  %v480_v26 = vsel %vm7272_vm6, 0, %v479_v49  ;;  %v495_v32 = vsel %vm7272_vm6, 0, %v494_v11 }
  0xaf   : > { %v1213_v16 = vsel %vm7316_vm10, %v1208_v6, %v7437_v35  ;;  %v1375_v19 = vor.u32 %v1374_v8, %v1371_v15  ;;  %v1125_v20 = vld [vmem:[#allocation2 + $0x60] sm:$0xf]  ;;  %v769_v22 = vor.u32 %v767_v57, %v766_v10  ;;  %v771_v23 = vrot.slane %v766_v10, 4  ;;  %543 = vst [vmem:[#allocation2 + $0x74] sm:$0x1] %v542_v14 }
  0xb0   : > { %1544 = vrot.lane.b32.xlu2 %v1213_v16, %s7011_s11  ;;  %v1345_v29 = vshrl.u32 %v1125_v20, 16  ;;  %v1348_v30 = vshll.u32 %v1125_v20, 16  ;;  %481 = vst [vmem:[#allocation2 + $0x54] sm:$0x1] %v480_v26  ;;  %v754_v39 = vrot.slane %v7478_v60, 4  ;;  %v1385_v43 = vor.u32 %v1384_v28, %v1380_v13 }
  0xb1   : > { %v1376_v12 = vrot.slane %v1375_v19, 4  ;;  %v7536_v33 = vld [vmem:[#allocation2 + $0x64] sm:$0xf]  ;;  %v770_v35 = vsel %vm7289_vm8, %v762_v4, %v769_v22  ;;  %v993_v34 = vsel %vm7272_vm6, %v771_v23, %v992_v0  ;;  %496 = vst [vmem:[#allocation2 + $0x90] sm:$0x1] %v495_v32  ;;  %vm3951_vm13 = vcmask 261124  }
  0xb2   : > { %v1347_v31 = vrot.slane %v1345_v29, 4  ;;  %v1350_v36 = vrot.slane %v1348_v30, 5  ;;  %v1354_v38 = vshll.u32 %v7536_v33, 16  ;;  %v1113_v7 = vld [vmem:[#allocation2 + $0x30] sm:$0xf]  ;;  %v1358_v56 = vshrl.u32 %v7536_v33, 16 }
  0xb3   : > { %v1381_v3 = vsel %vm7316_vm10, %v1376_v12, %v1380_v13  ;;  %v1249_v18 = vshrl.u32 %v1113_v7, 16  ;;  %v1252_v37 = vshll.u32 %v1113_v7, 16  ;;  %991 = vst.msk [vmem:[#allocation2 + $0x7c] sm:$0xf] %vm446_vm0, %v770_v35  ;;  %v590_v48 = vld [vmem:[%s7225_s23 + $0x58] sm:$0xf] }
  0xb4   : > { %1572 = vrot.lane.b32.xlu0 %v1381_v3, %s7011_s11  ;;  %v1351_v44 = vor.u32 %v1350_v36, %v1347_v31  ;;  %v7548_v45 = vrot.slane %v1354_v38, 5  ;;  %994 = vst [vmem:[#allocation2 + $0x80] sm:$0x1] %v993_v34  ;;  %v591_v60 = vld [vmem:[%s7225_s23 + $0x5c] sm:$0xf]  ;;  %v790_v54 = vshrl.u32 %v590_v48, 16 }
  0xb5   : > { %v1251_v50 = vrot.slane %v1249_v18, 4  ;;  %v1254_v53 = vrot.slane %v1252_v37, 5  ;;  %v793_v55 = vshll.u32 %v590_v48, 16  ;;  %v798_v58 = vshrl.u32 %v591_v60, 16  ;;  %v491_v2 = vld [vmem:[#allocation2 + $0x84] sm:$0x1] }
  0xb6   : > { %v1352_v17 = vrot.slane %v1351_v44, 4  ;;  %v985_v57 = vld [vmem:[#allocation2 + $0x74] sm:$0x1]  ;;  %v801_v59 = vshll.u32 %v591_v60, 16  ;;  %v7556_v62 = vrot.slane %v1385_v43, 4  ;;  %v792_v63 = vrot.slane %v790_v54, 7 }
  0xb7   : > { %v1255_v61 = vor.u32 %v1254_v53, %v1251_v50  ;;  %v986_v40 = vsel %vm7272_vm6, %v754_v39, %v985_v57  ;;  %v967_v42 = vld [vmem:[#allocation2 + $0x54] sm:$0xf]  ;;  %v7563_v6 = vrot.slane %v798_v58, 7  ;;  %v492_v8 = vsel %vm7272_vm6, 0, %v491_v2  ;;  %v588_v0 = vld [vmem:[%s7225_s23 + $0x50] sm:$0xf] }
  0xb8   : > { %v1357_v4 = vsel %vm7316_vm10, %v1352_v17, %v7548_v45  ;;  %987 = vst [vmem:[#allocation2 + $0x74] sm:$0x1] %v986_v40  ;;  %v968_v49 = vsel %vm7352_vm11, %v710_v47, %v967_v42  ;;  %v1002_v15 = vld [vmem:[#allocation2 + $0x90] sm:$0xf]  ;;  %v795_v11 = vor.u32 %v793_v55, %v792_v63  ;;  %v796_v13 = vrot.slane %v792_v63, 4 }
  0xb9   : > { %1568 = vrot.lane.b32.xlu1 %v1357_v4, %s7011_s11  ;;  %v1256_v10 = vrot.slane %v1255_v61, 4  ;;  %969 = vst [vmem:[#allocation2 + $0x54] sm:$0xf] %v968_v49  ;;  %v803_v28 = vor.u32 %v801_v59, %v7563_v6  ;;  %v589_v26 = vld [vmem:[%s7225_s23 + $0x54] sm:$0xf]  ;;  %v773_v32 = vshrl.u32 %v588_v0, 16 }
  0xba   : > { %v1132_v14 = vld [vmem:[#allocation2 + $0x7c] sm:$0xf]  ;;  %493 = vst [vmem:[#allocation2 + $0x84] sm:$0x1] %v492_v8  ;;  %v1003_v23 = vsel %vm7352_vm11, %v795_v11, %v1002_v15  ;;  %v538_v27 = vld [vmem:[#allocation2 + $0x68] sm:$0x1] }
  0xbb   : > { %v1261_v16 = vsel %vm7316_vm10, %v1256_v10, %v7358_v46  ;;  %v1133_v19 = vld [vmem:[#allocation2 + $0x80] sm:$0x1]  ;;  %v1402_v20 = vshll.u32 %v1132_v14, 16  ;;  %v1406_v22 = vshrl.u32 %v1132_v14, 16  ;;  %v804_v30 = vsel %vm7289_vm8, %v796_v13, %v803_v28  ;;  %1004 = vst [vmem:[#allocation2 + $0x90] sm:$0xf] %v1003_v23 }
  0xbc   : > { %1552 = vrot.lane.b32.xlu2 %v1261_v16, %s7011_s11  ;;  %v1412_v29 = vshll.u32 %v1133_v19, 16  ;;  %v776_v12 = vshll.u32 %v588_v0, 16  ;;  %1005 = vst.msk [vmem:[#allocation2 + $0x94] sm:$0xf] %vm446_vm0, %v804_v30  ;;  %v781_v46 = vshrl.u32 %v589_v26, 16  ;;  %v784_v34 = vshll.u32 %v589_v26, 16 }
  0xbd   : > { %v7579_v33 = vrot.slane %v1402_v20, 5  ;;  %v1408_v35 = vrot.slane %v1406_v22, 4  ;;  %v775_v36 = vrot.slane %v773_v32, 7  ;;  %v539_v38 = vsel %vm7260_vm4, 0, %v538_v27  ;;  %v553_v39 = vld [vmem:[#allocation2 + $0xa4] sm:$0x1] }
  0xbe   : > { %v1414_v31 = vrot.slane %v1412_v29, 5  ;;  %v1360_v7 = vrot.slane %v1358_v56, 4  ;;  %v7585_v37 = vrot.slane %v781_v46, 7  ;;  %540 = vst [vmem:[#allocation2 + $0x68] sm:$0x1] %v539_v38  ;;  %v554_v43 = vsel %vm7260_vm4, 0, %v553_v39 }
  0xbf   : > { %v1409_v3 = vor.u32 %v1408_v35, %v7579_v33  ;;  %v1130_v18 = vld [vmem:[#allocation2 + $0x74] sm:$0x1]  ;;  %v778_v48 = vor.u32 %v776_v12, %v775_v36  ;;  %v779_v50 = vrot.slane %v775_v36, 4  ;;  %555 = vst [vmem:[#allocation2 + $0xa4] sm:$0x1] %v554_v43  ;;  %v737_v58 = vrot.slane %v7497_v24, 4 }
  0xc0   : > { %v1388_v44 = vshll.u32 %v1130_v18, 16  ;;  %v1122_v47 = vld [vmem:[#allocation2 + $0x54] sm:$0xf]  ;;  %v786_v55 = vor.u32 %v784_v34, %v7585_v37  ;;  %v7594_v59 = vld [vmem:[%s7225_s23 + $0x60] sm:$0xf]  ;;  %v1361_v13 = vor.u32 %v1360_v7, %v7548_v45  ;;  %v759_v28 = vshll.u32 %v7503_v25, 16 }
  0xc1   : > { %v1410_v53 = vrot.slane %v1409_v3, 4  ;;  %v1321_v60 = vshrl.u32 %v1122_v47, 16  ;;  %v1324_v54 = vshll.u32 %v1122_v47, 16  ;;  %v995_v17 = vld [vmem:[#allocation2 + $0x84] sm:$0xf]  ;;  %v807_v0 = vshrl.u32 %v7594_v59, 16 }
  0xc2   : > { %v1390_v56 = vrot.slane %v1388_v44, 5  ;;  %v996_v57 = vsel %vm7352_vm11, %v778_v48, %v995_v17  ;;  %v593_v61 = vld [vmem:[%s7225_s23 + $0x64] sm:$0xf]  ;;  %v1137_v2 = vld [vmem:[#allocation2 + $0x90] sm:$0xf]  ;;  %v787_v4 = vsel %vm7289_vm8, %v779_v50, %v786_v55  ;;  %v7624_v35 = vrot.slane %v1361_v13, 4 }
  0xc3   : > { %v1415_v40 = vsel %vm7316_vm10, %v1410_v53, %v1414_v31  ;;  %v1323_v42 = vrot.slane %v1321_v60, 4  ;;  %v1326_v63 = vrot.slane %v1324_v54, 5  ;;  %997 = vst [vmem:[#allocation2 + $0x84] sm:$0xf] %v996_v57  ;;  %v7605_v24 = vld [vmem:[#allocation2 + $0x94] sm:$0xf] }
  0xc4   : > { %1578 = vrot.lane.b32.xlu0 %v1415_v40, %s7011_s11  ;;  %v1391_v49 = vsel %vm7316_vm10, %v7556_v62, %v1390_v56  ;;  %v1441_v15 = vshrl.u32 %v1137_v2, 16  ;;  %v1444_v8 = vshll.u32 %v1137_v2, 16  ;;  %998 = vst.msk [vmem:[#allocation2 + $0x88] sm:$0xf] %vm446_vm0, %v787_v4  ;;  %v1450_v11 = vshll.u32 %v7605_v24, 16 }
  0xc5   : > { %1574 = vrot.lane.b32.xlu1 %v1391_v49, %s7011_s11  ;;  %v1327_v10 = vor.u32 %v1326_v63, %v1323_v42  ;;  %v550_v14 = vld [vmem:[#allocation2 + $0x98] sm:$0x1]  ;;  %v978_v16 = vld [vmem:[#allocation2 + $0x68] sm:$0x1]  ;;  %v815_v19 = vshrl.u32 %v593_v61, 16  ;;  %v7617_v27 = vrot.slane %v807_v0, 7  ;;  %v761_v42 = vor.u32 %v759_v28, %v7515_v51 }
  0xc6   : > { %v1443_v26 = vrot.slane %v1441_v15, 4  ;;  %v1446_v62 = vrot.slane %v1444_v8, 5  ;;  %v7613_v22 = vrot.slane %v1450_v11, 5  ;;  %v979_v23 = vsel %vm7272_vm6, %v737_v58, %v978_v16  ;;  %v1013_v32 = vld [vmem:[#allocation2 + $0xa4] sm:$0x1] }
  0xc7   : > { %v1328_v20 = vrot.slane %v1327_v10, 4  ;;  %980 = vst [vmem:[#allocation2 + $0x68] sm:$0x1] %v979_v23  ;;  %v817_v45 = vrot.slane %v815_v19, 7  ;;  %v818_v30 = vshll.u32 %v593_v61, 16  ;;  %v551_v25 = vsel %vm7260_vm4, 0, %v550_v14 }
  0xc8   : > { %v1447_v29 = vor.u32 %v1446_v62, %v1443_v26  ;;  %v813_v46 = vrot.slane %v7617_v27, 4  ;;  %552 = vst [vmem:[#allocation2 + $0x98] sm:$0x1] %v551_v25  ;;  %v488_v34 = vld [vmem:[#allocation2 + $0x78] sm:$0x1]  ;;  %v1454_v44 = vshrl.u32 %v7605_v24, 16 }
  0xc9   : > { %v1333_v12 = vsel %vm7316_vm10, %v1328_v20, %v7489_v9  ;;  %v820_v38 = vor.u32 %v818_v30, %v817_v45  ;;  %v822_v7 = vrot.slane %v817_v45, 4  ;;  %v489_v39 = vsel %vm7272_vm6, 0, %v488_v34  ;;  %v503_v50 = vld [vmem:[#allocation2 + $0xb4] sm:$0x1]  ;;  %v596_v53 = vld [vmem:[%s7225_s23 + $0x70] sm:$0xf] }
  0xca   : > { %1564 = vrot.lane.b32.xlu2 %v1333_v12, %s7011_s11  ;;  %v1448_v31 = vrot.slane %v1447_v29, 4  ;;  %v1134_v36 = vld [vmem:[#allocation2 + $0x84] sm:$0xf]  ;;  %490 = vst [vmem:[#allocation2 + $0x78] sm:$0x1] %v489_v39  ;;  %v805_v17 = vrot.slane %v7563_v6, 4 }
  0xcb   : > { %v7630_v3 = vld [vmem:[#allocation2 + $0x88] sm:$0xf]  ;;  %v1417_v18 = vshrl.u32 %v1134_v36, 16  ;;  %v1420_v9 = vshll.u32 %v1134_v36, 16  ;;  %v821_v48 = vsel %vm7289_vm8, %v813_v46, %v820_v38  ;;  %v1014_v55 = vsel %vm7272_vm6, %v822_v7, %v1013_v32  ;;  %v597_v58 = vld [vmem:[%s7225_s23 + $0x74] sm:$0xf] }
  0xcc   : > { %v1453_v43 = vsel %vm7316_vm10, %v1448_v31, %v7613_v22  ;;  %v1426_v47 = vshll.u32 %v7630_v3, 16  ;;  %1012 = vst.msk [vmem:[#allocation2 + $0xa0] sm:$0xf] %vm446_vm0, %v821_v48  ;;  %v504_v57 = vsel %vm7272_vm6, 0, %v503_v50  ;;  %v841_v63 = vshrl.u32 %v596_v53, 16 }
  0xcd   : > { %1584 = vrot.lane.b32.xlu0 %v1453_v43, %s7011_s11  ;;  %v1419_v60 = vrot.slane %v1417_v18, 4  ;;  %v1422_v54 = vrot.slane %v1420_v9, 5  ;;  %1015 = vst [vmem:[#allocation2 + $0xa4] sm:$0x1] %v1014_v55  ;;  %v844_v2 = vshll.u32 %v596_v53, 16  ;;  %v1456_v24 = vrot.slane %v1454_v44, 4 }
  0xce   : > { %v7645_v56 = vrot.slane %v1426_v47, 5  ;;  %v1127_v40 = vld [vmem:[#allocation2 + $0x68] sm:$0x1]  ;;  %505 = vst [vmem:[#allocation2 + $0xb4] sm:$0x1] %v504_v57  ;;  %v849_v6 = vshrl.u32 %v597_v58, 16 }
  0xcf   : > { %v1423_v61 = vor.u32 %v1422_v54, %v1419_v60  ;;  %v1364_v4 = vshll.u32 %v1127_v40, 16  ;;  %v1006_v49 = vld [vmem:[#allocation2 + $0x98] sm:$0x1]  ;;  %v852_v15 = vshll.u32 %v597_v58, 16  ;;  %v843_v11 = vrot.slane %v841_v63, 7 }
  0xd0   : > { %v1007_v10 = vsel %vm7272_vm6, %v805_v17, %v1006_v49  ;;  %v500_v13 = vld [vmem:[#allocation2 + $0xa8] sm:$0x1]  ;;  %v594_v0 = vld [vmem:[%s7225_s23 + $0x68] sm:$0xf]  ;;  %v7654_v51 = vrot.slane %v849_v6, 7  ;;  %v1457_v31 = vor.u32 %v1456_v24, %v7613_v22  ;;  %vm4794_vm2 = vcmask 556032  }
  0xd1   : > { %v1424_v8 = vrot.slane %v1423_v61, 4  ;;  %v1366_v14 = vrot.slane %v1364_v4, 5  ;;  %1008 = vst [vmem:[#allocation2 + $0x98] sm:$0x1] %v1007_v10  ;;  %v988_v26 = vld [vmem:[#allocation2 + $0x78] sm:$0xf]  ;;  %v846_v16 = vor.u32 %v844_v2, %v843_v11 }
  0xd2   : > { %v989_v62 = vsel %vm7352_vm11, %v761_v42, %v988_v26  ;;  %v847_v19 = vrot.slane %v843_v11, 4  ;;  %v595_v20 = vld [vmem:[%s7225_s23 + $0x6c] sm:$0xf]  ;;  %v854_v45 = vor.u32 %v852_v15, %v7654_v51  ;;  %v501_v30 = vsel %vm7272_vm6, 0, %v500_v13  ;;  %v547_v25 = vld [vmem:[#allocation2 + $0x8c] sm:$0x1] }
  0xd3   : > { %v1429_v28 = vsel %vm7316_vm10, %v1424_v8, %v7645_v56  ;;  %v1367_v23 = vsel %vm7316_vm10, %v7624_v35, %v1366_v14  ;;  %v1141_v29 = vld [vmem:[#allocation2 + $0xa0] sm:$0xf]  ;;  %990 = vst [vmem:[#allocation2 + $0x78] sm:$0xf] %v989_v62  ;;  %v824_v32 = vshrl.u32 %v594_v0, 16  ;;  %v827_v39 = vshll.u32 %v594_v0, 16 }
  0xd4   : > { %1580 = vrot.lane.b32.xlu1 %v1429_v28, %s7011_s11  ;;  %1570 = vrot.lane.b32.xlu2 %v1367_v23, %s7011_s11  ;;  %v1142_v12 = vld [vmem:[#allocation2 + $0xa4] sm:$0x1]  ;;  %v1474_v46 = vshll.u32 %v1141_v29, 16  ;;  %v1478_v34 = vshrl.u32 %v1141_v29, 16  ;;  %502 = vst [vmem:[#allocation2 + $0xa8] sm:$0x1] %v501_v30  ;;  %v855_v35 = vsel %vm7289_vm8, %v847_v19, %v854_v45 }
  0xd5   : > { %v1484_v36 = vshll.u32 %v1142_v12, 16  ;;  %v1023_v38 = vld [vmem:[#allocation2 + $0xb4] sm:$0xf]  ;;  %v826_v7 = vrot.slane %v824_v32, 7  ;;  %1026 = vst.msk [vmem:[#allocation2 + $0xb8] sm:$0xf] %vm446_vm0, %v855_v35 }
  0xd6   : > { %v7673_v18 = vrot.slane %v1474_v46, 5  ;;  %v1480_v9 = vrot.slane %v1478_v34, 4  ;;  %v1024_v43 = vsel %vm7352_vm11, %v846_v16, %v1023_v38  ;;  %v832_v44 = vshrl.u32 %v595_v20, 16  ;;  %v559_v10 = vld [vmem:[#allocation2 + $0xbc] sm:$0x1] }
  0xd7   : > { %v1486_v47 = vrot.slane %v1484_v36, 5  ;;  %1025 = vst [vmem:[#allocation2 + $0xb4] sm:$0xf] %v1024_v43  ;;  %v829_v22 = vor.u32 %v827_v39, %v826_v7  ;;  %v835_v48 = vshll.u32 %v595_v20, 16  ;;  %v830_v60 = vrot.slane %v826_v7, 4 }
  0xd8   : > { %v1481_v50 = vor.u32 %v1480_v9, %v7673_v18  ;;  %v1139_v53 = vld [vmem:[#allocation2 + $0x98] sm:$0x1]  ;;  %v7679_v54 = vrot.slane %v832_v44, 7  ;;  %v548_v55 = vsel %vm7260_vm4, 0, %v547_v25  ;;  %v1458_v17 = vrot.slane %v1457_v31, 4 }
  0xd9   : > { %v1460_v57 = vshll.u32 %v1139_v53, 16  ;;  %549 = vst [vmem:[#allocation2 + $0x8c] sm:$0x1] %v548_v55  ;;  %v1430_v42 = vshrl.u32 %v7630_v3, 16  ;;  %v788_v8 = vrot.slane %v7585_v37, 4  ;;  %v810_v14 = vshll.u32 %v7594_v59, 16 }
  0xda   : > { %v1482_v58 = vrot.slane %v1481_v50, 4  ;;  %v1131_v61 = vld [vmem:[#allocation2 + $0x78] sm:$0xf]  ;;  %v837_v40 = vor.u32 %v835_v48, %v7679_v54  ;;  %v497_v19 = vld [vmem:[#allocation2 + $0x9c] sm:$0x1]  ;;  %v560_v45 = vsel %vm7260_vm4, 0, %v559_v10 }
  0xdb   : > { %v1462_v63 = vrot.slane %v1460_v57, 5  ;;  %v1393_v2 = vshrl.u32 %v1131_v61, 16  ;;  %v1396_v4 = vshll.u32 %v1131_v61, 16  ;;  %v1016_v49 = vld [vmem:[#allocation2 + $0xa8] sm:$0xf]  ;;  %v1432_v23 = vrot.slane %v1430_v42, 4 }
  0xdc   : > { %v1487_v24 = vsel %vm7316_vm10, %v1482_v58, %v1486_v47  ;;  %v838_v6 = vsel %vm7289_vm8, %v830_v60, %v837_v40  ;;  %v1017_v15 = vsel %vm7352_vm11, %v829_v22, %v1016_v49  ;;  %v1147_v0 = vld [vmem:[#allocation2 + $0xb8] sm:$0xf]  ;;  %v7698_v29 = vld [vmem:[#allocation2 + $0x4] sm:$0xf]  ;;  %561 = vst [vmem:[#allocation2 + $0xbc] sm:$0x1] %v560_v45  ;;  %v812_v39 = vor.u32 %v810_v14, %v7617_v27 }
  0xdd   : > { %1590 = vrot.lane.b32.xlu0 %v1487_v24, %s7011_s11  ;;  %v1463_v3 = vsel %vm7316_vm10, %v1458_v17, %v1462_v63  ;;  %v1395_v11 = vrot.slane %v1393_v2, 4  ;;  %v1398_v13 = vrot.slane %v1396_v4, 5  ;;  %1018 = vst [vmem:[#allocation2 + $0xa8] sm:$0xf] %v1017_v15  ;;  %v1522_v16 = vshll.u32 %v1147_v0, 16 }
  0xde   : > { %1586 = vrot.lane.b32.xlu1 %v1463_v3, %s7011_s11  ;;  %v1146_v26 = vld [vmem:[#allocation2 + $0xb4] sm:$0xf]  ;;  %1019 = vst.msk [vmem:[#allocation2 + $0xac] sm:$0xf] %vm446_vm0, %v838_v6  ;;  %v498_v12 = vsel %vm7272_vm6, 0, %v497_v19  ;;  %v1433_v35 = vor.u32 %v1432_v23, %v7645_v56  ;;  %v1766_v7 = vrot.slane %v7698_v29, 5 }
  0xdf   : > { %v1399_v28 = vor.u32 %v1398_v13, %v1395_v11  ;;  %v1513_v62 = vshrl.u32 %v1146_v26, 16  ;;  %v1516_v37 = vshll.u32 %v1146_v26, 16  ;;  %v1524_v31 = vrot.slane %v1522_v16, 5  ;;  %499 = vst [vmem:[#allocation2 + $0x9c] sm:$0x1] %v498_v12 }
  0xe0   : > { %v999_v20 = vld [vmem:[#allocation2 + $0x8c] sm:$0x1]  ;;  %v1667_v38 = vld [vmem:[#allocation2 + $0x8] sm:$0x1]  ;;  %v1526_v22 = vshrl.u32 %v1147_v0, 16  ;;  %v1434_v55 = vrot.slane %v1433_v35, 4 }
  0xe1   : > { %v1400_v30 = vrot.slane %v1399_v28, 4  ;;  %v1515_v32 = vrot.slane %v1513_v62, 4  ;;  %v1518_v59 = vrot.slane %v1516_v37, 5  ;;  %v1000_v25 = vsel %vm7272_vm6, %v788_v8, %v999_v20  ;;  %v556_v50 = vld [vmem:[#allocation2 + $0xb0] sm:$0x1] }
  0xe2   : > { %1001 = vst [vmem:[#allocation2 + $0x8c] sm:$0x1] %v1000_v25  ;;  %v557_v27 = vsel %vm7260_vm4, 0, %v556_v50  ;;  %v1769_v40 = vrot.slane %v1667_v38, 5  ;;  %v1528_v4 = vrot.slane %v1526_v22, 4  ;;  %v839_v8 = vrot.slane %v7679_v54, 4 }
  0xe3   : > { %v1405_v46 = vsel %vm7316_vm10, %v1400_v30, %v7579_v33  ;;  %v1519_v34 = vor.u32 %v1518_v59, %v1515_v32  ;;  %v856_v33 = vrot.slane %v7654_v51, 4  ;;  %v1768_v51 = vrot.slane %v1766_v7, 4  ;;  %v1027_v17 = vld [vmem:[#allocation2 + $0xbc] sm:$0x1]  ;;  %558 = vst [vmem:[#allocation2 + $0xb0] sm:$0x1] %v557_v27 }
  0xe4   : > { %1576 = vrot.lane.b32.xlu2 %v1405_v46, %s7011_s11  ;;  %v1143_v36 = vld [vmem:[#allocation2 + $0xa8] sm:$0xf]  ;;  %v1671_v11 = vld [vmem:[#allocation2 + $0x18] sm:$0xe]  ;;  %v1529_v0 = vor.u32 %v1528_v4, %v1524_v31  ;;  %v7745_v14 = vld [vmem:[#allocation2 + $0x1c] sm:$0xf] }
  0xe5   : > { %v1520_v9 = vrot.slane %v1519_v34, 4  ;;  %v7713_v43 = vld [vmem:[#allocation2 + $0xac] sm:$0xf]  ;;  %v1489_v44 = vshrl.u32 %v1143_v36, 16  ;;  %v1492_v47 = vshll.u32 %v1143_v36, 16  ;;  %v1028_v42 = vsel %vm7272_vm6, %v856_v33, %v1027_v17 }
  0xe6   : > { %v1498_v48 = vshll.u32 %v7713_v43, 16  ;;  %1029 = vst [vmem:[#allocation2 + $0xbc] sm:$0x1] %v1028_v42  ;;  %v1009_v49 = vld [vmem:[#allocation2 + $0x9c] sm:$0xf]  ;;  %v1770_v3 = vsel %vm7730_vm14, %v1768_v51, %v1769_v40  ;;  %v6007_v54 = vrot.slane %v1671_v11, 9 }
  0xe7   : > { %v1525_v56 = vsel %vm7316_vm10, %v1520_v9, %v1524_v31  ;;  %v1491_v53 = vrot.slane %v1489_v44, 4  ;;  %v1494_v60 = vrot.slane %v1492_v47, 5  ;;  %v1010_v6 = vsel %vm7352_vm11, %v812_v39, %v1009_v49  ;;  %v1038_v62 = vld [vmem:[#allocation2 + $0x4] sm:$0xf]  ;;  %v7753_v45 = vld [vmem:[#allocation2 + $0x28] sm:$0xf]  ;;  %v1539_v30 = vpop.permute.xlu0 %1538 }
  0xe8   : > { %1596 = vrot.lane.b32.xlu0 %v1525_v56, %s7011_s11  ;;  %v7724_v58 = vrot.slane %v1498_v48, 5  ;;  %1011 = vst [vmem:[#allocation2 + $0x9c] sm:$0xf] %v1010_v6  ;;  %v1502_v37 = vshrl.u32 %v7713_v43, 16  ;;  %v1780_v19 = vrot.slane %v7745_v14, 5  ;;  %v1530_v20 = vrot.slane %v1529_v0, 4 }
  0xe9   : > { %v1495_v57 = vor.u32 %v1494_v60, %v1491_v53  ;;  %v1136_v61 = vld [vmem:[#allocation2 + $0x8c] sm:$0x1]  ;;  %1070 = vst.msk [vmem:[#allocation3 + $0xc] sm:$0xf] %vm446_vm0, %v1038_v62  ;;  %v1668_v46 = vld [vmem:[#allocation2 + $0xc] sm:$0xe] }
  0xea   : > { %v1436_v63 = vshll.u32 %v1136_v61, 16  ;;  %v1020_v26 = vld [vmem:[#allocation2 + $0xb0] sm:$0x1]  ;;  %1634 = vst.msk [vmem:[#allocation3 + $0xc] sm:$0xf] %vm1632_vm15, %v1539_v30  ;;  %v1781_v34 = vsel %vm7730_vm14, %v6007_v54, %v1780_v19  ;;  %v1504_v36 = vrot.slane %v1502_v37, 4 }
  0xeb   : > { %v1496_v24 = vrot.slane %v1495_v57, 4  ;;  %v1021_v28 = vsel %vm7272_vm6, %v839_v8, %v1020_v26  ;;  %v7759_v31 = vld [vmem:[#allocation2 + $0x10] sm:$0xf]  ;;  %v1787_v35 = vrot.slane %v7753_v45, 5  ;;  %v1042_v38 = vld [vmem:[#allocation2 + $0x1c] sm:$0xf] }
  0xec   : > { %v1438_v15 = vrot.slane %v1436_v63, 5  ;;  %1022 = vst [vmem:[#allocation2 + $0xb0] sm:$0x1] %v1021_v28  ;;  %v1676_v44 = vld [vmem:[#allocation2 + $0x2c] sm:$0x1]  ;;  %v6006_v22 = vrot.slane %v1668_v46, 9  ;;  %v1505_v27 = vor.u32 %v1504_v36, %v7724_v58 }
  0xed   : > { %v1501_v10 = vsel %vm7316_vm10, %v1496_v24, %v7724_v58  ;;  %v1148_v16 = vld [vmem:[#allocation2 + $0xbc] sm:$0x1]  ;;  %1074 = vst.msk [vmem:[#allocation3 + $0x3c] sm:$0xf] %vm446_vm0, %v1042_v38  ;;  %v1773_v48 = vrot.slane %v7759_v31, 5  ;;  %v1789_v56 = vrot.slane %v1787_v35, 4  ;;  %v1543_v4 = vpop.permute.xlu1 %1542 }
  0xee   : > { %1592 = vrot.lane.b32.xlu1 %v1501_v10, %s7011_s11  ;;  %v1439_v13 = vsel %vm7316_vm10, %v1434_v55, %v1438_v15  ;;  %v1532_v23 = vshll.u32 %v1148_v16, 16  ;;  %v1790_v53 = vrot.slane %v1676_v44, 5  ;;  %v1673_v57 = vld [vmem:[#allocation2 + $0x20] sm:$0x1]  ;;  %v1680_v40 = vld [vmem:[#allocation2 + $0x3c] sm:$0xe] }
  0xef   : > { %1582 = vrot.lane.b32.xlu2 %v1439_v13, %s7011_s11  ;;  %v1140_v32 = vld [vmem:[#allocation2 + $0x9c] sm:$0xf]  ;;  %v1774_v17 = vsel %vm7730_vm14, %v6006_v22, %v1773_v48  ;;  %v1537_v42 = vpop.permute.xlu0 %1536  ;;  %v1037_v63 = vld [vmem:[#allocation2] sm:$0xf]  ;;  %v1040_v58 = vld [vmem:[#allocation2 + $0x10] sm:$0xf] }
  0xf0   : > { %1878 = vrot.lane.b32.xlu0 %v1770_v3, %s7012_s5  ;;  %v1534_v59 = vrot.slane %v1532_v23, 5  ;;  %v1465_v25 = vshrl.u32 %v1140_v32, 16  ;;  %v1468_v12 = vshll.u32 %v1140_v32, 16  ;;  %v1791_v61 = vsel %vm7730_vm14, %v1789_v56, %v1790_v53  ;;  %v7782_v6 = vld [vmem:[#allocation2 + $0x40] sm:$0xf] }
  0xf1   : > { %v1547_v47 = vpop.permute.xlu2 %1546  ;;  %v1506_v49 = vrot.slane %v1505_v27, 4  ;;  %1069 = vst.msk [vmem:[#allocation3] sm:$0xf] %vm446_vm0, %v1037_v63  ;;  %v1782_v15 = vrot.slane %v1780_v19, 4  ;;  %v1783_v8 = vrot.slane %v1673_v57, 5  ;;  %v6010_v3 = vrot.slane %v1680_v40, 9 }
  0xf2   : > { %v1535_v39 = vsel %vm7316_vm10, %v1530_v20, %v1534_v59  ;;  %v1467_v9 = vrot.slane %v1465_v25, 4  ;;  %v1470_v43 = vrot.slane %v1468_v12, 5  ;;  %1638 = vst.msk [vmem:[#allocation3 + $0x3c] sm:$0xf] %vm1632_vm15, %v1547_v47  ;;  %v1801_v11 = vrot.slane %v7782_v6, 5 }
  0xf3   : > { %v1145_v50 = vld [vmem:[#allocation2 + $0xb0] sm:$0x1]  ;;  %1633 = vst.msk [vmem:[#allocation3] sm:$0xf] %vm1632_vm15, %v1537_v42  ;;  %v7793_v0 = vld [vmem:[#allocation2 + $0x4c] sm:$0xf]  ;;  %v1784_v26 = vsel %vm7730_vm14, %v1782_v15, %v1783_v8 }
  0xf4   : > { %v1471_v33 = vor.u32 %v1470_v43, %v1467_v9  ;;  %v1508_v55 = vshll.u32 %v1145_v50, 16  ;;  %1072 = vst.msk [vmem:[#allocation3 + $0x24] sm:$0xf] %vm446_vm0, %v1040_v58  ;;  %v1665_v14 = vld [vmem:[#allocation2] sm:$0xe]  ;;  %v1802_v62 = vsel %vm7730_vm14, %v6010_v3, %v1801_v11  ;;  %v1808_v37 = vrot.slane %v7793_v0, 5 }
  0xf5   : > { %1636 = vst.msk [vmem:[#allocation3 + $0x24] sm:$0xf] %vm1632_vm15, %v1543_v4  ;;  %v1677_v54 = vld [vmem:[#allocation2 + $0x30] sm:$0xe]  ;;  %v7799_v28 = vld [vmem:[#allocation2 + $0x34] sm:$0xf] }
  0xf6   : > { %1598 = vrot.lane.b32.xlu1 %v1535_v39, %s7011_s11  ;;  %v1472_v60 = vrot.slane %v1471_v33, 4  ;;  %v1510_v24 = vrot.slane %v1508_v55, 5  ;;  %v1046_v16 = vld [vmem:[#allocation2 + $0x34] sm:$0xf]  ;;  %v1044_v20 = vld [vmem:[#allocation2 + $0x28] sm:$0xf] }
  0xf7   : > { %v1555_v19 = vpop.permute.xlu0 %1554  ;;  %v6005_v30 = vrot.slane %v1665_v14, 9  ;;  %v1685_v32 = vld [vmem:[#allocation2 + $0x50] sm:$0x1]  ;;  %1078 = vst.msk [vmem:[#allocation3 + $0x6c] sm:$0xf] %vm446_vm0, %v1046_v16  ;;  %v6009_v25 = vrot.slane %v1677_v54, 9 }
  0xf8   : > { %1884 = vrot.lane.b32.xlu0 %v1781_v34, %s7012_s5  ;;  %v1477_v51 = vsel %vm7316_vm10, %v1472_v60, %v7673_v18  ;;  %v1048_v18 = vld [vmem:[#allocation2 + $0x40] sm:$0xf]  ;;  %v1511_v13 = vsel %vm7316_vm10, %v1506_v49, %v1510_v24  ;;  %1642 = vst.msk [vmem:[#allocation3 + $0x6c] sm:$0xf] %vm1632_vm15, %v1555_v19  ;;  %v1041_v59 = vld [vmem:[#allocation2 + $0x18] sm:$0xf] }
  0xf9   : > { %1588 = vrot.lane.b32.xlu2 %v1477_v51, %s7011_s11  ;;  %1080 = vst.msk [vmem:[#allocation3 + $0x84] sm:$0xf] %vm446_vm0, %v1048_v18  ;;  %v1551_v23 = vpop.permute.xlu1 %1550  ;;  %v1794_v12 = vrot.slane %v7799_v28, 5  ;;  %v1670_v46 = vld [vmem:[#allocation2 + $0x14] sm:$0x1]  ;;  %v1810_v34 = vrot.slane %v1808_v37, 4  ;;  %v1767_v38 = vsel %vm7730_vm14, %v6005_v30, %v1766_v7 }
  0xfa   : > { %v1559_v10 = vpop.permute.xlu2 %1558  ;;  %1076 = vst.msk [vmem:[#allocation3 + $0x54] sm:$0xf] %vm446_vm0, %v1044_v20  ;;  %v1811_v36 = vrot.slane %v1685_v32, 5  ;;  %v1775_v43 = vrot.slane %v1773_v48, 4  ;;  %v1776_v44 = vrot.slane %v1670_v46, 5  ;;  %v1803_v48 = vrot.slane %v1801_v11, 4 }
  0xfb   : > { %1644 = vst.msk [vmem:[#allocation3 + $0x84] sm:$0xf] %vm1632_vm15, %v1559_v10  ;;  %v1795_v9 = vsel %vm7730_vm14, %v6009_v25, %v1794_v12  ;;  %v1682_v7 = vld [vmem:[#allocation2 + $0x44] sm:$0x1]  ;;  %v1050_v22 = vld [vmem:[#allocation2 + $0x4c] sm:$0xf] }
  0xfc   : > { %1640 = vst.msk [vmem:[#allocation3 + $0x54] sm:$0xf] %vm1632_vm15, %v1551_v23  ;;  %v1812_v29 = vsel %vm7730_vm14, %v1810_v34, %v1811_v36  ;;  %v1043_v47 = vld [vmem:[#allocation2 + $0x24] sm:$0xf]  ;;  %v1689_v56 = vld [vmem:[#allocation2 + $0x60] sm:$0xe]  ;;  %v1777_v51 = vsel %vm7730_vm14, %v1775_v43, %v1776_v44 }
  0xfd   : > { %1073 = vst.msk [vmem:[#allocation3 + $0x30] sm:$0xf] %vm446_vm0, %v1041_v59  ;;  %v1690_v53 = vld [vmem:[#allocation2 + $0x64] sm:$0xf]  ;;  %v1045_v31 = vld [vmem:[#allocation2 + $0x30] sm:$0xf] }
  0xfe   : > { %1880 = vrot.lane.b32.xlu1 %v1774_v17, %s7012_s5  ;;  %1075 = vst.msk [vmem:[#allocation3 + $0x48] sm:$0xf] %vm446_vm0, %v1043_v47  ;;  %v1804_v60 = vrot.slane %v1682_v7, 5  ;;  %v6013_v27 = vrot.slane %v1689_v56, 9  ;;  %v1822_v55 = vrot.slane %v1690_v53, 5  ;;  %v1796_v16 = vrot.slane %v1794_v12, 4 }
  0xff   : > { %v1549_v33 = vpop.permute.xlu0 %1548  ;;  %1082 = vst.msk [vmem:[#allocation3 + $0x9c] sm:$0xf] %vm446_vm0, %v1050_v22  ;;  %v1674_v17 = vld [vmem:[#allocation2 + $0x24] sm:$0xe]  ;;  %v7837_v57 = vld [vmem:[#allocation2 + $0x70] sm:$0xf] }
 0x100   : > { %1890 = vrot.lane.b32.xlu0 %v1791_v61, %s7012_s5  ;;  %1639 = vst.msk [vmem:[#allocation3 + $0x48] sm:$0xf] %vm1632_vm15, %v1549_v33  ;;  %v1805_v61 = vsel %vm7730_vm14, %v1803_v48, %v1804_v60  ;;  %v1686_v40 = vld [vmem:[#allocation2 + $0x54] sm:$0xe]  ;;  %v6008_v42 = vrot.slane %v1674_v17, 9  ;;  %v1823_v63 = vsel %vm7730_vm14, %v6013_v27, %v1822_v55  ;;  %v1829_v4 = vrot.slane %v7837_v57, 5 }
 0x101   : > { %1594 = vrot.lane.b32.xlu2 %v1511_v13, %s7011_s11  ;;  %1077 = vst.msk [vmem:[#allocation3 + $0x60] sm:$0xf] %vm446_vm0, %v1045_v31  ;;  %v7845_v58 = vld [vmem:[#allocation2 + $0x58] sm:$0xf]  ;;  %v1049_v24 = vld [vmem:[#allocation2 + $0x48] sm:$0xf] }
 0x102   : > { %v1563_v50 = vpop.permute.xlu1 %1562  ;;  %v1694_v18 = vld [vmem:[#allocation2 + $0x74] sm:$0x1]  ;;  %v1039_v8 = vld [vmem:[#allocation2 + $0xc] sm:$0xf]  ;;  %1081 = vst.msk [vmem:[#allocation3 + $0x90] sm:$0xf] %vm446_vm0, %v1049_v24  ;;  %v1788_v54 = vsel %vm7730_vm14, %v6008_v42, %v1787_v35 }
 0x103   : > { %1646 = vst.msk [vmem:[#allocation3 + $0x9c] sm:$0xf] %vm1632_vm15, %v1563_v50  ;;  %v6012_v10 = vrot.slane %v1686_v40, 9  ;;  %v1815_v3 = vrot.slane %v7845_v58, 5  ;;  %v1051_v11 = vld [vmem:[#allocation2 + $0x54] sm:$0xf] }
 0x104   : > { %v1679_v13 = vld [vmem:[#allocation2 + $0x38] sm:$0x1]  ;;  %v1831_v14 = vrot.slane %v1829_v4, 4  ;;  %1071 = vst.msk [vmem:[#allocation3 + $0x18] sm:$0xf] %vm446_vm0, %v1039_v8  ;;  %v1824_v12 = vrot.slane %v1822_v55, 4 }
 0x105   : > { %1083 = vst.msk [vmem:[#allocation3 + $0xa8] sm:$0xf] %vm446_vm0, %v1051_v11  ;;  %v1797_v19 = vrot.slane %v1679_v13, 5  ;;  %v1691_v20 = vld [vmem:[#allocation2 + $0x68] sm:$0x1]  ;;  %s6900_s11 = sshra.s32 %s5816_s21, 4  ;;  %s6901_s11 = int_to_ptr.hbm [resolvable:$true] %s6900_s11 }
 0x106   : > { %1886 = vrot.lane.b32.xlu1 %v1784_v26, %s7012_s5  ;;  %v1832_v26 = vrot.slane %v1694_v18, 5  ;;  %v1052_v35 = vld [vmem:[#allocation2 + $0x58] sm:$0xf]  ;;  %v1047_v30 = vld [vmem:[#allocation2 + $0x3c] sm:$0xf]  ;;  %v1825_v46 = vrot.slane %v1691_v20, 5  ;;  %p6907_p2 = scmp.lt.s32.totalorder %s6901_s11, %s9911_s8 }
 0x107   : > { %v1698_v32 = vld [vmem:[#allocation2 + $0x84] sm:$0xe]  ;;  %v1699_v59 = vld [vmem:[#allocation2 + $0x88] sm:$0xf]  ;;  %1084 = vst.msk [vmem:[#allocation3 + $0xb4] sm:$0xf] %vm446_vm0, %v1052_v35 }
 0x108   : > { %1896 = vrot.lane.b32.xlu0 %v1802_v62, %s7012_s5  ;;  %v1816_v62 = vsel %vm7730_vm14, %v6012_v10, %v1815_v3  ;;  %v1833_v45 = vsel %vm7730_vm14, %v1831_v14, %v1832_v26  ;;  %v1054_v28 = vld [vmem:[#allocation2 + $0x64] sm:$0xf]  ;;  %1079 = vst.msk [vmem:[#allocation3 + $0x78] sm:$0xf] %vm446_vm0, %v1047_v30  ;;  %v6016_v34 = vrot.slane %v1698_v32, 9  ;;  %v1843_v36 = vrot.slane %v1699_v59, 5 }
 0x109   : > { %1876 = vrot.lane.b32.xlu2 %v1767_v38, %s7012_s5  ;;  %v1798_v38 = vsel %vm7730_vm14, %v1796_v16, %v1797_v19  ;;  %1086 = vst.msk [vmem:[#allocation3 + $0xcc] sm:$0xf] %vm446_vm0, %v1054_v28  ;;  %v1826_v44 = vsel %vm7730_vm14, %v1824_v12, %v1825_v46  ;;  %v7885_v7 = vld [vmem:[#allocation2 + $0x7c] sm:$0xf]  ;;  %v1055_v50 = vld [vmem:[#allocation2 + $0x6c] sm:$0xf] }
 0x10a   : > { %v1545_v39 = vpop.permute.xlu2 %1544  ;;  %v1844_v33 = vsel %vm7730_vm14, %v6016_v34, %v1843_v36  ;;  %v1053_v56 = vld [vmem:[#allocation2 + $0x60] sm:$0xf]  ;;  %v1703_v53 = vld [vmem:[#allocation2 + $0x98] sm:$0x1]  ;;  %1087 = vst.msk [vmem:[#allocation3 + $0xd8] sm:$0xf] %vm446_vm0, %v1055_v50 }
 0x10b   : > { %1637 = vst.msk [vmem:[#allocation3 + $0x30] sm:$0xf] %vm1632_vm15, %v1545_v39  ;;  %v1683_v39 = vld [vmem:[#allocation2 + $0x48] sm:$0xe]  ;;  %v1057_v48 = vld [vmem:[#allocation2 + $0x78] sm:$0xf] }
 0x10c   : > { %v6011_v47 = vrot.slane %v1683_v39, 9  ;;  %v1836_v27 = vrot.slane %v7885_v7, 5  ;;  %1085 = vst.msk [vmem:[#allocation3 + $0xc0] sm:$0xf] %vm446_vm0, %v1053_v56  ;;  %v1688_v55 = vld [vmem:[#allocation2 + $0x5c] sm:$0x1] }
 0x10d   : > { %v1853_v17 = vrot.slane %v1703_v53, 5  ;;  %1089 = vst.msk [vmem:[#allocation3 + $0xf0] sm:$0xf] %vm446_vm0, %v1057_v48  ;;  %v1700_v24 = vld [vmem:[#allocation2 + $0x8c] sm:$0x1]  ;;  %v1845_v58 = vrot.slane %v1843_v36, 4 }
 0x10e   : > { %1892 = vrot.lane.b32.xlu1 %v1795_v9, %s7012_s5  ;;  %v7880_v9 = vld [vmem:[#allocation2 + $0x94] sm:$0xf]  ;;  %v1056_v18 = vld [vmem:[#allocation2 + $0x70] sm:$0xf]  ;;  %v1708_v8 = vld [vmem:[#allocation2 + $0xac] sm:$0xf] }
 0x10f   : > { %v1561_v6 = vpop.permute.xlu0 %1560  ;;  %v1850_v22 = vrot.slane %v7880_v9, 5  ;;  %v1060_v10 = vld [vmem:[#allocation2 + $0x88] sm:$0xf]  ;;  %1088 = vst.msk [vmem:[#allocation3 + $0xe4] sm:$0xf] %vm446_vm0, %v1056_v18  ;;  %v1864_v13 = vrot.slane %v1708_v8, 5 }
 0x110   : > { %1902 = vrot.lane.b32.xlu0 %v1812_v29, %s7012_s5  ;;  %v1541_v15 = vpop.permute.xlu1 %1540  ;;  %1645 = vst.msk [vmem:[#allocation3 + $0x90] sm:$0xf] %vm1632_vm15, %v1561_v6  ;;  %v1695_v29 = vld [vmem:[#allocation2 + $0x78] sm:$0xe]  ;;  %v1707_v6 = vld [vmem:[#allocation2 + $0xa8] sm:$0xe] }
 0x111   : > { %1882 = vrot.lane.b32.xlu2 %v1777_v51, %s7012_s5  ;;  %1635 = vst.msk [vmem:[#allocation3 + $0x18] sm:$0xf] %vm1632_vm15, %v1541_v15  ;;  %v6015_v60 = vrot.slane %v1695_v29, 9  ;;  %v1852_v51 = vrot.slane %v1850_v22, 4  ;;  %v6019_v11 = vrot.slane %v1707_v6, 9 }
 0x112   : > { %1092 = vst.msk [vmem:[#allocation3 + $0x114] sm:$0xf] %vm446_vm0, %v1060_v10  ;;  %v1692_v26 = vld [vmem:[#allocation2 + $0x6c] sm:$0xe]  ;;  %v1704_v16 = vld [vmem:[#allocation2 + $0x9c] sm:$0xe] }
 0x113   : > { %v1837_v42 = vsel %vm7730_vm14, %v6015_v60, %v1836_v27  ;;  %v1854_v0 = vsel %vm7730_vm14, %v1852_v51, %v1853_v17  ;;  %v6014_v19 = vrot.slane %v1692_v26, 9  ;;  %v7930_v20 = vld [vmem:[#allocation2 + $0xa0] sm:$0xf]  ;;  %v1061_v30 = vld [vmem:[#allocation2 + $0x90] sm:$0xf]  ;;  %v6018_v12 = vrot.slane %v1704_v16, 9 }
 0x114   : > { %v1712_v32 = vld [vmem:[#allocation2 + $0xbc] sm:$0x1]  ;;  %v1857_v46 = vrot.slane %v7930_v20, 5  ;;  %1093 = vst.msk [vmem:[#allocation3 + $0x120] sm:$0xf] %vm446_vm0, %v1061_v30 }
 0x115   : > { %v1063_v28 = vld [vmem:[#allocation2 + $0x9c] sm:$0xf]  ;;  %v1874_v36 = vrot.slane %v1712_v32, 5  ;;  %v1697_v39 = vld [vmem:[#allocation2 + $0x80] sm:$0x1] }
 0x116   : > { %v1553_v49 = vpop.permute.xlu2 %1552  ;;  %1898 = vrot.lane.b32.xlu1 %v1805_v61, %s7012_s5  ;;  %v1809_v61 = vsel %vm7730_vm14, %v6011_v47, %v1808_v37  ;;  %v1058_v37 = vld [vmem:[#allocation2 + $0x7c] sm:$0xf]  ;;  %1095 = vst.msk [vmem:[#allocation3 + $0x138] sm:$0xf] %vm446_vm0, %v1063_v28  ;;  %v1709_v29 = vld [vmem:[#allocation2 + $0xb0] sm:$0x1] }
 0x117   : > { %1641 = vst.msk [vmem:[#allocation3 + $0x60] sm:$0xf] %vm1632_vm15, %v1553_v49  ;;  %v1818_v49 = vrot.slane %v1688_v55, 5  ;;  %v1064_v47 = vld [vmem:[#allocation2 + $0xa0] sm:$0xf]  ;;  %v1839_v57 = vrot.slane %v1697_v39, 5 }
 0x118   : > { %1908 = vrot.lane.b32.xlu0 %v1823_v63, %s7012_s5  ;;  %v1817_v63 = vrot.slane %v1815_v3, 4  ;;  %1090 = vst.msk [vmem:[#allocation3 + $0xfc] sm:$0xf] %vm446_vm0, %v1058_v37  ;;  %v1846_v3 = vrot.slane %v1700_v24, 5  ;;  %v1066_v53 = vld [vmem:[#allocation2 + $0xac] sm:$0xf] }
 0x119   : > { %1888 = vrot.lane.b32.xlu2 %v1788_v54, %s7012_s5  ;;  %v7923_v54 = vld [vmem:[#allocation2 + $0xb8] sm:$0xf]  ;;  %1096 = vst.msk [vmem:[#allocation3 + $0x144] sm:$0xf] %vm446_vm0, %v1064_v47  ;;  %v1867_v48 = vrot.slane %v1709_v29, 5  ;;  %v1859_v37 = vrot.slane %v1857_v46, 4 }
 0x11a   : > { %v1819_v14 = vsel %vm7730_vm14, %v1817_v63, %v1818_v49  ;;  %v1871_v35 = vrot.slane %v7923_v54, 5  ;;  %1098 = vst.msk [vmem:[#allocation3 + $0x15c] sm:$0xf] %vm446_vm0, %v1066_v53  ;;  %v1701_v60 = vld [vmem:[#allocation2 + $0x90] sm:$0xe] }
 0x11b   : > { %v1567_v23 = vpop.permute.xlu0 %1566  ;;  %v2007_v55 = vld [vmem:[#allocation2 + $0x18] sm:$0xf]  ;;  %v1067_v17 = vld [vmem:[#allocation2 + $0xb4] sm:$0xf]  ;;  %v1706_v49 = vld [vmem:[#allocation2 + $0xa4] sm:$0x1] }
 0x11c   : > { %1648 = vst.msk [vmem:[#allocation3 + $0xb4] sm:$0xf] %vm1632_vm15, %v1567_v23  ;;  %v1873_v34 = vrot.slane %v1871_v35, 4  ;;  %v2005_v24 = vld [vmem:[#allocation2 + $0xc] sm:$0xf]  ;;  %v1860_v18 = vrot.slane %v1706_v49, 5 }
 0x11d   : > { %1099 = vst.msk [vmem:[#allocation3 + $0x168] sm:$0xf] %vm446_vm0, %v1067_v17  ;;  %v1068_v6 = vld [vmem:[#allocation2 + $0xb8] sm:$0xf]  ;;  %v1710_v8 = vld [vmem:[#allocation2 + $0xb4] sm:$0xe] }
 0x11e   : > { %1904 = vrot.lane.b32.xlu1 %v1816_v62, %s7012_s5  ;;  %v1847_v62 = vsel %vm7730_vm14, %v1845_v58, %v1846_v3  ;;  %1100 = vst.msk [vmem:[#allocation3 + $0x174] sm:$0xf] %vm446_vm0, %v1068_v6  ;;  %v2008_v10 = vld [vmem:[#allocation2 + $0x1c] sm:$0xf]  ;;  %v6020_v3 = vrot.slane %v1710_v8, 9 }
 0x11f   : > { %v1557_v25 = vpop.permute.xlu1 %1556  ;;  %v2013_v58 = vld [vmem:[#allocation2 + $0x3c] sm:$0xf]  ;;  %v2011_v26 = vld [vmem:[#allocation2 + $0x30] sm:$0xf]  ;;  %v2014_v20 = vld [vmem:[#allocation2 + $0x40] sm:$0xf] }
 0x120   : > { %1914 = vrot.lane.b32.xlu0 %v1833_v45, %s7012_s5  ;;  %1643 = vst.msk [vmem:[#allocation3 + $0x78] sm:$0xf] %vm1632_vm15, %v1557_v25  ;;  %v1865_v45 = vsel %vm7730_vm14, %v6019_v11, %v1864_v13  ;;  %v1059_v25 = vld [vmem:[#allocation2 + $0x84] sm:$0xf]  ;;  %v2006_v54 = vld [vmem:[#allocation2 + $0x10] sm:$0xf] }
 0x121   : > { %1894 = vrot.lane.b32.xlu2 %v1798_v38, %s7012_s5  ;;  %1091 = vst.msk [vmem:[#allocation3 + $0x108] sm:$0xf] %vm446_vm0, %v1059_v25  ;;  %v1830_v38 = vsel %vm7730_vm14, %v6014_v19, %v1829_v4  ;;  %v1062_v4 = vld [vmem:[#allocation2 + $0x94] sm:$0xf]  ;;  %v2009_v32 = vld [vmem:[#allocation2 + $0x24] sm:$0xf] }
 0x122   : > { %1094 = vst.msk [vmem:[#allocation3 + $0x12c] sm:$0xf] %vm446_vm0, %v1062_v4  ;;  %v2017_v25 = vld [vmem:[#allocation2 + $0x54] sm:$0xf]  ;;  %v2022_v28 = vld [vmem:[#allocation2 + $0x70] sm:$0xf] }
 0x123   : > { %v2025_v29 = vld [vmem:[#allocation2 + $0x84] sm:$0xf]  ;;  %v2015_v53 = vld [vmem:[#allocation2 + $0x48] sm:$0xf]  ;;  %v2018_v17 = vld [vmem:[#allocation2 + $0x58] sm:$0xf] }
 0x124   : > { %v1565_v43 = vpop.permute.xlu2 %1564  ;;  %v2026_v41 = vld [vmem:[#allocation2 + $0x88] sm:$0xf] }
 0x125   : > { %1647 = vst.msk [vmem:[#allocation3 + $0xa8] sm:$0xf] %vm1632_vm15, %v1565_v43  ;;  %v1858_v43 = vsel %vm7730_vm14, %v6018_v12, %v1857_v46 }
 0x126   : > { %v1573_v31 = vpop.permute.xlu0 %1572  ;;  %1910 = vrot.lane.b32.xlu1 %v1826_v44, %s7012_s5  ;;  %v1875_v44 = vsel %vm7730_vm14, %v1873_v34, %v1874_v36  ;;  %v506_v34 = vld [vmem:[#allocation2 + $0xc0] sm:$0x1]  ;;  %v2012_v36 = vld [vmem:[#allocation2 + $0x34] sm:$0xf] }
 0x127   : > { %1651 = vst.msk [vmem:[#allocation3 + $0xd8] sm:$0xf] %vm1632_vm15, %v1573_v31  ;;  %v1866_v31 = vrot.slane %v1864_v13, 4  ;;  %v1872_v13 = vsel %vm7730_vm14, %v6020_v3, %v1871_v35  ;;  %v2019_v35 = vld [vmem:[#allocation2 + $0x60] sm:$0xf]  ;;  %v507_v39 = vsel %vm7272_vm6, 0, %v506_v34 }
 0x128   : > { %1920 = vrot.lane.b32.xlu0 %v1844_v33, %s7012_s5  ;;  %v1838_v33 = vrot.slane %v1836_v27, 4  ;;  %508 = vst [vmem:[#allocation2 + $0xc0] sm:$0x1] %v507_v39  ;;  %v2266_v3 = vld [vmem:[#allocation2 + $0x10] sm:$0xf] }
 0x129   : > { %1900 = vrot.lane.b32.xlu2 %v1809_v61, %s7012_s5  ;;  %v1868_v27 = vsel %vm7730_vm14, %v1866_v31, %v1867_v48  ;;  %v1065_v61 = vld [vmem:[#allocation2 + $0xa8] sm:$0xf]  ;;  %v2327_v34 = vshrl.u32 %v2266_v3, 16 }
 0x12a   : > { %v1840_v7 = vsel %vm7730_vm14, %v1838_v33, %v1839_v57  ;;  %1097 = vst.msk [vmem:[#allocation3 + $0x150] sm:$0xf] %vm446_vm0, %v1065_v61 }
 0x12b   : > { %v1569_v40 = vpop.permute.xlu1 %1568 }
 0x12c   : > { %1649 = vst.msk [vmem:[#allocation3 + $0xc0] sm:$0xf] %vm1632_vm15, %v1569_v40  ;;  %v6017_v40 = vrot.slane %v1701_v60, 9 }
 0x12e   : > { %v1571_v15 = vpop.permute.xlu2 %1570  ;;  %1916 = vrot.lane.b32.xlu1 %v1837_v42, %s7012_s5  ;;  %v1851_v63 = vsel %vm7730_vm14, %v6017_v40, %v1850_v22  ;;  %v1861_v22 = vsel %vm7730_vm14, %v1859_v37, %v1860_v18  ;;  %v2265_v40 = vld [vmem:[#allocation2 + $0xc] sm:$0xf] }
 0x12f   : > { %1650 = vst.msk [vmem:[#allocation3 + $0xcc] sm:$0xf] %vm1632_vm15, %v1571_v15  ;;  %v1030_v48 = vld [vmem:[#allocation2 + $0xc0] sm:$0xf]  ;;  %v2317_v49 = vshll.u32 %v2265_v40, 16 }
 0x130   : > { %1926 = vrot.lane.b32.xlu0 %v1854_v0, %s7012_s5  ;;  %v2010_v0 = vld [vmem:[#allocation2 + $0x28] sm:$0xf] }
 0x131   : > { %1906 = vrot.lane.b32.xlu2 %v1819_v14, %s7012_s5 }
 0x136   : > { %v1579_v23 = vpop.permute.xlu0 %1578  ;;  %1922 = vrot.lane.b32.xlu1 %v1847_v62, %s7012_s5  ;;  %v2016_v62 = vld [vmem:[#allocation2 + $0x4c] sm:$0xf] }
 0x137   : > { %1654 = vst.msk [vmem:[#allocation3 + $0xfc] sm:$0xf] %vm1632_vm15, %v1579_v23  ;;  %v1575_v59 = vpop.permute.xlu1 %1574 }
 0x138   : > { %1652 = vst.msk [vmem:[#allocation3 + $0xe4] sm:$0xf] %vm1632_vm15, %v1575_v59  ;;  %1932 = vrot.lane.b32.xlu0 %v1865_v45, %s7012_s5 }
 0x139   : > { %1912 = vrot.lane.b32.xlu2 %v1830_v38, %s7012_s5 }
 0x13e   : > { %v1577_v50 = vpop.permute.xlu2 %1576  ;;  %1928 = vrot.lane.b32.xlu1 %v1858_v43, %s7012_s5  ;;  %v2020_v43 = vld [vmem:[#allocation2 + $0x64] sm:$0xf] }
 0x13f   : > { %1653 = vst.msk [vmem:[#allocation3 + $0xf0] sm:$0xf] %vm1632_vm15, %v1577_v50  ;;  %v1585_v56 = vpop.permute.xlu0 %1584 }
 0x140   : > { %1938 = vrot.lane.b32.xlu0 %v1875_v44, %s7012_s5  ;;  %1657 = vst.msk [vmem:[#allocation3 + $0x120] sm:$0xf] %vm1632_vm15, %v1585_v56  ;;  %v598_v44 = vld [vmem:[%s7225_s23 + $0x78] sm:$0xf] }
 0x141   : > { %1918 = vrot.lane.b32.xlu2 %v1840_v7, %s7012_s5  ;;  %v858_v47 = vshrl.u32 %v598_v44, 16  ;;  %v861_v50 = vshll.u32 %v598_v44, 16  ;;  %v2023_v7 = vld [vmem:[#allocation2 + $0x78] sm:$0xf] }
 0x143   : > { %v860_v57 = vrot.slane %v858_v47, 7 }
 0x145   : > { %v863_v56 = vor.u32 %v861_v50, %v860_v57  ;;  %v2027_v50 = vld [vmem:[#allocation2 + $0x90] sm:$0xf] }
 0x146   : > { %v1581_v51 = vpop.permute.xlu1 %1580  ;;  %1934 = vrot.lane.b32.xlu1 %v1868_v27, %s7012_s5  ;;  %v2028_v27 = vld [vmem:[#allocation2 + $0x94] sm:$0xf] }
 0x147   : > { %1655 = vst.msk [vmem:[#allocation3 + $0x108] sm:$0xf] %vm1632_vm15, %v1581_v51  ;;  %v1031_v60 = vsel %vm7352_vm11, %v863_v56, %v1030_v48  ;;  %v2267_v48 = vld [vmem:[#allocation2 + $0x14] sm:$0x1]  ;;  %vm3885_vm11 = vcmask 1014784  }
 0x148   : > { %2073 = vrot.lane.b32.xlu0 %v2007_v55, %s7013_s6  ;;  %1032 = vst [vmem:[#allocation2 + $0xc0] sm:$0xf] %v1031_v60 }
 0x149   : > { %v1583_v42 = vpop.permute.xlu2 %1582  ;;  %1924 = vrot.lane.b32.xlu2 %v1851_v63, %s7012_s5  ;;  %v2314_v63 = vshrl.u32 %v2265_v40, 16 }
 0x14a   : > { %1656 = vst.msk [vmem:[#allocation3 + $0x114] sm:$0xf] %vm1632_vm15, %v1583_v42  ;;  %v2031_v42 = vld [vmem:[#allocation2 + $0xa8] sm:$0xf] }
 0x14b   : > { %v2316_v18 = vrot.slane %v2314_v63, 4 }
 0x14e   : > { %2069 = vrot.lane.b32.xlu1 %v2005_v24, %s7013_s6  ;;  %v599_v24 = vld [vmem:[%s7225_s23 + $0x7c] sm:$0xf] }
 0x14f   : > { %v1591_v15 = vpop.permute.xlu0 %1590  ;;  %v869_v8 = vshll.u32 %v599_v24, 16 }
 0x150   : > { %2079 = vrot.lane.b32.xlu0 %v2010_v0, %s7013_s6  ;;  %1660 = vst.msk [vmem:[#allocation3 + $0x144] sm:$0xf] %vm1632_vm15, %v1591_v15  ;;  %v1587_v9 = vpop.permute.xlu1 %1586  ;;  %v866_v0 = vshrl.u32 %v599_v24, 16  ;;  %v2319_v15 = vrot.slane %v2317_v49, 5  ;;  %v2333_v49 = vshll.u32 %v2267_v48, 16 }
 0x151   : > { %1658 = vst.msk [vmem:[#allocation3 + $0x12c] sm:$0xf] %vm1632_vm15, %v1587_v9  ;;  %1930 = vrot.lane.b32.xlu2 %v1861_v22, %s7012_s5  ;;  %v2269_v9 = vld [vmem:[#allocation2 + $0x1c] sm:$0xf] }
 0x152   : > { %v8033_v22 = vrot.slane %v866_v0, 7 }
 0x153   : > { %v1589_v11 = vpop.permute.xlu2 %1588 }
 0x154   : > { %1659 = vst.msk [vmem:[#allocation3 + $0x138] sm:$0xf] %vm1632_vm15, %v1589_v11  ;;  %v864_v11 = vrot.slane %v860_v57, 4  ;;  %v6429_v57 = vld [vmem:[#allocation9 + $0x30] sm:$0xff] }
 0x156   : > { %2075 = vrot.lane.b32.xlu1 %v2008_v10, %s7013_s6  ;;  %v2021_v10 = vld [vmem:[#allocation2 + $0x6c] sm:$0xf] }
 0x158   : > { %2085 = vrot.lane.b32.xlu0 %v2013_v58, %s7013_s6 }
 0x159   : > { %1936 = vrot.lane.b32.xlu2 %v1872_v13, %s7012_s5  ;;  %v2029_v13 = vld [vmem:[#allocation2 + $0x9c] sm:$0xf]  ;;  %s6902_s5 = scalar_lea.hbm %s6901_s11, 64 }
 0x15a   : > { %v1597_v14 = vpop.permute.xlu0 %1596  ;;  %p6903_p1 = scmp.ne.s32.totalorder %s6901_s11, %s6902_s5 }
 0x15b   : > { %1663 = vst.msk [vmem:[#allocation3 + $0x168] sm:$0xf] %vm1632_vm15, %v1597_v14  ;;  %v1595_v16 = vpop.permute.xlu2 %1594  ;;  %v2347_v14 = vshll.u32 %v2269_v9, 16 }
 0x15c   : > { %1662 = vst.msk [vmem:[#allocation3 + $0x15c] sm:$0xf] %vm1632_vm15, %v1595_v16  ;;  %v2034_v16 = vld [vmem:[#allocation2 + $0xb8] sm:$0xf]  ;;  %p6904_p4 = pnand %p6903_p1, %p7161_p3 }
 0x15e   : > { %2081 = vrot.lane.b32.xlu1 %v2011_v26, %s7013_s6  ;;  %v2351_v26 = vshrl.u32 %v2269_v9, 16  ;;  %p6905_p8 = pneg %p6904_p4 }
 0x160   : > { %v1593_v19 = vpop.permute.xlu1 %1592  ;;  %2091 = vrot.lane.b32.xlu0 %v2016_v62, %s7013_s6  ;;  %v871_v62 = vor.u32 %v869_v8, %v8033_v22  ;;  %v6427_v8 = vld [vmem:[#allocation9 + $0x20] sm:$0xff] }
 0x161   : > { %1661 = vst.msk [vmem:[#allocation3 + $0x150] sm:$0xf] %vm1632_vm15, %v1593_v19  ;;  %2071 = vrot.lane.b32.xlu2 %v2006_v54, %s7013_s6  ;;  %v2320_v19 = vor.u32 %v2319_v15, %v2316_v18  ;;  %v2323_v54 = vshll.u32 %v2266_v3, 16  ;;  %v2335_v3 = vrot.slane %v2333_v49, 5 }
 0x162   : > { %v1879_v45 = vpop.permute.xlu0 %1878 }
 0x163   : > { %1974 = vst.msk [vmem:[#allocation3 + $0xc] sm:$0xf] %vm1972_vm1, %v1879_v45  ;;  %v1877_v23 = vpop.permute.xlu2 %1876  ;;  %v872_v45 = vsel %vm7289_vm8, %v864_v11, %v871_v62  ;;  %v8064_v11 = vld [vmem:[#allocation2 + $0x28] sm:$0xf]  ;;  %vm4843_vm8 = vcmask 1041408  }
 0x164   : > { %1973 = vst.msk [vmem:[#allocation3] sm:$0xf] %vm1972_vm1, %v1877_v23  ;;  %v2353_v23 = vrot.slane %v2351_v26, 4 }
 0x165   : > { %1033 = vst.msk [vmem:[#allocation2 + $0xc4] sm:$0xf] %vm446_vm0, %v872_v45  ;;  %vm2165_vm0 = vcmask 883712  }
 0x166   : > { %2087 = vrot.lane.b32.xlu1 %v2014_v20, %s7013_s6 }
 0x168   : > { %2097 = vrot.lane.b32.xlu0 %v2019_v35, %s7013_s6  ;;  %v1599_v30 = vpop.permute.xlu1 %1598  ;;  %v8045_v35 = vrot.slane %v2347_v14, 5 }
 0x169   : > { %1664 = vst.msk [vmem:[#allocation3 + $0x174] sm:$0xf] %vm1632_vm15, %v1599_v30  ;;  %2077 = vrot.lane.b32.xlu2 %v2009_v32, %s7013_s6  ;;  %v2321_v32 = vrot.slane %v2320_v19, 4  ;;  %v2283_v19 = vld [vmem:[#allocation2 + $0x54] sm:$0xf]  ;;  %vm3324_vm15 = vcmask 1011392  }
 0x16a   : > { %v1885_v59 = vpop.permute.xlu0 %1884 }
 0x16b   : > { %1977 = vst.msk [vmem:[#allocation3 + $0x30] sm:$0xf] %vm1972_vm1, %v1885_v59  ;;  %v1883_v12 = vpop.permute.xlu2 %1882  ;;  %v2325_v59 = vrot.slane %v2323_v54, 5 }
 0x16c   : > { %1976 = vst.msk [vmem:[#allocation3 + $0x24] sm:$0xf] %vm1972_vm1, %v1883_v12  ;;  %v2024_v12 = vld [vmem:[#allocation2 + $0x7c] sm:$0xf] }
 0x16e   : > { %2093 = vrot.lane.b32.xlu1 %v2017_v25, %s7013_s6  ;;  %v2270_v25 = vld [vmem:[#allocation2 + $0x20] sm:$0x1] }
 0x16f   : > { %v2357_v39 = vshll.u32 %v2270_v25, 16  ;;  %v2268_v25 = vld [vmem:[#allocation2 + $0x18] sm:$0xf] }
 0x170   : > { %2103 = vrot.lane.b32.xlu0 %v2022_v28, %s7013_s6  ;;  %v1881_v46 = vpop.permute.xlu1 %1880  ;;  %v6430_v28 = vld [vmem:[#allocation9 + $0x38] sm:$0xff] }
 0x171   : > { %1975 = vst.msk [vmem:[#allocation3 + $0x18] sm:$0xf] %vm1972_vm1, %v1881_v46  ;;  %2083 = vrot.lane.b32.xlu2 %v2012_v36, %s7013_s6  ;;  %v2274_v46 = vld [vmem:[#allocation2 + $0x30] sm:$0xf]  ;;  %4847 = vmatpush.bf16.msra.mxu0 %v6430_v28  ;;  %v2032_v36 = vld [vmem:[#allocation2 + $0xac] sm:$0xf] }
 0x172   : > { %v1891_v38 = vpop.permute.xlu0 %1890  ;;  %6445 = vmatpush.bf16.msra.mxu3 %v6430_v28  ;;  %v2386_v44 = vshrl.u32 %v2274_v46, 16  ;;  %v2359_v56 = vrot.slane %v2357_v39, 5  ;;  %v2458_v28 = vshrl.u32 %v2283_v19, 16 }
 0x173   : > { %1980 = vst.msk [vmem:[#allocation3 + $0x54] sm:$0xf] %vm1972_vm1, %v1891_v38  ;;  %v1889_v33 = vpop.permute.xlu2 %1888  ;;  %v2354_v38 = vor.u32 %v2353_v23, %v8045_v35 }
 0x174   : > { %1979 = vst.msk [vmem:[#allocation3 + $0x48] sm:$0xf] %vm1972_vm1, %v1889_v33  ;;  %v2329_v33 = vrot.slane %v2327_v34, 4 }
 0x175   : > { %4848 = vmatpush.bf16.msra.mxu0 %v6429_v57 }
 0x176   : > { %2099 = vrot.lane.b32.xlu1 %v2020_v43, %s7013_s6  ;;  %v2326_v43 = vsel %vm7316_vm10, %v2321_v32, %v2325_v59  ;;  %6446 = vmatpush.bf16.msra.mxu3 %v6429_v57  ;;  %v2330_v63 = vor.u32 %v2329_v33, %v2325_v59  ;;  %v6426_v32 = vld [vmem:[#allocation9 + $0x18] sm:$0xff]  ;;  %v6425_v33 = vld [vmem:[#allocation9 + $0x10] sm:$0xff]  ;;  %v2460_v57 = vrot.slane %v2458_v28, 4 }
 0x177   : > { %v2273_v28 = vld [vmem:[#allocation2 + $0x2c] sm:$0x1] }
 0x178   : > { %2109 = vrot.lane.b32.xlu0 %v2025_v29, %s7013_s6  ;;  %v1887_v4 = vpop.permute.xlu1 %1886  ;;  %v2389_v29 = vshll.u32 %v2274_v46, 16 }
 0x179   : > { %1978 = vst.msk [vmem:[#allocation3 + $0x3c] sm:$0xf] %vm1972_vm1, %v1887_v4  ;;  %2089 = vrot.lane.b32.xlu2 %v2015_v53, %s7013_s6  ;;  %v2355_v4 = vrot.slane %v2354_v38, 4  ;;  %v2271_v53 = vld [vmem:[#allocation2 + $0x24] sm:$0xf] }
 0x17a   : > { %v1897_v31 = vpop.permute.xlu0 %1896  ;;  %v2391_v60 = vrot.slane %v2389_v29, 5  ;;  %v2365_v40 = vshll.u32 %v2271_v53, 16  ;;  %v2338_v29 = vshrl.u32 %v2268_v25, 16 }
 0x17b   : > { %1983 = vst.msk [vmem:[#allocation3 + $0x78] sm:$0xf] %vm1972_vm1, %v1897_v31  ;;  %v1895_v55 = vpop.permute.xlu2 %1894 }
 0x17c   : > { %1982 = vst.msk [vmem:[#allocation3 + $0x6c] sm:$0xf] %vm1972_vm1, %v1895_v55  ;;  %v2367_v9 = vrot.slane %v2365_v40, 5  ;;  %v6424_v40 = vld [vmem:[#allocation9 + $0x8] sm:$0xff] }
 0x17e   : > { %2105 = vrot.lane.b32.xlu1 %v2023_v7, %s7013_s6  ;;  %v2388_v7 = vrot.slane %v2386_v44, 4 }
 0x180   : > { %2115 = vrot.lane.b32.xlu0 %v2028_v27, %s7013_s6  ;;  %v1893_v51 = vpop.permute.xlu1 %1892  ;;  %v6428_v27 = vld [vmem:[#allocation9 + $0x28] sm:$0xff]  ;;  %v2392_v24 = vor.u32 %v2391_v60, %v2388_v7 }
 0x181   : > { %1981 = vst.msk [vmem:[#allocation3 + $0x60] sm:$0xf] %vm1972_vm1, %v1893_v51  ;;  %2095 = vrot.lane.b32.xlu2 %v2018_v17, %s7013_s6  ;;  %v2275_v51 = vld [vmem:[#allocation2 + $0x34] sm:$0xf]  ;;  %v2278_v17 = vld [vmem:[#allocation2 + $0x40] sm:$0xf]  ;;  %4849 = vmatpush.bf16.msra.mxu0 %v6428_v27 }
 0x182   : > { %v1903_v61 = vpop.permute.xlu0 %1902  ;;  %v2395_v0 = vshll.u32 %v2275_v51, 16  ;;  %6447 = vmatpush.bf16.msra.mxu3 %v6428_v27  ;;  %v2393_v14 = vrot.slane %v2392_v24, 4  ;;  %v2399_v45 = vshrl.u32 %v2275_v51, 16  ;;  %v2287_v51 = vld [vmem:[#allocation2 + $0x64] sm:$0xf] }
 0x183   : > { %1986 = vst.msk [vmem:[#allocation3 + $0x9c] sm:$0xf] %vm1972_vm1, %v1903_v61  ;;  %v1901_v6 = vpop.permute.xlu2 %1900  ;;  %v2362_v61 = vshrl.u32 %v2271_v53, 16 }
 0x184   : > { %1985 = vst.msk [vmem:[#allocation3 + $0x90] sm:$0xf] %vm1972_vm1, %v1901_v6  ;;  %v2419_v6 = vshll.u32 %v2278_v17, 16  ;;  %v8066_v26 = vrot.slane %v2395_v0, 5  ;;  %v2401_v38 = vrot.slane %v2399_v45, 4 }
 0x185   : > { %v2364_v15 = vrot.slane %v2362_v61, 4  ;;  %4850 = vmatpush.bf16.msra.mxu0 %v6427_v8 }
 0x186   : > { %2111 = vrot.lane.b32.xlu1 %v2026_v41, %s7013_s6  ;;  %v2035_v41 = vld [vmem:[#allocation2 + $0xc0] sm:$0xf]  ;;  %v8068_v62 = vrot.slane %v2419_v6, 5  ;;  %6448 = vmatpush.bf16.msra.mxu3 %v6427_v8  ;;  %v2402_v27 = vor.u32 %v2401_v38, %v8066_v26  ;;  %v8094_v6 = vld [vmem:[#allocation2 + $0x4c] sm:$0xf] }
 0x187   : > { %v2368_v23 = vor.u32 %v2367_v9, %v2364_v15 }
 0x188   : > { %2121 = vrot.lane.b32.xlu0 %v2031_v42, %s7013_s6  ;;  %v1899_v37 = vpop.permute.xlu1 %1898  ;;  %v2360_v42 = vsel %vm7316_vm10, %v2355_v4, %v2359_v56  ;;  %v2280_v4 = vld [vmem:[#allocation2 + $0x48] sm:$0xf]  ;;  %v2033_v56 = vld [vmem:[#allocation2 + $0xb4] sm:$0xf]  ;;  %v2403_v15 = vrot.slane %v2402_v27, 4 }
 0x189   : > { %1984 = vst.msk [vmem:[#allocation3 + $0x84] sm:$0xf] %vm1972_vm1, %v1899_v37  ;;  %2101 = vrot.lane.b32.xlu2 %v2021_v10, %s7013_s6  ;;  %v2423_v37 = vshrl.u32 %v2278_v17, 16  ;;  %v2030_v10 = vld [vmem:[#allocation2 + $0xa0] sm:$0xf]  ;;  %4851 = vmatpush.bf16.msra.mxu0 %v6426_v32  ;;  %v2434_v17 = vshrl.u32 %v2280_v4, 16 }
 0x18a   : > { %v1909_v58 = vpop.permute.xlu0 %1908  ;;  %6449 = vmatpush.bf16.msra.mxu3 %v6426_v32  ;;  %v2437_v61 = vshll.u32 %v2280_v4, 16  ;;  %v2277_v32 = vld [vmem:[#allocation2 + $0x3c] sm:$0xf]  ;;  %v2381_v4 = vshll.u32 %v2273_v28, 16  ;;  %v2289_v27 = vld [vmem:[#allocation2 + $0x6c] sm:$0xf] }
 0x18b   : > { %1989 = vst.msk [vmem:[#allocation3 + $0xc0] sm:$0xf] %vm1972_vm1, %v1909_v58  ;;  %v1907_v20 = vpop.permute.xlu2 %1906  ;;  %v2331_v58 = vrot.slane %v2330_v63, 4 }
 0x18c   : > { %1988 = vst.msk [vmem:[#allocation3 + $0xb4] sm:$0xf] %vm1972_vm1, %v1907_v20  ;;  %v2279_v20 = vld [vmem:[#allocation2 + $0x44] sm:$0x1] }
 0x18d   : > { %v2336_v59 = vsel %vm7316_vm10, %v2331_v58, %v2335_v3  ;;  %v2429_v34 = vshll.u32 %v2279_v20, 16  ;;  %4852 = vmatpush.bf16.msra.mxu0 %v6425_v33  ;;  %v2436_v58 = vrot.slane %v2434_v17, 4  ;;  %v2439_v3 = vrot.slane %v2437_v61, 5  ;;  %v8123_v61 = vld [vmem:[#allocation2 + $0x7c] sm:$0xf] }
 0x18e   : > { %2117 = vrot.lane.b32.xlu1 %v2029_v13, %s7013_s6  ;;  %6450 = vmatpush.bf16.msra.mxu3 %v6425_v33 }
 0x18f   : > { %v2431_v48 = vrot.slane %v2429_v34, 5 }
 0x190   : > { %2127 = vrot.lane.b32.xlu0 %v2034_v16, %s7013_s6  ;;  %v1905_v30 = vpop.permute.xlu1 %1904  ;;  %v2425_v16 = vrot.slane %v2423_v37, 4  ;;  %v2491_v37 = vshll.u32 %v2287_v51, 16 }
 0x191   : > { %1987 = vst.msk [vmem:[#allocation3 + $0xa8] sm:$0xf] %vm1972_vm1, %v1905_v30  ;;  %2107 = vrot.lane.b32.xlu2 %v2024_v12, %s7013_s6  ;;  %v2371_v30 = vshll.u32 %v8064_v11, 16  ;;  %v2461_v12 = vshll.u32 %v2283_v19, 16  ;;  %4853 = vmatpush.bf16.msra.mxu0 %v6424_v40  ;;  %v2443_v19 = vshll.u32 %v8094_v6, 16 }
 0x192   : > { %v1915_v21 = vpop.permute.xlu0 %1914  ;;  %v2426_v46 = vor.u32 %v2425_v16, %v8068_v62  ;;  %6451 = vmatpush.bf16.msra.mxu3 %v6424_v40 }
 0x193   : > { %1992 = vst.msk [vmem:[#allocation3 + $0xe4] sm:$0xf] %vm1972_vm1, %v1915_v21  ;;  %v1913_v47 = vpop.permute.xlu2 %1912  ;;  %v2398_v21 = vsel %vm7316_vm10, %v2393_v14, %v8066_v26  ;;  %v8081_v44 = vrot.slane %v2371_v30, 5  ;;  %v2036_v14 = vld [vmem:[#allocation2 + $0xc4] sm:$0xf] }
 0x194   : > { %1991 = vst.msk [vmem:[#allocation3 + $0xd8] sm:$0xf] %vm1972_vm1, %v1913_v47  ;;  %v2341_v47 = vshll.u32 %v2268_v25, 16 }
 0x196   : > { %2123 = vrot.lane.b32.xlu1 %v2032_v36, %s7013_s6  ;;  %v2276_v36 = vld [vmem:[#allocation2 + $0x38] sm:$0x1]  ;;  %v2343_v63 = vrot.slane %v2341_v47, 5 }
 0x197   : > { %v2405_v7 = vshll.u32 %v2276_v36, 16 }
 0x198   : > { %2697 = vrot.lane.b32.xlu0 %v2326_v43, %s7014_s25  ;;  %v1911_v31 = vpop.permute.xlu1 %1910  ;;  %v2369_v43 = vrot.slane %v2368_v23, 4 }
 0x199   : > { %1990 = vst.msk [vmem:[#allocation3 + $0xcc] sm:$0xf] %vm1972_vm1, %v1911_v31  ;;  %2113 = vrot.lane.b32.xlu2 %v2027_v50, %s7013_s6  ;;  %v2463_v50 = vrot.slane %v2461_v12, 5  ;;  %v2427_v31 = vrot.slane %v2426_v46, 4  ;;  %v2407_v9 = vrot.slane %v2405_v7, 5 }
 0x19a   : > { %v1921_v55 = vpop.permute.xlu0 %1920  ;;  %v2288_v12 = vld [vmem:[#allocation2 + $0x68] sm:$0x1] }
 0x19b   : > { %1995 = vst.msk [vmem:[#allocation3 + $0x108] sm:$0xf] %vm1972_vm1, %v1921_v55  ;;  %v1919_v18 = vpop.permute.xlu2 %1918  ;;  %v2284_v55 = vld [vmem:[#allocation2 + $0x58] sm:$0xf]  ;;  %v2464_v49 = vor.u32 %v2463_v50, %v2460_v57  ;;  %v2432_v24 = vsel %vm7316_vm10, %v2427_v31, %v2431_v48  ;;  %v2501_v33 = vshll.u32 %v2288_v12, 16  ;;  %v8114_v50 = vrot.slane %v2443_v19, 5 }
 0x19c   : > { %1994 = vst.msk [vmem:[#allocation3 + $0xfc] sm:$0xf] %vm1972_vm1, %v1919_v18  ;;  %v2467_v0 = vshll.u32 %v2284_v55, 16  ;;  %v2495_v18 = vshrl.u32 %v2287_v51, 16  ;;  %v2471_v23 = vshrl.u32 %v2284_v55, 16 }
 0x19d   : > { %v2465_v16 = vrot.slane %v2464_v49, 4  ;;  %v2296_v49 = vld [vmem:[#allocation2 + $0x88] sm:$0xf] }
 0x19e   : > { %2129 = vrot.lane.b32.xlu1 %v2035_v41, %s7013_s6  ;;  %v2374_v41 = vsel %vm7316_vm10, %v2369_v43, %v8081_v44  ;;  %v8101_v20 = vrot.slane %v2467_v0, 5  ;;  %v2497_v30 = vrot.slane %v2495_v18, 4  ;;  %v2413_v43 = vshll.u32 %v2277_v32, 16 }
 0x19f   : > { %v2473_v57 = vrot.slane %v2471_v23, 4  ;;  %v2383_v0 = vrot.slane %v2381_v4, 5  ;;  %v2509_v18 = vshll.u32 %v2289_v27, 16  ;;  %v2302_v23 = vld [vmem:[#allocation2 + $0xa0] sm:$0xf] }
 0x1a0   : > { %2703 = vrot.lane.b32.xlu0 %v2360_v42, %s7014_s25  ;;  %v1917_v13 = vpop.permute.xlu1 %1916  ;;  %v2340_v42 = vrot.slane %v2338_v29, 4  ;;  %v2470_v29 = vsel %vm7316_vm10, %v2465_v16, %v8101_v20  ;;  %v2415_v17 = vrot.slane %v2413_v43, 5  ;;  %v2297_v43 = vld [vmem:[#allocation2 + $0x8c] sm:$0x1] }
 0x1a1   : > { %1993 = vst.msk [vmem:[#allocation3 + $0xf0] sm:$0xf] %vm1972_vm1, %v1917_v13  ;;  %2119 = vrot.lane.b32.xlu2 %v2030_v10, %s7013_s6  ;;  %v2375_v10 = vshrl.u32 %v8064_v11, 16  ;;  %v6423_v13 = vld [vmem:[#allocation9] sm:$0xff]  ;;  %v8103_v11 = vrot.slane %v2491_v37, 5 }
 0x1a2   : > { %v1927_v54 = vpop.permute.xlu0 %1926  ;;  %v2344_v26 = vor.u32 %v2343_v63, %v2340_v42  ;;  %4854 = vmatpush.bf16.msra.mxu0 %v6423_v13  ;;  %6452 = vmatpush.bf16.msra.mxu3 %v6423_v13  ;;  %v2503_v42 = vrot.slane %v2501_v33, 5  ;;  %v2563_v13 = vshll.u32 %v2296_v49, 16 }
 0x1a3   : > { %1998 = vst.msk [vmem:[#allocation3 + $0x12c] sm:$0xf] %vm1972_vm1, %v1927_v54  ;;  %v1925_v39 = vpop.permute.xlu2 %1924  ;;  %v2292_v54 = vld [vmem:[#allocation2 + $0x78] sm:$0xf]  ;;  %v2377_v46 = vrot.slane %v2375_v10, 4  ;;  %v2498_v47 = vor.u32 %v2497_v30, %v8103_v11  ;;  %v2539_v10 = vshll.u32 %v8123_v61, 16 }
 0x1a4   : > { %1997 = vst.msk [vmem:[#allocation3 + $0x120] sm:$0xf] %vm1972_vm1, %v1925_v39  ;;  %v2530_v34 = vshrl.u32 %v2292_v54, 16  ;;  %v2533_v36 = vshll.u32 %v2292_v54, 16  ;;  %v2345_v38 = vrot.slane %v2344_v26, 4  ;;  %v2410_v39 = vshrl.u32 %v2277_v32, 16 }
 0x1a5   : > { %v2378_v48 = vor.u32 %v2377_v46, %v8081_v44  ;;  %v2474_v44 = vor.u32 %v2473_v57, %v8101_v20  ;;  %v2511_v20 = vrot.slane %v2509_v18, 5 }
 0x1a6   : > { %2699 = vrot.lane.b32.xlu1 %v2336_v59, %s7014_s25  ;;  %v2408_v59 = vsel %vm7316_vm10, %v2403_v15, %v2407_v9  ;;  %v2532_v7 = vrot.slane %v2530_v34, 4  ;;  %v2350_v55 = vsel %vm7316_vm10, %v2345_v38, %v8045_v35  ;;  %v2412_v51 = vrot.slane %v2410_v39, 4 }
 0x1a7   : > { %v2506_v35 = vshrl.u32 %v2289_v27, 16  ;;  %v2379_v15 = vrot.slane %v2378_v48, 4  ;;  %v2475_v19 = vrot.slane %v2474_v44, 4 }
 0x1a8   : > { %2709 = vrot.lane.b32.xlu0 %v2398_v21, %s7014_s25  ;;  %v1923_v53 = vpop.permute.xlu1 %1922  ;;  %v2440_v21 = vor.u32 %v2439_v3, %v2436_v58  ;;  %v2416_v3 = vor.u32 %v2415_v17, %v2412_v51  ;;  %v2573_v51 = vshll.u32 %v2297_v43, 16 }
 0x1a9   : > { %1996 = vst.msk [vmem:[#allocation3 + $0x114] sm:$0xf] %vm1972_vm1, %v1923_v53  ;;  %2125 = vrot.lane.b32.xlu2 %v2033_v56, %s7013_s6  ;;  %v2285_v56 = vld [vmem:[#allocation2 + $0x5c] sm:$0x1]  ;;  %v2384_v34 = vsel %vm7316_vm10, %v2379_v15, %v2383_v0 }
 0x1aa   : > { %v1933_v60 = vpop.permute.xlu0 %1932  ;;  %v2441_v31 = vrot.slane %v2440_v21, 4  ;;  %v2477_v63 = vshll.u32 %v2285_v56, 16  ;;  %v8150_v12 = vrot.slane %v2416_v3, 4  ;;  %v8152_v21 = vrot.slane %v2563_v13, 5 }
 0x1ab   : > { %2001 = vst.msk [vmem:[#allocation3 + $0x150] sm:$0xf] %vm1972_vm1, %v1933_v60  ;;  %v1931_v8 = vpop.permute.xlu2 %1930  ;;  %v2535_v60 = vrot.slane %v2533_v36, 5 }
 0x1ac   : > { %2000 = vst.msk [vmem:[#allocation3 + $0x144] sm:$0xf] %vm1972_vm1, %v1931_v8  ;;  %v2446_v58 = vsel %vm7316_vm10, %v2441_v31, %v8114_v50  ;;  %v2479_v54 = vrot.slane %v2477_v63, 5  ;;  %v2422_v0 = vsel %vm7316_vm10, %v8150_v12, %v8068_v62 }
 0x1ad   : > { %v2536_v8 = vor.u32 %v2535_v60, %v2532_v7  ;;  %v2543_v7 = vshrl.u32 %v8123_v61, 16  ;;  %v2615_v60 = vshrl.u32 %v2302_v23, 16 }
 0x1ae   : > { %2705 = vrot.lane.b32.xlu1 %v2374_v41, %s7014_s25  ;;  %v2499_v41 = vrot.slane %v2498_v47, 4  ;;  %v2480_v38 = vsel %vm7316_vm10, %v2475_v19, %v2479_v54  ;;  %v2611_v47 = vshll.u32 %v2302_v23, 16 }
 0x1af   : > { %v2537_v32 = vrot.slane %v2536_v8, 4  ;;  %v8176_v63 = vrot.slane %v2615_v60, 4  ;;  %v2575_v8 = vrot.slane %v2573_v51, 5 }
 0x1b0   : > { %2715 = vrot.lane.b32.xlu0 %v2432_v24, %s7014_s25  ;;  %v1929_v45 = vpop.permute.xlu1 %1928  ;;  %v2447_v24 = vshrl.u32 %v8094_v6, 16  ;;  %v2504_v16 = vsel %vm7316_vm10, %v2499_v41, %v2503_v42  ;;  %v2286_v41 = vld [vmem:[#allocation2 + $0x60] sm:$0xf]  ;;  %v8174_v44 = vrot.slane %v2611_v47, 5 }
 0x1b1   : > { %1999 = vst.msk [vmem:[#allocation3 + $0x138] sm:$0xf] %vm1972_vm1, %v1929_v45  ;;  %2131 = vrot.lane.b32.xlu2 %v2036_v14, %s7013_s6  ;;  %v2567_v14 = vshrl.u32 %v2296_v49, 16  ;;  %v2508_v45 = vrot.slane %v2506_v35, 4  ;;  %v2545_v35 = vrot.slane %v2543_v7, 4 }
 0x1b2   : > { %v1939_v25 = vpop.permute.xlu0 %1938  ;;  %v8158_v39 = vrot.slane %v2447_v24, 4  ;;  %v2618_v18 = vor.u32 %v8176_v63, %v8174_v44 }
 0x1b3   : > { %2004 = vst.msk [vmem:[#allocation3 + $0x174] sm:$0xf] %vm1972_vm1, %v1939_v25  ;;  %v1937_v53 = vpop.permute.xlu2 %1936  ;;  %v8147_v25 = vld [vmem:[#allocation2 + $0x70] sm:$0xf]  ;;  %v2569_v46 = vrot.slane %v2567_v14, 4  ;;  %v2512_v56 = vor.u32 %v2511_v20, %v2508_v45 }
 0x1b4   : > { %2003 = vst.msk [vmem:[#allocation3 + $0x168] sm:$0xf] %vm1972_vm1, %v1937_v53  ;;  %v2515_v53 = vshll.u32 %v8147_v25, 16  ;;  %v2450_v13 = vor.u32 %v8158_v39, %v8114_v50  ;;  %v2294_v14 = vld [vmem:[#allocation2 + $0x80] sm:$0x1] }
 0x1b5   : > { %v2513_v61 = vrot.slane %v2512_v56, 4  ;;  %v8209_v56 = vld [vmem:[#allocation2 + $0x94] sm:$0xf] }
 0x1b6   : > { %2711 = vrot.lane.b32.xlu1 %v2408_v59, %s7014_s25  ;;  %v8145_v59 = vrot.slane %v2539_v10, 5  ;;  %v8180_v49 = vrot.slane %v2515_v53, 5  ;;  %v2482_v10 = vshrl.u32 %v2286_v41, 16 }
 0x1b8   : > { %2721 = vrot.lane.b32.xlu0 %v2470_v29, %s7014_s25  ;;  %v1935_v40 = vpop.permute.xlu1 %1934  ;;  %v2301_v29 = vld [vmem:[#allocation2 + $0x9c] sm:$0xf]  ;;  %v2542_v48 = vsel %vm7316_vm10, %v2537_v32, %v8145_v59  ;;  %v2518_v45 = vsel %vm7316_vm10, %v2513_v61, %v8180_v49  ;;  %v2546_v50 = vor.u32 %v2545_v35, %v8145_v59  ;;  %v2484_v39 = vrot.slane %v2482_v10, 4  ;;  %v2295_v10 = vld [vmem:[#allocation2 + $0x84] sm:$0xf] }
 0x1b9   : > { %2002 = vst.msk [vmem:[#allocation3 + $0x15c] sm:$0xf] %vm1972_vm1, %v1935_v40  ;;  %2701 = vrot.lane.b32.xlu2 %v2350_v55, %s7014_s25  ;;  %v2570_v55 = vor.u32 %v2569_v46, %v8152_v21  ;;  %v2602_v17 = vshrl.u32 %v2301_v29, 16  ;;  %v2605_v42 = vshll.u32 %v2301_v29, 16  ;;  %vm8574_vm1 = vmor %vm3951_vm13, %vm3950_vm12 }
 0x1ba   : > { %v2074_v37 = vpop.permute.xlu0 %2073  ;;  %v2547_v7 = vrot.slane %v2546_v50, 4 }
 0x1bb   : > { %v2135_v9 = vrot.slane %v2074_v37, 4  ;;  %v2072_v30 = vpop.permute.xlu2 %2071  ;;  %v2607_v62 = vrot.slane %v2605_v42, 5 }
 0x1bc   : > { %v2134_v28 = vrot.slane %v2072_v30, 4 }
 0x1bd   : > { %v2168_v26 = vsel %vm2165_vm0, %v2135_v9, %v2074_v37  ;;  %v2282_v37 = vld [vmem:[#allocation2 + $0x50] sm:$0x1]  ;;  %v2571_v9 = vrot.slane %v2570_v55, 4  ;;  %v2519_v55 = vshrl.u32 %v8147_v25, 16 }
 0x1be   : > { %2235 = vst.msk [vmem:[#allocation3 + $0x18] sm:$0xff] %vm8135_vm5, %v2168_v26  ;;  %2717 = vrot.lane.b32.xlu1 %v2446_v58, %s7014_s25  ;;  %v2167_v33 = vsel %vm2165_vm0, %v2134_v28, %v2072_v30  ;;  %v2298_v58 = vld [vmem:[#allocation2 + $0x90] sm:$0xf]  ;;  %v2485_v26 = vshll.u32 %v2286_v41, 16  ;;  %v2453_v23 = vshll.u32 %v2282_v37, 16 }
 0x1bf   : > { %2234 = vst.msk [vmem:[#allocation3 + $0xc] sm:$0xff] %vm8135_vm5, %v2167_v33  ;;  %v2578_v28 = vshrl.u32 %v2298_v58, 16  ;;  %v2581_v12 = vshll.u32 %v2298_v58, 16  ;;  %v2451_v33 = vrot.slane %v2450_v13, 4 }
 0x1c0   : > { %2727 = vrot.lane.b32.xlu0 %v2504_v16, %s7014_s25  ;;  %v2070_v36 = vpop.permute.xlu1 %2069  ;;  %v2604_v16 = vrot.slane %v2602_v17, 4  ;;  %v2487_v47 = vrot.slane %v2485_v26, 5  ;;  %v8229_v26 = vld [vmem:[#allocation2 + $0x10] sm:$0xf] }
 0x1c1   : > { %v2133_v57 = vrot.slane %v2070_v36, 4  ;;  %2707 = vrot.lane.b32.xlu2 %v2384_v34, %s7014_s25  ;;  %v2580_v53 = vrot.slane %v2578_v28, 4  ;;  %v2924_v28 = vrot.slane %v8229_v26, 5  ;;  %v8297_v26 = vld [vmem:[#allocation2 + $0x1c] sm:$0xf] }
 0x1c2   : > { %v2080_v4 = vpop.permute.xlu0 %2079  ;;  %v2608_v59 = vor.u32 %v2607_v62, %v2604_v16  ;;  %v2488_v17 = vor.u32 %v2487_v47, %v2484_v39  ;;  %v2521_v62 = vrot.slane %v2519_v55, 4 }
 0x1c3   : > { %v2138_v31 = vrot.slane %v2080_v4, 4  ;;  %v2166_v27 = vsel %vm2165_vm0, %v2133_v57, %v2070_v36  ;;  %v2078_v24 = vpop.permute.xlu2 %2077  ;;  %v2576_v36 = vsel %vm7316_vm10, %v2571_v9, %v2575_v8  ;;  %v2455_v57 = vrot.slane %v2453_v23, 5 }
 0x1c4   : > { %2233 = vst.msk [vmem:[#allocation3] sm:$0xff] %vm8135_vm5, %v2166_v27  ;;  %v2137_v15 = vrot.slane %v2078_v24, 4  ;;  %v3357_v27 = vld [vmem:[#allocation2 + $0x18] sm:$0xf]  ;;  %v2489_v58 = vrot.slane %v2488_v17, 4  ;;  %v2554_v23 = vshrl.u32 %v2295_v10, 16 }
 0x1c5   : > { %v2171_v40 = vsel %vm2165_vm0, %v2138_v31, %v2080_v4  ;;  %v2583_v31 = vrot.slane %v2581_v12, 5  ;;  %v2456_v42 = vsel %vm7316_vm10, %v2451_v33, %v2455_v57  ;;  %v3409_v8 = vshll.u32 %v3357_v27, 16  ;;  %v8238_v12 = vld [vmem:[#allocation2 + $0x1c] sm:$0xf]  ;;  %v3360_v33 = vld [vmem:[#allocation2 + $0x24] sm:$0xf] }
 0x1c6   : > { %2238 = vst.msk [vmem:[#allocation3 + $0x3c] sm:$0xff] %vm8135_vm5, %v2171_v40  ;;  %2723 = vrot.lane.b32.xlu1 %v2480_v38, %s7014_s25  ;;  %v2170_v19 = vsel %vm2165_vm0, %v2137_v15, %v2078_v24  ;;  %v6376_v20 = vld [vmem:[#allocation3 + $0x8] sm:$0xf0]  ;;  %v2549_v38 = vshll.u32 %v2294_v14, 16  ;;  %v2609_v40 = vrot.slane %v2608_v59, 4  ;;  %v3406_v15 = vshrl.u32 %v3357_v27, 16 }
 0x1c7   : > { %2237 = vst.msk [vmem:[#allocation3 + $0x30] sm:$0xff] %vm8135_vm5, %v2170_v19  ;;  %v2584_v35 = vor.u32 %v2583_v31, %v2580_v53  ;;  %v2826_v14 = vld [vmem:[#allocation2 + $0xc] sm:$0xe]  ;;  %v2556_v53 = vrot.slane %v2554_v23, 4  ;;  %v3433_v17 = vshll.u32 %v3360_v33, 16 }
 0x1c8   : > { %2733 = vrot.lane.b32.xlu0 %v2542_v48, %s7014_s25  ;;  %v2076_v3 = vpop.permute.xlu1 %2075  ;;  %v2551_v60 = vrot.slane %v2549_v38, 5  ;;  %v2614_v13 = vsel %vm7316_vm10, %v2609_v40, %v8174_v44  ;;  %v6021_v50 = vrot.slane %v2826_v14, 9 }
 0x1c9   : > { %v2136_v54 = vrot.slane %v2076_v3, 4  ;;  %2713 = vrot.lane.b32.xlu2 %v2422_v0, %s7014_s25  ;;  %v2587_v0 = vshll.u32 %v8209_v56, 16 }
 0x1ca   : > { %v2086_v30 = vpop.permute.xlu0 %2085  ;;  %v2552_v9 = vsel %vm7316_vm10, %v2547_v7, %v2551_v60 }
 0x1cb   : > { %v2141_v32 = vrot.slane %v2086_v30, 4  ;;  %v2169_v46 = vsel %vm2165_vm0, %v2136_v54, %v2076_v3  ;;  %v6055_v34 = vld [vmem:[#allocation3] sm:$0xf]  ;;  %v2084_v4 = vpop.permute.xlu2 %2083  ;;  %v8233_v16 = vrot.slane %v2587_v0, 5  ;;  %v2585_v54 = vrot.slane %v2584_v35, 4 }
 0x1cc   : > { %2236 = vst.msk [vmem:[#allocation3 + $0x24] sm:$0xff] %vm8135_vm5, %v2169_v46  ;;  %v6056_v43 = vor.u32 %v6376_v20, %v6055_v34  ;;  %v2140_v48 = vrot.slane %v2084_v4, 4  ;;  %v3408_v20 = vrot.slane %v3406_v15, 4  ;;  %v3411_v46 = vrot.slane %v3409_v8, 5 }
 0x1cd   : > { %v2174_v29 = vsel %vm2165_vm0, %v2141_v32, %v2086_v30  ;;  %v2557_v30 = vshll.u32 %v2295_v10, 16  ;;  %v2494_v34 = vsel %vm7316_vm10, %v2489_v58, %v8103_v11  ;;  %v2590_v57 = vsel %vm7316_vm10, %v2585_v54, %v8233_v16 }
 0x1ce   : > { %2241 = vst.msk [vmem:[#allocation3 + $0x60] sm:$0xff] %vm8135_vm5, %v2174_v29  ;;  %2729 = vrot.lane.b32.xlu1 %v2518_v45, %s7014_s25  ;;  %4855 = vmatmul.bf16.vlgmr.msra.gmra.mxu0 %v6056_v43  ;;  %v2173_v41 = vsel %vm2165_vm0, %v2140_v48, %v2084_v4  ;;  %v2291_v45 = vld [vmem:[#allocation2 + $0x74] sm:$0x1]  ;;  %v2522_v29 = vor.u32 %v2521_v62, %v8180_v49  ;;  %v3415_v11 = vshll.u32 %v8238_v12, 16  ;;  %v6067_v48 = vld [vmem:[#allocation3 + $0x18] sm:$0xf] }
 0x1cf   : > { %2240 = vst.msk [vmem:[#allocation3 + $0x54] sm:$0xff] %vm8135_vm5, %v2173_v41  ;;  %v2525_v47 = vshll.u32 %v2291_v45, 16  ;;  %v2925_v49 = vsel %vm7730_vm14, %v6021_v50, %v2924_v28  ;;  %v3412_v7 = vor.u32 %v3411_v46, %v3408_v20  ;;  %v2559_v60 = vrot.slane %v2557_v30, 5  ;;  %v3165_v45 = vld [vmem:[#allocation2 + $0x1c] sm:$0xf] }
 0x1d0   : > { %2739 = vrot.lane.b32.xlu0 %v2576_v36, %s7014_s25  ;;  %v2082_v51 = vpop.permute.xlu1 %2081  ;;  %v2523_v40 = vrot.slane %v2522_v29, 4  ;;  %v8264_v0 = vrot.slane %v3415_v11, 5  ;;  %v2591_v8 = vshrl.u32 %v8209_v56, 16  ;;  %v2828_v20 = vld [vmem:[#allocation2 + $0x14] sm:$0x1]  ;;  %v3419_v46 = vshrl.u32 %v8238_v12, 16 }
 0x1d1   : > { %v2139_v61 = vrot.slane %v2082_v51, 4  ;;  %2719 = vrot.lane.b32.xlu2 %v2456_v42, %s7014_s25  ;;  %v2527_v41 = vrot.slane %v2525_v47, 5  ;;  %v6382_v47 = vld [vmem:[#allocation3 + $0x38] sm:$0xf0] }
 0x1d2   : > { %v2092_v24 = vpop.permute.xlu0 %2091 }
 0x1d3   : > { %v2144_v37 = vrot.slane %v2092_v24, 4  ;;  %v2172_v25 = vsel %vm2165_vm0, %v2139_v61, %v2082_v51  ;;  %v2090_v19 = vpop.permute.xlu2 %2089  ;;  %v6379_v43 = vld [vmem:[#allocation3 + $0x20] sm:$0xf0]  ;;  %v3430_v51 = vshrl.u32 %v3360_v33, 16  ;;  %v2528_v10 = vsel %vm7316_vm10, %v2523_v40, %v2527_v41 }
 0x1d4   : > { %2239 = vst.msk [vmem:[#allocation3 + $0x48] sm:$0xff] %vm8135_vm5, %v2172_v25  ;;  %v2143_v32 = vrot.slane %v2090_v19, 4  ;;  %v6068_v27 = vor.u32 %v6379_v43, %v6067_v48  ;;  %v3435_v25 = vrot.slane %v3433_v17, 5  ;;  %v2931_v17 = vrot.slane %v8297_v26, 5 }
 0x1d5   : > { %v2177_v3 = vsel %vm2165_vm0, %v2144_v37, %v2092_v24  ;;  %v3413_v24 = vrot.slane %v3412_v7, 4  ;;  %v2560_v37 = vor.u32 %v2559_v60, %v2556_v53  ;;  %v3432_v15 = vrot.slane %v3430_v51, 4  ;;  %v8312_v51 = vld [vmem:[#allocation2 + $0x1c] sm:$0xf] }
 0x1d6   : > { %2244 = vst.msk [vmem:[#allocation3 + $0x84] sm:$0xff] %vm8135_vm5, %v2177_v3  ;;  %2735 = vrot.lane.b32.xlu1 %v2552_v9, %s7014_s25  ;;  %v2176_v38 = vsel %vm2165_vm0, %v2143_v32, %v2090_v19  ;;  %v2593_v32 = vrot.slane %v2591_v8, 4 }
 0x1d7   : > { %2243 = vst.msk [vmem:[#allocation3 + $0x78] sm:$0xff] %vm8135_vm5, %v2176_v38  ;;  %v3418_v19 = vsel %vm7316_vm10, %v3413_v24, %v8264_v0  ;;  %v2561_v54 = vrot.slane %v2560_v37, 4  ;;  %v3436_v23 = vor.u32 %v3435_v25, %v3432_v15  ;;  %v2926_v38 = vrot.slane %v2924_v28, 4  ;;  %v3359_v24 = vld [vmem:[#allocation2 + $0x20] sm:$0x1] }
 0x1d8   : > { %2745 = vrot.lane.b32.xlu0 %v2614_v13, %s7014_s25  ;;  %v2088_v36 = vpop.permute.xlu1 %2087  ;;  %v8270_v13 = vld [vmem:[#allocation2 + $0x28] sm:$0xf]  ;;  %v2594_v11 = vor.u32 %v2593_v32, %v8233_v16  ;;  %v4083_v25 = vrot.slane %v8312_v51, 5 }
 0x1d9   : > { %v2142_v39 = vrot.slane %v2088_v36, 4  ;;  %2725 = vrot.lane.b32.xlu2 %v2494_v34, %s7014_s25  ;;  %v3439_v30 = vshll.u32 %v8270_v13, 16  ;;  %v2300_v34 = vld [vmem:[#allocation2 + $0x98] sm:$0x1]  ;;  %v2566_v43 = vsel %vm7316_vm10, %v2561_v54, %v8152_v21  ;;  %v3421_v21 = vrot.slane %v3419_v46, 4 }
 0x1da   : > { %v2098_v59 = vpop.permute.xlu0 %2097  ;;  %v2597_v53 = vshll.u32 %v2300_v34, 16  ;;  %v3443_v7 = vshrl.u32 %v8270_v13, 16  ;;  %v2595_v40 = vrot.slane %v2594_v11, 4  ;;  %v3364_v54 = vld [vmem:[#allocation2 + $0x34] sm:$0xf] }
 0x1db   : > { %v2147_v4 = vrot.slane %v2098_v59, 4  ;;  %v2175_v31 = vsel %vm2165_vm0, %v2142_v39, %v2088_v36  ;;  %v2096_v42 = vpop.permute.xlu2 %2095  ;;  %v2927_v39 = vrot.slane %v2828_v20, 5  ;;  %v8293_v12 = vrot.slane %v3439_v30, 5 }
 0x1dc   : > { %2242 = vst.msk [vmem:[#allocation3 + $0x6c] sm:$0xff] %vm8135_vm5, %v2175_v31  ;;  %v2146_v61 = vrot.slane %v2096_v42, 4  ;;  %v2599_v41 = vrot.slane %v2597_v53, 5  ;;  %v3422_v37 = vor.u32 %v3421_v21, %v8264_v0  ;;  %v3425_v0 = vshll.u32 %v3359_v24, 16 }
 0x1dd   : > { %v2180_v55 = vsel %vm2165_vm0, %v2147_v4, %v2098_v59  ;;  %v3437_v59 = vrot.slane %v3436_v23, 4  ;;  %v6079_v4 = vld [vmem:[#allocation3 + $0x30] sm:$0xf]  ;;  %v3463_v34 = vshll.u32 %v3364_v54, 16 }
 0x1de   : > { %2247 = vst.msk [vmem:[#allocation3 + $0xa8] sm:$0xff] %vm8135_vm5, %v2180_v55  ;;  %2741 = vrot.lane.b32.xlu1 %v2590_v57, %s7014_s25  ;;  %4860 = vmatmul.bf16.gmra.mxu0 %v6068_v27  ;;  %v2179_v9 = vsel %vm2165_vm0, %v2146_v61, %v2096_v42  ;;  %v6080_v16 = vor.u32 %v6382_v47, %v6079_v4  ;;  %v3985_v55 = vld [vmem:[#allocation2 + $0x18] sm:$0xe]  ;;  %v2831_v42 = vld [vmem:[#allocation2 + $0x20] sm:$0x1] }
 0x1df   : > { %2246 = vst.msk [vmem:[#allocation3 + $0x9c] sm:$0xff] %vm8135_vm5, %v2179_v9  ;;  %v3442_v27 = vsel %vm7316_vm10, %v3437_v59, %v8293_v12  ;;  %v6037_v15 = vrot.slane %v3985_v55, 9  ;;  %v3445_v9 = vrot.slane %v3443_v7, 4  ;;  %v6091_v4 = vld [vmem:[#allocation3 + $0x48] sm:$0xf] }
 0x1e0   : > { %3034 = vrot.lane.b32.xlu0 %v2925_v49, %s7015_s26  ;;  %v2094_v35 = vpop.permute.xlu1 %2093  ;;  %v2928_v49 = vsel %vm7730_vm14, %v2926_v38, %v2927_v39  ;;  %v3427_v38 = vrot.slane %v3425_v0, 5  ;;  %v3988_v39 = vld [vmem:[#allocation2 + $0x24] sm:$0xe]  ;;  %v6115_v6 = vld [vmem:[#allocation3 + $0x78] sm:$0xf] }
 0x1e1   : > { %v2145_v58 = vrot.slane %v2094_v35, 4  ;;  %2731 = vrot.lane.b32.xlu2 %v2528_v10, %s7014_s25  ;;  %v2933_v10 = vrot.slane %v2931_v17, 4  ;;  %v4084_v23 = vsel %vm7730_vm14, %v6037_v15, %v4083_v25  ;;  %v3446_v30 = vor.u32 %v3445_v9, %v8293_v12 }
 0x1e2   : > { %v2104_v3 = vpop.permute.xlu0 %2103  ;;  %v6038_v11 = vrot.slane %v3988_v39, 9 }
 0x1e3   : > { %v2150_v14 = vrot.slane %v2104_v3, 4  ;;  %v2178_v62 = vsel %vm2165_vm0, %v2145_v58, %v2094_v35  ;;  %v2102_v50 = vpop.permute.xlu2 %2101  ;;  %v2934_v58 = vrot.slane %v2831_v42, 5  ;;  %v3447_v59 = vrot.slane %v3446_v30, 4 }
 0x1e4   : > { %2245 = vst.msk [vmem:[#allocation3 + $0x90] sm:$0xff] %vm8135_vm5, %v2178_v62  ;;  %v2149_v36 = vrot.slane %v2102_v50, 4 }
 0x1e5   : > { %v2183_v56 = vsel %vm2165_vm0, %v2150_v14, %v2104_v3  ;;  %v3362_v3 = vld [vmem:[#allocation2 + $0x2c] sm:$0x1]  ;;  %v2600_v14 = vsel %vm7316_vm10, %v2595_v40, %v2599_v41  ;;  %v2935_v46 = vsel %vm7730_vm14, %v2933_v10, %v2934_v58  ;;  %v3164_v58 = vld [vmem:[#allocation2 + $0x18] sm:$0xf] }
 0x1e6   : > { %2250 = vst.msk [vmem:[#allocation3 + $0xcc] sm:$0xff] %vm8135_vm5, %v2183_v56  ;;  %3789 = vrot.lane.b32.xlu1 %v3418_v19, %s7016_s4  ;;  %v2182_v33 = vsel %vm2165_vm0, %v2149_v36, %v2102_v50  ;;  %v3423_v56 = vrot.slane %v3422_v37, 4  ;;  %v3449_v32 = vshll.u32 %v3362_v3, 16  ;;  %v3467_v36 = vshrl.u32 %v3364_v54, 16 }
 0x1e7   : > { %2249 = vst.msk [vmem:[#allocation3 + $0xc0] sm:$0xff] %vm8135_vm5, %v2182_v33  ;;  %v6385_v33 = vld [vmem:[#allocation3 + $0x50] sm:$0xf0] }
 0x1e8   : > { %3230 = vrot.lane.b32.xlu0 %v3165_v45, %s7017_s10  ;;  %v2100_v29 = vpop.permute.xlu1 %2099  ;;  %v3451_v12 = vrot.slane %v3449_v32, 5  ;;  %v6092_v40 = vor.u32 %v6385_v33, %v6091_v4 }
 0x1e9   : > { %v2148_v57 = vrot.slane %v2100_v29, 4  ;;  %2737 = vrot.lane.b32.xlu2 %v2566_v43, %s7014_s25  ;;  %v3989_v43 = vld [vmem:[#allocation2 + $0x28] sm:$0xf] }
 0x1ea   : > { %v2110_v31 = vpop.permute.xlu0 %2109  ;;  %v4090_v53 = vrot.slane %v3989_v43, 5  ;;  %v3452_v55 = vsel %vm7316_vm10, %v3447_v59, %v3451_v12  ;;  %v6103_v59 = vld [vmem:[#allocation3 + $0x60] sm:$0xf] }
 0x1eb   : > { %v2153_v28 = vrot.slane %v2110_v31, 4  ;;  %v2181_v48 = vsel %vm2165_vm0, %v2148_v57, %v2100_v29  ;;  %v2108_v61 = vpop.permute.xlu2 %2107 }
 0x1ec   : > { %2248 = vst.msk [vmem:[#allocation3 + $0xb4] sm:$0xff] %vm8135_vm5, %v2181_v48  ;;  %v2152_v35 = vrot.slane %v2108_v61, 4  ;;  %v3428_v48 = vsel %vm7316_vm10, %v3423_v56, %v3427_v38  ;;  %v4091_v42 = vsel %vm7730_vm14, %v6038_v11, %v4090_v53  ;;  %v6388_v38 = vld [vmem:[#allocation3 + $0x68] sm:$0xf0]  ;;  %v3168_v11 = vld [vmem:[#allocation2 + $0x30] sm:$0xf] }
 0x1ed   : > { %v2186_v60 = vsel %vm2165_vm0, %v2153_v28, %v2110_v31  ;;  %v8344_v31 = vrot.slane %v3463_v34, 5  ;;  %v3469_v28 = vrot.slane %v3467_v36, 4  ;;  %v2829_v34 = vld [vmem:[#allocation2 + $0x18] sm:$0xe] }
 0x1ee   : > { %2253 = vst.msk [vmem:[#allocation3 + $0xf0] sm:$0xff] %vm8135_vm5, %v2186_v60  ;;  %3036 = vrot.lane.b32.xlu1 %v2928_v49, %s7015_s26  ;;  %4865 = vmatmul.bf16.gmra.mxu0 %v6080_v16  ;;  %v2185_v13 = vsel %vm2165_vm0, %v2152_v35, %v2108_v61  ;;  %v3365_v16 = vld [vmem:[#allocation2 + $0x38] sm:$0x1]  ;;  %v6022_v12 = vrot.slane %v2829_v34, 9 }
 0x1ef   : > { %2252 = vst.msk [vmem:[#allocation3 + $0xe4] sm:$0xff] %vm8135_vm5, %v2185_v13  ;;  %v3470_v61 = vor.u32 %v3469_v28, %v8344_v31  ;;  %v3473_v24 = vshll.u32 %v3365_v16, 16 }
 0x1f0   : > { %3793 = vrot.lane.b32.xlu0 %v3442_v27, %s7016_s4  ;;  %v2106_v8 = vpop.permute.xlu1 %2105 }
 0x1f1   : > { %v2151_v62 = vrot.slane %v2106_v8, 4  ;;  %2743 = vrot.lane.b32.xlu2 %v2600_v14, %s7014_s25  ;;  %v3471_v9 = vrot.slane %v3470_v61, 4  ;;  %v3987_v14 = vld [vmem:[#allocation2 + $0x20] sm:$0x1] }
 0x1f2   : > { %v2116_v19 = vpop.permute.xlu0 %2115 }
 0x1f3   : > { %v2156_v45 = vrot.slane %v2116_v19, 4  ;;  %v2184_v20 = vsel %vm2165_vm0, %v2151_v62, %v2106_v8  ;;  %v2114_v29 = vpop.permute.xlu2 %2113  ;;  %v3475_v8 = vrot.slane %v3473_v24, 5 }
 0x1f4   : > { %2251 = vst.msk [vmem:[#allocation3 + $0xd8] sm:$0xff] %vm8135_vm5, %v2184_v20  ;;  %v2155_v47 = vrot.slane %v2114_v29, 4  ;;  %v4085_v20 = vrot.slane %v4083_v25, 4 }
 0x1f5   : > { %v2189_v50 = vsel %vm2165_vm0, %v2156_v45, %v2116_v19  ;;  %v3166_v19 = vld [vmem:[#allocation2 + $0x24] sm:$0xf]  ;;  %v3476_v56 = vsel %vm7316_vm10, %v3471_v9, %v3475_v8  ;;  %v3990_v45 = vld [vmem:[#allocation2 + $0x2c] sm:$0x1] }
 0x1f6   : > { %2256 = vst.msk [vmem:[#allocation3 + $0x114] sm:$0xff] %vm8135_vm5, %v2189_v50  ;;  %4193 = vrot.lane.b32.xlu1 %v4084_v23, %s7018_s13  ;;  %v2188_v21 = vsel %vm2165_vm0, %v2155_v47, %v2114_v29  ;;  %v4086_v23 = vrot.slane %v3987_v14, 5  ;;  %v4092_v50 = vrot.slane %v4090_v53, 4  ;;  %v8384_v47 = vld [vmem:[#allocation2 + $0x34] sm:$0xf]  ;;  %v6104_v53 = vor.u32 %v6388_v38, %v6103_v59 }
 0x1f7   : > { %2255 = vst.msk [vmem:[#allocation3 + $0x108] sm:$0xff] %vm8135_vm5, %v2188_v21  ;;  %v2832_v21 = vld [vmem:[#allocation2 + $0x24] sm:$0xe]  ;;  %v3369_v38 = vld [vmem:[#allocation2 + $0x48] sm:$0xf] }
 0x1f8   : > { %3040 = vrot.lane.b32.xlu0 %v2935_v46, %s7015_s26  ;;  %v2112_v57 = vpop.permute.xlu1 %2111  ;;  %v4093_v46 = vrot.slane %v3990_v45, 5  ;;  %v4087_v51 = vsel %vm7730_vm14, %v4085_v20, %v4086_v23 }
 0x1f9   : > { %v2154_v49 = vrot.slane %v2112_v57, 4  ;;  %3791 = vrot.lane.b32.xlu2 %v3428_v48, %s7016_s4  ;;  %v8395_v48 = vld [vmem:[#allocation2 + $0x28] sm:$0xf] }
 0x1fa   : > { %v2122_v7 = vpop.permute.xlu0 %2121 }
 0x1fb   : > { %v2159_v60 = vrot.slane %v2122_v7, 4  ;;  %v2187_v27 = vsel %vm2165_vm0, %v2154_v49, %v2112_v57  ;;  %v2120_v37 = vpop.permute.xlu2 %2119  ;;  %v4094_v57 = vsel %vm7730_vm14, %v4092_v50, %v4093_v46  ;;  %v4097_v49 = vrot.slane %v8384_v47, 5  ;;  %v8424_v50 = vld [vmem:[#allocation2 + $0x40] sm:$0xf]  ;;  %v3167_v46 = vld [vmem:[#allocation2 + $0x28] sm:$0xf] }
 0x1fc   : > { %2254 = vst.msk [vmem:[#allocation3 + $0xfc] sm:$0xff] %vm8135_vm5, %v2187_v27  ;;  %v2158_v35 = vrot.slane %v2120_v37, 4 }
 0x1fd   : > { %v2192_v41 = vsel %vm2165_vm0, %v2159_v60, %v2122_v7  ;;  %v3993_v7 = vld [vmem:[#allocation2 + $0x38] sm:$0x1]  ;;  %v3363_v60 = vld [vmem:[#allocation2 + $0x30] sm:$0xf]  ;;  %v4099_v61 = vrot.slane %v4097_v49, 4 }
 0x1fe   : > { %2259 = vst.msk [vmem:[#allocation3 + $0x138] sm:$0xff] %vm8135_vm5, %v2192_v41  ;;  %3795 = vrot.lane.b32.xlu1 %v3452_v55, %s7016_s4  ;;  %4870 = vmatmul.bf16.gmra.mxu0 %v6092_v40  ;;  %v2191_v10 = vsel %vm2165_vm0, %v2158_v35, %v2120_v37  ;;  %v6023_v55 = vrot.slane %v2832_v21, 9  ;;  %v2938_v40 = vrot.slane %v8395_v48, 5  ;;  %v2932_v41 = vsel %vm7730_vm14, %v6022_v12, %v2931_v17  ;;  %v3366_v37 = vld [vmem:[#allocation2 + $0x3c] sm:$0xf] }
 0x1ff   : > { %2258 = vst.msk [vmem:[#allocation3 + $0x12c] sm:$0xff] %vm8135_vm5, %v2191_v10  ;;  %v4100_v24 = vrot.slane %v3993_v7, 5  ;;  %v3454_v8 = vshrl.u32 %v3363_v60, 16  ;;  %v3457_v10 = vshll.u32 %v3363_v60, 16 }
 0x200   : > { %4197 = vrot.lane.b32.xlu0 %v4091_v42, %s7018_s13  ;;  %v2118_v15 = vpop.permute.xlu1 %2117  ;;  %v2939_v17 = vsel %vm7730_vm14, %v6023_v55, %v2938_v40 }
 0x201   : > { %v2157_v3 = vrot.slane %v2118_v15, 4  ;;  %3228 = vrot.lane.b32.xlu2 %v3164_v58, %s7017_s10  ;;  %v3478_v58 = vshrl.u32 %v3366_v37, 16  ;;  %v3456_v14 = vrot.slane %v3454_v8, 4 }
 0x202   : > { %v2128_v13 = vpop.permute.xlu0 %2127 }
 0x203   : > { %v2162_v62 = vrot.slane %v2128_v13, 4  ;;  %v2190_v0 = vsel %vm2165_vm0, %v2157_v3, %v2118_v15  ;;  %v2126_v30 = vpop.permute.xlu2 %2125  ;;  %v3481_v3 = vshll.u32 %v3366_v37, 16  ;;  %v3480_v45 = vrot.slane %v3478_v58, 4  ;;  %v2837_v37 = vld [vmem:[#allocation2 + $0x38] sm:$0x1] }
 0x204   : > { %2257 = vst.msk [vmem:[#allocation3 + $0x120] sm:$0xff] %vm8135_vm5, %v2190_v0  ;;  %v2161_v32 = vrot.slane %v2126_v30, 4  ;;  %v2835_v0 = vld [vmem:[#allocation2 + $0x30] sm:$0xe]  ;;  %v3491_v58 = vshrl.u32 %v8424_v50, 16 }
 0x205   : > { %v2195_v54 = vsel %vm2165_vm0, %v2162_v62, %v2128_v13  ;;  %v4101_v13 = vsel %vm7730_vm14, %v4099_v61, %v4100_v24  ;;  %v3459_v62 = vrot.slane %v3457_v10, 5  ;;  %v3483_v20 = vrot.slane %v3481_v3, 5  ;;  %v6211_v59 = vld [vmem:[#allocation3 + $0x138] sm:$0xf]  ;;  %v3171_v24 = vld [vmem:[#allocation2 + $0x40] sm:$0xf] }
 0x206   : > { %2262 = vst.msk [vmem:[#allocation3 + $0x15c] sm:$0xff] %vm8135_vm5, %v2195_v54  ;;  %3232 = vrot.lane.b32.xlu1 %v3166_v19, %s7017_s10  ;;  %v2194_v39 = vsel %vm2165_vm0, %v2161_v32, %v2126_v30  ;;  %v6412_v43 = vld [vmem:[#allocation3 + $0x128] sm:$0xf0]  ;;  %v2836_v19 = vld [vmem:[#allocation2 + $0x34] sm:$0xf]  ;;  %v6024_v30 = vrot.slane %v2835_v0, 9 }
 0x207   : > { %2261 = vst.msk [vmem:[#allocation3 + $0x150] sm:$0xff] %vm8135_vm5, %v2194_v39  ;;  %v2945_v32 = vrot.slane %v2836_v19, 5  ;;  %v3460_v34 = vor.u32 %v3459_v62, %v3456_v14  ;;  %v8455_v19 = vld [vmem:[#allocation2 + $0x40] sm:$0xf] }
 0x208   : > { %3799 = vrot.lane.b32.xlu0 %v3476_v56, %s7016_s4  ;;  %v2124_v36 = vpop.permute.xlu1 %2123  ;;  %v6391_v56 = vld [vmem:[#allocation3 + $0x80] sm:$0xf0] }
 0x209   : > { %v2160_v25 = vrot.slane %v2124_v36, 4  ;;  %4195 = vrot.lane.b32.xlu2 %v4087_v51, %s7018_s13  ;;  %v3169_v51 = vld [vmem:[#allocation2 + $0x34] sm:$0xf]  ;;  %v2946_v12 = vsel %vm7730_vm14, %v6024_v30, %v2945_v32  ;;  %v2947_v10 = vrot.slane %v2945_v32, 4  ;;  %v3994_v30 = vld [vmem:[#allocation2 + $0x3c] sm:$0xe] }
 0x20a   : > { %v2698_v29 = vpop.permute.xlu0 %2697  ;;  %v8463_v32 = vld [vmem:[#allocation2 + $0x40] sm:$0xf] }
 0x20b   : > { %v2193_v33 = vsel %vm2165_vm0, %v2160_v25, %v2124_v36  ;;  %v6199_v4 = vld [vmem:[#allocation3 + $0x120] sm:$0xf]  ;;  %2794 = vst.msk [vmem:[#allocation3 + $0x4] sm:$0xf] %vm2793_vm7, %v2698_v29  ;;  %v2132_v16 = vpop.permute.xlu2 %2131  ;;  %v3484_v25 = vor.u32 %v3483_v20, %v3480_v45  ;;  %v6116_v29 = vor.u32 %v6391_v56, %v6115_v6  ;;  %v3991_v56 = vld [vmem:[#allocation2 + $0x30] sm:$0xe] }
 0x20c   : > { %2260 = vst.msk [vmem:[#allocation3 + $0x144] sm:$0xff] %vm8135_vm5, %v2193_v33  ;;  %v6200_v28 = vor.u32 %v6412_v43, %v6199_v4  ;;  %v2164_v27 = vrot.slane %v2132_v16, 4  ;;  %v3487_v43 = vshll.u32 %v8424_v50, 16  ;;  %v3502_v33 = vshrl.u32 %v3369_v38, 16 }
 0x20d   : > { %v3493_v50 = vrot.slane %v3491_v58, 4 }
 0x20e   : > { %4199 = vrot.lane.b32.xlu1 %v4094_v57, %s7018_s13  ;;  %4875 = vmatmul.bf16.gmra.mxu0 %v6104_v53  ;;  %v2197_v35 = vsel %vm2165_vm0, %v2164_v27, %v2132_v16  ;;  %v3505_v57 = vshll.u32 %v3369_v38, 16  ;;  %v8435_v21 = vrot.slane %v3487_v43, 5  ;;  %v3504_v16 = vrot.slane %v3502_v33, 4  ;;  %v2840_v38 = vld [vmem:[#allocation2 + $0x44] sm:$0x1] }
 0x20f   : > { %4915 = vmatmul.bf16.vlgmr.msra.gmra.mxu3 %v6200_v28  ;;  %2264 = vst.msk [vmem:[#allocation3 + $0x174] sm:$0xff] %vm8135_vm5, %v2197_v35  ;;  %v3485_v28 = vrot.slane %v3484_v25, 4  ;;  %v6040_v25 = vrot.slane %v3994_v30, 9  ;;  %v4104_v43 = vrot.slane %v8463_v32, 5  ;;  %v6435_v30 = vld [vmem:[#allocation9 + $0x60] sm:$0xff]  ;;  %v6432_v32 = vld [vmem:[#allocation9 + $0x48] sm:$0xff] }
 0x210   : > { %3236 = vrot.lane.b32.xlu0 %v3168_v11, %s7017_s10  ;;  %v2130_v42 = vpop.permute.xlu1 %2129  ;;  %v3461_v11 = vrot.slane %v3460_v34, 4  ;;  %v3507_v60 = vrot.slane %v3505_v57, 5  ;;  %v2955_v57 = vrot.slane %v2840_v38, 5 }
 0x211   : > { %v2163_v15 = vrot.slane %v2130_v42, 4  ;;  %3038 = vrot.lane.b32.xlu2 %v2932_v41, %s7015_s26  ;;  %v3370_v41 = vld [vmem:[#allocation2 + $0x4c] sm:$0xf]  ;;  %v3490_v61 = vsel %vm7316_vm10, %v3485_v28, %v8435_v21 }
 0x212   : > { %v2704_v9 = vpop.permute.xlu0 %2703  ;;  %v3466_v27 = vsel %vm7316_vm10, %v3461_v11, %v8344_v31  ;;  %v3508_v35 = vor.u32 %v3507_v60, %v3504_v16  ;;  %v2940_v31 = vrot.slane %v2938_v40, 4  ;;  %v6418_v40 = vld [vmem:[#allocation3 + $0x158] sm:$0xf0]  ;;  %v3515_v20 = vshrl.u32 %v3370_v41, 16  ;;  %v3373_v16 = vld [vmem:[#allocation2 + $0x58] sm:$0xf] }
 0x213   : > { %v2196_v26 = vsel %vm2165_vm0, %v2163_v15, %v2130_v42  ;;  %2797 = vst.msk [vmem:[#allocation3 + $0x28] sm:$0xf] %vm2793_vm7, %v2704_v9  ;;  %v2702_v54 = vpop.permute.xlu2 %2701  ;;  %v6415_v39 = vld [vmem:[#allocation3 + $0x140] sm:$0xf0]  ;;  %v2834_v42 = vld [vmem:[#allocation2 + $0x2c] sm:$0x1] }
 0x214   : > { %2263 = vst.msk [vmem:[#allocation3 + $0x168] sm:$0xff] %vm8135_vm5, %v2196_v26  ;;  %v6212_v4 = vor.u32 %v6415_v39, %v6211_v59  ;;  %v3511_v15 = vshll.u32 %v3370_v41, 16  ;;  %v2941_v9 = vrot.slane %v2834_v42, 5  ;;  %v2948_v26 = vrot.slane %v2837_v37, 5  ;;  %v6438_v11 = vld [vmem:[#allocation9 + $0x78] sm:$0xff]  ;;  %v6437_v37 = vld [vmem:[#allocation9 + $0x70] sm:$0xff] }
 0x215   : > { %2796 = vst.msk [vmem:[#allocation3 + $0x1c] sm:$0xf] %vm2793_vm7, %v2702_v54  ;;  %v3509_v14 = vrot.slane %v3508_v35, 4  ;;  %v6223_v54 = vld [vmem:[#allocation3 + $0x150] sm:$0xf]  ;;  %4936 = vmatpush.bf16.msra.mxu1 %v6438_v11  ;;  %6453 = vmatpush.bf16.msrb.mxu3 %v6438_v11  ;;  %v3539_v41 = vshrl.u32 %v3373_v16, 16 }
 0x216   : > { %3042 = vrot.lane.b32.xlu1 %v2939_v17, %s7015_s26  ;;  %v6394_v17 = vld [vmem:[#allocation3 + $0x98] sm:$0xf0]  ;;  %v3513_v62 = vrot.slane %v3511_v15, 5  ;;  %v2942_v48 = vsel %vm7730_vm14, %v2940_v31, %v2941_v9  ;;  %v2949_v45 = vsel %vm7730_vm14, %v2947_v10, %v2948_v26  ;;  %v6224_v34 = vor.u32 %v6418_v40, %v6223_v54  ;;  %v6421_v40 = vld [vmem:[#allocation3 + $0x170] sm:$0xf0] }
 0x217   : > { %v3541_v58 = vrot.slane %v3539_v41, 4  ;;  %v6139_v54 = vld [vmem:[#allocation3 + $0xa8] sm:$0xf]  ;;  %v3999_v11 = vld [vmem:[#allocation2 + $0x50] sm:$0x1]  ;;  %vm4289_vm0 = vcmask 552192  }
 0x218   : > { %4203 = vrot.lane.b32.xlu0 %v4101_v13, %s7018_s13  ;;  %v2700_v23 = vpop.permute.xlu1 %2699  ;;  %v6127_v13 = vld [vmem:[#allocation3 + $0x90] sm:$0xf]  ;;  %v3514_v6 = vsel %vm7316_vm10, %v3509_v14, %v3513_v62  ;;  %v3374_v14 = vld [vmem:[#allocation2 + $0x5c] sm:$0x1]  ;;  %v6151_v41 = vld [vmem:[#allocation3 + $0xc0] sm:$0xf] }
 0x219   : > { %2795 = vst.msk [vmem:[#allocation3 + $0x10] sm:$0xf] %vm2793_vm7, %v2700_v23  ;;  %3234 = vrot.lane.b32.xlu2 %v3167_v46, %s7017_s10  ;;  %v6128_v23 = vor.u32 %v6394_v17, %v6127_v13  ;;  %v2952_v46 = vrot.slane %v8455_v19, 5  ;;  %4937 = vmatpush.bf16.msra.mxu1 %v6437_v37  ;;  %v8554_v19 = vld [vmem:[#allocation9 + $0x80] sm:$0xff] }
 0x21a   : > { %v2710_v36 = vpop.permute.xlu0 %2709  ;;  %6454 = vmatpush.bf16.msrb.mxu3 %v6437_v37 }
 0x21b   : > { %2800 = vst.msk [vmem:[#allocation3 + $0x4c] sm:$0xf] %vm2793_vm7, %v2710_v36  ;;  %v2708_v53 = vpop.permute.xlu2 %2707  ;;  %v6039_v36 = vrot.slane %v3991_v56, 9  ;;  %v2954_v33 = vrot.slane %v2952_v46, 4 }
 0x21c   : > { %2799 = vst.msk [vmem:[#allocation3 + $0x40] sm:$0xf] %vm2793_vm7, %v2708_v53 }
 0x21d   : > { %v4098_v53 = vsel %vm7730_vm14, %v6039_v36, %v4097_v49  ;;  %v2956_v49 = vsel %vm7730_vm14, %v2954_v33, %v2955_v57  ;;  %v3172_v33 = vld [vmem:[#allocation2 + $0x48] sm:$0xf] }
 0x21e   : > { %3238 = vrot.lane.b32.xlu1 %v3169_v51, %s7017_s10  ;;  %4880 = vmatmul.bf16.gmra.mxu0 %v6116_v29  ;;  %v3368_v51 = vld [vmem:[#allocation2 + $0x44] sm:$0x1]  ;;  %v3517_v29 = vrot.slane %v3515_v20, 4 }
 0x21f   : > { %4920 = vmatmul.bf16.gmra.mxu3 %v6212_v4  ;;  %v3371_v4 = vld [vmem:[#allocation2 + $0x50] sm:$0x1]  ;;  %v3497_v28 = vshll.u32 %v3368_v51, 16  ;;  %v4426_v51 = vld [vmem:[#allocation9 + $0xa0] sm:$0x3] }
 0x220   : > { %3046 = vrot.lane.b32.xlu0 %v2946_v12, %s7015_s26  ;;  %v2706_v7 = vpop.permute.xlu1 %2705  ;;  %v3494_v12 = vor.u32 %v3493_v50, %v8435_v21  ;;  %v4105_v21 = vsel %vm7730_vm14, %v6040_v25, %v4104_v43  ;;  %v3518_v60 = vor.u32 %v3517_v29, %v3513_v62  ;;  %v6436_v62 = vld [vmem:[#allocation9 + $0x68] sm:$0xff]  ;;  %v3170_v25 = vld [vmem:[#allocation2 + $0x3c] sm:$0xf] }
 0x221   : > { %2798 = vst.msk [vmem:[#allocation3 + $0x34] sm:$0xf] %vm2793_vm7, %v2706_v7  ;;  %3797 = vrot.lane.b32.xlu2 %v3466_v27, %s7016_s4  ;;  %v3521_v27 = vshll.u32 %v3371_v4, 16  ;;  %v3499_v42 = vrot.slane %v3497_v28, 5  ;;  %4938 = vmatpush.bf16.msra.mxu1 %v6436_v62 }
 0x222   : > { %v2716_v55 = vpop.permute.xlu0 %2715  ;;  %v3495_v47 = vrot.slane %v3494_v12, 4  ;;  %v3519_v15 = vrot.slane %v3518_v60, 4  ;;  %6455 = vmatpush.bf16.msrb.mxu3 %v6436_v62  ;;  %v3996_v12 = vld [vmem:[#allocation2 + $0x44] sm:$0x1] }
 0x223   : > { %2803 = vst.msk [vmem:[#allocation3 + $0x70] sm:$0xf] %vm2793_vm7, %v2716_v55  ;;  %v2714_v8 = vpop.permute.xlu2 %2713  ;;  %v3535_v55 = vshll.u32 %v3373_v16, 16  ;;  %v3523_v31 = vrot.slane %v3521_v27, 5  ;;  %v4107_v28 = vrot.slane %v3996_v12, 5  ;;  %v6433_v16 = vld [vmem:[#allocation9 + $0x50] sm:$0xff] }
 0x224   : > { %2802 = vst.msk [vmem:[#allocation3 + $0x64] sm:$0xf] %vm2793_vm7, %v2714_v8  ;;  %v6397_v8 = vld [vmem:[#allocation3 + $0xb0] sm:$0xf0]  ;;  %v4114_v27 = vrot.slane %v3999_v11, 5 }
 0x225   : > { %v8492_v17 = vrot.slane %v3535_v55, 5  ;;  %v6140_v56 = vor.u32 %v6397_v8, %v6139_v54  ;;  %4939 = vmatpush.bf16.msra.mxu1 %v6435_v30  ;;  %v6400_v55 = vld [vmem:[#allocation3 + $0xc8] sm:$0xf0]  ;;  %v8531_v8 = vld [vmem:[#allocation2 + $0x4c] sm:$0xf] }
 0x226   : > { %3801 = vrot.lane.b32.xlu1 %v3490_v61, %s7016_s4  ;;  %v3997_v61 = vld [vmem:[#allocation2 + $0x48] sm:$0xe]  ;;  %6456 = vmatpush.bf16.msrb.mxu3 %v6435_v30 }
 0x227   : > { %v6041_v10 = vrot.slane %v3997_v61, 9  ;;  %v3542_v20 = vor.u32 %v3541_v58, %v8492_v17  ;;  %v8522_v61 = vld [vmem:[#allocation2 + $0x58] sm:$0xf]  ;;  %v4002_v58 = vld [vmem:[#allocation2 + $0x5c] sm:$0x1] }
 0x228   : > { %3242 = vrot.lane.b32.xlu0 %v3171_v24, %s7017_s10  ;;  %v2712_v3 = vpop.permute.xlu1 %2711  ;;  %v8486_v24 = vld [vmem:[#allocation2 + $0x4c] sm:$0xf] }
 0x229   : > { %2801 = vst.msk [vmem:[#allocation3 + $0x58] sm:$0xf] %vm2793_vm7, %v2712_v3  ;;  %3044 = vrot.lane.b32.xlu2 %v2942_v48, %s7015_s26  ;;  %v4111_v26 = vrot.slane %v8486_v24, 5  ;;  %v3500_v3 = vsel %vm7316_vm10, %v3495_v47, %v3499_v42  ;;  %v6235_v48 = vld [vmem:[#allocation3 + $0x168] sm:$0xf]  ;;  %v3543_v36 = vrot.slane %v3542_v20, 4 }
 0x22a   : > { %v2722_v0 = vpop.permute.xlu0 %2721  ;;  %v8517_v47 = vld [vmem:[#allocation9 + $0x98] sm:$0xff]  ;;  %v2838_v24 = vld [vmem:[#allocation2 + $0x3c] sm:$0xe] }
 0x22b   : > { %2806 = vst.msk [vmem:[#allocation3 + $0x94] sm:$0xf] %vm2793_vm7, %v2722_v0  ;;  %v2720_v39 = vpop.permute.xlu2 %2719  ;;  %v3524_v0 = vsel %vm7316_vm10, %v3519_v15, %v3523_v31  ;;  %v4113_v60 = vrot.slane %v4111_v26, 4  ;;  %v8528_v15 = vld [vmem:[#allocation9 + $0x90] sm:$0xff]  ;;  %v6152_v31 = vor.u32 %v6400_v55, %v6151_v41 }
 0x22c   : > { %2805 = vst.msk [vmem:[#allocation3 + $0x88] sm:$0xf] %vm2793_vm7, %v2720_v39  ;;  %v6434_v39 = vld [vmem:[#allocation9 + $0x58] sm:$0xff] }
 0x22d   : > { %4940 = vmatpush.bf16.msra.mxu1 %v6434_v39  ;;  %6457 = vmatpush.bf16.msrb.mxu3 %v6434_v39  ;;  %v4115_v37 = vsel %vm7730_vm14, %v4113_v60, %v4114_v27  ;;  %v3378_v27 = vld [vmem:[#allocation2 + $0x6c] sm:$0xf] }
 0x22e   : > { %3048 = vrot.lane.b32.xlu1 %v2949_v45, %s7015_s26  ;;  %4885 = vmatmul.bf16.gmra.mxu0 %v6128_v23  ;;  %v4112_v45 = vsel %vm7730_vm14, %v6041_v10, %v4111_v26  ;;  %v3545_v23 = vshll.u32 %v3374_v14, 16  ;;  %v4118_v10 = vrot.slane %v8522_v61, 5  ;;  %v6025_v26 = vrot.slane %v2838_v24, 9  ;;  %v3372_v14 = vld [vmem:[#allocation2 + $0x54] sm:$0xf] }
 0x22f   : > { %4925 = vmatmul.bf16.gmra.mxu3 %v6224_v34  ;;  %v3529_v30 = vshll.u32 %v3372_v14, 16  ;;  %v3574_v41 = vshrl.u32 %v3378_v27, 16 }
 0x230   : > { %3805 = vrot.lane.b32.xlu0 %v3514_v6, %s7016_s4  ;;  %v2718_v59 = vpop.permute.xlu1 %2717  ;;  %v6236_v6 = vor.u32 %v6421_v40, %v6235_v48  ;;  %v3547_v38 = vrot.slane %v3545_v23, 5  ;;  %v2959_v48 = vrot.slane %v8531_v8, 5  ;;  %v8539_v40 = vld [vmem:[#allocation9 + $0x88] sm:$0xff]  ;;  %v4120_v54 = vrot.slane %v4118_v10, 4 }
 0x231   : > { %2804 = vst.msk [vmem:[#allocation3 + $0x7c] sm:$0xf] %vm2793_vm7, %v2718_v59  ;;  %4201 = vrot.lane.b32.xlu2 %v4098_v53, %s7018_s13  ;;  %v4752_v59 = vunpack.c.l.b16 %v4426_v51  ;;  %v4106_v53 = vrot.slane %v4104_v43, 4  ;;  %4941 = vmatpush.bf16.msra.mxu1 %v6433_v16  ;;  %v2953_v20 = vsel %vm7730_vm14, %v6025_v26, %v2952_v46  ;;  %v3531_v39 = vrot.slane %v3529_v30, 5  ;;  %v2844_v51 = vld [vmem:[#allocation2 + $0x54] sm:$0xe] }
 0x232   : > { %v2728_v7 = vpop.permute.xlu0 %2727  ;;  %v3548_v4 = vsel %vm7316_vm10, %v3543_v36, %v3547_v38  ;;  %6458 = vmatpush.bf16.msrb.mxu3 %v6433_v16  ;;  %v6027_v11 = vrot.slane %v2844_v51, 9 }
 0x233   : > { %2809 = vst.msk [vmem:[#allocation3 + $0xb8] sm:$0xf] %vm2793_vm7, %v2728_v7  ;;  %v2726_v35 = vpop.permute.xlu2 %2725  ;;  %v4773_v57 = vpack.c.b16 %v4752_v59, %v4752_v59  ;;  %v4108_v43 = vsel %vm7730_vm14, %v4106_v53, %v4107_v28  ;;  %v6403_v59 = vld [vmem:[#allocation3 + $0xe0] sm:$0xf0]  ;;  %v8566_v28 = vld [vmem:[#allocation2 + $0x64] sm:$0xf] }
 0x234   : > { %2808 = vst.msk [vmem:[#allocation3 + $0xac] sm:$0xf] %vm2793_vm7, %v2726_v35  ;;  %v2841_v35 = vld [vmem:[#allocation2 + $0x48] sm:$0xe] }
 0x235   : > { %v4845_v7 = vsel %vm4843_vm8, %v4773_v57, 0  ;;  %4942 = vmatpush.bf16.msra.mxu1 %v6432_v32  ;;  %v6026_v62 = vrot.slane %v2841_v35, 9 }
 0x236   : > { %4205 = vrot.lane.b32.xlu1 %v4105_v21, %s7018_s13  ;;  %5028 = vmatpush.bf16.msra.mxu2 %v4845_v7 }
 0x237   : > { %6459 = vmatpush.bf16.msrb.mxu3 %v6432_v32  ;;  %v3559_v32 = vshll.u32 %v8566_v28, 16 }
 0x238   : > { %3052 = vrot.lane.b32.xlu0 %v2956_v49, %s7015_s26  ;;  %v2724_v9 = vpop.permute.xlu1 %2723 }
 0x239   : > { %2807 = vst.msk [vmem:[#allocation3 + $0xa0] sm:$0xf] %vm2793_vm7, %v2724_v9  ;;  %3803 = vrot.lane.b32.xlu2 %v3500_v3, %s7016_s4  ;;  %v3174_v9 = vld [vmem:[#allocation2 + $0x54] sm:$0xf]  ;;  %v6431_v3 = vld [vmem:[#allocation9 + $0x40] sm:$0xff]  ;;  %v8581_v26 = vrot.slane %v3559_v32, 5 }
 0x23a   : > { %v2734_v13 = vpop.permute.xlu0 %2733  ;;  %5029 = vmatpush.bf16.msra.mxu2 %v8517_v47  ;;  %4943 = vmatpush.bf16.msra.mxu1 %v6431_v3  ;;  %v3377_v32 = vld [vmem:[#allocation2 + $0x68] sm:$0x1] }
 0x23b   : > { %2812 = vst.msk [vmem:[#allocation3 + $0xdc] sm:$0xf] %vm2793_vm7, %v2734_v13  ;;  %v2732_v50 = vpop.permute.xlu2 %2731  ;;  %6460 = vmatpush.bf16.msrb.mxu3 %v6431_v3  ;;  %v3576_v3 = vrot.slane %v3574_v41, 4 }
 0x23c   : > { %2811 = vst.msk [vmem:[#allocation3 + $0xd0] sm:$0xf] %vm2793_vm7, %v2732_v50  ;;  %v2960_v50 = vsel %vm7730_vm14, %v6026_v62, %v2959_v48 }
 0x23e   : > { %3807 = vrot.lane.b32.xlu1 %v3524_v0, %s7016_s4  ;;  %4890 = vmatmul.bf16.gmra.mxu0 %v6140_v56  ;;  %v4121_v56 = vrot.slane %v4002_v58, 5 }
 0x23f   : > { %4930 = vmatmul.bf16.gmra.mxu3 %v6236_v6  ;;  %5030 = vmatpush.bf16.msra.mxu2 %v8528_v15  ;;  %v3526_v6 = vshrl.u32 %v3372_v14, 16 }
 0x240   : > { %4209 = vrot.lane.b32.xlu0 %v4112_v45, %s7018_s13  ;;  %v2730_v34 = vpop.permute.xlu1 %2729  ;;  %v3375_v45 = vld [vmem:[#allocation2 + $0x60] sm:$0xf]  ;;  %6461 = vmatpush.bf16.msra.mxu3 %v4845_v7  ;;  %v4122_v46 = vsel %vm7730_vm14, %v4120_v54, %v4121_v56  ;;  %v3173_v7 = vld [vmem:[#allocation2 + $0x4c] sm:$0xf] }
 0x241   : > { %2810 = vst.msk [vmem:[#allocation3 + $0xc4] sm:$0xf] %vm2793_vm7, %v2730_v34  ;;  %3240 = vrot.lane.b32.xlu2 %v3170_v25, %s7017_s10  ;;  %v3550_v34 = vshrl.u32 %v3375_v45, 16  ;;  %v3553_v36 = vshll.u32 %v3375_v45, 16  ;;  %v3528_v38 = vrot.slane %v3526_v6, 4  ;;  %v2961_v6 = vrot.slane %v2959_v48, 4 }
 0x242   : > { %v2740_v29 = vpop.permute.xlu0 %2739  ;;  %v8559_v25 = vld [vmem:[#allocation2 + $0x58] sm:$0xf]  ;;  %v2846_v45 = vld [vmem:[#allocation2 + $0x5c] sm:$0x1]  ;;  %v4000_v48 = vld [vmem:[#allocation2 + $0x54] sm:$0xe] }
 0x243   : > { %2815 = vst.msk [vmem:[#allocation3 + $0x100] sm:$0xf] %vm2793_vm7, %v2740_v29  ;;  %v2738_v21 = vpop.permute.xlu2 %2737  ;;  %5031 = vmatpush.bf16.msra.mxu2 %v8539_v40  ;;  %v3552_v12 = vrot.slane %v3550_v34, 4  ;;  %v2966_v53 = vrot.slane %v8559_v25, 5 }
 0x244   : > { %2814 = vst.msk [vmem:[#allocation3 + $0xf4] sm:$0xf] %vm2793_vm7, %v2738_v21  ;;  %6462 = vmatpush.bf16.msra.mxu3 %v8517_v47  ;;  %v3532_v21 = vor.u32 %v3531_v39, %v3528_v38  ;;  %v3175_v47 = vld [vmem:[#allocation2 + $0x58] sm:$0xf]  ;;  %v6406_v38 = vld [vmem:[#allocation3 + $0xf8] sm:$0xf0] }
 0x245   : > { %v2968_v34 = vrot.slane %v2966_v53, 4 }
 0x246   : > { %3244 = vrot.lane.b32.xlu1 %v3172_v33, %s7017_s10  ;;  %v3555_v33 = vrot.slane %v3553_v36, 5  ;;  %v2969_v36 = vrot.slane %v2846_v45, 5 }
 0x247   : > { %5032 = vmatpush.bf16.msra.mxu2 %v8554_v19 }
 0x248   : > { %3811 = vrot.lane.b32.xlu0 %v3548_v4, %s7016_s4  ;;  %v2736_v49 = vpop.permute.xlu1 %2735  ;;  %v6163_v4 = vld [vmem:[#allocation3 + $0xd8] sm:$0xf]  ;;  %6463 = vmatpush.bf16.msra.mxu3 %v8528_v15  ;;  %v3556_v55 = vor.u32 %v3555_v33, %v3552_v12 }
 0x249   : > { %2813 = vst.msk [vmem:[#allocation3 + $0xe8] sm:$0xf] %vm2793_vm7, %v2736_v49  ;;  %4207 = vrot.lane.b32.xlu2 %v4108_v43, %s7018_s13  ;;  %v6164_v49 = vor.u32 %v6403_v59, %v6163_v4  ;;  %v2967_v43 = vsel %vm7730_vm14, %v6027_v11, %v2966_v53  ;;  %v6175_v4 = vld [vmem:[#allocation3 + $0xf0] sm:$0xf] }
 0x24a   : > { %v2746_v42 = vpop.permute.xlu0 %2745  ;;  %v6176_v53 = vor.u32 %v6406_v38, %v6175_v4  ;;  %v3393_v38 = vld [vmem:[#allocation2 + $0xa8] sm:$0xf]  ;;  %v3176_v4 = vld [vmem:[#allocation2 + $0x60] sm:$0xf] }
 0x24b   : > { %2818 = vst.msk [vmem:[#allocation3 + $0x124] sm:$0xf] %vm2793_vm7, %v2746_v42  ;;  %v2744_v13 = vpop.permute.xlu2 %2743  ;;  %v3577_v42 = vshll.u32 %v3378_v27, 16  ;;  %v3694_v63 = vshrl.u32 %v3393_v38, 16 }
 0x24c   : > { %2817 = vst.msk [vmem:[#allocation3 + $0x118] sm:$0xf] %vm2793_vm7, %v2744_v13  ;;  %6464 = vmatpush.bf16.msra.mxu3 %v8539_v40  ;;  %v2843_v40 = vld [vmem:[#allocation2 + $0x50] sm:$0x1] }
 0x24d   : > { %v3579_v13 = vrot.slane %v3577_v42, 5  ;;  %v2962_v30 = vrot.slane %v2843_v40, 5  ;;  %v2303_v40 = vld [vmem:[#allocation2 + $0xa4] sm:$0x1] }
 0x24e   : > { %4211 = vrot.lane.b32.xlu1 %v4115_v37, %s7018_s13  ;;  %4895 = vmatmul.bf16.gmra.mxu0 %v6152_v31  ;;  %v3533_v37 = vrot.slane %v3532_v21, 4  ;;  %v8618_v21 = vld [vmem:[#allocation2 + $0x64] sm:$0xf]  ;;  %v2621_v45 = vshll.u32 %v2303_v40, 16 }
 0x24f   : > { %v2963_v8 = vsel %vm7730_vm14, %v2961_v6, %v2962_v30  ;;  %v4125_v41 = vrot.slane %v8618_v21, 5 }
 0x250   : > { %3248 = vrot.lane.b32.xlu0 %v3174_v9, %s7017_s10  ;;  %v2742_v0 = vpop.permute.xlu1 %2741  ;;  %v3557_v9 = vrot.slane %v3556_v55, 4  ;;  %v3538_v14 = vsel %vm7316_vm10, %v3533_v37, %v8492_v17  ;;  %6465 = vmatpush.bf16.msra.mxu3 %v8554_v19  ;;  %v3177_v17 = vld [vmem:[#allocation2 + $0x64] sm:$0xf]  ;;  %v3563_v19 = vshrl.u32 %v8566_v28, 16  ;;  %v6042_v28 = vrot.slane %v4000_v48, 9 }
 0x251   : > { %2816 = vst.msk [vmem:[#allocation3 + $0x10c] sm:$0xf] %vm2793_vm7, %v2742_v0  ;;  %3050 = vrot.lane.b32.xlu2 %v2953_v20, %s7015_s26  ;;  %v3379_v0 = vld [vmem:[#allocation2 + $0x70] sm:$0xf]  ;;  %v3580_v20 = vor.u32 %v3579_v13, %v3576_v3  ;;  %v6409_v48 = vld [vmem:[#allocation3 + $0x110] sm:$0xf0] }
 0x252   : > { %v3035_v23 = vpop.permute.xlu0 %3034  ;;  %v3562_v56 = vsel %vm7316_vm10, %v3557_v9, %v8581_v26  ;;  %v3587_v11 = vshrl.u32 %v3379_v0, 16  ;;  %v3565_v27 = vrot.slane %v3563_v19, 4  ;;  %v2619_v19 = vrot.slane %v2618_v18, 4 }
 0x253   : > { %3131 = vst.msk [vmem:[#allocation3 + $0x4] sm:$0xf] %vm3130_vm9, %v3035_v23  ;;  %v3792_v29 = vpop.permute.xlu2 %3791  ;;  %v3583_v23 = vshll.u32 %v3379_v0, 16  ;;  %v3581_v39 = vrot.slane %v3580_v20, 4  ;;  %v3569_v0 = vshll.u32 %v3377_v32, 16  ;;  %v3697_v18 = vshll.u32 %v3393_v38, 16 }
 0x254   : > { %v3854_v15 = vrot.slane %v3792_v29, 4  ;;  %v3589_v42 = vrot.slane %v3587_v11, 4  ;;  %v8669_v11 = vld [vmem:[#allocation2 + $0xac] sm:$0xf] }
 0x255   : > { %v3585_v51 = vrot.slane %v3583_v23, 5  ;;  %v3571_v6 = vrot.slane %v3569_v0, 5 }
 0x256   : > { %3054 = vrot.lane.b32.xlu1 %v2960_v50, %s7015_s26  ;;  %v3887_v54 = vsel %vm3885_vm11, %v3854_v15, %v3792_v29  ;;  %v8610_v29 = vld [vmem:[#allocation2 + $0x64] sm:$0xf] }
 0x258   : > { %4215 = vrot.lane.b32.xlu0 %v4122_v46, %s7018_s13  ;;  %v3790_v57 = vpop.permute.xlu1 %3789 }
 0x259   : > { %v3853_v16 = vrot.slane %v3790_v57, 4  ;;  %3246 = vrot.lane.b32.xlu2 %v3173_v7, %s7017_s10  ;;  %v3586_v7 = vsel %vm7316_vm10, %v3581_v39, %v3585_v51 }
 0x25a   : > { %v3231_v60 = vpop.permute.xlu0 %3230 }
 0x25b   : > { %v3886_v24 = vsel %vm3885_vm11, %v3853_v16, %v3790_v57  ;;  %v3229_v31 = vpop.permute.xlu2 %3228  ;;  %v2970_v57 = vsel %vm7730_vm14, %v2968_v34, %v2969_v36  ;;  %v4003_v16 = vld [vmem:[#allocation2 + $0x60] sm:$0xe] }
 0x25c   : > { %3325 = vst.msk [vmem:[#allocation3 + $0x4] sm:$0xf] %vm3324_vm15, %v3229_v31 }
 0x25d   : > { %3953 = vst.msk [vmem:[#allocation3 + $0x4] sm:$0xff] %vm8574_vm1, %v3886_v24  ;;  %v4119_v24 = vsel %vm7730_vm14, %v6042_v28, %v4118_v10  ;;  %v3590_v10 = vor.u32 %v3589_v42, %v3585_v51  ;;  %v3699_v28 = vrot.slane %v3697_v18, 5 }
 0x25e   : > { %3250 = vrot.lane.b32.xlu1 %v3175_v47, %s7017_s10  ;;  %4900 = vmatmul.bf16.gmra.mxu0 %v6164_v49  ;;  %v2849_v47 = vld [vmem:[#allocation2 + $0x68] sm:$0x1] }
 0x25f   : > { %v2976_v9 = vrot.slane %v2849_v47, 5  ;;  %v8672_v47 = vld [vmem:[#allocation2 + $0x70] sm:$0xf] }
 0x260   : > { %3058 = vrot.lane.b32.xlu0 %v2967_v43, %s7015_s26  ;;  %v3037_v58 = vpop.permute.xlu1 %3036  ;;  %v6043_v43 = vrot.slane %v4003_v16, 9 }
 0x261   : > { %3132 = vst.msk [vmem:[#allocation3 + $0x10] sm:$0xf] %vm3130_vm9, %v3037_v58  ;;  %3809 = vrot.lane.b32.xlu2 %v3538_v14, %s7016_s4  ;;  %v3380_v58 = vld [vmem:[#allocation2 + $0x74] sm:$0x1]  ;;  %v3566_v14 = vor.u32 %v3565_v27, %v8581_v26 }
 0x262   : > { %v8590_v62 = vpop.permute.xlu0 %3793  ;;  %3326 = vst.msk [vmem:[#allocation3 + $0x10] sm:$0xf] %vm3324_vm15, %v3231_v60  ;;  %v2973_v60 = vrot.slane %v8610_v29, 5  ;;  %v4126_v61 = vsel %vm7730_vm14, %v6043_v43, %v4125_v41 }
 0x263   : > { %3954 = vst.msk [vmem:[#allocation3 + $0x10] sm:$0xff] %vm8574_vm1, %v3887_v54  ;;  %v4196_v50 = vpop.permute.xlu2 %4195  ;;  %v3855_v26 = vrot.slane %v8590_v62, 4  ;;  %v3567_v23 = vrot.slane %v3566_v14, 4  ;;  %v4127_v14 = vrot.slane %v4125_v41, 4 }
 0x264   : > { %4291 = vst.msk [vmem:[#allocation3 + $0x14] sm:$0xf] %vm4289_vm0, %v4196_v50  ;;  %v6375_v59 = vld [vmem:[#allocation3 + $0x4] sm:$0xf]  ;;  %v2975_v31 = vrot.slane %v2973_v60, 4  ;;  %v3591_v50 = vrot.slane %v3590_v10, 4 }
 0x265   : > { %v3888_v39 = vsel %vm3885_vm11, %v3855_v26, %v8590_v62  ;;  %v3572_v51 = vsel %vm7316_vm10, %v3567_v23, %v3571_v6 }
 0x266   : > { %3813 = vrot.lane.b32.xlu1 %v3562_v56, %s7016_s4  ;;  %v3593_v56 = vshll.u32 %v3380_v58, 16  ;;  %v4132_v58 = vrot.slane %v8672_v47, 5  ;;  %v4009_v47 = vld [vmem:[#allocation2 + $0x78] sm:$0xe] }
 0x268   : > { %3254 = vrot.lane.b32.xlu0 %v3177_v17, %s7017_s10  ;;  %v4194_v46 = vpop.permute.xlu1 %4193  ;;  %v2977_v17 = vsel %vm7730_vm14, %v2975_v31, %v2976_v9  ;;  %v3595_v34 = vrot.slane %v3593_v56, 5  ;;  %v3703_v31 = vshll.u32 %v8669_v11, 16  ;;  %v4134_v21 = vrot.slane %v4132_v58, 4 }
 0x269   : > { %4290 = vst.msk [vmem:[#allocation3 + $0x8] sm:$0xf] %vm4289_vm0, %v4194_v46  ;;  %3056 = vrot.lane.b32.xlu2 %v2963_v8, %s7015_s26  ;;  %v2623_v46 = vrot.slane %v2621_v45, 5  ;;  %v6187_v8 = vld [vmem:[#allocation3 + $0x108] sm:$0xf] }
 0x26a   : > { %v3041_v25 = vpop.permute.xlu0 %3040  ;;  %v6057_v12 = vld [vmem:[#allocation3 + $0xc] sm:$0xf0]  ;;  %v3596_v44 = vsel %vm7316_vm10, %v3591_v50, %v3595_v34  ;;  %v6188_v62 = vor.u32 %v6409_v48, %v6187_v8  ;;  %v3382_v34 = vld [vmem:[#allocation2 + $0x7c] sm:$0xf] }
 0x26b   : > { %3134 = vst.msk [vmem:[#allocation3 + $0x28] sm:$0xf] %vm3130_vm9, %v3041_v25  ;;  %v6060_v33 = vor.u32 %v6375_v59, %v6057_v12  ;;  %v3039_v49 = vpop.permute.xlu2 %3038  ;;  %v6377_v55 = vld [vmem:[#allocation3 + $0x10] sm:$0xf0]  ;;  %v2624_v59 = vsel %vm7316_vm10, %v2619_v19, %v2623_v46  ;;  %v2862_v12 = vld [vmem:[#allocation2 + $0x9c] sm:$0xe] }
 0x26c   : > { %3133 = vst.msk [vmem:[#allocation3 + $0x1c] sm:$0xf] %vm3130_vm9, %v3039_v49  ;;  %v6033_v16 = vrot.slane %v2862_v12, 9  ;;  %v3381_v49 = vld [vmem:[#allocation2 + $0x78] sm:$0xf]  ;;  %v3607_v8 = vshll.u32 %v3382_v34, 16 }
 0x26d   : > { %4944 = vmatmul.bf16.vlgmr.msra.gmra.mxu1 %v6060_v33  ;;  %v8665_v33 = vld [vmem:[#allocation2 + $0xa0] sm:$0xf] }
 0x26e   : > { %3060 = vrot.lane.b32.xlu1 %v2970_v57, %s7015_s26  ;;  %4905 = vmatmul.bf16.gmra.mxu0 %v6176_v53  ;;  %v3696_v53 = vrot.slane %v3694_v63, 4  ;;  %v3008_v27 = vrot.slane %v8665_v33, 5  ;;  %v2847_v19 = vld [vmem:[#allocation2 + $0x60] sm:$0xe]  ;;  %v8707_v33 = vrot.slane %v3607_v8, 5 }
 0x270   : > { %3817 = vrot.lane.b32.xlu0 %v3586_v7, %s7016_s4  ;;  %v3796_v37 = vpop.permute.xlu1 %3795  ;;  %v6063_v15 = vld [vmem:[#allocation3 + $0x8] sm:$0xf]  ;;  %v3009_v9 = vsel %vm7730_vm14, %v6033_v16, %v3008_v27  ;;  %v3010_v18 = vrot.slane %v3008_v27, 4  ;;  %v2304_v16 = vld [vmem:[#allocation2 + $0xa8] sm:$0xf]  ;;  %v3611_v27 = vshrl.u32 %v3382_v34, 16 }
 0x271   : > { %v3856_v3 = vrot.slane %v3796_v37, 4  ;;  %v6064_v13 = vor.u32 %v6377_v55, %v6063_v15  ;;  %4213 = vrot.lane.b32.xlu2 %v4119_v24, %s7018_s13  ;;  %v4005_v24 = vld [vmem:[#allocation2 + $0x68] sm:$0x1]  ;;  %v3700_v15 = vor.u32 %v3699_v28, %v3696_v53  ;;  %v3707_v53 = vshrl.u32 %v8669_v11, 16 }
 0x272   : > { %v4198_v54 = vpop.permute.xlu0 %4197  ;;  %v4128_v0 = vrot.slane %v4005_v24, 5  ;;  %v3613_v24 = vrot.slane %v3611_v27, 4 }
 0x273   : > { %6325 = vmatmul.msk.bf16.vlgmr.msra.gmra.mxu2 %vm4794_vm2, %v6064_v13  ;;  %v3889_v20 = vsel %vm3885_vm11, %v3856_v3, %v3796_v37  ;;  %v3235_v30 = vpop.permute.xlu2 %3234  ;;  %v3178_v37 = vld [vmem:[#allocation2 + $0x6c] sm:$0xf]  ;;  %v3598_v3 = vshrl.u32 %v3381_v49, 16  ;;  %v3601_v13 = vshll.u32 %v3381_v49, 16  ;;  %v3701_v56 = vrot.slane %v3700_v15, 4 }
 0x274   : > { %3328 = vst.msk [vmem:[#allocation3 + $0x28] sm:$0xf] %vm3324_vm15, %v3235_v30  ;;  %v4129_v6 = vsel %vm7730_vm14, %v4127_v14, %v4128_v0  ;;  %v2626_v49 = vshrl.u32 %v2304_v16, 16 }
 0x275   : > { %3956 = vst.msk [vmem:[#allocation3 + $0x28] sm:$0xff] %vm8574_vm1, %v3889_v20  ;;  %v3600_v20 = vrot.slane %v3598_v3, 4  ;;  %v3603_v23 = vrot.slane %v3601_v13, 5  ;;  %v2305_v3 = vld [vmem:[#allocation2 + $0xac] sm:$0xf] }
 0x276   : > { %4217 = vrot.lane.b32.xlu1 %v4126_v61, %s7018_s13  ;;  %v2628_v0 = vrot.slane %v2626_v49, 4 }
 0x278   : > { %3064 = vrot.lane.b32.xlu0 %v2977_v17, %s7015_s26  ;;  %v3233_v36 = vpop.permute.xlu1 %3232  ;;  %v8685_v17 = vrot.slane %v3703_v31, 5 }
 0x279   : > { %3327 = vst.msk [vmem:[#allocation3 + $0x1c] sm:$0xf] %vm3324_vm15, %v3233_v36  ;;  %3815 = vrot.lane.b32.xlu2 %v3572_v51, %s7016_s4  ;;  %v3604_v51 = vor.u32 %v3603_v23, %v3600_v20 }
 0x27a   : > { %v8655_v25 = vpop.permute.xlu0 %3799  ;;  %3955 = vst.msk [vmem:[#allocation3 + $0x1c] sm:$0xff] %vm8574_vm1, %v3888_v39  ;;  %v3706_v46 = vsel %vm7316_vm10, %v3701_v56, %v8685_v17  ;;  %v2864_v39 = vld [vmem:[#allocation2 + $0xa4] sm:$0x1] }
 0x27b   : > { %4292 = vst.msk [vmem:[#allocation3 + $0x20] sm:$0xf] %vm4289_vm0, %v4198_v54  ;;  %v3798_v57 = vpop.permute.xlu2 %3797  ;;  %v4008_v54 = vld [vmem:[#allocation2 + $0x74] sm:$0x1]  ;;  %v3858_v48 = vrot.slane %v8655_v25, 4  ;;  %v3605_v12 = vrot.slane %v3604_v51, 4 }
 0x27c   : > { %v6069_v32 = vld [vmem:[#allocation3 + $0x24] sm:$0xf0]  ;;  %v3857_v40 = vrot.slane %v3798_v57, 4  ;;  %v4135_v41 = vrot.slane %v4008_v54, 5 }
 0x27d   : > { %v3610_v29 = vsel %vm7316_vm10, %v3605_v12, %v8707_v33 }
 0x27e   : > { %3819 = vrot.lane.b32.xlu1 %v3596_v44, %s7016_s4  ;;  %4910 = vmatmul.bf16.gmra.mxu0 %v6188_v62  ;;  %v3890_v36 = vsel %vm3885_vm11, %v3857_v40, %v3798_v57  ;;  %v4136_v38 = vsel %vm7730_vm14, %v4134_v21, %v4135_v41  ;;  %v6028_v44 = vrot.slane %v2847_v19, 9  ;;  %v3011_v62 = vrot.slane %v2864_v39, 5  ;;  %v8709_v57 = vld [vmem:[#allocation2 + $0x70] sm:$0xf]  ;;  %v3397_v40 = vld [vmem:[#allocation2 + $0xb8] sm:$0xf] }
 0x27f   : > { %v2980_v11 = vrot.slane %v8709_v57, 5  ;;  %v2635_v19 = vshll.u32 %v2305_v3, 16 }
 0x280   : > { %2747 = vrot.lane.b32.xlu0 %v2624_v59, %s7014_s25  ;;  %v4200_v7 = vpop.permute.xlu1 %4199  ;;  %v2974_v28 = vsel %vm7730_vm14, %v6028_v44, %v2973_v60  ;;  %v2852_v60 = vld [vmem:[#allocation2 + $0x74] sm:$0x1] }
 0x281   : > { %4293 = vst.msk [vmem:[#allocation3 + $0x2c] sm:$0xf] %vm4289_vm0, %v4200_v7  ;;  %v6378_v55 = vld [vmem:[#allocation3 + $0x1c] sm:$0xf]  ;;  %3252 = vrot.lane.b32.xlu2 %v3176_v4, %s7017_s10  ;;  %v3891_v4 = vsel %vm3885_vm11, %v3858_v48, %v8655_v25  ;;  %v3012_v25 = vsel %vm7730_vm14, %v3010_v18, %v3011_v62  ;;  %v2982_v15 = vrot.slane %v2980_v11, 4  ;;  %v2983_v31 = vrot.slane %v2852_v60, 5 }
 0x282   : > { %v3237_v43 = vpop.permute.xlu0 %3236  ;;  %v6072_v42 = vor.u32 %v6378_v55, %v6069_v32  ;;  %v6075_v10 = vld [vmem:[#allocation3 + $0x20] sm:$0xf]  ;;  %v2629_v55 = vshll.u32 %v2304_v16, 16  ;;  %v3709_v32 = vrot.slane %v3707_v53, 4  ;;  %v4006_v16 = vld [vmem:[#allocation2 + $0x6c] sm:$0xe] }
 0x283   : > { %v3045_v61 = vpop.permute.xlu2 %3044 }
 0x284   : > { %4949 = vmatmul.bf16.gmra.mxu1 %v6072_v42  ;;  %3136 = vst.msk [vmem:[#allocation3 + $0x40] sm:$0xf] %vm3130_vm9, %v3045_v61  ;;  %v3395_v42 = vld [vmem:[#allocation2 + $0xb0] sm:$0x1]  ;;  %v2631_v54 = vrot.slane %v2629_v55, 5  ;;  %v6044_v55 = vrot.slane %v4006_v16, 9 }
 0x286   : > { %3256 = vrot.lane.b32.xlu1 %v3178_v37, %s7017_s10  ;;  %v3179_v37 = vld [vmem:[#allocation2 + $0x70] sm:$0xf] }
 0x288   : > { %3082 = vrot.lane.b32.xlu0 %v3009_v9, %s7015_s26  ;;  %v3043_v45 = vpop.permute.xlu1 %3042  ;;  %v6380_v26 = vld [vmem:[#allocation3 + $0x28] sm:$0xf0]  ;;  %v3383_v9 = vld [vmem:[#allocation2 + $0x80] sm:$0x1] }
 0x289   : > { %3135 = vst.msk [vmem:[#allocation3 + $0x34] sm:$0xf] %vm3130_vm9, %v3043_v45  ;;  %v6076_v30 = vor.u32 %v6380_v26, %v6075_v10  ;;  %4219 = vrot.lane.b32.xlu2 %v4129_v6, %s7018_s13  ;;  %v3710_v45 = vor.u32 %v3709_v32, %v8685_v17  ;;  %v3713_v26 = vshll.u32 %v3395_v42, 16  ;;  %v3188_v6 = vld [vmem:[#allocation2 + $0xa8] sm:$0xf]  ;;  %v3617_v34 = vshll.u32 %v3383_v9, 16 }
 0x28a   : > { %v4204_v50 = vpop.permute.xlu0 %4203  ;;  %3329 = vst.msk [vmem:[#allocation3 + $0x34] sm:$0xf] %vm3324_vm15, %v3237_v43 }
 0x28b   : > { %3957 = vst.msk [vmem:[#allocation3 + $0x34] sm:$0xff] %vm8574_vm1, %v3890_v36  ;;  %6326 = vmatmul.msk.bf16.gmra.mxu2 %vm4794_vm2, %v6076_v30  ;;  %v4202_v63 = vpop.permute.xlu2 %4201  ;;  %v2984_v30 = vsel %vm7730_vm14, %v2982_v15, %v2983_v31  ;;  %v2632_v36 = vor.u32 %v2631_v54, %v2628_v0  ;;  %v3711_v39 = vrot.slane %v3710_v45, 4  ;;  %v3715_v51 = vrot.slane %v3713_v26, 5  ;;  %v2306_v15 = vld [vmem:[#allocation2 + $0xb0] sm:$0x1] }
 0x28c   : > { %4294 = vst.msk [vmem:[#allocation3 + $0x38] sm:$0xf] %vm4289_vm0, %v4202_v63  ;;  %v3619_v63 = vrot.slane %v3617_v34, 5  ;;  %v4133_v31 = vsel %vm7730_vm14, %v6044_v55, %v4132_v58  ;;  %v3180_v0 = vld [vmem:[#allocation2 + $0x78] sm:$0xf] }
 0x28d   : > { %v2633_v62 = vrot.slane %v2632_v36, 4  ;;  %v2850_v36 = vld [vmem:[#allocation2 + $0x6c] sm:$0xe] }
 0x28e   : > { %3837 = vrot.lane.b32.xlu1 %v3706_v46, %s7016_s4  ;;  %v3727_v46 = vshll.u32 %v3397_v40, 16 }
 0x290   : > { %4223 = vrot.lane.b32.xlu0 %v4136_v38, %s7018_s13  ;;  %v3239_v59 = vpop.permute.xlu1 %3238  ;;  %v3731_v38 = vshrl.u32 %v3397_v40, 16  ;;  %v8746_v12 = vrot.slane %v3727_v46, 5  ;;  %v2645_v40 = vshll.u32 %v2306_v15, 16  ;;  %v562_v46 = vld [vmem:[#allocation2 + $0xc8] sm:$0x1] }
 0x291   : > { %3330 = vst.msk [vmem:[#allocation3 + $0x40] sm:$0xf] %vm3324_vm15, %v3239_v59  ;;  %3062 = vrot.lane.b32.xlu2 %v2974_v28, %s7015_s26  ;;  %v2637_v59 = vrot.slane %v2635_v19, 5  ;;  %v3398_v28 = vld [vmem:[#allocation2 + $0xbc] sm:$0x1] }
 0x292   : > { %v3047_v7 = vpop.permute.xlu0 %3046  ;;  %3958 = vst.msk [vmem:[#allocation3 + $0x40] sm:$0xff] %vm8574_vm1, %v3891_v4  ;;  %v6381_v10 = vld [vmem:[#allocation3 + $0x34] sm:$0xf]  ;;  %v3716_v4 = vsel %vm7316_vm10, %v3711_v39, %v3715_v51  ;;  %v3737_v49 = vshll.u32 %v3398_v28, 16  ;;  %v2647_v26 = vrot.slane %v2645_v40, 5  ;;  %v563_v51 = vsel %vm7260_vm4, 0, %v562_v46 }
 0x293   : > { %4295 = vst.msk [vmem:[#allocation3 + $0x44] sm:$0xf] %vm4289_vm0, %v4204_v50  ;;  %v3804_v43 = vpop.permute.xlu2 %3803  ;;  %v6087_v14 = vld [vmem:[#allocation3 + $0x38] sm:$0xf]  ;;  %v3614_v50 = vor.u32 %v3613_v24, %v8707_v33  ;;  %v3733_v33 = vrot.slane %v3731_v38, 4 }
 0x294   : > { %3137 = vst.msk [vmem:[#allocation3 + $0x4c] sm:$0xf] %vm3130_vm9, %v3047_v7  ;;  %v3860_v8 = vrot.slane %v3804_v43, 4  ;;  %v8787_v39 = vld [vmem:[#allocation2 + $0xac] sm:$0xf] }
 0x295   : > { %v3615_v44 = vrot.slane %v3614_v50, 4  ;;  %v3734_v60 = vor.u32 %v3733_v33, %v8746_v12  ;;  %564 = vst [vmem:[#allocation2 + $0xc8] sm:$0x1] %v563_v51  ;;  %v3181_v15 = vld [vmem:[#allocation2 + $0x7c] sm:$0xf] }
 0x296   : > { %3084 = vrot.lane.b32.xlu1 %v3012_v25, %s7015_s26  ;;  %v3893_v7 = vsel %vm3885_vm11, %v3860_v8, %v3804_v43  ;;  %v2639_v25 = vshrl.u32 %v2305_v3, 16  ;;  %v8824_v40 = vld [vmem:[#allocation2 + $0x88] sm:$0xf] }
 0x297   : > { %v3620_v27 = vsel %vm7316_vm10, %v3615_v44, %v3619_v63  ;;  %v3735_v24 = vrot.slane %v3734_v60, 4  ;;  %v6029_v44 = vrot.slane %v2850_v36, 9  ;;  %v3191_v60 = vld [vmem:[#allocation2 + $0xb8] sm:$0xf] }
 0x298   : > { %3821 = vrot.lane.b32.xlu0 %v3610_v29, %s7016_s4  ;;  %v3802_v13 = vpop.permute.xlu1 %3801  ;;  %v2638_v29 = vsel %vm7316_vm10, %v2633_v62, %v2637_v59  ;;  %v2641_v43 = vrot.slane %v2639_v25, 4 }
 0x299   : > { %v3859_v61 = vrot.slane %v3802_v13, 4  ;;  %v6081_v56 = vld [vmem:[#allocation3 + $0x3c] sm:$0xf0]  ;;  %3258 = vrot.lane.b32.xlu2 %v3179_v37, %s7017_s10  ;;  %v3739_v37 = vrot.slane %v3737_v49, 5  ;;  %v4011_v49 = vld [vmem:[#allocation2 + $0x80] sm:$0x1] }
 0x29a   : > { %v3243_v21 = vpop.permute.xlu0 %3242  ;;  %v6084_v41 = vor.u32 %v6381_v10, %v6081_v56  ;;  %v6383_v20 = vld [vmem:[#allocation3 + $0x40] sm:$0xf0]  ;;  %v2642_v54 = vor.u32 %v2641_v43, %v2637_v59  ;;  %v3015_v59 = vrot.slane %v8787_v39, 5 }
 0x29b   : > { %v6088_v23 = vor.u32 %v6383_v20, %v6087_v14  ;;  %v3892_v17 = vsel %vm3885_vm11, %v3859_v61, %v3802_v13  ;;  %v3241_v48 = vpop.permute.xlu2 %3240  ;;  %v3740_v61 = vsel %vm7316_vm10, %v3735_v24, %v3739_v37  ;;  %v8775_v10 = vld [vmem:[#allocation2 + $0x7c] sm:$0xf]  ;;  %v6045_v20 = vrot.slane %v4009_v47, 9 }
 0x29c   : > { %4954 = vmatmul.bf16.gmra.mxu1 %v6084_v41  ;;  %3331 = vst.msk [vmem:[#allocation3 + $0x4c] sm:$0xf] %vm3324_vm15, %v3241_v48  ;;  %v2643_v45 = vrot.slane %v2642_v54, 4  ;;  %v1034_v55 = vld [vmem:[#allocation2 + $0xc8] sm:$0x1] }
 0x29d   : > { %6327 = vmatmul.msk.bf16.gmra.mxu2 %vm4794_vm2, %v6088_v23  ;;  %3959 = vst.msk [vmem:[#allocation3 + $0x4c] sm:$0xff] %vm8574_vm1, %v3892_v17  ;;  %v4139_v23 = vrot.slane %v8775_v10, 5  ;;  %v2865_v17 = vld [vmem:[#allocation2 + $0xa8] sm:$0xe] }
 0x29e   : > { %3276 = vrot.lane.b32.xlu1 %v3188_v6, %s7017_s10  ;;  %v3189_v6 = vld [vmem:[#allocation2 + $0xac] sm:$0xf]  ;;  %v2648_v19 = vsel %vm7316_vm10, %v2643_v45, %v2647_v26  ;;  %v6034_v62 = vrot.slane %v2865_v17, 9 }
 0x29f   : > { %v4140_v38 = vsel %vm7730_vm14, %v6045_v20, %v4139_v23 }
 0x2a0   : > { %3068 = vrot.lane.b32.xlu0 %v2984_v30, %s7015_s26  ;;  %v3049_v18 = vpop.permute.xlu1 %3048  ;;  %v3016_v57 = vsel %vm7730_vm14, %v6034_v62, %v3015_v59  ;;  %v3400_v62 = vld [vmem:[#allocation2 + $0xc4] sm:$0xf] }
 0x2a1   : > { %3138 = vst.msk [vmem:[#allocation3 + $0x58] sm:$0xf] %vm3130_vm9, %v3049_v18  ;;  %3839 = vrot.lane.b32.xlu2 %v3716_v4, %s7016_s4  ;;  %v3396_v18 = vld [vmem:[#allocation2 + $0xb4] sm:$0xf]  ;;  %v3384_v4 = vld [vmem:[#allocation2 + $0x84] sm:$0xf] }
 0x2a2   : > { %v8751_v53 = vpop.permute.xlu0 %3805  ;;  %3332 = vst.msk [vmem:[#allocation3 + $0x58] sm:$0xf] %vm3324_vm15, %v3243_v21  ;;  %v3721_v25 = vshll.u32 %v3396_v18, 16 }
 0x2a3   : > { %3960 = vst.msk [vmem:[#allocation3 + $0x58] sm:$0xff] %vm8574_vm1, %v3893_v7  ;;  %v4208_v32 = vpop.permute.xlu2 %4207  ;;  %v3861_v8 = vrot.slane %v8751_v53, 4  ;;  %v2981_v7 = vsel %vm7730_vm14, %v6029_v44, %v2980_v11  ;;  %v3625_v11 = vshll.u32 %v3384_v4, 16 }
 0x2a4   : > { %4297 = vst.msk [vmem:[#allocation3 + $0x5c] sm:$0xf] %vm4289_vm0, %v4208_v32  ;;  %v6384_v3 = vld [vmem:[#allocation3 + $0x4c] sm:$0xf]  ;;  %v3723_v43 = vrot.slane %v3721_v25, 5 }
 0x2a5   : > { %v3894_v28 = vsel %vm3885_vm11, %v3861_v8, %v8751_v53  ;;  %v3622_v53 = vshrl.u32 %v3384_v4, 16  ;;  %v2867_v4 = vld [vmem:[#allocation2 + $0xb0] sm:$0x1]  ;;  %v2855_v25 = vld [vmem:[#allocation2 + $0x80] sm:$0x1] }
 0x2a6   : > { %3823 = vrot.lane.b32.xlu1 %v3620_v27, %s7016_s4  ;;  %v3718_v27 = vshrl.u32 %v3396_v18, 16 }
 0x2a8   : > { %2749 = vrot.lane.b32.xlu0 %v2638_v29, %s7014_s25  ;;  %v4206_v42 = vpop.permute.xlu1 %4205  ;;  %v873_v29 = vrot.slane %v8033_v22, 4  ;;  %v3720_v32 = vrot.slane %v3718_v27, 4  ;;  %v2853_v22 = vld [vmem:[#allocation2 + $0x78] sm:$0xe]  ;;  %v3183_v27 = vld [vmem:[#allocation2 + $0x88] sm:$0xf] }
 0x2a9   : > { %4296 = vst.msk [vmem:[#allocation3 + $0x50] sm:$0xf] %vm4289_vm0, %v4206_v42  ;;  %4221 = vrot.lane.b32.xlu2 %v4133_v31, %s7018_s13  ;;  %v8817_v42 = vld [vmem:[#allocation2 + $0x7c] sm:$0xf]  ;;  %v4141_v31 = vrot.slane %v4139_v23, 4 }
 0x2aa   : > { %v3053_v9 = vpop.permute.xlu0 %3052  ;;  %v6093_v13 = vld [vmem:[#allocation3 + $0x54] sm:$0xf0]  ;;  %v1035_v37 = vsel %vm7272_vm6, %v873_v29, %v1034_v55  ;;  %v2987_v54 = vrot.slane %v8817_v42, 5 }
 0x2ab   : > { %3140 = vst.msk [vmem:[#allocation3 + $0x70] sm:$0xf] %vm3130_vm9, %v3053_v9  ;;  %v6096_v14 = vor.u32 %v6384_v3, %v6093_v13  ;;  %v3051_v58 = vpop.permute.xlu2 %3050  ;;  %v6386_v56 = vld [vmem:[#allocation3 + $0x58] sm:$0xf0]  ;;  %v4142_v9 = vrot.slane %v4011_v49, 5  ;;  %v3624_v3 = vrot.slane %v3622_v53, 4 }
 0x2ac   : > { %3139 = vst.msk [vmem:[#allocation3 + $0x64] sm:$0xf] %vm3130_vm9, %v3051_v58  ;;  %v3627_v13 = vrot.slane %v3625_v11, 5  ;;  %v3724_v58 = vor.u32 %v3723_v43, %v3720_v32  ;;  %v3017_v11 = vrot.slane %v3015_v59, 4  ;;  %v2989_v55 = vrot.slane %v2987_v54, 4 }
 0x2ad   : > { %4959 = vmatmul.bf16.gmra.mxu1 %v6096_v14  ;;  %1036 = vst [vmem:[#allocation2 + $0xc8] sm:$0x1] %v1035_v37  ;;  %v4143_v26 = vsel %vm7730_vm14, %v4141_v31, %v4142_v9  ;;  %v2990_v32 = vrot.slane %v2855_v25, 5  ;;  %v3635_v59 = vshrl.u32 %v8824_v40, 16 }
 0x2ae   : > { %3260 = vrot.lane.b32.xlu1 %v3180_v0, %s7017_s10  ;;  %v6030_v0 = vrot.slane %v2853_v22, 9 }
 0x2b0   : > { %3843 = vrot.lane.b32.xlu0 %v3740_v61, %s7016_s4  ;;  %v3808_v21 = vpop.permute.xlu1 %3807  ;;  %v6099_v41 = vld [vmem:[#allocation3 + $0x50] sm:$0xf]  ;;  %v3399_v61 = vld [vmem:[#allocation2 + $0xc0] sm:$0xf]  ;;  %v2988_v20 = vsel %vm7730_vm14, %v6030_v0, %v2987_v54 }
 0x2b1   : > { %v3862_v30 = vrot.slane %v3808_v21, 4  ;;  %v6100_v50 = vor.u32 %v6386_v56, %v6099_v41  ;;  %3278 = vrot.lane.b32.xlu2 %v3189_v6, %s7017_s10  ;;  %v3631_v41 = vshll.u32 %v8824_v40, 16  ;;  %v3742_v23 = vshrl.u32 %v3399_v61, 16 }
 0x2b2   : > { %v4210_v34 = vpop.permute.xlu0 %4209  ;;  %v3745_v6 = vshll.u32 %v3399_v61, 16  ;;  %v3637_v61 = vrot.slane %v3635_v59, 4 }
 0x2b3   : > { %6328 = vmatmul.msk.bf16.gmra.mxu2 %vm4794_vm2, %v6100_v50  ;;  %v3895_v48 = vsel %vm3885_vm11, %v3862_v30, %v3808_v21  ;;  %v3247_v63 = vpop.permute.xlu2 %3246  ;;  %v3628_v21 = vor.u32 %v3627_v13, %v3624_v3  ;;  %v3725_v30 = vrot.slane %v3724_v58, 4  ;;  %v8836_v46 = vrot.slane %v3631_v41, 5  ;;  %v8865_v3 = vld [vmem:[#allocation2 + $0xb8] sm:$0xf]  ;;  %v3386_v58 = vld [vmem:[#allocation2 + $0x8c] sm:$0x1] }
 0x2b4   : > { %3334 = vst.msk [vmem:[#allocation3 + $0x70] sm:$0xf] %vm3324_vm15, %v3247_v63  ;;  %v3744_v51 = vrot.slane %v3742_v23, 4  ;;  %v3747_v8 = vrot.slane %v3745_v6, 5  ;;  %v2991_v13 = vsel %vm7730_vm14, %v2989_v55, %v2990_v32  ;;  %v3022_v40 = vrot.slane %v8865_v3, 5 }
 0x2b5   : > { %3962 = vst.msk [vmem:[#allocation3 + $0x70] sm:$0xff] %vm8574_vm1, %v3895_v48  ;;  %v2307_v48 = vld [vmem:[#allocation2 + $0xb4] sm:$0xf]  ;;  %v3730_v44 = vsel %vm7316_vm10, %v3725_v30, %v8746_v12 }
 0x2b6   : > { %2751 = vrot.lane.b32.xlu1 %v2648_v19, %s7014_s25  ;;  %v3629_v19 = vrot.slane %v3628_v21, 4  ;;  %v2650_v12 = vshrl.u32 %v2307_v48, 16  ;;  %v3748_v29 = vor.u32 %v3747_v8, %v3744_v51  ;;  %v3401_v21 = vld [vmem:[#allocation2 + $0xc8] sm:$0x1]  ;;  %v3024_v6 = vrot.slane %v3022_v40, 4 }
 0x2b8   : > { %4225 = vrot.lane.b32.xlu0 %v4140_v38, %s7018_s13  ;;  %v3245_v33 = vpop.permute.xlu1 %3244  ;;  %v2652_v43 = vrot.slane %v2650_v12, 4 }
 0x2b9   : > { %3333 = vst.msk [vmem:[#allocation3 + $0x64] sm:$0xf] %vm3324_vm15, %v3245_v33  ;;  %3066 = vrot.lane.b32.xlu2 %v2981_v7, %s7015_s26  ;;  %v2653_v7 = vshll.u32 %v2307_v48, 16 }
 0x2ba   : > { %v8806_v16 = vpop.permute.xlu0 %3811  ;;  %3961 = vst.msk [vmem:[#allocation3 + $0x64] sm:$0xff] %vm8574_vm1, %v3894_v28  ;;  %v3634_v28 = vsel %vm7316_vm10, %v3629_v19, %v8836_v46 }
 0x2bb   : > { %4298 = vst.msk [vmem:[#allocation3 + $0x68] sm:$0xf] %vm4289_vm0, %v4210_v34  ;;  %v3810_v24 = vpop.permute.xlu2 %3809  ;;  %v3864_v53 = vrot.slane %v8806_v16, 4  ;;  %v2655_v22 = vrot.slane %v2653_v7, 5 }
 0x2bc   : > { %v6105_v10 = vld [vmem:[#allocation3 + $0x6c] sm:$0xf0]  ;;  %v3863_v50 = vrot.slane %v3810_v24, 4 }
 0x2bd   : > { %v3897_v39 = vsel %vm3885_vm11, %v3864_v53, %v8806_v16  ;;  %v2656_v16 = vor.u32 %v2655_v22, %v2652_v43  ;;  %v3389_v43 = vld [vmem:[#allocation2 + $0x98] sm:$0x1] }
 0x2be   : > { %3086 = vrot.lane.b32.xlu1 %v3016_v57, %s7015_s26  ;;  %v3896_v33 = vsel %vm3885_vm11, %v3863_v50, %v3810_v24  ;;  %v3751_v57 = vshll.u32 %v3400_v62, 16  ;;  %v3749_v24 = vrot.slane %v3748_v29, 4  ;;  %v3388_v50 = vld [vmem:[#allocation2 + $0x94] sm:$0xf]  ;;  %v3665_v59 = vshll.u32 %v3389_v43, 16 }
 0x2c0   : > { %3282 = vrot.lane.b32.xlu0 %v3191_v60, %s7017_s10  ;;  %v4212_v14 = vpop.permute.xlu1 %4211  ;;  %v3018_v60 = vrot.slane %v2867_v4, 5  ;;  %v3753_v37 = vrot.slane %v3751_v57, 5  ;;  %v3655_v4 = vshll.u32 %v3388_v50, 16 }
 0x2c1   : > { %4299 = vst.msk [vmem:[#allocation3 + $0x74] sm:$0xf] %vm4289_vm0, %v4212_v14  ;;  %v6387_v47 = vld [vmem:[#allocation3 + $0x64] sm:$0xf]  ;;  %3262 = vrot.lane.b32.xlu2 %v3181_v15, %s7017_s10  ;;  %v8857_v15 = vld [vmem:[#allocation2 + $0xb8] sm:$0xf] }
 0x2c2   : > { %v3249_v56 = vpop.permute.xlu0 %3248  ;;  %v6108_v45 = vor.u32 %v6387_v47, %v6105_v10  ;;  %v6111_v36 = vld [vmem:[#allocation3 + $0x68] sm:$0xf]  ;;  %v3019_v31 = vsel %vm7730_vm14, %v3017_v11, %v3018_v60  ;;  %v3755_v14 = vshrl.u32 %v3400_v62, 16  ;;  %v2659_v0 = vshll.u32 %v8857_v15, 16  ;;  %v2870_v47 = vld [vmem:[#allocation2 + $0xbc] sm:$0x1] }
 0x2c3   : > { %v3057_v34 = vpop.permute.xlu2 %3056  ;;  %v3754_v54 = vsel %vm7316_vm10, %v3749_v24, %v3753_v37  ;;  %v3025_v30 = vrot.slane %v2870_v47, 5  ;;  %v3761_v62 = vshll.u32 %v3401_v21, 16  ;;  %v8898_v11 = vrot.slane %v3655_v4, 5  ;;  %v3192_v24 = vld [vmem:[#allocation2 + $0xc0] sm:$0xf] }
 0x2c4   : > { %4964 = vmatmul.bf16.gmra.mxu1 %v6108_v45  ;;  %3142 = vst.msk [vmem:[#allocation3 + $0x88] sm:$0xf] %vm3130_vm9, %v3057_v34  ;;  %v2657_v45 = vrot.slane %v2656_v16, 4  ;;  %v3757_v41 = vrot.slane %v3755_v14, 4  ;;  %v2309_v16 = vld [vmem:[#allocation2 + $0xbc] sm:$0x1] }
 0x2c5   : > { %v3763_v57 = vrot.slane %v3761_v62, 5  ;;  %v2311_v21 = vld [vmem:[#allocation2 + $0xc4] sm:$0xf]  ;;  %v2868_v62 = vld [vmem:[#allocation2 + $0xb4] sm:$0xe] }
 0x2c6   : > { %4227 = vrot.lane.b32.xlu1 %v4143_v26, %s7018_s13  ;;  %v8880_v26 = vrot.slane %v2659_v0, 5  ;;  %v2312_v4 = vld [vmem:[#allocation2 + $0xc8] sm:$0x1] }
 0x2c8   : > { %3070 = vrot.lane.b32.xlu0 %v2988_v20, %s7015_s26  ;;  %v3055_v38 = vpop.permute.xlu1 %3054  ;;  %v6389_v17 = vld [vmem:[#allocation3 + $0x70] sm:$0xf0] }
 0x2c9   : > { %3141 = vst.msk [vmem:[#allocation3 + $0x7c] sm:$0xf] %vm3130_vm9, %v3055_v38  ;;  %v6112_v63 = vor.u32 %v6389_v17, %v6111_v36  ;;  %3841 = vrot.lane.b32.xlu2 %v3730_v44, %s7016_s4  ;;  %v3638_v38 = vor.u32 %v3637_v61, %v8836_v46  ;;  %v3641_v17 = vshll.u32 %v3386_v58, 16  ;;  %v3182_v61 = vld [vmem:[#allocation2 + $0x84] sm:$0xf]  ;;  %v3667_v58 = vrot.slane %v3665_v59, 5 }
 0x2ca   : > { %v4216_v18 = vpop.permute.xlu0 %4215  ;;  %3335 = vst.msk [vmem:[#allocation3 + $0x7c] sm:$0xf] %vm3324_vm15, %v3249_v56  ;;  %v3190_v56 = vld [vmem:[#allocation2 + $0xb4] sm:$0xf] }
 0x2cb   : > { %3963 = vst.msk [vmem:[#allocation3 + $0x7c] sm:$0xff] %vm8574_vm1, %v3896_v33  ;;  %6329 = vmatmul.msk.bf16.gmra.mxu2 %vm4794_vm2, %v6112_v63  ;;  %v4214_v49 = vpop.permute.xlu2 %4213  ;;  %v2662_v63 = vsel %vm7316_vm10, %v2657_v45, %v8880_v26  ;;  %v3026_v33 = vsel %vm7730_vm14, %v3024_v6, %v3025_v30  ;;  %v3639_v12 = vrot.slane %v3638_v38, 4  ;;  %v3643_v7 = vrot.slane %v3641_v17, 5 }
 0x2cc   : > { %4300 = vst.msk [vmem:[#allocation3 + $0x80] sm:$0xf] %vm4289_vm0, %v4214_v49  ;;  %v2663_v49 = vshrl.u32 %v8857_v15, 16  ;;  %v8913_v15 = vld [vmem:[#allocation2 + $0x88] sm:$0xf] }
 0x2cd   : > { %v3644_v55 = vsel %vm7316_vm10, %v3639_v12, %v3643_v7  ;;  %v6035_v12 = vrot.slane %v2868_v62, 9  ;;  %v3184_v7 = vld [vmem:[#allocation2 + $0x90] sm:$0xf] }
 0x2ce   : > { %3825 = vrot.lane.b32.xlu1 %v3634_v28, %s7016_s4  ;;  %v3659_v28 = vshrl.u32 %v3388_v50, 16  ;;  %v2683_v50 = vshll.u32 %v2311_v21, 16 }
 0x2d0   : > { %3266 = vrot.lane.b32.xlu0 %v3183_v27, %s7017_s10  ;;  %v3251_v42 = vpop.permute.xlu1 %3250  ;;  %v3661_v60 = vrot.slane %v3659_v28, 4  ;;  %v3193_v28 = vld [vmem:[#allocation2 + $0xc4] sm:$0xf] }
 0x2d1   : > { %3336 = vst.msk [vmem:[#allocation3 + $0x88] sm:$0xf] %vm3324_vm15, %v3251_v42  ;;  %3088 = vrot.lane.b32.xlu2 %v3019_v31, %s7015_s26  ;;  %v509_v31 = vld [vmem:[#allocation2 + $0xcc] sm:$0x1] }
 0x2d2   : > { %v3059_v9 = vpop.permute.xlu0 %3058  ;;  %3964 = vst.msk [vmem:[#allocation3 + $0x88] sm:$0xff] %vm8574_vm1, %v3897_v39  ;;  %v6390_v36 = vld [vmem:[#allocation3 + $0x7c] sm:$0xf]  ;;  %v3662_v39 = vor.u32 %v3661_v60, %v8898_v11 }
 0x2d3   : > { %4301 = vst.msk [vmem:[#allocation3 + $0x8c] sm:$0xf] %vm4289_vm0, %v4216_v18  ;;  %v3816_v10 = vpop.permute.xlu2 %3815  ;;  %v6123_v23 = vld [vmem:[#allocation3 + $0x80] sm:$0xf]  ;;  %v3758_v18 = vor.u32 %v3757_v41, %v3753_v37  ;;  %v4012_v37 = vld [vmem:[#allocation2 + $0x84] sm:$0xe] }
 0x2d4   : > { %3143 = vst.msk [vmem:[#allocation3 + $0x94] sm:$0xf] %vm3130_vm9, %v3059_v9  ;;  %v3866_v27 = vrot.slane %v3816_v10, 4  ;;  %v2665_v9 = vrot.slane %v2663_v49, 4  ;;  %v6046_v0 = vrot.slane %v4012_v37, 9 }
 0x2d5   : > { %v3759_v29 = vrot.slane %v3758_v18, 4  ;;  %v3387_v49 = vld [vmem:[#allocation2 + $0x90] sm:$0xf] }
 0x2d6   : > { %3072 = vrot.lane.b32.xlu1 %v2991_v13, %s7015_s26  ;;  %v3899_v22 = vsel %vm3885_vm11, %v3866_v27, %v3816_v10  ;;  %v510_v13 = vsel %vm7272_vm6, 0, %v509_v31  ;;  %v3663_v10 = vrot.slane %v3662_v39, 4  ;;  %v2666_v5 = vor.u32 %v2665_v9, %v8880_v26  ;;  %v8942_v27 = vld [vmem:[#allocation2 + $0x88] sm:$0xf] }
 0x2d7   : > { %v3764_v42 = vsel %vm7316_vm10, %v3759_v29, %v3763_v57  ;;  %511 = vst [vmem:[#allocation2 + $0xcc] sm:$0x1] %v510_v13  ;;  %v2687_v26 = vshrl.u32 %v2311_v21, 16  ;;  %v2693_v29 = vshll.u32 %v2312_v4, 16  ;;  %v4017_v4 = vld [vmem:[#allocation2 + $0x98] sm:$0x1] }
 0x2d8   : > { %3845 = vrot.lane.b32.xlu0 %v3754_v54, %s7016_s4  ;;  %v3814_v20 = vpop.permute.xlu1 %3813  ;;  %v4146_v54 = vrot.slane %v8913_v15, 5  ;;  %v3668_v30 = vsel %vm7316_vm10, %v3663_v10, %v3667_v58 }
 0x2d9   : > { %v3865_v34 = vrot.slane %v3814_v20, 4  ;;  %v6117_v19 = vld [vmem:[#allocation3 + $0x84] sm:$0xf0]  ;;  %3280 = vrot.lane.b32.xlu2 %v3190_v56, %s7017_s10  ;;  %v2669_v56 = vshll.u32 %v2309_v16, 16  ;;  %v2695_v59 = vrot.slane %v2693_v29, 5  ;;  %v3649_v16 = vshll.u32 %v3387_v49, 16 }
 0x2da   : > { %v3255_v51 = vpop.permute.xlu0 %3254  ;;  %v6120_v8 = vor.u32 %v6390_v36, %v6117_v19  ;;  %v6392_v48 = vld [vmem:[#allocation3 + $0x88] sm:$0xf0]  ;;  %v4147_v6 = vsel %vm7730_vm14, %v6046_v0, %v4146_v54 }
 0x2db   : > { %v6124_v44 = vor.u32 %v6392_v48, %v6123_v23  ;;  %v3898_v46 = vsel %vm3885_vm11, %v3865_v34, %v3814_v20  ;;  %v3253_v25 = vpop.permute.xlu2 %3252  ;;  %v2667_v34 = vrot.slane %v2666_v5, 4  ;;  %v2671_v36 = vrot.slane %v2669_v56, 5  ;;  %v2871_v5 = vld [vmem:[#allocation2 + $0xc0] sm:$0xe]  ;;  %v8974_v56 = vld [vmem:[#allocation2 + $0xc4] sm:$0xf] }
 0x2dc   : > { %4969 = vmatmul.bf16.gmra.mxu1 %v6120_v8  ;;  %3337 = vst.msk [vmem:[#allocation3 + $0x94] sm:$0xf] %vm3324_vm15, %v3253_v25  ;;  %v8935_v8 = vrot.slane %v2683_v50, 5  ;;  %v2689_v48 = vrot.slane %v2687_v26, 4  ;;  %v3651_v58 = vrot.slane %v3649_v16, 5 }
 0x2dd   : > { %6330 = vmatmul.msk.bf16.gmra.mxu2 %vm4794_vm2, %v6124_v44  ;;  %3965 = vst.msk [vmem:[#allocation3 + $0x94] sm:$0xff] %vm8574_vm1, %v3898_v46  ;;  %v2672_v44 = vsel %vm7316_vm10, %v2667_v34, %v2671_v36  ;;  %v2856_v46 = vld [vmem:[#allocation2 + $0x84] sm:$0xe] }
 0x2de   : > { %2753 = vrot.lane.b32.xlu1 %v2662_v63, %s7014_s25  ;;  %v2690_v25 = vor.u32 %v2689_v48, %v8935_v8  ;;  %v6031_v43 = vrot.slane %v2856_v46, 9  ;;  %v3402_v31 = vld [vmem:[#allocation2 + $0xcc] sm:$0xf]  ;;  %v2310_v46 = vld [vmem:[#allocation2 + $0xc0] sm:$0xf] }
 0x2e0   : > { %3092 = vrot.lane.b32.xlu0 %v3026_v33, %s7015_s26  ;;  %v3061_v53 = vpop.permute.xlu1 %3060  ;;  %v2691_v39 = vrot.slane %v2690_v25, 4 }
 0x2e1   : > { %3144 = vst.msk [vmem:[#allocation3 + $0xa0] sm:$0xf] %vm3130_vm9, %v3061_v53  ;;  %3827 = vrot.lane.b32.xlu2 %v3644_v55, %s7016_s4  ;;  %v565_v55 = vld [vmem:[#allocation2 + $0xd4] sm:$0x1] }
 0x2e2   : > { %v8904_v32 = vpop.permute.xlu0 %3817  ;;  %3338 = vst.msk [vmem:[#allocation3 + $0xa0] sm:$0xf] %vm3324_vm15, %v3255_v51  ;;  %v566_v0 = vsel %vm7260_vm4, 0, %v565_v55  ;;  %v2696_v1 = vsel %vm7316_vm10, %v2691_v39, %v2695_v59 }
 0x2e3   : > { %3966 = vst.msk [vmem:[#allocation3 + $0xa0] sm:$0xff] %vm8574_vm1, %v3899_v22  ;;  %v4220_v14 = vpop.permute.xlu2 %4219  ;;  %v3867_v57 = vrot.slane %v8904_v32, 4  ;;  %v2994_v22 = vrot.slane %v8942_v27, 5 }
 0x2e4   : > { %4303 = vst.msk [vmem:[#allocation3 + $0xa4] sm:$0xf] %vm4289_vm0, %v4220_v14  ;;  %v6393_v41 = vld [vmem:[#allocation3 + $0x94] sm:$0xf]  ;;  %v3646_v14 = vshrl.u32 %v3387_v49, 16 }
 0x2e5   : > { %v3900_v9 = vsel %vm3885_vm11, %v3867_v57, %v8904_v32  ;;  %v2995_v3 = vsel %vm7730_vm14, %v6031_v43, %v2994_v22  ;;  %v3769_v32 = vshll.u32 %v3402_v31, 16  ;;  %567 = vst [vmem:[#allocation2 + $0xd4] sm:$0x1] %v566_v0  ;;  %v4156_v57 = vrot.slane %v4017_v4, 5 }
 0x2e6   : > { %3847 = vrot.lane.b32.xlu1 %v3764_v42, %s7016_s4  ;;  %v4014_v42 = vld [vmem:[#allocation2 + $0x8c] sm:$0x1]  ;;  %v3648_v10 = vrot.slane %v3646_v14, 4  ;;  %v2674_v43 = vshrl.u32 %v2310_v46, 16 }
 0x2e8   : > { %3284 = vrot.lane.b32.xlu0 %v3192_v24, %s7017_s10  ;;  %v4218_v47 = vpop.permute.xlu1 %4217  ;;  %v3023_v24 = vsel %vm7730_vm14, %v6035_v12, %v3022_v40  ;;  %v3766_v40 = vshrl.u32 %v3402_v31, 16  ;;  %v3652_v34 = vor.u32 %v3651_v58, %v3648_v10  ;;  %v2996_v31 = vrot.slane %v2994_v22, 4 }
 0x2e9   : > { %4302 = vst.msk [vmem:[#allocation3 + $0x98] sm:$0xf] %vm4289_vm0, %v4218_v47  ;;  %3264 = vrot.lane.b32.xlu2 %v3182_v61, %s7017_s10  ;;  %v4148_v61 = vrot.slane %v4146_v54, 4  ;;  %v4149_v47 = vrot.slane %v4014_v42, 5  ;;  %v6036_v54 = vrot.slane %v2871_v5, 9  ;;  %v2677_v42 = vshll.u32 %v2310_v46, 16 }
 0x2ea   : > { %v3065_v45 = vpop.permute.xlu0 %3064  ;;  %v6129_v20 = vld [vmem:[#allocation3 + $0x9c] sm:$0xf0]  ;;  %v3768_v21 = vrot.slane %v3766_v40, 4  ;;  %v2676_v40 = vrot.slane %v2674_v43, 4 }
 0x2eb   : > { %3146 = vst.msk [vmem:[#allocation3 + $0xb8] sm:$0xf] %vm3130_vm9, %v3065_v45  ;;  %v6132_v23 = vor.u32 %v6393_v41, %v6129_v20  ;;  %v3063_v19 = vpop.permute.xlu2 %3062  ;;  %v6395_v38 = vld [vmem:[#allocation3 + $0xa0] sm:$0xf0]  ;;  %v3771_v41 = vrot.slane %v3769_v32, 5  ;;  %v3029_v20 = vrot.slane %v8974_v56, 5 }
 0x2ec   : > { %3145 = vst.msk [vmem:[#allocation3 + $0xac] sm:$0xf] %vm3130_vm9, %v3063_v19  ;;  %v3390_v19 = vld [vmem:[#allocation2 + $0x9c] sm:$0xf]  ;;  %v2679_v32 = vrot.slane %v2677_v42, 5 }
 0x2ed   : > { %4974 = vmatmul.bf16.gmra.mxu1 %v6132_v23  ;;  %v8983_v23 = vld [vmem:[#allocation2 + $0xd0] sm:$0xf]  ;;  %v3673_v62 = vshll.u32 %v3390_v19, 16 }
 0x2ee   : > { %4229 = vrot.lane.b32.xlu1 %v4147_v6, %s7018_s13  ;;  %v8985_v6 = vld [vmem:[#allocation2 + $0x94] sm:$0xf]  ;;  %v3775_v48 = vshll.u32 %v8983_v23, 16  ;;  %v3779_v58 = vshrl.u32 %v8983_v23, 16 }
 0x2f0   : > { %3831 = vrot.lane.b32.xlu0 %v3668_v30, %s7016_s4  ;;  %v3820_v17 = vpop.permute.xlu1 %3819  ;;  %v6135_v51 = vld [vmem:[#allocation3 + $0x98] sm:$0xf]  ;;  %v4150_v30 = vsel %vm7730_vm14, %v4148_v61, %v4149_v47 }
 0x2f1   : > { %v3868_v63 = vrot.slane %v3820_v17, 4  ;;  %v6136_v18 = vor.u32 %v6395_v38, %v6135_v51  ;;  %2755 = vrot.lane.b32.xlu2 %v2672_v44, %s7014_s25  ;;  %v3772_v51 = vor.u32 %v3771_v41, %v3768_v21  ;;  %v3030_v44 = vsel %vm7730_vm14, %v6036_v54, %v3029_v20 }
 0x2f2   : > { %v2748_v33 = vpop.permute.xlu0 %2747  ;;  %v2680_v54 = vor.u32 %v2679_v32, %v2676_v40  ;;  %v9070_v32 = vld [vmem:[#allocation2 + $0xb8] sm:$0xf] }
 0x2f3   : > { %2819 = vst.msk [vmem:[#allocation3 + $0x130] sm:$0xf] %vm2793_vm7, %v2748_v33  ;;  %6331 = vmatmul.msk.bf16.gmra.mxu2 %vm4794_vm2, %v6136_v18  ;;  %v3901_v53 = vsel %vm3885_vm11, %v3868_v63, %v3820_v17  ;;  %v3259_v60 = vpop.permute.xlu2 %3258  ;;  %v3185_v17 = vld [vmem:[#allocation2 + $0x94] sm:$0xf]  ;;  %v4153_v63 = vrot.slane %v8985_v6, 5  ;;  %v3670_v18 = vshrl.u32 %v3390_v19, 16 }
 0x2f4   : > { %3340 = vst.msk [vmem:[#allocation3 + $0xb8] sm:$0xf] %vm3324_vm15, %v3259_v60  ;;  %v3653_v33 = vrot.slane %v3652_v34, 4  ;;  %v3773_v12 = vrot.slane %v3772_v51, 4  ;;  %v3675_v60 = vrot.slane %v3673_v62, 5 }
 0x2f5   : > { %3968 = vst.msk [vmem:[#allocation3 + $0xb8] sm:$0xff] %vm8574_vm1, %v3901_v53  ;;  %v4155_v29 = vrot.slane %v4153_v63, 4  ;;  %v3672_v53 = vrot.slane %v3670_v18, 4  ;;  %v2861_v19 = vld [vmem:[#allocation2 + $0x98] sm:$0x1] }
 0x2f6   : > { %3286 = vrot.lane.b32.xlu1 %v3193_v28, %s7017_s10  ;;  %v3658_v49 = vsel %vm7316_vm10, %v3653_v33, %v8898_v11  ;;  %v3004_v62 = vrot.slane %v2861_v19, 5  ;;  %v3392_v33 = vld [vmem:[#allocation2 + $0xa4] sm:$0x1] }
 0x2f7   : > { %v3676_v14 = vor.u32 %v3675_v60, %v3672_v53  ;;  %v3194_v53 = vld [vmem:[#allocation2 + $0xcc] sm:$0xf] }
 0x2f8   : > { %3268 = vrot.lane.b32.xlu0 %v3184_v7, %s7017_s10  ;;  %v3257_v37 = vpop.permute.xlu1 %3256  ;;  %v8998_v7 = vrot.slane %v3775_v48, 5 }
 0x2f9   : > { %3339 = vst.msk [vmem:[#allocation3 + $0xac] sm:$0xf] %vm3324_vm15, %v3257_v37  ;;  %3090 = vrot.lane.b32.xlu2 %v3023_v24, %s7015_s26  ;;  %v3391_v24 = vld [vmem:[#allocation2 + $0xa0] sm:$0xf]  ;;  %v2858_v37 = vld [vmem:[#allocation2 + $0x8c] sm:$0x1] }
 0x2fa   : > { %v3083_v13 = vpop.permute.xlu0 %3082  ;;  %3967 = vst.msk [vmem:[#allocation3 + $0xac] sm:$0xff] %vm8574_vm1, %v3900_v9  ;;  %v3778_v59 = vsel %vm7316_vm10, %v3773_v12, %v8998_v7  ;;  %v4157_v9 = vsel %vm7730_vm14, %v4155_v29, %v4156_v57  ;;  %v3679_v16 = vshll.u32 %v3391_v24, 16  ;;  %v3677_v56 = vrot.slane %v3676_v14, 4 }
 0x2fb   : > { %3155 = vst.msk [vmem:[#allocation3 + $0x124] sm:$0xf] %vm3130_vm9, %v3083_v13  ;;  %v8976_v45 = vpop.permute.xlu2 %3839  ;;  %v2873_v13 = vld [vmem:[#allocation2 + $0xc8] sm:$0x1] }
 0x2fc   : > { %v6141_v26 = vld [vmem:[#allocation3 + $0xb4] sm:$0xf0]  ;;  %v3878_v39 = vrot.slane %v8976_v45, 4  ;;  %v3032_v10 = vrot.slane %v2873_v13, 5  ;;  %v3681_v21 = vrot.slane %v3679_v16, 5 }
 0x2fe   : > { %3074 = vrot.lane.b32.xlu1 %v2995_v3, %s7015_s26  ;;  %v2997_v3 = vrot.slane %v2858_v37, 5  ;;  %v3911_v27 = vsel %vm3885_vm11, %v3878_v39, %v8976_v45  ;;  %v4018_v39 = vld [vmem:[#allocation2 + $0x9c] sm:$0xe] }
 0x2ff   : > { %v6048_v14 = vrot.slane %v4018_v39, 9 }
 0x300   : > { %2759 = vrot.lane.b32.xlu0 %v2696_v1, %s7014_s25  ;;  %v8980_v15 = vpop.permute.xlu1 %3837  ;;  %v3031_v1 = vrot.slane %v3029_v20, 4  ;;  %v2998_v45 = vsel %vm7730_vm14, %v2996_v31, %v2997_v3 }
 0x301   : > { %v6396_v50 = vld [vmem:[#allocation3 + $0xac] sm:$0xf]  ;;  %4231 = vrot.lane.b32.xlu2 %v4150_v30, %s7018_s13  ;;  %v3877_v0 = vrot.slane %v8980_v15, 4  ;;  %v9032_v30 = vld [vmem:[#allocation2 + $0x94] sm:$0xf] }
 0x302   : > { %v4224_v36 = vpop.permute.xlu0 %4223  ;;  %v6144_v38 = vor.u32 %v6396_v50, %v6141_v26  ;;  %v3033_v23 = vsel %vm7730_vm14, %v3031_v1, %v3032_v10  ;;  %v3682_v50 = vsel %vm7316_vm10, %v3677_v56, %v3681_v21  ;;  %v3781_v26 = vrot.slane %v3779_v58, 4  ;;  %v4026_v1 = vld [vmem:[#allocation2 + $0xbc] sm:$0x1] }
 0x303   : > { %4305 = vst.msk [vmem:[#allocation3 + $0xbc] sm:$0xf] %vm4289_vm0, %v4224_v36  ;;  %v4222_v28 = vpop.permute.xlu2 %4221  ;;  %v3910_v41 = vsel %vm3885_vm11, %v3877_v0, %v8980_v15  ;;  %v3683_v15 = vshrl.u32 %v3391_v24, 16  ;;  %v3001_v34 = vrot.slane %v9032_v30, 5  ;;  %v2681_v36 = vrot.slane %v2680_v54, 4 }
 0x304   : > { %4979 = vmatmul.bf16.gmra.mxu1 %v6144_v38  ;;  %4304 = vst.msk [vmem:[#allocation3 + $0xb0] sm:$0xf] %vm4289_vm0, %v4222_v28  ;;  %v4177_v56 = vrot.slane %v4026_v1, 5 }
 0x305   : > { %v3685_v51 = vrot.slane %v3683_v15, 4  ;;  %v3003_v18 = vrot.slane %v3001_v34, 4  ;;  %v2686_v4 = vsel %vm7316_vm10, %v2681_v36, %v8935_v8  ;;  %v9092_v15 = vpop.f32.mrf.mxu1 }
 0x306   : > { %3270 = vrot.lane.b32.xlu1 %v3185_v17, %s7017_s10  ;;  %v3404_v17 = vld [vmem:[#allocation2 + $0xd4] sm:$0x1] }
 0x307   : > { %v3686_v60 = vor.u32 %v3685_v51, %v3681_v21  ;;  %v3005_v8 = vsel %vm7730_vm14, %v3003_v18, %v3004_v62  ;;  %v3195_v18 = vld [vmem:[#allocation2 + $0xd0] sm:$0xf] }
 0x308   : > { %3094 = vrot.lane.b32.xlu0 %v3030_v44, %s7015_s26  ;;  %v3085_v25 = vpop.permute.xlu1 %3084  ;;  %v3782_v44 = vor.u32 %v3781_v26, %v8998_v7  ;;  %v3689_v7 = vshll.u32 %v3392_v33, 16  ;;  %v4027_v26 = vld [vmem:[#allocation2 + $0xc0] sm:$0xe] }
 0x309   : > { %3156 = vst.msk [vmem:[#allocation3 + $0x130] sm:$0xf] %vm3130_vm9, %v3085_v25  ;;  %3829 = vrot.lane.b32.xlu2 %v3658_v49, %s7016_s4  ;;  %v3785_v25 = vshll.u32 %v3404_v17, 16  ;;  %v9053_v49 = vpop.f32.mrf.mxu0  ;;  %v4028_v17 = vld [vmem:[#allocation2 + $0xc4] sm:$0xf] }
 0x30a   : > { %v9006_v55 = vpop.permute.xlu0 %3821  ;;  %v6398_v11 = vld [vmem:[#allocation3 + $0xb8] sm:$0xf0]  ;;  %v3783_v43 = vrot.slane %v3782_v44, 4  ;;  %v6051_v44 = vrot.slane %v4027_v26, 9 }
 0x30b   : > { %v3279_v61 = vpop.permute.xlu2 %3278  ;;  %v6147_v47 = vld [vmem:[#allocation3 + $0xb0] sm:$0xf]  ;;  %v3869_v42 = vrot.slane %v9006_v55, 4  ;;  %v3787_v37 = vrot.slane %v3785_v25, 5 }
 0x30c   : > { %3350 = vst.msk [vmem:[#allocation3 + $0x130] sm:$0xf] %vm3324_vm15, %v3279_v61  ;;  %v6148_v22 = vor.u32 %v6398_v11, %v6147_v47  ;;  %v3687_v11 = vrot.slane %v3686_v60, 4  ;;  %v4015_v61 = vld [vmem:[#allocation2 + $0x90] sm:$0xe] }
 0x30d   : > { %3978 = vst.msk [vmem:[#allocation3 + $0x130] sm:$0xff] %vm8574_vm1, %v3911_v27  ;;  %v3902_v0 = vsel %vm3885_vm11, %v3869_v42, %v9006_v55  ;;  %v3788_v3 = vsel %vm7316_vm10, %v3783_v43, %v3787_v37  ;;  %v4174_v27 = vrot.slane %v9070_v32, 5  ;;  %v4021_v25 = vld [vmem:[#allocation2 + $0xa8] sm:$0xe]  ;;  %v9118_v43 = vpop.f32.mrf.mxu1 }
 0x30e   : > { %3849 = vrot.lane.b32.xlu1 %v3778_v59, %s7016_s4  ;;  %6332 = vmatmul.msk.bf16.gmra.mxu2 %vm4794_vm2, %v6148_v22  ;;  %v4019_v59 = vld [vmem:[#allocation2 + $0xa0] sm:$0xf]  ;;  %v6047_v22 = vrot.slane %v4015_v61, 9  ;;  %v6049_v37 = vrot.slane %v4021_v25, 9 }
 0x30f   : > { %v4160_v16 = vrot.slane %v4019_v59, 5  ;;  %v4176_v52 = vrot.slane %v4174_v27, 4  ;;  %v4032_v59 = vld [vmem:[#allocation2 + $0xd4] sm:$0x1] }
 0x310   : > { %4235 = vrot.lane.b32.xlu0 %v4157_v9, %s7018_s13  ;;  %v3277_v5 = vpop.permute.xlu1 %3276  ;;  %v3691_v9 = vrot.slane %v3689_v7, 5  ;;  %v4154_v21 = vsel %vm7730_vm14, %v6047_v22, %v4153_v63  ;;  %v9116_v7 = vld [vmem:[#allocation2 + $0xd0] sm:$0xf] }
 0x311   : > { %3349 = vst.msk [vmem:[#allocation3 + $0x124] sm:$0xf] %vm3324_vm15, %v3277_v5  ;;  %3076 = vrot.lane.b32.xlu2 %v2998_v45, %s7015_s26  ;;  %v4161_v55 = vsel %vm7730_vm14, %v6048_v14, %v4160_v16  ;;  %v9080_v10 = vpop.f32.mrf.mxu0  ;;  %v4178_v6 = vsel %vm7730_vm14, %v4176_v52, %v4177_v56  ;;  %v4162_v19 = vrot.slane %v4160_v16, 4  ;;  %v4188_v42 = vrot.slane %v9116_v7, 5 }
 0x312   : > { %v3069_v20 = vpop.permute.xlu0 %3068  ;;  %3977 = vst.msk [vmem:[#allocation3 + $0x124] sm:$0xff] %vm8574_vm1, %v3910_v41  ;;  %v3692_v47 = vsel %vm7316_vm10, %v3687_v11, %v3691_v9  ;;  %v4191_v9 = vrot.slane %v4032_v59, 5 }
 0x313   : > { %3148 = vst.msk [vmem:[#allocation3 + $0xd0] sm:$0xf] %vm3130_vm9, %v3069_v20  ;;  %v3067_v38 = vpop.permute.xlu2 %3066  ;;  %v4190_v11 = vrot.slane %v4188_v42, 4 }
 0x314   : > { %3147 = vst.msk [vmem:[#allocation3 + $0xc4] sm:$0xf] %vm3130_vm9, %v3067_v38  ;;  %v6201_v12 = vld [vmem:[#allocation3 + $0x12c] sm:$0xf0] }
 0x316   : > { %3096 = vrot.lane.b32.xlu1 %v3033_v23, %s7015_s26  ;;  %v3186_v23 = vld [vmem:[#allocation2 + $0x9c] sm:$0xf] }
 0x318   : > { %3833 = vrot.lane.b32.xlu0 %v3682_v50, %s7016_s4  ;;  %v3824_v48 = vpop.permute.xlu1 %3823  ;;  %v4020_v50 = vld [vmem:[#allocation2 + $0xa4] sm:$0x1] }
 0x319   : > { %v3870_v28 = vrot.slane %v3824_v48, 4  ;;  %v6411_v46 = vld [vmem:[#allocation3 + $0x124] sm:$0xf]  ;;  %2757 = vrot.lane.b32.xlu2 %v2686_v4, %s7014_s25  ;;  %v4163_v38 = vrot.slane %v4020_v50, 5  ;;  %v9100_v51 = vpop.f32.mrf.mxu0  ;;  %v2859_v4 = vld [vmem:[#allocation2 + $0x90] sm:$0xe] }
 0x31a   : > { %v2750_v29 = vpop.permute.xlu0 %2749  ;;  %v6204_v57 = vor.u32 %v6411_v46, %v6201_v12  ;;  %v6032_v60 = vrot.slane %v2859_v4, 9 }
 0x31b   : > { %2820 = vst.msk [vmem:[#allocation3 + $0x13c] sm:$0xf] %vm2793_vm7, %v2750_v29  ;;  %v3903_v24 = vsel %vm3885_vm11, %v3870_v28, %v3824_v48  ;;  %v3263_v31 = vpop.permute.xlu2 %3262  ;;  %v4181_v28 = vrot.slane %v4028_v17, 5  ;;  %v4164_v12 = vsel %vm7730_vm14, %v4162_v19, %v4163_v38  ;;  %v9110_v29 = vld [vmem:[#allocation2 + $0xac] sm:$0xf] }
 0x31c   : > { %5004 = vmatmul.bf16.vlgmr.msrb.gmra.mxu3 %v6204_v57  ;;  %3342 = vst.msk [vmem:[#allocation3 + $0xd0] sm:$0xf] %vm3324_vm15, %v3263_v31  ;;  %v4167_v39 = vrot.slane %v9110_v29, 5 }
 0x31d   : > { %3970 = vst.msk [vmem:[#allocation3 + $0xd0] sm:$0xff] %vm8574_vm1, %v3903_v24  ;;  %v4182_v57 = vsel %vm7730_vm14, %v6051_v44, %v4181_v28  ;;  %v4183_v1 = vrot.slane %v4181_v28, 4 }
 0x31e   : > { %3288 = vrot.lane.b32.xlu1 %v3194_v53, %s7017_s10  ;;  %v9114_v53 = vpop.f32.mrf.mxu2 }
 0x320   : > { %3080 = vrot.lane.b32.xlu0 %v3005_v8, %s7015_s26  ;;  %v3261_v13 = vpop.permute.xlu1 %3260 }
 0x321   : > { %3341 = vst.msk [vmem:[#allocation3 + $0xc4] sm:$0xf] %vm3324_vm15, %v3261_v13  ;;  %3851 = vrot.lane.b32.xlu2 %v3788_v3, %s7016_s4  ;;  %v3002_v13 = vsel %vm7730_vm14, %v6032_v60, %v3001_v34  ;;  %v9135_v16 = vpop.f32.mrf.mxu0  ;;  %v4029_v3 = vld [vmem:[#allocation2 + $0xc8] sm:$0x1] }
 0x322   : > { %v3844_v40 = vpop.permute.xlu0 %3843  ;;  %3969 = vst.msk [vmem:[#allocation3 + $0xc4] sm:$0xff] %vm8574_vm1, %v3902_v0  ;;  %v4168_v0 = vsel %vm7730_vm14, %v6049_v37, %v4167_v39 }
 0x323   : > { %v3842_v58 = vpop.permute.xlu2 %3841  ;;  %v3880_v63 = vrot.slane %v3844_v40, 4 }
 0x324   : > { %v6153_v45 = vld [vmem:[#allocation3 + $0xcc] sm:$0xf0]  ;;  %v3879_v46 = vrot.slane %v3842_v58, 4 }
 0x325   : > { %v3913_v33 = vsel %vm3885_vm11, %v3880_v63, %v3844_v40  ;;  %v4192_v40 = vsel %vm7730_vm14, %v4190_v11, %v4191_v9 }
 0x326   : > { %3835 = vrot.lane.b32.xlu1 %v3692_v47, %s7016_s4  ;;  %v3912_v24 = vsel %vm3885_vm11, %v3879_v46, %v3842_v58  ;;  %v9143_v47 = vpop.f32.mrf.mxu1  ;;  %v4184_v58 = vrot.slane %v4029_v3, 5  ;;  %s6906_s4 = scalar_lea.hbm %s9911_s8, 128 }
 0x327   : > { %p6908_p10 = scmp.lt.s32.totalorder %s6906_s4, %s6902_s5 }
 0x328   : > { %4237 = vrot.lane.b32.xlu0 %v4161_v55, %s7018_s13  ;;  %v2752_v5 = vpop.permute.xlu1 %2751  ;;  %v9146_v55 = vpop.f32.mrf.mxu2 }
 0x329   : > { %2821 = vst.msk [vmem:[#allocation3 + $0x148] sm:$0xf] %vm2793_vm7, %v2752_v5  ;;  %v6399_v41 = vld [vmem:[#allocation3 + $0xc4] sm:$0xf]  ;;  %4233 = vrot.lane.b32.xlu2 %v4154_v21, %s7018_s13  ;;  %p6909_p11 = por %p6908_p10, %p6907_p2 }
 0x32a   : > { %v4226_v54 = vpop.permute.xlu0 %4225  ;;  %v6156_v20 = vor.u32 %v6399_v41, %v6153_v45  ;;  %v3187_v41 = vld [vmem:[#allocation2 + $0xa0] sm:$0xf] }
 0x32b   : > { %4306 = vst.msk [vmem:[#allocation3 + $0xc8] sm:$0xf] %vm4289_vm0, %v4226_v54  ;;  %v3089_v36 = vpop.permute.xlu2 %3088  ;;  %p6910_p9 = pnand %p6909_p11, %p6905_p8 }
 0x32c   : > { %4984 = vmatmul.bf16.gmra.mxu1 %v6156_v20  ;;  %3158 = vst.msk [vmem:[#allocation3 + $0x148] sm:$0xf] %vm3130_vm9, %v3089_v36  ;;  %v4024_v20 = vld [vmem:[#allocation2 + $0xb4] sm:$0xe] }
 0x32d   : > { %v6050_v26 = vrot.slane %v4024_v20, 9 }
 0x32e   : > { %3272 = vrot.lane.b32.xlu1 %v3186_v23, %s7017_s10  ;;  %v4185_v23 = vsel %vm7730_vm14, %v4183_v1, %v4184_v58  ;;  %v9160_v38 = vpop.f32.mrf.mxu1 }
 0x330   : > { %4247 = vrot.lane.b32.xlu0 %v4178_v6, %s7018_s13  ;;  %v3087_v48 = vpop.permute.xlu1 %3086  ;;  %v9152_v6 = vpop.f32.mrf.mxu0 }
 0x331   : > { %3157 = vst.msk [vmem:[#allocation3 + $0x13c] sm:$0xf] %vm3130_vm9, %v3087_v48  ;;  %3290 = vrot.lane.b32.xlu2 %v3195_v18, %s7017_s10  ;;  %v9157_v19 = vpop.f32.mrf.mxu2  ;;  %v4175_v48 = vsel %vm7730_vm14, %v6050_v26, %v4174_v27 }
 0x332   : > { %v3283_v62 = vpop.permute.xlu0 %3282  ;;  %v6159_v34 = vld [vmem:[#allocation3 + $0xc8] sm:$0xf] }
 0x333   : > { %3352 = vst.msk [vmem:[#allocation3 + $0x148] sm:$0xf] %vm3324_vm15, %v3283_v62  ;;  %v3281_v8 = vpop.permute.xlu2 %3280  ;;  %v4023_v62 = vld [vmem:[#allocation2 + $0xb0] sm:$0x1] }
 0x334   : > { %3980 = vst.msk [vmem:[#allocation3 + $0x148] sm:$0xff] %vm8574_vm1, %v3913_v33  ;;  %v4169_v33 = vrot.slane %v4167_v39, 4  ;;  %v4170_v4 = vrot.slane %v4023_v62, 5 }
 0x335   : > { %3351 = vst.msk [vmem:[#allocation3 + $0x13c] sm:$0xf] %vm3324_vm15, %v3281_v8  ;;  %v4030_v8 = vld [vmem:[#allocation2 + $0xcc] sm:$0xe] }
 0x336   : > { %4239 = vrot.lane.b32.xlu1 %v4164_v12, %s7018_s13  ;;  %3979 = vst.msk [vmem:[#allocation3 + $0x13c] sm:$0xff] %vm8574_vm1, %v3912_v24  ;;  %v9177_v32 = vpop.f32.mrf.mxu1  ;;  %v6052_v37 = vrot.slane %v4030_v8, 9 }
 0x338   : > { %4249 = vrot.lane.b32.xlu0 %v4182_v57, %s7018_s13  ;;  %v4228_v31 = vpop.permute.xlu1 %4227  ;;  %v9174_v28 = vpop.f32.mrf.mxu0  ;;  %v4171_v57 = vsel %vm7730_vm14, %v4169_v33, %v4170_v4 }
 0x339   : > { %4307 = vst.msk [vmem:[#allocation3 + $0xd4] sm:$0xf] %vm4289_vm0, %v4228_v31  ;;  %3078 = vrot.lane.b32.xlu2 %v3002_v13, %s7015_s26  ;;  %v9179_v12 = vpop.f32.mrf.mxu2 }
 0x33a   : > { %v3071_v14 = vpop.permute.xlu0 %3070 }
 0x33b   : > { %3149 = vst.msk [vmem:[#allocation3 + $0xdc] sm:$0xf] %vm3130_vm9, %v3071_v14  ;;  %v6213_v61 = vld [vmem:[#allocation3 + $0x144] sm:$0xf0]  ;;  %v3828_v30 = vpop.permute.xlu2 %3827  ;;  %v4189_v14 = vsel %vm7730_vm14, %v6052_v37, %v4188_v42 }
 0x33c   : > { %v3872_v63 = vrot.slane %v3828_v30, 4 }
 0x33d   : > { %v6414_v22 = vld [vmem:[#allocation3 + $0x13c] sm:$0xf] }
 0x33e   : > { %4241 = vrot.lane.b32.xlu1 %v4168_v0, %s7018_s13  ;;  %v6216_v52 = vor.u32 %v6414_v22, %v6213_v61  ;;  %v3905_v18 = vsel %vm3885_vm11, %v3872_v63, %v3828_v30  ;;  %v9195_v0 = vpop.f32.mrf.mxu1 }
 0x340   : > { %4255 = vrot.lane.b32.xlu0 %v4192_v40, %s7018_s13  ;;  %v3826_v5 = vpop.permute.xlu1 %3825  ;;  %v6401_v56 = vld [vmem:[#allocation3 + $0xd0] sm:$0xf0]  ;;  %5009 = vmatmul.bf16.gmra.mxu3 %v6216_v52  ;;  %v9187_v31 = vpop.f32.mrf.mxu0 }
 0x341   : > { %v3871_v21 = vrot.slane %v3826_v5, 4  ;;  %v6160_v45 = vor.u32 %v6401_v56, %v6159_v34  ;;  %3274 = vrot.lane.b32.xlu2 %v3187_v41, %s7017_s10  ;;  %v9189_v9 = vpop.f32.mrf.mxu2 }
 0x342   : > { %v3267_v54 = vpop.permute.xlu0 %3266 }
 0x343   : > { %6333 = vmatmul.msk.bf16.gmra.mxu2 %vm4794_vm2, %v6160_v45  ;;  %v3904_v50 = vsel %vm3885_vm11, %v3871_v21, %v3826_v5  ;;  %v3265_v36 = vpop.permute.xlu2 %3264 }
 0x344   : > { %3343 = vst.msk [vmem:[#allocation3 + $0xdc] sm:$0xf] %vm3324_vm15, %v3265_v36 }
 0x345   : > { %3971 = vst.msk [vmem:[#allocation3 + $0xdc] sm:$0xff] %vm8574_vm1, %v3904_v50  ;;  %v9225_v50 = vld [vmem:[%s9906_s3] ss:$0 sm:$0xff] }
 0x346   : > { %4251 = vrot.lane.b32.xlu1 %v4185_v23, %s7018_s13  ;;  %v9208_v30 = vpop.f32.mrf.mxu1 }
 0x348   : > { %v3073_v17 = vpop.permute.xlu1 %3072  ;;  %v9204_v2 = vpop.f32.mrf.mxu0 }
 0x349   : > { %3150 = vst.msk [vmem:[#allocation3 + $0xe8] sm:$0xf] %vm3130_vm9, %v3073_v17  ;;  %4245 = vrot.lane.b32.xlu2 %v4175_v48, %s7018_s13  ;;  %v9206_v42 = vpop.f32.mrf.mxu2 }
 0x34a   : > { %v3846_v44 = vpop.permute.xlu0 %3845  ;;  %3344 = vst.msk [vmem:[#allocation3 + $0xe8] sm:$0xf] %vm3324_vm15, %v3267_v54 }
 0x34b   : > { %3972 = vst.msk [vmem:[#allocation3 + $0xe8] sm:$0xff] %vm8574_vm1, %v3905_v18  ;;  %v2756_v46 = vpop.permute.xlu2 %2755  ;;  %v3881_v39 = vrot.slane %v3846_v44, 4  ;;  %v4857_v18 = vadd.f32 %v9225_v50, %v9053_v49 }
 0x34c   : > { %2823 = vst.msk [vmem:[#allocation3 + $0x160] sm:$0xf] %vm2793_vm7, %v2756_v46  ;;  %v6402_v25 = vld [vmem:[#allocation3 + $0xdc] sm:$0xf] }
 0x34d   : > { %v3914_v3 = vsel %vm3885_vm11, %v3881_v39, %v3846_v44 }
 0x34e   : > { %v9219_v54 = vpop.f32.mrf.mxu1 }
 0x350   : > { %v2754_v27 = vpop.permute.xlu1 %2753  ;;  %v9217_v45 = vpop.f32.mrf.mxu0 }
 0x351   : > { %2822 = vst.msk [vmem:[#allocation3 + $0x154] sm:$0xf] %vm2793_vm7, %v2754_v27  ;;  %4243 = vrot.lane.b32.xlu2 %v4171_v57, %s7018_s13  ;;  %v9214_v41 = vpop.f32.mrf.mxu2  ;;  %v4946_v27 = vadd.f32 %v9092_v15, %v4857_v18  ;;  %v4859_v15 = vadd.f32 %v9225_v50, %v9080_v10  ;;  %v4862_v10 = vadd.f32 %v9225_v50, %v9100_v51 }
 0x352   : > { %v3093_v29 = vpop.permute.xlu0 %3092  ;;  %v6165_v60 = vld [vmem:[#allocation3 + $0xe4] sm:$0xf0] }
 0x353   : > { %3160 = vst.msk [vmem:[#allocation3 + $0x160] sm:$0xf] %vm3130_vm9, %v3093_v29  ;;  %v6168_v24 = vor.u32 %v6402_v25, %v6165_v60  ;;  %v3091_v59 = vpop.permute.xlu2 %3090  ;;  %v5035_v57 = vadd.f32 %v9114_v53, %v4946_v27  ;;  %v4948_v37 = vadd.f32 %v9118_v43, %v4859_v15  ;;  %v4951_v43 = vadd.f32 %v9143_v47, %v4862_v10 }
 0x354   : > { %3159 = vst.msk [vmem:[#allocation3 + $0x154] sm:$0xf] %vm3130_vm9, %v3091_v59  ;;  %v4864_v47 = vadd.f32 %v9225_v50, %v9135_v16 }
 0x355   : > { %4989 = vmatmul.bf16.gmra.mxu1 %v6168_v24  ;;  %v5037_v59 = vadd.f32 %v9146_v55, %v4948_v37 }
 0x356   : > { %v9237_v4 = vpop.f32.mrf.mxu1 }
 0x358   : > { %v3848_v11 = vpop.permute.xlu1 %3847  ;;  %v9241_v25 = vpop.f32.mrf.mxu0 }
 0x359   : > { %4253 = vrot.lane.b32.xlu2 %v4189_v14, %s7018_s13  ;;  %v3882_v34 = vrot.slane %v3848_v11, 4  ;;  %v9235_v62 = vpop.f32.mrf.mxu2 }
 0x35a   : > { %v3285_v13 = vpop.permute.xlu0 %3284 }
 0x35b   : > { %3353 = vst.msk [vmem:[#allocation3 + $0x154] sm:$0xf] %vm3324_vm15, %v3285_v13  ;;  %v4232_v40 = vpop.permute.xlu2 %4231  ;;  %v3915_v52 = vsel %vm3885_vm11, %v3882_v34, %v3848_v11 }
 0x35c   : > { %3981 = vst.msk [vmem:[#allocation3 + $0x154] sm:$0xff] %vm8574_vm1, %v3914_v3 }
 0x35d   : > { %4309 = vst.msk [vmem:[#allocation3 + $0xec] sm:$0xf] %vm4289_vm0, %v4232_v40 }
 0x35e   : > { %v9254_v53 = vpop.f32.mrf.mxu1 }
 0x360   : > { %v4230_v61 = vpop.permute.xlu1 %4229  ;;  %v9257_v3 = vpop.f32.mrf.mxu0 }
 0x361   : > { %4308 = vst.msk [vmem:[#allocation3 + $0xe0] sm:$0xf] %vm4289_vm0, %v4230_v61  ;;  %v9251_v8 = vpop.f32.mrf.mxu2 }
 0x362   : > { %v3832_v7 = vpop.permute.xlu0 %3831 }
 0x363   : > { %v3830_v22 = vpop.permute.xlu2 %3829  ;;  %v6417_v63 = vld [vmem:[#allocation3 + $0x154] sm:$0xf]  ;;  %v3874_v33 = vrot.slane %v3832_v7, 4 }
 0x364   : > { %v6404_v1 = vld [vmem:[#allocation3 + $0xe8] sm:$0xf0]  ;;  %v3873_v20 = vrot.slane %v3830_v22, 4 }
 0x365   : > { %v3907_v60 = vsel %vm3885_vm11, %v3874_v33, %v3832_v7 }
 0x366   : > { %v3906_v48 = vsel %vm3885_vm11, %v3873_v20, %v3830_v22  ;;  %v9266_v55 = vpop.f32.mrf.mxu1  ;;  %v5040_v22 = vadd.f32 %v9157_v19, %v4951_v43  ;;  %v4953_v20 = vadd.f32 %v9160_v38, %v4864_v47  ;;  %v4874_v47 = vadd.f32 %v9225_v50, %v9204_v2 }
 0x368   : > { %v3287_v58 = vpop.permute.xlu1 %3286  ;;  %v6171_v5 = vld [vmem:[#allocation3 + $0xe0] sm:$0xf] }
 0x369   : > { %3354 = vst.msk [vmem:[#allocation3 + $0x160] sm:$0xf] %vm3324_vm15, %v3287_v58  ;;  %v6172_v56 = vor.u32 %v6404_v1, %v6171_v5  ;;  %v9263_v7 = vpop.f32.mrf.mxu2  ;;  %v9270_v5 = vpop.f32.mrf.mxu0 }
 0x36a   : > { %v3269_v21 = vpop.permute.xlu0 %3268  ;;  %3982 = vst.msk [vmem:[#allocation3 + $0x160] sm:$0xff] %vm8574_vm1, %v3915_v52 }
 0x36b   : > { %6334 = vmatmul.msk.bf16.gmra.mxu2 %vm4794_vm2, %v6172_v56  ;;  %v3077_v23 = vpop.permute.xlu2 %3076 }
 0x36c   : > { %3152 = vst.msk [vmem:[#allocation3 + $0x100] sm:$0xf] %vm3130_vm9, %v3077_v23 }
 0x370   : > { %v3075_v26 = vpop.permute.xlu1 %3074 }
 0x371   : > { %3151 = vst.msk [vmem:[#allocation3 + $0xf4] sm:$0xf] %vm3130_vm9, %v3075_v26  ;;  %v6225_v36 = vld [vmem:[#allocation3 + $0x15c] sm:$0xf0]  ;;  %v9277_v26 = vpop.f32.mrf.mxu2 }
 0x372   : > { %v2760_v17 = vpop.permute.xlu0 %2759  ;;  %3345 = vst.msk [vmem:[#allocation3 + $0xf4] sm:$0xf] %vm3324_vm15, %v3269_v21  ;;  %v6228_v44 = vor.u32 %v6417_v63, %v6225_v36  ;;  %v5042_v36 = vadd.f32 %v9179_v12, %v4953_v20  ;;  %v4963_v20 = vadd.f32 %v9219_v54, %v4874_v47 }
 0x373   : > { %3973 = vst.msk [vmem:[#allocation3 + $0xf4] sm:$0xff] %vm8574_vm1, %v3906_v48  ;;  %v2758_v46 = vpop.permute.xlu2 %2757  ;;  %v4867_v48 = vadd.f32 %v9225_v50, %v9152_v6  ;;  %v4869_v6 = vadd.f32 %v9225_v50, %v9174_v28 }
 0x374   : > { %5014 = vmatmul.bf16.gmra.mxu3 %v6228_v44  ;;  %2825 = vst.msk [vmem:[#allocation3 + $0x178] sm:$0xf] %vm2793_vm7, %v2760_v17  ;;  %v9285_v17 = vpop.f32.mrf.mxu1  ;;  %v9292_v44 = vpop.f32.mrf.mxu0 }
 0x375   : > { %2824 = vst.msk [vmem:[#allocation3 + $0x16c] sm:$0xf] %vm2793_vm7, %v2758_v46  ;;  %v4956_v18 = vadd.f32 %v9177_v32, %v4867_v48 }
 0x377   : > { %v5045_v46 = vadd.f32 %v9189_v9, %v4956_v18  ;;  %v4958_v9 = vadd.f32 %v9195_v0, %v4869_v6  ;;  %v4872_v0 = vadd.f32 %v9225_v50, %v9187_v31 }
 0x378   : > { %v3271_v29 = vpop.permute.xlu1 %3270 }
 0x379   : > { %3346 = vst.msk [vmem:[#allocation3 + $0x100] sm:$0xf] %vm3324_vm15, %v3271_v29 }
 0x37a   : > { %v3095_v49 = vpop.permute.xlu0 %3094  ;;  %3974 = vst.msk [vmem:[#allocation3 + $0x100] sm:$0xff] %vm8574_vm1, %v3907_v60  ;;  %v6405_v11 = vld [vmem:[#allocation3 + $0xf4] sm:$0xf] }
 0x37b   : > { %5114 = vxpose.xlu1.b32.start [1/16] %v5035_v57, 128  ;;  %3161 = vst.msk [vmem:[#allocation3 + $0x16c] sm:$0xf] %vm3130_vm9, %v3095_v49  ;;  %v3852_v24 = vpop.permute.xlu2 %3851  ;;  %v9297_v49 = vpop.f32.mrf.mxu2 }
 0x37c   : > { %v3884_v58 = vrot.slane %v3852_v24, 4 }
 0x37e   : > { %v3917_v23 = vsel %vm3885_vm11, %v3884_v58, %v3852_v24  ;;  %v9299_v24 = vpop.f32.mrf.mxu1 }
 0x380   : > { %v3850_v39 = vpop.permute.xlu1 %3849 }
 0x381   : > { %v6177_v13 = vld [vmem:[#allocation3 + $0xfc] sm:$0xf0]  ;;  %v3883_v52 = vrot.slane %v3850_v39, 4 }
 0x382   : > { %v4236_v14 = vpop.permute.xlu0 %4235  ;;  %v6180_v40 = vor.u32 %v6405_v11, %v6177_v13  ;;  %v5047_v13 = vadd.f32 %v9206_v42, %v4958_v9 }
 0x383   : > { %4311 = vst.msk [vmem:[#allocation3 + $0x104] sm:$0xf] %vm4289_vm0, %v4236_v14  ;;  %5115 = vxpose.xlu1.b32.cont [2/16] %v5037_v59, 128  ;;  %v4234_v61 = vpop.permute.xlu2 %4233  ;;  %v3916_v16 = vsel %vm3885_vm11, %v3883_v52, %v3850_v39  ;;  %v9306_v59 = vpop.f32.mrf.mxu0 }
 0x384   : > { %4994 = vmatmul.bf16.gmra.mxu1 %v6180_v40  ;;  %4310 = vst.msk [vmem:[#allocation3 + $0xf8] sm:$0xf] %vm4289_vm0, %v4234_v61  ;;  %v9313_v40 = vpop.f32.mrf.mxu2  ;;  %v4961_v61 = vadd.f32 %v9208_v30, %v4872_v0 }
 0x386   : > { %v9321_v10 = vpop.f32.mrf.mxu1 }
 0x388   : > { %v3097_v34 = vpop.permute.xlu1 %3096 }
 0x389   : > { %3162 = vst.msk [vmem:[#allocation3 + $0x178] sm:$0xf] %vm3130_vm9, %v3097_v34  ;;  %v5050_v34 = vadd.f32 %v9214_v41, %v4961_v61 }
 0x38a   : > { %v3834_v1 = vpop.permute.xlu0 %3833  ;;  %v6407_v51 = vld [vmem:[#allocation3 + $0x100] sm:$0xf0] }
 0x38b   : > { %5116 = vxpose.xlu1.b32.cont [3/16] %v5040_v22, 128  ;;  %v3291_v56 = vpop.permute.xlu2 %3290  ;;  %v6183_v21 = vld [vmem:[#allocation3 + $0xf8] sm:$0xf]  ;;  %v3875_v32 = vrot.slane %v3834_v1, 4  ;;  %v9327_v58 = vpop.f32.mrf.mxu0 }
 0x38c   : > { %3356 = vst.msk [vmem:[#allocation3 + $0x178] sm:$0xf] %vm3324_vm15, %v3291_v56  ;;  %v6184_v19 = vor.u32 %v6407_v51, %v6183_v21  ;;  %v9330_v31 = vpop.f32.mrf.mxu2 }
 0x38d   : > { %3984 = vst.msk [vmem:[#allocation3 + $0x178] sm:$0xff] %vm8574_vm1, %v3917_v23  ;;  %v3908_v14 = vsel %vm3885_vm11, %v3875_v32, %v3834_v1 }
 0x38e   : > { %6335 = vmatmul.msk.bf16.gmra.mxu2 %vm4794_vm2, %v6184_v19  ;;  %v9334_v52 = vpop.f32.mrf.mxu1 }
 0x390   : > { %v3289_v63 = vpop.permute.xlu1 %3288 }
 0x391   : > { %3355 = vst.msk [vmem:[#allocation3 + $0x16c] sm:$0xf] %vm3324_vm15, %v3289_v63 }
 0x392   : > { %v3081_v38 = vpop.permute.xlu0 %3080  ;;  %3983 = vst.msk [vmem:[#allocation3 + $0x16c] sm:$0xff] %vm8574_vm1, %v3916_v16 }
 0x393   : > { %5117 = vxpose.xlu1.b32.cont [4/16] %v5042_v36, 128  ;;  %3154 = vst.msk [vmem:[#allocation3 + $0x118] sm:$0xf] %vm3130_vm9, %v3081_v38  ;;  %v3079_v12 = vpop.permute.xlu2 %3078  ;;  %v5052_v36 = vadd.f32 %v9235_v62, %v4963_v20  ;;  %v9341_v38 = vpop.f32.mrf.mxu3  ;;  %v4877_v62 = vadd.f32 %v9225_v50, %v9217_v45  ;;  %v4879_v45 = vadd.f32 %v9225_v50, %v9241_v25 }
 0x394   : > { %3153 = vst.msk [vmem:[#allocation3 + $0x10c] sm:$0xf] %vm3130_vm9, %v3079_v12  ;;  %v6237_v57 = vld [vmem:[#allocation3 + $0x174] sm:$0xf0]  ;;  %v9345_v54 = vpop.f32.mrf.mxu0  ;;  %v9347_v48 = vpop.f32.mrf.mxu2  ;;  %v4882_v25 = vadd.f32 %v9225_v50, %v9257_v3  ;;  %v4884_v3 = vadd.f32 %v9225_v50, %v9270_v5 }
 0x395   : > { %v4966_v18 = vadd.f32 %v9237_v4, %v4877_v62 }
 0x396   : > { %v4971_v61 = vadd.f32 %v9266_v55, %v4882_v25  ;;  %v4973_v55 = vadd.f32 %v9285_v17, %v4884_v3  ;;  %v5186_v3 = vld [vmem:[#allocation10] sm:$0xff] }
 0x398   : > { %v3836_v33 = vpop.permute.xlu1 %3835 }
 0x399   : > { %v3876_v27 = vrot.slane %v3836_v33, 4  ;;  %v6420_v29 = vld [vmem:[#allocation3 + $0x16c] sm:$0xf] }
 0x39a   : > { %v4238_v60 = vpop.permute.xlu0 %4237  ;;  %v6240_v15 = vor.u32 %v6420_v29, %v6237_v57 }
 0x39b   : > { %5118 = vxpose.xlu1.b32.cont [5/16] %v5045_v46, 128  ;;  %v3909_v37 = vsel %vm3885_vm11, %v3876_v27, %v3836_v33  ;;  %v3275_v39 = vpop.permute.xlu2 %3274  ;;  %v9353_v33 = vpop.f32.mrf.mxu1  ;;  %v5055_v27 = vadd.f32 %v9251_v8, %v4966_v18 }
 0x39c   : > { %5019 = vmatmul.bf16.gmra.mxu3 %v6240_v15  ;;  %3348 = vst.msk [vmem:[#allocation3 + $0x118] sm:$0xf] %vm3324_vm15, %v3275_v39  ;;  %v9357_v29 = vpop.f32.mrf.mxu3  ;;  %v4896_v15 = vpop.f32.mrf.mxu0 }
 0x39d   : > { %3976 = vst.msk [vmem:[#allocation3 + $0x118] sm:$0xff] %vm8574_vm1, %v3909_v37  ;;  %v5071_v6 = vpop.f32.mrf.mxu2  ;;  %v4968_v37 = vadd.f32 %v9254_v53, %v4879_v45 }
 0x39f   : > { %v5057_v8 = vadd.f32 %v9263_v7, %v4968_v37  ;;  %v5060_v7 = vadd.f32 %v9277_v26, %v4971_v61  ;;  %v5062_v26 = vadd.f32 %v9297_v49, %v4973_v55 }
 0x3a0   : > { %v3273_v11 = vpop.permute.xlu1 %3272 }
 0x3a1   : > { %3347 = vst.msk [vmem:[#allocation3 + $0x10c] sm:$0xf] %vm3324_vm15, %v3273_v11 }
 0x3a2   : > { %v4248_v28 = vpop.permute.xlu0 %4247  ;;  %3975 = vst.msk [vmem:[#allocation3 + $0x10c] sm:$0xff] %vm8574_vm1, %v3908_v14 }
 0x3a3   : > { %4312 = vst.msk [vmem:[#allocation3 + $0x110] sm:$0xf] %vm4289_vm0, %v4238_v60  ;;  %5119 = vxpose.xlu1.b32.cont [6/16] %v5047_v13, 128  ;;  %v4246_v42 = vpop.permute.xlu2 %4245  ;;  %v4897_v13 = vadd.f32 %v9225_v50, %v4896_v15 }
 0x3a4   : > { %4317 = vst.msk [vmem:[#allocation3 + $0x14c] sm:$0xf] %vm4289_vm0, %v4248_v28  ;;  %v6189_v22 = vld [vmem:[#allocation3 + $0x114] sm:$0xf0]  ;;  %v9368_v28 = vpop.f32.mrf.mxu3 }
 0x3a5   : > { %4316 = vst.msk [vmem:[#allocation3 + $0x140] sm:$0xf] %vm4289_vm0, %v4246_v42  ;;  %v4898_v42 = vpop.f32.mrf.mxu0 }
 0x3a8   : > { %v4240_v43 = vpop.permute.xlu1 %4239 }
 0x3a9   : > { %4313 = vst.msk [vmem:[#allocation3 + $0x11c] sm:$0xf] %vm4289_vm0, %v4240_v43  ;;  %v6408_v35 = vld [vmem:[#allocation3 + $0x10c] sm:$0xf]  ;;  %v4985_v39 = vpop.f32.mrf.mxu1 }
 0x3aa   : > { %v4250_v1 = vpop.permute.xlu0 %4249  ;;  %v6192_v51 = vor.u32 %v6408_v35, %v6189_v22  ;;  %v6195_v56 = vld [vmem:[#allocation3 + $0x110] sm:$0xf]  ;;  %v4986_v14 = vadd.f32 %v4985_v39, %v4897_v13 }
 0x3ab   : > { %4318 = vst.msk [vmem:[#allocation3 + $0x158] sm:$0xf] %vm4289_vm0, %v4250_v1  ;;  %5120 = vxpose.xlu1.b32.cont [7/16] %v5050_v34, 128  ;;  %v6416_v30 = vld [vmem:[#allocation3 + $0x148] sm:$0xf0]  ;;  %v4244_v21 = vpop.permute.xlu2 %4243  ;;  %v4899_v34 = vadd.f32 %v9225_v50, %v4898_v42 }
 0x3ac   : > { %4999 = vmatmul.bf16.gmra.mxu1 %v6192_v51  ;;  %v6219_v41 = vld [vmem:[#allocation3 + $0x140] sm:$0xf]  ;;  %4315 = vst.msk [vmem:[#allocation3 + $0x134] sm:$0xf] %vm4289_vm0, %v4244_v21 }
 0x3ad   : > { %v6220_v23 = vor.u32 %v6416_v30, %v6219_v41  ;;  %v9375_v41 = vpop.f32.mrf.mxu3 }
 0x3af   : > { %6338 = vmatmul.msk.bf16.vlgmr.msra.gmra.mxu3 %vm4794_vm2, %v6220_v23  ;;  %v4889_v23 = vadd.f32 %v9225_v50, %v9306_v59 }
 0x3b0   : > { %v4242_v19 = vpop.permute.xlu1 %4241  ;;  %v6410_v63 = vld [vmem:[#allocation3 + $0x118] sm:$0xf0] }
 0x3b1   : > { %4314 = vst.msk [vmem:[#allocation3 + $0x128] sm:$0xf] %vm4289_vm0, %v4242_v19  ;;  %v6196_v16 = vor.u32 %v6410_v63, %v6195_v56  ;;  %v4987_v43 = vpop.f32.mrf.mxu1  ;;  %v4887_v56 = vadd.f32 %v9225_v50, %v9292_v44  ;;  %v4978_v17 = vadd.f32 %v9321_v10, %v4889_v23  ;;  %v4892_v44 = vadd.f32 %v9225_v50, %v9327_v58  ;;  %v4901_v63 = vpop.f32.mrf.mxu0 }
 0x3b2   : > { %v4256_v2 = vpop.permute.xlu0 %4255  ;;  %v6231_v4 = vld [vmem:[#allocation3 + $0x158] sm:$0xf]  ;;  %v4988_v1 = vadd.f32 %v4987_v43, %v4899_v34  ;;  %v4894_v10 = vadd.f32 %v9225_v50, %v9345_v54 }
 0x3b3   : > { %4321 = vst.msk [vmem:[#allocation3 + $0x17c] sm:$0xf] %vm4289_vm0, %v4256_v2  ;;  %6336 = vmatmul.msk.bf16.gmra.mxu2 %vm4794_vm2, %v6196_v16  ;;  %5121 = vxpose.xlu1.b32.cont [8/16] %v5052_v36, 128  ;;  %v4254_v12 = vpop.permute.xlu2 %4253  ;;  %v6413_v60 = vld [vmem:[#allocation3 + $0x130] sm:$0xf0]  ;;  %v4976_v21 = vadd.f32 %v9299_v24, %v4887_v56  ;;  %v5067_v49 = vadd.f32 %v9330_v31, %v4978_v17 }
 0x3b4   : > { %4320 = vst.msk [vmem:[#allocation3 + $0x170] sm:$0xf] %vm4289_vm0, %v4254_v12  ;;  %v4981_v24 = vadd.f32 %v9334_v52, %v4892_v44  ;;  %v4902_v16 = vadd.f32 %v9225_v50, %v4901_v63  ;;  %v4983_v58 = vadd.f32 %v9353_v33, %v4894_v10 }
 0x3b5   : > { %v9383_v20 = vpop.f32.mrf.mxu3  ;;  %v5065_v5 = vadd.f32 %v9313_v40, %v4976_v21 }
 0x3b6   : > { %v5070_v40 = vadd.f32 %v9347_v48, %v4981_v24  ;;  %v5072_v18 = vadd.f32 %v5071_v6, %v4983_v58 }
 0x3b8   : > { %v4252_v46 = vpop.permute.xlu1 %4251  ;;  %v6207_v57 = vld [vmem:[#allocation3 + $0x128] sm:$0xf] }
 0x3b9   : > { %4319 = vst.msk [vmem:[#allocation3 + $0x164] sm:$0xf] %vm4289_vm0, %v4252_v46  ;;  %v6208_v32 = vor.u32 %v6413_v60, %v6207_v57  ;;  %v4903_v12 = vpop.f32.mrf.mxu0 }
 0x3ba   : > { %v6422_v22 = vld [vmem:[#allocation3 + $0x178] sm:$0xf0]  ;;  %v4904_v46 = vadd.f32 %v9225_v50, %v4903_v12 }
 0x3bb   : > { %5122 = vxpose.xlu1.b32.cont [9/16] %v5055_v27, 128  ;;  %v6243_v35 = vld [vmem:[#allocation3 + $0x170] sm:$0xf] }
 0x3bc   : > { %v6244_v47 = vor.u32 %v6422_v22, %v6243_v35 }
 0x3bd   : > { %v9390_v19 = vpop.f32.mrf.mxu3 }
 0x3c0   : > { %v6419_v9 = vld [vmem:[#allocation3 + $0x160] sm:$0xf0] }
 0x3c1   : > { %v6232_v11 = vor.u32 %v6419_v9, %v6231_v4  ;;  %v4906_v54 = vpop.f32.mrf.mxu0 }
 0x3c3   : > { %6337 = vmatmul.msk.bf16.gmra.mxu2 %vm4794_vm2, %v6208_v32  ;;  %6339 = vmatmul.msk.bf16.gmra.mxu3 %vm4794_vm2, %v6232_v11  ;;  %v4907_v32 = vadd.f32 %v9225_v50, %v4906_v54  ;;  %v4919_v54 = vadd.f32 %v9225_v50, %v9357_v29 }
 0x3c4   : > { %5123 = vxpose.xlu1.b32.cont [10/16] %v5057_v8, 128 }
 0x3c5   : > { %v9397_v2 = vpop.f32.mrf.mxu3 }
 0x3c6   : > { %v5074_v0 = vpop.f32.mrf.mxu2 }
 0x3c7   : > { %v5075_v53 = vadd.f32 %v5074_v0, %v4986_v14 }
 0x3c9   : > { %5146 = vxpose.xlu2.b32.start [1/16] %v5075_v53, 128  ;;  %v4908_v9 = vpop.f32.mrf.mxu0 }
 0x3ca   : > { %v4909_v8 = vadd.f32 %v9225_v50, %v4908_v9 }
 0x3cc   : > { %5124 = vxpose.xlu1.b32.cont [11/16] %v5060_v7, 128 }
 0x3cd   : > { %v9403_v60 = vpop.f32.mrf.mxu3 }
 0x3ce   : > { %v5076_v51 = vpop.f32.mrf.mxu2 }
 0x3cf   : > { %v5077_v30 = vadd.f32 %v5076_v51, %v4988_v1  ;;  %v9419_v1 = vld [vmem:[%s7236_s22] sm:$0xff] }
 0x3d0   : > { %v5194_v55 = vmul.f32 %v5186_v3, %v9419_v1 }
 0x3d1   : > { %5147 = vxpose.xlu2.b32.cont [2/16] %v5077_v30, 128  ;;  %v4911_v7 = vpop.f32.mrf.mxu0 }
 0x3d2   : > { %v4990_v36 = vpop.f32.mrf.mxu1  ;;  %v4912_v22 = vadd.f32 %v9225_v50, %v4911_v7 }
 0x3d3   : > { %6340 = vmatmul.msk.bf16.gmra.mxu3 %vm4794_vm2, %v6244_v47  ;;  %v4991_v59 = vadd.f32 %v4990_v36, %v4902_v16  ;;  %v5362_v36 = vld [vmem:[#allocation12] sm:$0xff] }
 0x3d4   : > { %5125 = vxpose.xlu1.b32.cont [12/16] %v5062_v26, 128  ;;  %v5370_v16 = vmul.f32 %v5362_v36, %v9419_v1 }
 0x3d5   : > { %v5005_v45 = vpop.f32.mrf.mxu3 }
 0x3d9   : > { %v4913_v56 = vpop.f32.mrf.mxu0 }
 0x3da   : > { %v4992_v52 = vpop.f32.mrf.mxu1  ;;  %v4914_v17 = vadd.f32 %v9225_v50, %v4913_v56 }
 0x3db   : > { %v4993_v48 = vadd.f32 %v4992_v52, %v4904_v46 }
 0x3dc   : > { %5126 = vxpose.xlu1.b32.cont [13/16] %v5065_v5, 128 }
 0x3dd   : > { %v9405_v15 = vpop.f32.mrf.mxu3 }
 0x3e4   : > { %5127 = vxpose.xlu1.b32.cont [14/16] %v5067_v49, 128 }
 0x3e5   : > { %v9408_v33 = vpop.f32.mrf.mxu3 }
 0x3ec   : > { %5128 = vxpose.xlu1.b32.cont [15/16] %v5070_v40, 128 }
 0x3ed   : > { %v9411_v14 = vpop.f32.mrf.mxu3 }
 0x3ee   : > { %v5079_v31 = vpop.f32.mrf.mxu2 }
 0x3ef   : > { %v5080_v62 = vadd.f32 %v5079_v31, %v4991_v59  ;;  %v4917_v31 = vadd.f32 %v9225_v50, %v9341_v38  ;;  %v5190_v38 = vld [vmem:[#allocation10 + $0x20] sm:$0xff] }
 0x3f1   : > { %5148 = vxpose.xlu2.b32.cont [3/16] %v5080_v62, 128  ;;  %v5006_v12 = vadd.f32 %v5005_v45, %v4917_v31 }
 0x3f4   : > { %5129 = vxpose.xlu1.b32.end [16/16] %v5072_v18, 128 }
 0x3f6   : > { %v5081_v27 = vpop.f32.mrf.mxu2 }
 0x3f7   : > { %v5082_v57 = vadd.f32 %v5081_v27, %v4993_v48  ;;  %v9413_v42 = vpop.f32.mrf.mxu3  ;;  %v9433_v27 = vld [vmem:[%s7236_s22 + $0x10] sm:$0xff] }
 0x3f9   : > { %5149 = vxpose.xlu2.b32.cont [4/16] %v5082_v57, 128  ;;  %v5188_v57 = vld [vmem:[#allocation10 + $0x10] sm:$0xff] }
 0x3ff   : > { %v9415_v43 = vpop.f32.mrf.mxu3 }
 0x401   : > { %v4995_v4 = vpop.f32.mrf.mxu1 }
 0x402   : > { %v4996_v6 = vadd.f32 %v4995_v4, %v4907_v32  ;;  %v9440_v32 = vld [vmem:[%s7236_s22 + $0x20] sm:$0xff] }
 0x409   : > { %v4997_v11 = vpop.f32.mrf.mxu1 }
 0x40a   : > { %v4998_v13 = vadd.f32 %v4997_v11, %v4909_v8  ;;  %v5198_v11 = vmul.f32 %v5190_v38, %v9440_v32 }
 0x411   : > { %v5084_v37 = vpop.f32.mrf.mxu2 }
 0x412   : > { %v5085_v39 = vadd.f32 %v5084_v37, %v4996_v6  ;;  %v5008_v6 = vadd.f32 %v9405_v15, %v4919_v54  ;;  %v5196_v37 = vmul.f32 %v5188_v57, %v9433_v27  ;;  %v9451_v15 = vld [vmem:[%s7236_s22 + $0x30] sm:$0xff] }
 0x414   : > { %5150 = vxpose.xlu2.b32.cont [5/16] %v5085_v39, 128 }
 0x419   : > { %v5086_v25 = vpop.f32.mrf.mxu2 }
 0x41a   : > { %v5087_v0 = vadd.f32 %v5086_v25, %v4998_v13 }
 0x41c   : > { %5151 = vxpose.xlu2.b32.cont [6/16] %v5087_v0, 128  ;;  %v5364_v0 = vld [vmem:[#allocation12 + $0x10] sm:$0xff] }
 0x41f   : > { %v9421_v30 = vpop.f32.mrf.mxu3 }
 0x420   : > { %v5130_v53 = vpop.trf.xlu1 }
 0x421   : > { %v5202_v23 = vadd.f32 %v5194_v55, %v5130_v53  ;;  %v4922_v53 = vadd.f32 %v9225_v50, %v9368_v28 }
 0x423   : > { %v6341_v63 = vmul.f32 -1.442695, %v5202_v23  ;;  %v5011_v3 = vadd.f32 %v9408_v33, %v4922_v53  ;;  %v5366_v23 = vld [vmem:[#allocation12 + $0x20] sm:$0xff]  ;;  %v4924_v33 = vadd.f32 %v9225_v50, %v9375_v41  ;;  %v4929_v53 = vadd.f32 %v9225_v50, %v9390_v19 }
 0x425   : > { %6578 = vpow2.f32 %v6341_v63  ;;  %v5013_v63 = vadd.f32 %v9411_v14, %v4924_v33  ;;  %v4927_v14 = vadd.f32 %v9225_v50, %v9383_v20 }
 0x427   : > { %v9427_v40 = vpop.f32.mrf.mxu3 }
 0x428   : > { %v5131_v61 = vpop.trf.xlu1 }
 0x429   : > { %v5000_v34 = vpop.f32.mrf.mxu1  ;;  %v5204_v13 = vadd.f32 %v5196_v37, %v5131_v61 }
 0x42a   : > { %v5001_v51 = vadd.f32 %v5000_v34, %v4912_v22  ;;  %v5192_v34 = vld [vmem:[#allocation10 + $0x30] sm:$0xff] }
 0x42b   : > { %v6579_v52 = vpop.eup %6578 }
 0x42c   : > { %v9437_v4 = vadd.f32 1.0, %v6579_v52  ;;  %v5368_v52 = vld [vmem:[#allocation12 + $0x30] sm:$0xff] }
 0x42e   : > { %vm5247_vm4 = vweird.f32 %v9437_v4  ;;  %v5251_v38 = vand.u32 2147483647, %v9437_v4 }
 0x430   : > { %v5132_v35 = vpop.trf.xlu1  ;;  %vm5252_vm14 = vcmp.eq.f32.partialorder %v5251_v38, 8.507059e+37 }
 0x431   : > { %v5002_v5 = vpop.f32.mrf.mxu1  ;;  %v5206_v7 = vadd.f32 %v5198_v11, %v5132_v35 }
 0x432   : > { %v5003_v49 = vadd.f32 %v5002_v5, %v4914_v17  ;;  %v5099_v46 = vpop.f32.mrf.mxu3 }
 0x433   : > { %v5100_v61 = vadd.f32 %v5099_v46, %v5011_v3  ;;  %v6345_v55 = vmul.f32 -1.442695, %v5206_v7  ;;  %v5253_v46 = vand.u32 2147483648, %v9437_v4 }
 0x435   : > { %v5254_v11 = vor.u32 1.1754944e-38, %v5253_v46 }
 0x436   : > { %v5089_v47 = vpop.f32.mrf.mxu2 }
 0x437   : > { %v5090_v26 = vadd.f32 %v5089_v47, %v5001_v51  ;;  %v6343_v51 = vmul.f32 -1.442695, %v5204_v13  ;;  %v5372_v47 = vmul.f32 %v5364_v0, %v9433_v27 }
 0x438   : > { %v9424_v21 = vpop.trf.xlu1 }
 0x439   : > { %5152 = vxpose.xlu2.b32.cont [7/16] %v5090_v26, 128  ;;  %v5200_v26 = vmul.f32 %v5192_v34, %v9451_v15 }
 0x43a   : > { %v5101_v25 = vpop.f32.mrf.mxu3 }
 0x43b   : > { %v5208_v17 = vadd.f32 %v5200_v26, %v9424_v21 }
 0x43d   : > { %v6347_v31 = vmul.f32 -1.442695, %v5208_v17 }
 0x43e   : > { %v5091_v44 = vpop.f32.mrf.mxu2 }
 0x43f   : > { %v5092_v24 = vadd.f32 %v5091_v44, %v5003_v49 }
 0x440   : > { %v5134_v59 = vpop.trf.xlu1 }
 0x441   : > { %5153 = vxpose.xlu2.b32.cont [8/16] %v5092_v24, 128  ;;  %v5378_v10 = vadd.f32 %v5370_v16, %v5134_v59  ;;  %v5374_v16 = vmul.f32 %v5366_v23, %v9440_v32 }
 0x443   : > { %v6349_v62 = vmul.f32 -1.442695, %v5378_v10  ;;  %v5102_v10 = vadd.f32 %v5101_v25, %v5013_v63 }
 0x445   : > { %6580 = vpow2.f32 %v6349_v62 }
 0x446   : > { %v5094_v58 = vpop.f32.mrf.mxu2  ;;  %6582 = vrcp.f32 %v9437_v4  ;;  %v5104_v44 = vpop.f32.mrf.mxu3 }
 0x447   : > { %v5095_v18 = vadd.f32 %v5094_v58, %v5006_v12 }
 0x448   : > { %v5135_v48 = vpop.trf.xlu1 }
 0x449   : > { %5154 = vxpose.xlu2.b32.cont [9/16] %v5095_v18, 128  ;;  %v5380_v56 = vadd.f32 %v5372_v47, %v5135_v48  ;;  %v5016_v48 = vadd.f32 %v9413_v42, %v4927_v14 }
 0x44b   : > { %v6581_v45 = vpop.eup %6580  ;;  %v6351_v36 = vmul.f32 -1.442695, %v5380_v56 }
 0x44c   : > { %v9446_v8 = vadd.f32 1.0, %v6581_v45  ;;  %v9454_v22 = vpop.eup %6582 }
 0x44d   : > { %v5243_v28 = vmul.f32 %v9454_v22, %v9437_v4  ;;  %vm5248_vm6 = vweird.f32 %v9454_v22 }
 0x44e   : > { %v5096_v39 = vpop.f32.mrf.mxu2  ;;  %6584 = vrcp.f32 %v9446_v8  ;;  %vm9485_vm10 = vmor %vm5247_vm4, %vm5248_vm6  ;;  %vm5423_vm3 = vweird.f32 %v9446_v8 }
 0x44f   : > { %v5097_v9 = vadd.f32 %v5096_v39, %v5008_v6  ;;  %6586 = vpow2.f32 %v6343_v51  ;;  %v5244_v49 = vsub.f32 1.0, %v5243_v28  ;;  %v5376_v6 = vmul.f32 %v5368_v52, %v9451_v15  ;;  %v5106_v39 = vpop.f32.mrf.mxu3 }
 0x450   : > { %v5136_v29 = vpop.trf.xlu1  ;;  %6588 = vpow2.f32 %v6345_v55  ;;  %v5429_v51 = vand.u32 2147483648, %v9446_v8 }
 0x451   : > { %5155 = vxpose.xlu2.b32.cont [10/16] %v5097_v9, 128  ;;  %v5245_v62 = vmul.f32 %v9454_v22, %v5244_v49  ;;  %6590 = vpow2.f32 %v6351_v36  ;;  %v5382_v21 = vadd.f32 %v5374_v16, %v5136_v29  ;;  %v5105_v9 = vadd.f32 %v5104_v44, %v5016_v48 }
 0x452   : > { %6592 = vpow2.f32 %v6347_v31  ;;  %v5430_v28 = vor.u32 1.1754944e-38, %v5429_v51  ;;  %v4932_v36 = vadd.f32 %v9225_v50, %v9397_v2 }
 0x453   : > { %v5246_v54 = vadd.f32 %v9454_v22, %v5245_v62  ;;  %v6353_v45 = vmul.f32 -1.442695, %v5382_v21  ;;  %v4934_v21 = vadd.f32 %v9225_v50, %v9403_v60 }
 0x454   : > { %v9461_v5 = vpop.eup %6584 }
 0x455   : > { %v5419_v24 = vmul.f32 %v9461_v5, %v9446_v8  ;;  %v6587_v59 = vpop.eup %6586  ;;  %v5250_v4 = vsel %vm9485_vm10, %v9454_v22, %v5246_v54  ;;  %vm5424_vm5 = vweird.f32 %v9461_v5  ;;  %v5427_v22 = vand.u32 2147483647, %v9446_v8  ;;  %v5570_v54 = vld [vmem:[#allocation13] sm:$0xff] }
 0x456   : > { %v6589_v41 = vpop.eup %6588  ;;  %v9473_v18 = vadd.f32 1.0, %v6587_v59  ;;  %v5255_v3 = vsel %vm5252_vm14, %v5254_v11, %v5250_v4  ;;  %vm5425_vm7 = vmor %vm5423_vm3, %vm5424_vm5  ;;  %v5023_v38 = vadd.f32 %v9427_v40, %v4934_v21 }
 0x457   : > { %v5420_v58 = vsub.f32 1.0, %v5419_v24  ;;  %v9479_v57 = vadd.f32 1.0, %v6589_v41  ;;  %v6591_v42 = vpop.eup %6590  ;;  %vm5428_vm8 = vcmp.eq.f32.partialorder %v5427_v22, 8.507059e+37  ;;  %v5109_v17 = vpop.f32.mrf.mxu3 }
 0x458   : > { %v5137_v35 = vpop.trf.xlu1  ;;  %v6593_v13 = vpop.eup %6592  ;;  %v9499_v7 = vadd.f32 1.0, %v6591_v42  ;;  %vm5277_vm9 = vweird.f32 %v9473_v18  ;;  %v5283_v46 = vand.u32 2147483648, %v9473_v18  ;;  %v5281_v60 = vand.u32 2147483647, %v9473_v18 }
 0x459   : > { %5156 = vxpose.xlu2.b32.cont [11/16] %v5100_v61, 128  ;;  %v5421_v20 = vmul.f32 %v9461_v5, %v5420_v58  ;;  %v5384_v25 = vadd.f32 %v5376_v6, %v5137_v35  ;;  %v5018_v61 = vadd.f32 %v9415_v43, %v4929_v53  ;;  %v9508_v55 = vadd.f32 1.0, %v6593_v13 }
 0x45a   : > { %vm5307_vm13 = vweird.f32 %v9479_v57  ;;  %vm5282_vm1 = vcmp.eq.f32.partialorder %v5281_v60, 8.507059e+37  ;;  %vm5453_vm4 = vweird.f32 %v9499_v7 }
 0x45b   : > { %v5422_v0 = vadd.f32 %v9461_v5, %v5421_v20  ;;  %v6355_v19 = vmul.f32 -1.442695, %v5384_v25  ;;  %v5107_v33 = vadd.f32 %v5106_v39, %v5018_v61  ;;  %vm5337_vm10 = vweird.f32 %v9508_v55 }
 0x45d   : > { %v5426_v26 = vsel %vm5425_vm7, %v9461_v5, %v5422_v0 }
 0x45e   : > { %v5431_v43 = vsel %vm5428_vm8, %v5430_v28, %v5426_v26  ;;  %v5459_v26 = vand.u32 2147483648, %v9499_v7 }
 0x45f   : > { %v5538_v5 = vmul.f32 %v5431_v43, %v9419_v1  ;;  %v5021_v1 = vadd.f32 %v9421_v30, %v4932_v36  ;;  %v5111_v14 = vpop.f32.mrf.mxu3 }
 0x460   : > { %v5138_v12 = vpop.trf.xlu1  ;;  %v5112_v39 = vadd.f32 %v5111_v14, %v5023_v38 }
 0x461   : > { %5157 = vxpose.xlu2.b32.cont [12/16] %v5102_v10, 128  ;;  %6594 = vtanh.f32 %v5138_v12  ;;  %v5110_v12 = vadd.f32 %v5109_v17, %v5021_v1 }
 0x462   : > { %6596 = vrcp.f32 %v9473_v18 }
 0x463   : > { %6598 = vrcp.f32 %v9479_v57 }
 0x464   : > { %6600 = vpow2.f32 %v6353_v45 }
 0x465   : > { %6602 = vrcp.f32 %v9499_v7 }
 0x466   : > { %6604 = vrcp.f32 %v9508_v55 }
 0x467   : > { %v6595_v34 = vpop.eup %6594  ;;  %6606 = vpow2.f32 %v6355_v19 }
 0x468   : > { %v9494_v29 = vpop.trf.xlu1  ;;  %v9505_v47 = vpop.eup %6596  ;;  %v5554_v56 = vmul.f32 %v6595_v34, %v5255_v3 }
 0x469   : > { %5158 = vxpose.xlu2.b32.cont [13/16] %v5105_v9, 128  ;;  %v9511_v35 = vpop.eup %6598  ;;  %v5273_v8 = vmul.f32 %v9505_v47, %v9473_v18  ;;  %vm5278_vm11 = vweird.f32 %v9505_v47  ;;  %v5284_v18 = vor.u32 1.1754944e-38, %v5283_v46  ;;  %v5311_v9 = vand.u32 2147483647, %v9479_v57 }
 0x46a   : > { %v6601_v23 = vpop.eup %6600  ;;  %v5303_v44 = vmul.f32 %v9511_v35, %v9479_v57  ;;  %v9524_v24 = vadd.f32 %v5554_v56, %v5538_v5  ;;  %vm9559_vm12 = vmor %vm5277_vm9, %vm5278_vm11  ;;  %vm5308_vm15 = vweird.f32 %v9511_v35 }
 0x46b   : > { %v9522_v63 = vadd.f32 1.0, %v6601_v23  ;;  %v5274_v16 = vsub.f32 1.0, %v5273_v8  ;;  %v9533_v59 = vpop.eup %6602  ;;  %vm9575_vm0 = vmor %vm5307_vm13, %vm5308_vm15  ;;  %vm9584_vm2 = vcmp.eq.f32.partialorder %v5311_v9, 8.507059e+37  ;;  %v5460_v23 = vor.u32 1.1754944e-38, %v5459_v26 }
 0x46c   : > { %5770 = vst [vmem:[%s9529_s2] sm:$0xff] %v9524_v24  ;;  %v9536_v10 = vpop.eup %6604  ;;  %v5304_v31 = vsub.f32 1.0, %v5303_v44  ;;  %v5449_v2 = vmul.f32 %v9533_v59, %v9499_v7  ;;  %v5578_v40 = vmul.f32 %v5570_v54, %v9524_v24  ;;  %vm5454_vm6 = vweird.f32 %v9533_v59 }
 0x46d   : > { %6608 = vrcp.f32 %v9522_v63  ;;  %v6607_v62 = vpop.eup %6606  ;;  %v5275_v41 = vmul.f32 %v9505_v47, %v5274_v16  ;;  %v5333_v30 = vmul.f32 %v9536_v10, %v9508_v55  ;;  %vm5338_vm14 = vweird.f32 %v9536_v10  ;;  %vm5455_vm3 = vmor %vm5453_vm4, %vm5454_vm6 }
 0x46e   : > { %v9550_v52 = vadd.f32 1.0, %v6607_v62  ;;  %v5305_v48 = vmul.f32 %v9511_v35, %v5304_v31  ;;  %v5450_v45 = vsub.f32 1.0, %v5449_v2  ;;  %6610 = vtanh.f32 %v9494_v29  ;;  %vm9605_vm7 = vmor %vm5337_vm10, %vm5338_vm14  ;;  %v5572_v2 = vld [vmem:[#allocation13 + $0x10] sm:$0xff] }
 0x46f   : > { %v5276_v50 = vadd.f32 %v9505_v47, %v5275_v41  ;;  %v5334_v37 = vsub.f32 1.0, %v5333_v30  ;;  %v5313_v29 = vand.u32 2147483648, %v9479_v57  ;;  %v5341_v16 = vand.u32 2147483647, %v9508_v55 }
 0x470   : > { %v9517_v49 = vpop.trf.xlu1  ;;  %6612 = vrcp.f32 %v9550_v52  ;;  %v5306_v42 = vadd.f32 %v9511_v35, %v5305_v48  ;;  %v5451_v25 = vmul.f32 %v9533_v59, %v5450_v45  ;;  %v5489_v21 = vand.u32 2147483648, %v9522_v63 }
 0x471   : > { %5159 = vxpose.xlu2.b32.cont [14/16] %v5107_v33, 128  ;;  %v5280_v4 = vsel %vm9559_vm12, %v9505_v47, %v5276_v50  ;;  %v5335_v51 = vmul.f32 %v9536_v10, %v5334_v37  ;;  %v5314_v19 = vor.u32 1.1754944e-38, %v5313_v29  ;;  %vm5483_vm8 = vweird.f32 %v9522_v63 }
 0x472   : > { %v5285_v34 = vsel %vm5282_vm1, %v5284_v18, %v5280_v4  ;;  %v5310_v3 = vsel %vm9575_vm0, %v9511_v35, %v5306_v42  ;;  %v5452_v56 = vadd.f32 %v9533_v59, %v5451_v25  ;;  %v5457_v35 = vand.u32 2147483647, %v9499_v7  ;;  %v5574_v18 = vld [vmem:[#allocation13 + $0x20] sm:$0xff] }
 0x473   : > { %v9557_v20 = vpop.eup %6608  ;;  %v5336_v17 = vadd.f32 %v9536_v10, %v5335_v51  ;;  %v5343_v7 = vand.u32 2147483648, %v9508_v55  ;;  %vm5342_vm9 = vcmp.eq.f32.partialorder %v5341_v16, 8.507059e+37  ;;  %v5490_v46 = vor.u32 1.1754944e-38, %v5489_v21 }
 0x474   : > { %v5479_v11 = vmul.f32 %v9557_v20, %v9522_v63  ;;  %v6611_v47 = vpop.eup %6610  ;;  %v5456_v33 = vsel %vm5455_vm3, %v9533_v59, %v5452_v56  ;;  %vm5458_vm5 = vcmp.eq.f32.partialorder %v5457_v35, 8.507059e+37  ;;  %v5315_v59 = vsel %vm9584_vm2, %v5314_v19, %v5310_v3  ;;  %v5576_v56 = vld [vmem:[#allocation13 + $0x30] sm:$0xff] }
 0x475   : > { %v5556_v8 = vmul.f32 %v6611_v47, %v5285_v34  ;;  %v5461_v5 = vsel %vm5458_vm5, %v5460_v23, %v5456_v33  ;;  %v5344_v41 = vor.u32 1.1754944e-38, %v5343_v7  ;;  %vm5484_vm11 = vweird.f32 %v9557_v20 }
 0x476   : > { %v5480_v61 = vsub.f32 1.0, %v5479_v11  ;;  %v9590_v28 = vpop.eup %6612  ;;  %vm5485_vm12 = vmor %vm5483_vm8, %vm5484_vm11  ;;  %v5519_v42 = vand.u32 2147483648, %v9550_v52  ;;  %vm5513_vm15 = vweird.f32 %v9550_v52  ;;  %v5517_v11 = vand.u32 2147483647, %v9550_v52 }
 0x477   : > { %v5509_v43 = vmul.f32 %v9590_v28, %v9550_v52  ;;  %vm5514_vm1 = vweird.f32 %v9590_v28 }
 0x478   : > { %v9542_v58 = vpop.trf.xlu1  ;;  %v5481_v44 = vmul.f32 %v9557_v20, %v5480_v61  ;;  %vm5515_vm2 = vmor %vm5513_vm15, %vm5514_vm1  ;;  %v5520_v13 = vor.u32 1.1754944e-38, %v5519_v42  ;;  %vm5518_vm4 = vcmp.eq.f32.partialorder %v5517_v11, 8.507059e+37 }
 0x479   : > { %5160 = vxpose.xlu2.b32.cont [15/16] %v5110_v12, 128  ;;  %v5510_v62 = vsub.f32 1.0, %v5509_v43  ;;  %v5340_v12 = vsel %vm9605_vm7, %v9536_v10, %v5336_v17  ;;  %v5487_v10 = vand.u32 2147483647, %v9522_v63 }
 0x47a   : > { %v5345_v45 = vsel %vm5342_vm9, %v5344_v41, %v5340_v12 }
 0x47b   : > { %vm5488_vm13 = vcmp.eq.f32.partialorder %v5487_v10, 8.507059e+37  ;;  %v5511_v60 = vmul.f32 %v9590_v28, %v5510_v62 }
 0x47d   : > { %v5512_v9 = vadd.f32 %v9590_v28, %v5511_v60  ;;  %v5187_v60 = vld [vmem:[#allocation10 + $0x8] sm:$0xff] }
 0x480   : > { %v5142_v0 = vpop.trf.xlu1 }
 0x481   : > { %5161 = vxpose.xlu2.b32.end [16/16] %v5112_v39, 128  ;;  %v5586_v53 = vadd.f32 %v5578_v40, %v5142_v0  ;;  %v5516_v0 = vsel %vm5515_vm2, %v9590_v28, %v5512_v9 }
 0x482   : > { %v5521_v3 = vsel %vm5518_vm4, %v5520_v13, %v5516_v0  ;;  %v9662_v13 = vld [vmem:[%s7236_s22 + $0x18] sm:$0xff] }
 0x483   : > { %v6357_v57 = vmul.f32 -1.442695, %v5586_v53  ;;  %v5544_v22 = vmul.f32 %v5521_v3, %v9451_v15 }
 0x485   : > { %6614 = vpow2.f32 %v6357_v57 }
 0x486   : > { %6616 = vtanh.f32 %v9517_v49  ;;  %v5540_v49 = vmul.f32 %v5461_v5, %v9433_v27 }
 0x487   : > { %6618 = vtanh.f32 %v9542_v58  ;;  %v5482_v58 = vadd.f32 %v9557_v20, %v5481_v44 }
 0x488   : > { %v9614_v1 = vadd.f32 %v5556_v8, %v5540_v49  ;;  %v5143_v14 = vpop.trf.xlu1 }
 0x489   : > { %v5486_v38 = vsel %vm5485_vm12, %v9557_v20, %v5482_v58 }
 0x48a   : > { %v5580_v55 = vmul.f32 %v5572_v2, %v9614_v1  ;;  %5772 = vst [vmem:[%s9529_s2 + $0x10] sm:$0xff] %v9614_v1  ;;  %v5491_v6 = vsel %vm5488_vm13, %v5490_v46, %v5486_v38 }
 0x48b   : > { %v6615_v31 = vpop.eup %6614  ;;  %v5542_v39 = vmul.f32 %v5491_v6, %v9440_v32 }
 0x48c   : > { %v6617_v27 = vpop.eup %6616  ;;  %v5618_v30 = vadd.f32 1.0, %v6615_v31  ;;  %v5588_v54 = vadd.f32 %v5580_v55, %v5143_v14 }
 0x48d   : > { %v5558_v48 = vmul.f32 %v6617_v27, %v5315_v59  ;;  %v6619_v50 = vpop.eup %6618 }
 0x48e   : > { %6620 = vrcp.f32 %v5618_v30  ;;  %v6359_v37 = vmul.f32 -1.442695, %v5588_v54  ;;  %v5560_v63 = vmul.f32 %v6619_v50, %v5345_v45  ;;  %vm5631_vm0 = vweird.f32 %v5618_v30  ;;  %v9657_v50 = vld [vmem:[%s7236_s22 + $0x8] sm:$0xff] }
 0x48f   : > { %6622 = vtanh.f32 %v9524_v24  ;;  %v9631_v40 = vadd.f32 %v5558_v48, %v5542_v39  ;;  %v5635_v29 = vand.u32 2147483647, %v5618_v30  ;;  %v5637_v25 = vand.u32 2147483648, %v5618_v30 }
 0x490   : > { %6624 = vpow2.f32 %v6359_v37  ;;  %v5144_v24 = vpop.trf.xlu1  ;;  %v9644_v26 = vadd.f32 %v5560_v63, %v5544_v22 }
 0x491   : > { %v5582_v32 = vmul.f32 %v5574_v18, %v9631_v40  ;;  %5774 = vst [vmem:[%s9529_s2 + $0x20] sm:$0xff] %v9631_v40  ;;  %v5638_v19 = vor.u32 1.1754944e-38, %v5637_v25  ;;  %vm5636_vm14 = vcmp.eq.f32.partialorder %v5635_v29, 8.507059e+37  ;;  %v5189_v29 = vld [vmem:[#allocation10 + $0x18] sm:$0xff] }
 0x492   : > { %5776 = vst [vmem:[%s9529_s2 + $0x30] sm:$0xff] %v9644_v26  ;;  %v5584_v15 = vmul.f32 %v5576_v56, %v9644_v26  ;;  %v5197_v3 = vmul.f32 %v5189_v29, %v9662_v13 }
 0x493   : > { %v5590_v34 = vadd.f32 %v5582_v32, %v5144_v24 }
 0x494   : > { %v6621_v20 = vpop.eup %6620 }
 0x495   : > { %v5627_v4 = vmul.f32 %v6621_v20, %v5618_v30  ;;  %vm5632_vm6 = vweird.f32 %v6621_v20  ;;  %v6623_v52 = vpop.eup %6622  ;;  %v6361_v61 = vmul.f32 -1.442695, %v5590_v34 }
 0x496   : > { %v6625_v51 = vpop.eup %6624  ;;  %vm5633_vm10 = vmor %vm5631_vm0, %vm5632_vm6 }
 0x497   : > { %v5628_v53 = vsub.f32 1.0, %v5627_v4  ;;  %v5620_v57 = vadd.f32 1.0, %v6625_v51  ;;  %6626 = vpow2.f32 %v6361_v61  ;;  %v5363_v61 = vld [vmem:[#allocation12 + $0x8] sm:$0xff] }
 0x498   : > { %v5145_v23 = vpop.trf.xlu1  ;;  %v5371_v56 = vmul.f32 %v5363_v61, %v9657_v50 }
 0x499   : > { %v5629_v47 = vmul.f32 %v6621_v20, %v5628_v53  ;;  %6628 = vrcp.f32 %v5620_v57  ;;  %v5592_v43 = vadd.f32 %v5584_v15, %v5145_v23  ;;  %v5667_v16 = vand.u32 2147483648, %v5620_v57 }
 0x49a   : > { %6630 = vtanh.f32 %v9614_v1  ;;  %vm5661_vm3 = vweird.f32 %v5620_v57  ;;  %v5665_v31 = vand.u32 2147483647, %v5620_v57 }
 0x49b   : > { %v5630_v28 = vadd.f32 %v6621_v20, %v5629_v47  ;;  %v6363_v7 = vmul.f32 -1.442695, %v5592_v43  ;;  %v5668_v41 = vor.u32 1.1754944e-38, %v5667_v16 }
 0x49c   : > { %vm5666_vm8 = vcmp.eq.f32.partialorder %v5665_v31, 8.507059e+37 }
 0x49d   : > { %v5634_v35 = vsel %vm5633_vm10, %v6621_v20, %v5630_v28  ;;  %v6627_v17 = vpop.eup %6626  ;;  %6632 = vpow2.f32 %v6363_v7  ;;  %v5191_v28 = vld [vmem:[#allocation10 + $0x28] sm:$0xff] }
 0x49e   : > { %v5639_v8 = vsel %vm5636_vm14, %v5638_v19, %v5634_v35  ;;  %v5622_v36 = vadd.f32 1.0, %v6627_v17 }
 0x49f   : > { %v5754_v33 = vmul.f32 %v6623_v52, %v5639_v8  ;;  %v6629_v5 = vpop.eup %6628 }
 0x4a0   : > { %v5657_v49 = vmul.f32 %v6629_v5, %v5620_v57  ;;  %6634 = vrcp.f32 %v5622_v36  ;;  %vm5662_vm5 = vweird.f32 %v6629_v5  ;;  %v6631_v12 = vpop.eup %6630  ;;  %vm5691_vm9 = vweird.f32 %v5622_v36 }
 0x4a1   : > { %5762 = vst [vmem:[%s9650_s24] sm:$0xff] %v5754_v33  ;;  %vm5663_vm7 = vmor %vm5661_vm3, %vm5662_vm5  ;;  %6636 = vtanh.f32 %v9631_v40  ;;  %v5697_v10 = vand.u32 2147483648, %v5622_v36  ;;  %v5695_v54 = vand.u32 2147483647, %v5622_v36  ;;  %v5195_v40 = vmul.f32 %v5187_v60, %v9657_v50  ;;  %v5365_v33 = vld [vmem:[#allocation12 + $0x18] sm:$0xff] }
 0x4a2   : > { %v5162_v44 = vpop.trf.xlu2  ;;  %v5658_v59 = vsub.f32 1.0, %v5657_v49 }
 0x4a3   : > { %v6633_v2 = vpop.eup %6632  ;;  %v5698_v45 = vor.u32 1.1754944e-38, %v5697_v10  ;;  %vm5696_vm13 = vcmp.eq.f32.partialorder %v5695_v54, 8.507059e+37  ;;  %v5203_v24 = vadd.f32 %v5195_v40, %v5162_v44  ;;  %v5193_v44 = vld [vmem:[#allocation10 + $0x38] sm:$0xff] }
 0x4a4   : > { %v5659_v62 = vmul.f32 %v6629_v5, %v5658_v59  ;;  %v5624_v30 = vadd.f32 1.0, %v6633_v2  ;;  %v5369_v54 = vld [vmem:[#allocation12 + $0x38] sm:$0xff] }
 0x4a5   : > { %v6342_v22 = vmul.f32 -1.442695, %v5203_v24 }
 0x4a6   : > { %v5660_v21 = vadd.f32 %v6629_v5, %v5659_v62  ;;  %v6635_v27 = vpop.eup %6634  ;;  %6638 = vrcp.f32 %v5624_v30  ;;  %vm5721_vm15 = vweird.f32 %v5624_v30  ;;  %v5727_v9 = vand.u32 2147483648, %v5624_v30 }
 0x4a7   : > { %v5687_v58 = vmul.f32 %v6635_v27, %v5622_v36  ;;  %vm5692_vm11 = vweird.f32 %v6635_v27  ;;  %v6637_v6 = vpop.eup %6636  ;;  %6640 = vtanh.f32 %v9644_v26  ;;  %v5725_v32 = vand.u32 2147483647, %v5624_v30  ;;  %v9667_v26 = vld [vmem:[%s7236_s22 + $0x28] sm:$0xff] }
 0x4a8   : > { %v5664_v55 = vsel %vm5663_vm7, %v6629_v5, %v5660_v21  ;;  %vm5693_vm12 = vmor %vm5691_vm9, %vm5692_vm11  ;;  %v5728_v0 = vor.u32 1.1754944e-38, %v5727_v9  ;;  %6642 = vpow2.f32 %v6342_v22  ;;  %v5199_v15 = vmul.f32 %v5191_v28, %v9667_v26  ;;  %v9673_v5 = vld [vmem:[%s7236_s22 + $0x38] sm:$0xff]  ;;  %s5784_s22 = scalar_lea.sflag [#allocation17], %s7221_s14 }
 0x4a9   : > { %v5669_v14 = vsel %vm5666_vm8, %v5668_v41, %v5664_v55  ;;  %v5688_v48 = vsub.f32 1.0, %v5687_v58  ;;  %vm5726_vm2 = vcmp.eq.f32.partialorder %v5725_v32, 8.507059e+37  ;;  %v5373_v36 = vmul.f32 %v5365_v33, %v9662_v13  ;;  %v5367_v41 = vld [vmem:[#allocation12 + $0x28] sm:$0xff] }
 0x4aa   : > { %v5163_v1 = vpop.trf.xlu2  ;;  %v5756_v46 = vmul.f32 %v6631_v12, %v5669_v14  ;;  %v5201_v59 = vmul.f32 %v5193_v44, %v9673_v5 }
 0x4ab   : > { %v5689_v38 = vmul.f32 %v6635_v27, %v5688_v48  ;;  %v5205_v57 = vadd.f32 %v5197_v3, %v5163_v1 }
 0x4ac   : > { %5764 = vst [vmem:[%s9650_s24 + $0x10] sm:$0xff] %v5756_v46  ;;  %v6639_v39 = vpop.eup %6638 }
 0x4ad   : > { %v5690_v37 = vadd.f32 %v6635_v27, %v5689_v38  ;;  %v5717_v42 = vmul.f32 %v6639_v39, %v5624_v30  ;;  %vm5722_vm1 = vweird.f32 %v6639_v39  ;;  %v6641_v34 = vpop.eup %6640  ;;  %v6344_v35 = vmul.f32 -1.442695, %v5205_v57 }
 0x4ae   : > { %vm5723_vm0 = vmor %vm5721_vm15, %vm5722_vm1  ;;  %v6643_v43 = vpop.eup %6642  ;;  %v5375_v30 = vmul.f32 %v5367_v41, %v9667_v26 }
 0x4af   : > { %v5694_v18 = vsel %vm5693_vm12, %v6635_v27, %v5690_v37  ;;  %v5718_v4 = vsub.f32 1.0, %v5717_v42  ;;  %6644 = vpow2.f32 %v6344_v35  ;;  %v9676_v49 = vadd.f32 1.0, %v6643_v43 }
 0x4b0   : > { %v5699_v20 = vsel %vm5696_vm13, %v5698_v45, %v5694_v18 }
 0x4b1   : > { %v5758_v11 = vmul.f32 %v6637_v6, %v5699_v20  ;;  %v5719_v25 = vmul.f32 %v6639_v39, %v5718_v4  ;;  %v5266_v28 = vand.u32 2147483647, %v9676_v49  ;;  %vm5262_vm14 = vweird.f32 %v9676_v49 }
 0x4b2   : > { %v5164_v63 = vpop.trf.xlu2 }
 0x4b3   : > { %5766 = vst [vmem:[%s9650_s24 + $0x20] sm:$0xff] %v5758_v11  ;;  %v5720_v53 = vadd.f32 %v6639_v39, %v5719_v25  ;;  %v5207_v7 = vadd.f32 %v5199_v15, %v5164_v63  ;;  %v5377_v63 = vmul.f32 %v5369_v54, %v9673_v5  ;;  %vm5267_vm7 = vcmp.eq.f32.partialorder %v5266_v28, 8.507059e+37 }
 0x4b5   : > { %v5724_v51 = vsel %vm5723_vm0, %v6639_v39, %v5720_v53  ;;  %v6346_v16 = vmul.f32 -1.442695, %v5207_v7  ;;  %v6645_v12 = vpop.eup %6644 }
 0x4b6   : > { %v5729_v47 = vsel %vm5726_vm2, %v5728_v0, %v5724_v51  ;;  %v9683_v55 = vadd.f32 1.0, %v6645_v12 }
 0x4b7   : > { %v5760_v19 = vmul.f32 %v6641_v34, %v5729_v47 }
 0x4b8   : > { %v5298_v12 = vand.u32 2147483648, %v9683_v55  ;;  %vm5292_vm13 = vweird.f32 %v9683_v55 }
 0x4b9   : > { %5768 = vst [vmem:[%s9650_s24 + $0x30] sm:$0xff] %v5760_v19 }
 0x4ba   : > { %v5165_v52 = vpop.trf.xlu2 }
 0x4bb   : > { %v5209_v27 = vadd.f32 %v5201_v59, %v5165_v52 }
 0x4bd   : > { %v6348_v14 = vmul.f32 -1.442695, %v5209_v27 }
 0x4c2   : > { %v5166_v23 = vpop.trf.xlu2 }
 0x4c3   : > { %v5379_v8 = vadd.f32 %v5371_v56, %v5166_v23  ;;  %v5268_v56 = vand.u32 2147483648, %v9676_v49 }
 0x4c5   : > { %v6350_v17 = vmul.f32 -1.442695, %v5379_v8 }
 0x4c7   : > { %6646 = vpow2.f32 %v6350_v17 }
 0x4c8   : > { %6648 = vrcp.f32 %v9676_v49 }
 0x4c9   : > { %6650 = vpow2.f32 %v6346_v16 }
 0x4ca   : > { %v5167_v31 = vpop.trf.xlu2 }
 0x4cb   : > { %v5381_v62 = vadd.f32 %v5373_v36, %v5167_v31  ;;  %v5269_v31 = vor.u32 1.1754944e-38, %v5268_v56 }
 0x4cd   : > { %v6647_v2 = vpop.eup %6646  ;;  %v6352_v21 = vmul.f32 -1.442695, %v5381_v62 }
 0x4ce   : > { %v9680_v1 = vadd.f32 1.0, %v6647_v2  ;;  %v9686_v58 = vpop.eup %6648 }
 0x4cf   : > { %6652 = vpow2.f32 %v6352_v21  ;;  %v6651_v48 = vpop.eup %6650  ;;  %v5258_v60 = vmul.f32 %v9686_v58, %v9676_v49  ;;  %vm5263_vm4 = vweird.f32 %v9686_v58 }
 0x4d0   : > { %6654 = vrcp.f32 %v9680_v1  ;;  %v9695_v40 = vadd.f32 1.0, %v6651_v48  ;;  %v5444_v19 = vand.u32 2147483648, %v9680_v1  ;;  %vm5438_vm10 = vweird.f32 %v9680_v1  ;;  %vm9731_vm5 = vmor %vm5262_vm14, %vm5263_vm4 }
 0x4d1   : > { %6656 = vrcp.f32 %v9683_v55  ;;  %v5259_v18 = vsub.f32 1.0, %v5258_v60  ;;  %v5442_v15 = vand.u32 2147483647, %v9680_v1  ;;  %v5296_v60 = vand.u32 2147483647, %v9683_v55 }
 0x4d2   : > { %v5168_v10 = vpop.trf.xlu2  ;;  %6658 = vpow2.f32 %v6348_v14  ;;  %v5445_v49 = vor.u32 1.1754944e-38, %v5444_v19  ;;  %vm5322_vm14 = vweird.f32 %v9695_v40  ;;  %v5326_v28 = vand.u32 2147483647, %v9695_v40 }
 0x4d3   : > { %v5383_v46 = vadd.f32 %v5375_v30, %v5168_v10  ;;  %v5260_v0 = vmul.f32 %v9686_v58, %v5259_v18  ;;  %vm5443_vm8 = vcmp.eq.f32.partialorder %v5442_v15, 8.507059e+37  ;;  %vm5297_vm2 = vcmp.eq.f32.partialorder %v5296_v60, 8.507059e+37 }
 0x4d5   : > { %v6653_v38 = vpop.eup %6652  ;;  %v6354_v45 = vmul.f32 -1.442695, %v5383_v46  ;;  %v5261_v61 = vadd.f32 %v9686_v58, %v5260_v0 }
 0x4d6   : > { %v6655_v6 = vpop.eup %6654  ;;  %v9691_v37 = vadd.f32 1.0, %v6653_v38 }
 0x4d7   : > { %v5434_v39 = vmul.f32 %v6655_v6, %v9680_v1  ;;  %6660 = vpow2.f32 %v6354_v45  ;;  %v9698_v20 = vpop.eup %6656  ;;  %vm5439_vm6 = vweird.f32 %v6655_v6  ;;  %v5265_v44 = vsel %vm9731_vm5, %v9686_v58, %v5261_v61 }
 0x4d8   : > { %6662 = vrcp.f32 %v9691_v37  ;;  %v6659_v4 = vpop.eup %6658  ;;  %v5288_v29 = vmul.f32 %v9698_v20, %v9683_v55  ;;  %vm9723_vm3 = vmor %vm5438_vm10, %vm5439_vm6  ;;  %vm5293_vm9 = vweird.f32 %v9698_v20  ;;  %v5270_v2 = vsel %vm5267_vm7, %v5269_v31, %v5265_v44 }
 0x4d9   : > { %v5435_v42 = vsub.f32 1.0, %v5434_v39  ;;  %6664 = vrcp.f32 %v9695_v40  ;;  %v9711_v52 = vadd.f32 1.0, %v6659_v4  ;;  %v5474_v14 = vand.u32 2147483648, %v9691_v37  ;;  %vm5294_vm1 = vmor %vm5292_vm13, %vm5293_vm9 }
 0x4da   : > { %v5169_v9 = vpop.trf.xlu2  ;;  %v5289_v51 = vsub.f32 1.0, %v5288_v29  ;;  %vm5468_vm12 = vweird.f32 %v9691_v37  ;;  %v5472_v38 = vand.u32 2147483647, %v9691_v37  ;;  %v5328_v61 = vand.u32 2147483648, %v9695_v40 }
 0x4db   : > { %v5385_v11 = vadd.f32 %v5377_v63, %v5169_v9  ;;  %v5436_v32 = vmul.f32 %v6655_v6, %v5435_v42  ;;  %v5475_v18 = vor.u32 1.1754944e-38, %v5474_v14  ;;  %v5299_v9 = vor.u32 1.1754944e-38, %v5298_v12 }
 0x4dc   : > { %v5290_v36 = vmul.f32 %v9698_v20, %v5289_v51  ;;  %vm5473_vm0 = vcmp.eq.f32.partialorder %v5472_v38, 8.507059e+37  ;;  %v5329_v23 = vor.u32 1.1754944e-38, %v5328_v61  ;;  %v5356_v31 = vand.u32 2147483647, %v9711_v52 }
 0x4dd   : > { %v6661_v24 = vpop.eup %6660  ;;  %v6356_v25 = vmul.f32 -1.442695, %v5385_v11  ;;  %v5437_v22 = vadd.f32 %v6655_v6, %v5436_v32 }
 0x4de   : > { %v9704_v53 = vpop.eup %6662  ;;  %v9706_v34 = vadd.f32 1.0, %v6661_v24  ;;  %v5291_v58 = vadd.f32 %v9698_v20, %v5290_v36 }
 0x4df   : > { %v5464_v3 = vmul.f32 %v9704_v53, %v9691_v37  ;;  %6666 = vpow2.f32 %v6356_v25  ;;  %v9716_v57 = vpop.eup %6664  ;;  %v5441_v43 = vsel %vm9723_vm3, %v6655_v6, %v5437_v22  ;;  %vm5469_vm11 = vweird.f32 %v9704_v53 }
 0x4e0   : > { %6668 = vrcp.f32 %v9706_v34  ;;  %v5318_v7 = vmul.f32 %v9716_v57, %v9695_v40  ;;  %v5446_v41 = vsel %vm5443_vm8, %v5445_v49, %v5441_v43  ;;  %vm9765_vm15 = vmor %vm5468_vm12, %vm5469_vm11  ;;  %v5295_v39 = vsel %vm5294_vm1, %v9698_v20, %v5291_v58 }
 0x4e1   : > { %v5465_v47 = vsub.f32 1.0, %v5464_v3  ;;  %v5539_v54 = vmul.f32 %v5446_v41, %v9657_v50  ;;  %v5300_v32 = vsel %vm5297_vm2, %v5299_v9, %v5295_v39  ;;  %vm5323_vm4 = vweird.f32 %v9716_v57  ;;  %v5571_v41 = vld [vmem:[#allocation13 + $0x8] sm:$0xff] }
 0x4e2   : > { %v5170_v35 = vpop.trf.xlu2  ;;  %v5319_v1 = vsub.f32 1.0, %v5318_v7  ;;  %vm5498_vm10 = vweird.f32 %v9706_v34  ;;  %vm5324_vm5 = vmor %vm5322_vm14, %vm5323_vm4  ;;  %vm5327_vm8 = vcmp.eq.f32.partialorder %v5326_v28, 8.507059e+37  ;;  %vm5357_vm2 = vcmp.eq.f32.partialorder %v5356_v31, 8.507059e+37 }
 0x4e3   : > { %6670 = vtanh.f32 %v5170_v35  ;;  %v5466_v8 = vmul.f32 %v9704_v53, %v5465_v47  ;;  %v5502_v47 = vand.u32 2147483647, %v9706_v34 }
 0x4e4   : > { %6672 = vrcp.f32 %v9711_v52  ;;  %v5320_v63 = vmul.f32 %v9716_v57, %v5319_v1 }
 0x4e5   : > { %v6667_v17 = vpop.eup %6666  ;;  %v5467_v21 = vadd.f32 %v9704_v53, %v5466_v8  ;;  %vm5503_vm7 = vcmp.eq.f32.partialorder %v5502_v47, 8.507059e+37 }
 0x4e6   : > { %v9743_v16 = vpop.eup %6668  ;;  %v9745_v59 = vadd.f32 1.0, %v6667_v17  ;;  %v5321_v0 = vadd.f32 %v9716_v57, %v5320_v63 }
 0x4e7   : > { %v5494_v62 = vmul.f32 %v9743_v16, %v9706_v34  ;;  %v5471_v37 = vsel %vm9765_vm15, %v9704_v53, %v5467_v21  ;;  %vm5499_vm6 = vweird.f32 %v9743_v16  ;;  %v5504_v53 = vand.u32 2147483648, %v9706_v34 }
 0x4e8   : > { %6674 = vrcp.f32 %v9745_v59  ;;  %v5476_v4 = vsel %vm5473_vm0, %v5475_v18, %v5471_v37  ;;  %vm5500_vm3 = vmor %vm5498_vm10, %vm5499_vm6  ;;  %v5325_v15 = vsel %vm5324_vm5, %v9716_v57, %v5321_v0  ;;  %v5534_v7 = vand.u32 2147483648, %v9745_v59 }
 0x4e9   : > { %v6671_v27 = vpop.eup %6670  ;;  %v5495_v30 = vsub.f32 1.0, %v5494_v62  ;;  %v5541_v51 = vmul.f32 %v5476_v4, %v9662_v13  ;;  %v5505_v34 = vor.u32 1.1754944e-38, %v5504_v53  ;;  %v5330_v43 = vsel %vm5327_vm8, %v5329_v23, %v5325_v15 }
 0x4ea   : > { %v9756_v10 = vpop.eup %6672  ;;  %v5555_v46 = vmul.f32 %v6671_v27, %v5270_v2  ;;  %v5171_v48 = vpop.trf.xlu2  ;;  %vm5528_vm12 = vweird.f32 %v9745_v59  ;;  %v5532_v49 = vand.u32 2147483647, %v9745_v59  ;;  %vm5352_vm15 = vweird.f32 %v9711_v52 }
 0x4eb   : > { %6676 = vtanh.f32 %v5171_v48  ;;  %v5496_v6 = vmul.f32 %v9743_v16, %v5495_v30  ;;  %v5348_v55 = vmul.f32 %v9756_v10, %v9711_v52  ;;  %vm5353_vm11 = vweird.f32 %v9756_v10 }
 0x4ec   : > { %v9772_v50 = vadd.f32 %v5555_v46, %v5539_v54  ;;  %vm5354_vm1 = vmor %vm5352_vm15, %vm5353_vm11  ;;  %vm5533_vm0 = vcmp.eq.f32.partialorder %v5532_v49, 8.507059e+37  ;;  %v5573_v54 = vld [vmem:[#allocation13 + $0x18] sm:$0xff] }
 0x4ed   : > { %v5497_v24 = vadd.f32 %v9743_v16, %v5496_v6  ;;  %v5349_v29 = vsub.f32 1.0, %v5348_v55 }
 0x4ee   : > { %v9781_v42 = vpop.eup %6674  ;;  %5771 = vst [vmem:[%s9529_s2 + $0x8] sm:$0xff] %v9772_v50  ;;  %v5579_v1 = vmul.f32 %v5571_v41, %v9772_v50 }
 0x4ef   : > { %v5524_v11 = vmul.f32 %v9781_v42, %v9745_v59  ;;  %v5501_v35 = vsel %vm5500_vm3, %v9743_v16, %v5497_v24  ;;  %v5350_v13 = vmul.f32 %v9756_v10, %v5349_v29  ;;  %vm5529_vm9 = vweird.f32 %v9781_v42 }
 0x4f0   : > { %v5506_v8 = vsel %vm5503_vm7, %v5505_v34, %v5501_v35  ;;  %v5358_v16 = vand.u32 2147483648, %v9711_v52  ;;  %vm5530_vm13 = vmor %vm5528_vm12, %vm5529_vm9 }
 0x4f1   : > { %v6677_v20 = vpop.eup %6676  ;;  %v5525_v25 = vsub.f32 1.0, %v5524_v11  ;;  %v5351_v17 = vadd.f32 %v9756_v10, %v5350_v13  ;;  %v5543_v36 = vmul.f32 %v5506_v8, %v9667_v26  ;;  %v5535_v26 = vor.u32 1.1754944e-38, %v5534_v7 }
 0x4f2   : > { %v5557_v3 = vmul.f32 %v6677_v20, %v5300_v32  ;;  %v5172_v22 = vpop.trf.xlu2  ;;  %v5359_v52 = vor.u32 1.1754944e-38, %v5358_v16 }
 0x4f3   : > { %6678 = vtanh.f32 %v5172_v22  ;;  %v5526_v19 = vmul.f32 %v9781_v42, %v5525_v25  ;;  %v5355_v59 = vsel %vm5354_vm1, %v9756_v10, %v5351_v17 }
 0x4f4   : > { %v9799_v56 = vadd.f32 %v5557_v3, %v5541_v51  ;;  %v5360_v27 = vsel %vm5357_vm2, %v5359_v52, %v5355_v59 }
 0x4f5   : > { %v5527_v40 = vadd.f32 %v9781_v42, %v5526_v19 }
 0x4f6   : > { %5773 = vst [vmem:[%s9529_s2 + $0x18] sm:$0xff] %v9799_v56 }
 0x4f7   : > { %v5531_v12 = vsel %vm5530_vm13, %v9781_v42, %v5527_v40 }
 0x4f8   : > { %v5536_v2 = vsel %vm5533_vm0, %v5535_v26, %v5531_v12 }
 0x4f9   : > { %v6679_v33 = vpop.eup %6678  ;;  %v5545_v14 = vmul.f32 %v5536_v2, %v9673_v5 }
 0x4fa   : > { %v5559_v57 = vmul.f32 %v6679_v33, %v5330_v43  ;;  %v5173_v44 = vpop.trf.xlu2 }
 0x4fb   : > { %6680 = vtanh.f32 %v5173_v44 }
 0x4fc   : > { %v9820_v62 = vadd.f32 %v5559_v57, %v5543_v36 }
 0x4fe   : > { %5775 = vst [vmem:[%s9529_s2 + $0x28] sm:$0xff] %v9820_v62 }
 0x501   : > { %v6681_v21 = vpop.eup %6680 }
 0x502   : > { %v5561_v30 = vmul.f32 %v6681_v21, %v5360_v27  ;;  %v5174_v58 = vpop.trf.xlu2 }
 0x503   : > { %v5587_v10 = vadd.f32 %v5579_v1, %v5174_v58 }
 0x504   : > { %v9836_v46 = vadd.f32 %v5561_v30, %v5545_v14 }
 0x505   : > { %v6358_v48 = vmul.f32 -1.442695, %v5587_v10 }
 0x506   : > { %5777 = vst [vmem:[%s9529_s2 + $0x38] sm:$0xff] %v9836_v46 }
 0x507   : > { %6682 = vpow2.f32 %v6358_v48 }
 0x508   : > { %6913 = shalt.err (!%p6910_p9)
}
 0x509   : > { %s7019_s29 = smov 256   ;;  %v5581_v5 = vmul.f32 %v5573_v54, %v9799_v56  ;;  %v5575_v55 = vld [vmem:[#allocation13 + $0x28] sm:$0xff]  ;;  %v5577_v32 = vld [vmem:[#allocation13 + $0x38] sm:$0xff]  ;;  %s5795_s18 = scalar_lea.hbm %s9910_s7, %s6443_s20 }
 0x50a   : > { %6487 = dma.vmem_to_hbm [thread:$0]  (%p7161_p3), %s5814_s17, 1024, %s5816_s21, %s5784_s22, %s7019_s29, %s7019_s29, %s7014_s25   ;;  %v5175_v38 = vpop.trf.xlu2  ;;  %v5583_v39 = vmul.f32 %v5575_v55, %v9820_v62  ;;  %v5585_v29 = vmul.f32 %v5577_v32, %v9836_v46 }
 0x50b   : > { %v5589_v60 = vadd.f32 %v5581_v5, %v5175_v38  ;;  %s5796_s23 = sshll.u32 %s9650_s24, 4  ;;  %s5798_s16 = sshll.u32 %s5795_s18, 4  ;;  %s5797_s23 = int_to_ptr.vmem [resolvable:$true] %s5796_s23  ;;  %s5799_s16 = int_to_ptr.hbm [resolvable:$true] %s5798_s16 }
 0x50c   : > { %s5779_s9 = scalar_lea.sflag [#allocation6], %s7221_s14  ;;  %s6928_s17 = sshra.s32 %s5799_s16, 4  ;;  %s6929_s17 = int_to_ptr.hbm [resolvable:$true] %s6928_s17 }
 0x50d   : > { %v6683_v45 = vpop.eup %6682  ;;  %v6360_v6 = vmul.f32 -1.442695, %v5589_v60  ;;  %s6930_s21 = scalar_lea.hbm %s6929_s17, 64  ;;  %s6934_s11 = scalar_lea.hbm %s9910_s7, 128 }
 0x50e   : > { %v5619_v37 = vadd.f32 1.0, %v6683_v45  ;;  %p6931_p12 = scmp.ne.s32.totalorder %s6929_s17, %s6930_s21  ;;  %p6935_p5 = scmp.lt.s32.totalorder %s6929_s17, %s9910_s7 }
 0x50f   : > { %6684 = vpow2.f32 %v6360_v6  ;;  %p6936_p7 = scmp.lt.s32.totalorder %s6934_s11, %s6930_s21 }
 0x510   : > { %6686 = vrcp.f32 %v5619_v37  ;;  %v5652_v25 = vand.u32 2147483648, %v5619_v37  ;;  %v5650_v3 = vand.u32 2147483647, %v5619_v37  ;;  %vm5646_vm6 = vweird.f32 %v5619_v37  ;;  %p6932_p13 = pnand %p6931_p12, %p7161_p3 }
 0x511   : > { %p6937_p1 = por %p6936_p7, %p6935_p5 }
 0x512   : > { %v5176_v63 = vpop.trf.xlu2  ;;  %v5653_v28 = vor.u32 1.1754944e-38, %v5652_v25  ;;  %vm5651_vm14 = vcmp.eq.f32.partialorder %v5650_v3, 8.507059e+37  ;;  %p6933_p0 = pneg %p6932_p13 }
 0x513   : > { %v5591_v18 = vadd.f32 %v5583_v39, %v5176_v63 }
 0x514   : > { %p6938_p4 = pnand %p6937_p1, %p6933_p0 }
 0x515   : > { %v6685_v42 = vpop.eup %6684  ;;  %v6362_v9 = vmul.f32 -1.442695, %v5591_v18 }
 0x516   : > { %v6687_v11 = vpop.eup %6686  ;;  %v5621_v4 = vadd.f32 1.0, %v6685_v42 }
 0x517   : > { %v5642_v24 = vmul.f32 %v6687_v11, %v5619_v37  ;;  %6688 = vpow2.f32 %v6362_v9  ;;  %vm5647_vm4 = vweird.f32 %v6687_v11 }
 0x518   : > { %6690 = vrcp.f32 %v5621_v4  ;;  %vm5648_vm10 = vmor %vm5646_vm6, %vm5647_vm4  ;;  %v5682_v40 = vand.u32 2147483648, %v5621_v4  ;;  %v5680_v43 = vand.u32 2147483647, %v5621_v4  ;;  %vm5676_vm5 = vweird.f32 %v5621_v4 }
 0x519   : > { %v5643_v20 = vsub.f32 1.0, %v5642_v24  ;;  %6692 = vtanh.f32 %v9772_v50 }
 0x51a   : > { %v5177_v0 = vpop.trf.xlu2  ;;  %v5683_v44 = vor.u32 1.1754944e-38, %v5682_v40  ;;  %vm5681_vm8 = vcmp.eq.f32.partialorder %v5680_v43, 8.507059e+37 }
 0x51b   : > { %v5644_v53 = vmul.f32 %v6687_v11, %v5643_v20  ;;  %v5593_v22 = vadd.f32 %v5585_v29, %v5177_v0 }
 0x51d   : > { %v6689_v51 = vpop.eup %6688  ;;  %v5645_v47 = vadd.f32 %v6687_v11, %v5644_v53  ;;  %v6364_v61 = vmul.f32 -1.442695, %v5593_v22 }
 0x51e   : > { %v6691_v19 = vpop.eup %6690  ;;  %v5623_v35 = vadd.f32 1.0, %v6689_v51 }
 0x51f   : > { %v5649_v13 = vsel %vm5648_vm10, %v6687_v11, %v5645_v47  ;;  %v5672_v34 = vmul.f32 %v6691_v19, %v5621_v4  ;;  %6694 = vpow2.f32 %v6364_v61  ;;  %v6693_v50 = vpop.eup %6692  ;;  %vm5677_vm3 = vweird.f32 %v6691_v19 }
 0x520   : > { %v5654_v15 = vsel %vm5651_vm14, %v5653_v28, %v5649_v13  ;;  %6696 = vrcp.f32 %v5623_v35  ;;  %vm5678_vm7 = vmor %vm5676_vm5, %vm5677_vm3  ;;  %v5712_v59 = vand.u32 2147483648, %v5623_v35  ;;  %v5710_v52 = vand.u32 2147483647, %v5623_v35 }
 0x521   : > { %v5755_v23 = vmul.f32 %v6693_v50, %v5654_v15  ;;  %v5673_v8 = vsub.f32 1.0, %v5672_v34  ;;  %6698 = vtanh.f32 %v9799_v56  ;;  %vm5706_vm11 = vweird.f32 %v5623_v35 }
 0x522   : > { %v5713_v27 = vor.u32 1.1754944e-38, %v5712_v59  ;;  %vm5711_vm13 = vcmp.eq.f32.partialorder %v5710_v52, 8.507059e+37 }
 0x523   : > { %5763 = vst [vmem:[%s9650_s24 + $0x8] sm:$0xff] %v5755_v23  ;;  %v5674_v33 = vmul.f32 %v6691_v19, %v5673_v8 }
 0x525   : > { %v6695_v17 = vpop.eup %6694  ;;  %v5675_v7 = vadd.f32 %v6691_v19, %v5674_v33 }
 0x526   : > { %v6697_v57 = vpop.eup %6696  ;;  %v5625_v36 = vadd.f32 1.0, %v6695_v17 }
 0x527   : > { %v5679_v49 = vsel %vm5678_vm7, %v6691_v19, %v5675_v7  ;;  %v5702_v16 = vmul.f32 %v6697_v57, %v5623_v35  ;;  %v6699_v31 = vpop.eup %6698  ;;  %vm5707_vm9 = vweird.f32 %v6697_v57 }
 0x528   : > { %v5684_v12 = vsel %vm5681_vm8, %v5683_v44, %v5679_v49  ;;  %6700 = vrcp.f32 %v5625_v36  ;;  %vm5708_vm12 = vmor %vm5706_vm11, %vm5707_vm9  ;;  %v5742_v48 = vand.u32 2147483648, %v5625_v36  ;;  %v5740_v5 = vand.u32 2147483647, %v5625_v36 }
 0x529   : > { %v5757_v56 = vmul.f32 %v6699_v31, %v5684_v12  ;;  %v5703_v26 = vsub.f32 1.0, %v5702_v16  ;;  %6702 = vtanh.f32 %v9820_v62  ;;  %vm5736_vm1 = vweird.f32 %v5625_v36 }
 0x52a   : > { %6704 = vtanh.f32 %v9836_v46  ;;  %v5743_v60 = vor.u32 1.1754944e-38, %v5742_v48  ;;  %vm5741_vm2 = vcmp.eq.f32.partialorder %v5740_v5, 8.507059e+37 }
 0x52b   : > { %5765 = vst [vmem:[%s9650_s24 + $0x18] sm:$0xff] %v5757_v56  ;;  %v5704_v41 = vmul.f32 %v6697_v57, %v5703_v26 }
 0x52d   : > { %v5705_v2 = vadd.f32 %v6697_v57, %v5704_v41 }
 0x52e   : > { %v6701_v21 = vpop.eup %6700 }
 0x52f   : > { %v5709_v1 = vsel %vm5708_vm12, %v6697_v57, %v5705_v2  ;;  %v5732_v30 = vmul.f32 %v6701_v21, %v5625_v36  ;;  %v6703_v58 = vpop.eup %6702  ;;  %vm5737_vm15 = vweird.f32 %v6701_v21 }
 0x530   : > { %v5714_v14 = vsel %vm5711_vm13, %v5713_v27, %v5709_v1  ;;  %vm5738_vm0 = vmor %vm5736_vm1, %vm5737_vm15  ;;  %v6705_v45 = vpop.eup %6704 }
 0x531   : > { %v5759_v10 = vmul.f32 %v6703_v58, %v5714_v14  ;;  %v5733_v62 = vsub.f32 1.0, %v5732_v30 }
 0x533   : > { %5767 = vst [vmem:[%s9650_s24 + $0x28] sm:$0xff] %v5759_v10  ;;  %v5734_v54 = vmul.f32 %v6701_v21, %v5733_v62 }
 0x535   : > { %v5735_v38 = vadd.f32 %v6701_v21, %v5734_v54 }
 0x537   : > { %v5739_v46 = vsel %vm5738_vm0, %v6701_v21, %v5735_v38 }
 0x538   : > { %v5744_v6 = vsel %vm5741_vm2, %v5743_v60, %v5739_v46 }
 0x539   : > { %v5761_v37 = vmul.f32 %v6705_v45, %v5744_v6 }
 0x53b   : > { %5769 = vst [vmem:[%s9650_s24 + $0x38] sm:$0xff] %v5761_v37 }
 0x53c   : > { %6941 = shalt.err (!%p6938_p4)
}
 0x53d   : > { %6486 = dma.vmem_to_hbm [thread:$0]  (%p7161_p3), %s5797_s23, 1024, %s5799_s16, %s5779_s9, %s7019_s29, %s7019_s29, %s7014_s25  }
 0x53e PF: > { %s5830_s14 = sand.u32 1, %s6988_s27   ;;  %p9972_p8 = scmp.ge.s32.totalorder %s7000_s30, 2 }
 0x53f   : > { %s5831_s24 = scalar_lea.sflag [#allocation6], %s5830_s14 }
 0x540   : > { %p6511_p2 = pnand %p9972_p8, %p7100_p6 }
 0x542   : > { %p6512_p10 = pneg %p6511_p2 }
 0x544   : > { %6979 = dma.done.wait (%p6512_p10), %s5831_s24, 1024  }
 0x545   : > { %6981 = vsyncadd (%p6512_p10), %s5831_s24, 4294966272  ;;  %s5841_s26 = scalar_lea.sflag [#allocation17], %s5830_s14 }
 0x546   : > { %6983 = dma.done.wait (%p6512_p10), %s5841_s26, 1024  }
 0x547   : > { %6985 = vsyncadd (%p6512_p10), %s5841_s26, 4294966272  ;;  %s9973_s30 = sld [smem:[#allocation26_spill]]  ;;  %s9976_s27 = smov %s6992_s28 }
 0x548   : > { %s9974_s15 = sld [smem:[#allocation25_spill]] }
 0x549   : > { %s9975_s29 = sld [smem:[#allocation27_spill]] }
 0x54d   : > { %p30_p3 = scmp.ge.s32.totalorder %s9973_s30, 4  }
 0x54e   : > { %s9977_s28 = smov %s9974_s15 }
 0x54f   :  { %32 = sbr.rel (!%p30_p3) target bundleno = 16 (0x10), region = 142 }
 0x554   :  { %5847 = vsyncpa [#allocation5], 1 }
 0x555   :  { %5849 = vsyncpa [#allocation5 + $0x1], 1 }
 0x556   :  { %5850 = vsyncpa [#allocation8], 1 }
 0x557   :  { %5852 = vsyncpa [#allocation8 + $0x1], 1 }
 0x558   :  { %5853 = vsyncpa [#allocation11], 1 }
 0x559   :  { %5854 = vsyncpa [#allocation14], 1 }
 0x55a   :  { %5855 = vsyncpa [#allocation6], 1 }
 0x55b   :  { %5857 = vsyncpa [#allocation6 + $0x1], 1 }
 0x55c   :  { %5858 = vsyncpa [#allocation17], 1 }
 0x55d   :  { %5860 = vsyncpa [#allocation17 + $0x1], 1 }

</bundles_post_ra>
